<compile_context>
chip_gen: v7x
topology: tpu7x:2x2x1
jax: 0.10.0
libtpu: 0.0.40
codegen_flags: <defaults>
</compile_context>

<pallas_src>
import numpy as np
import jax
import jax.numpy as jnp
from jax.experimental import pallas as pl
from jax.experimental.pallas import tpu as pltpu


# ---------------------------------------------------------------------------
# Kernels
# ---------------------------------------------------------------------------

def _make_conv_relu_pool_kernel(C, OC, W, OH, K=5):
    """conv(KxK, valid) + bias + ReLU + 2x2/stride-2 max-pool; one image per grid step.

    Refs:
      x_ref   : (1, C, Wpad)     per-channel flattened (H*W) rows, zero padded on lanes
      w_ref   : (K*K, OC, C)     w_ref[kh*K + kw] == torch_w[:, :, kh, kw]
      b_ref   : (OC, 1)
      sel_ref : (4, OH*W, OUTW)  0/1 gather matrices, one per 2x2 pool-window offset
      o_ref   : (1, OC, OUTW)    pooled output, column = i*Wo + j (zero padded to OUTW)
    """
    WIDE = OH * W  # "wide" conv output: all W columns per output row (invalid cols unused)

    def kernel(x_ref, w_ref, b_ref, sel_ref, o_ref):
        x = x_ref[0]                                        # (C, Wpad) in VMEM/vregs
        acc = jnp.zeros((OC, WIDE), jnp.float32)
        # Convolution as K*K shifted dots: acc[oc, oh*W+ow] += sum_c w[oc,c,kh,kw]*x[c,(oh+kh)*W+ow+kw]
        for kh in range(K):
            for kw in range(K):
                s = kh * W + kw
                xs = x[:, s:s + WIDE]                       # (C, WIDE) shifted slice (VMEM resident)
                acc = acc + jnp.dot(w_ref[kh * K + kw], xs,
                                    preferred_element_type=jnp.float32)
        acc = jnp.maximum(acc + b_ref[...], 0.0)            # bias + ReLU
        # 2x2/2 max-pool + gather of valid columns via 0/1 selection matmuls (MXU),
        # producing a lane-dense, zero-padded output tile.
        pooled = None
        for a in range(4):
            t = jnp.dot(acc, sel_ref[a], preferred_element_type=jnp.float32)
            pooled = t if pooled is None else jnp.maximum(pooled, t)
        o_ref[0] = pooled.astype(o_ref.dtype)

    return kernel


def _fc_stack_kernel(x_ref, w1_ref, b1_ref, w2_ref, b2_ref, w3_ref, b3_ref, o_ref):
    """Fused fc1+ReLU -> fc2+ReLU -> fc3 -> log_softmax. All weights zero padded to 128 lanes."""
    h = jnp.dot(x_ref[...], w1_ref[...], preferred_element_type=jnp.float32) + b1_ref[...]
    h = jnp.maximum(h, 0.0)
    h = jnp.dot(h, w2_ref[...], preferred_element_type=jnp.float32) + b2_ref[...]
    h = jnp.maximum(h, 0.0)
    y = jnp.dot(h, w3_ref[...], preferred_element_type=jnp.float32) + b3_ref[...]
    m = jnp.max(y, axis=-1, keepdims=True)
    s = y - m
    lse = jnp.log(jnp.sum(jnp.exp(s), axis=-1, keepdims=True))
    o_ref[...] = (s - lse).astype(o_ref.dtype)


# ---------------------------------------------------------------------------
# Wrappers / constant construction
# ---------------------------------------------------------------------------

def _pool_selectors(OH, OW, W, out_cols):
    """0/1 matrices that gather one element of each 2x2 pool window.

    Input columns are q = oh*W + ow (wide rows; only ow < OW is valid conv output);
    output column is i*(OW//2) + j.  Columns >= (OH//2)*(OW//2) stay all-zero so the
    kernel output is zero padded to a lane-friendly width."""
    Ho, Wo = OH // 2, OW // 2
    sel = np.zeros((4, OH * W, out_cols), np.float32)
    for a in range(2):
        for b in range(2):
            for i in range(Ho):
                for j in range(Wo):
                    sel[a * 2 + b, (2 * i + a) * W + (2 * j + b), i * Wo + j] = 1.0
    return jnp.asarray(sel)


def _conv_relu_pool(x_flat, w_packed, b, sel, *, C, OC, W, OH, out_w):
    """x_flat: (B, C, Wpad) -> (B, OC, out_w) fused conv+ReLU+maxpool, batch-parallel grid."""
    B, _, Wpad = x_flat.shape
    kernel = _make_conv_relu_pool_kernel(C=C, OC=OC, W=W, OH=OH)
    return pl.pallas_call(
        kernel,
        grid=(B,),
        in_specs=[
            pl.BlockSpec((1, C, Wpad), lambda bi: (bi, 0, 0)),
            pl.BlockSpec(w_packed.shape, lambda bi: (0, 0, 0)),   # resident across grid
            pl.BlockSpec(b.shape, lambda bi: (0, 0)),
            pl.BlockSpec(sel.shape, lambda bi: (0, 0, 0)),
        ],
        out_specs=pl.BlockSpec((1, OC, out_w), lambda bi: (bi, 0, 0)),
        out_shape=jax.ShapeDtypeStruct((B, OC, out_w), jnp.float32),
        compiler_params=pltpu.CompilerParams(
            dimension_semantics=("parallel",)),                   # v7x: shard batch across TCs
    )(x_flat, w_packed, b, sel)


def _pack_params(p):
    """Pack PyTorch-layout params into kernel-friendly, zero-padded layouts (tiny, one-time)."""
    f32 = jnp.float32
    # conv weights -> (K*K, OC, C); bias -> (OC, 1)
    c1w = jnp.transpose(p["conv1_w"], (2, 3, 0, 1)).reshape(25, 6, 3).astype(f32)
    c1b = p["conv1_b"].reshape(6, 1).astype(f32)
    c2w = jnp.transpose(p["conv2_w"], (2, 3, 0, 1)).reshape(25, 16, 6).astype(f32)
    c2b = p["conv2_b"].reshape(16, 1).astype(f32)
    # fc1: torch (120, 400), features flattened (c, i, j) with 25 spatial positions per channel.
    # Our conv2 output packs each channel into 32 lanes (25 valid + 7 zero), so insert zero rows.
    w1 = p["fc1_w"].reshape(120, 16, 25).astype(f32)
    w1 = jnp.pad(w1, ((0, 0), (0, 0), (0, 7))).reshape(120, 512).T      # (512, 120)
    f1w = jnp.pad(w1, ((0, 0), (0, 8)))                                  # (512, 128)
    f1b = jnp.pad(p["fc1_b"].astype(f32), (0, 8)).reshape(1, 128)
    # fc2: (84, 120) -> (120, 84) -> pad to (128, 128); padded rows/cols are zero.
    f2w = jnp.pad(p["fc2_w"].T.astype(f32), ((0, 8), (0, 44)))           # (128, 128)
    f2b = jnp.pad(p["fc2_b"].astype(f32), (0, 44)).reshape(1, 128)
    # fc3: (10, 84) -> (84, 10) -> pad rows to 128.
    f3w = jnp.pad(p["fc3_w"].T.astype(f32), ((0, 44), (0, 0)))           # (128, 10)
    f3b = p["fc3_b"].astype(f32).reshape(1, 10)
    return dict(c1w=c1w, c1b=c1b, c2w=c2w, c2b=c2b,
                f1w=f1w, f1b=f1b, f2w=f2w, f2b=f2b, f3w=f3w, f3b=f3b)


# ---------------------------------------------------------------------------
# LeNet parameters (deterministic, PyTorch-default uniform +-1/sqrt(fan_in))
# ---------------------------------------------------------------------------

def init_lenet_params(key):
    def uni(k, shape, fan_in):
        bound = 1.0 / float(fan_in) ** 0.5
        return jax.random.uniform(k, shape, jnp.float32, -bound, bound)

    ks = jax.random.split(key, 10)
    return {
        "conv1_w": uni(ks[0], (6, 3, 5, 5), 3 * 5 * 5),
        "conv1_b": uni(ks[1], (6,), 3 * 5 * 5),
        "conv2_w": uni(ks[2], (16, 6, 5, 5), 6 * 5 * 5),
        "conv2_b": uni(ks[3], (16,), 6 * 5 * 5),
        "fc1_w":   uni(ks[4], (120, 16 * 5 * 5), 16 * 5 * 5),
        "fc1_b":   uni(ks[5], (120,), 16 * 5 * 5),
        "fc2_w":   uni(ks[6], (84, 120), 120),
        "fc2_b":   uni(ks[7], (84,), 120),
        "fc3_w":   uni(ks[8], (10, 84), 84),
        "fc3_b":   uni(ks[9], (10,), 84),
    }


# ---------------------------------------------------------------------------
# Forward pass
# ---------------------------------------------------------------------------

def lenet_forward(params, x):
    """x: (B, 3, 32, 32) NCHW float32 -> (B, 10) log-probabilities."""
    B = x.shape[0]
    pk = _pack_params(params)

    # Boundary-only layout change: NCHW -> (B, C, H*W); lane-pad so in-kernel "wide row"
    # slices (start up to (K-1)*W + (K-1)) stay in bounds.
    x_flat = x.astype(jnp.float32).reshape(B, 3, 32 * 32)
    x_flat = jnp.pad(x_flat, ((0, 0), (0, 0), (0, 128)))                    # (B, 3, 1152)

    # Stage 1: conv1(3->6, 5x5) + ReLU + maxpool2x2  => per image (6, 256), 14x14 valid.
    sel1 = _pool_selectors(OH=28, OW=28, W=32, out_cols=256)
    a1 = _conv_relu_pool(x_flat, pk["c1w"], pk["c1b"], sel1,
                         C=3, OC=6, W=32, OH=28, out_w=256)                 # (B, 6, 256)

    # Stage 2: conv2(6->16, 5x5) + ReLU + maxpool2x2 => per image (16, 32), 5x5 valid.
    sel2 = _pool_selectors(OH=10, OW=10, W=14, out_cols=32)
    a2 = _conv_relu_pool(a1, pk["c2w"], pk["c2b"], sel2,
                         C=6, OC=16, W=14, OH=10, out_w=32)                 # (B, 16, 32)

    # Stage 3: fused fc1 -> fc2 -> fc3 -> log_softmax (single call, zero-padded K/N dims).
    feats = a2.reshape(B, 16 * 32)                                          # (B, 512), free reshape
    out = pl.pallas_call(
        _fc_stack_kernel,
        out_shape=jax.ShapeDtypeStruct((B, 10), jnp.float32),
    )(feats, pk["f1w"], pk["f1b"], pk["f2w"], pk["f2b"], pk["f3w"], pk["f3b"])
    return out


if __name__ == "__main__":
    key = jax.random.PRNGKey(0)
    pkey, xkey = jax.random.split(key)
    params = init_lenet_params(pkey)
    # LeNet for CIFAR-10 requires 32x32 spatial input (16*5*5 flatten -> fc1).
    x = jax.random.normal(xkey, (2, 3, 32, 32), dtype=jnp.float32)

    fwd = jax.jit(lenet_forward)
    out = fwd(params, x)
    jax.block_until_ready(out)

    assert out.shape == (2, 10)
    assert bool(jnp.all(jnp.isfinite(out)))
    # log_softmax rows should (approximately) exp-sum to 1
    assert jnp.allclose(jnp.sum(jnp.exp(out), axis=-1), 1.0, atol=1e-4)
    print("KERNEL_OK")
</pallas_src>

<mosaic_0001>
module attributes {stable_mosaic.version = 11 : i64} {
  func.func @kernel(%arg0: i32, %arg1: memref<1x3x1152xf32, #tpu.memory_space<vmem>>, %arg2: memref<25x6x3xf32, #tpu.memory_space<vmem>>, %arg3: memref<6x1xf32, #tpu.memory_space<vmem>>, %arg4: memref<4x896x256xf32, #tpu.memory_space<vmem>>, %arg5: memref<1x6x256xf32, #tpu.memory_space<vmem>>) attributes {dimension_semantics = [#tpu.dimension_semantics<parallel>], iteration_bounds = array<i64: 2>, scalar_prefetch = 0 : i64, scratch_operands = 0 : i64, tpu.core_type = #tpu.core_type<tc>, window_params = [{transform_indices = @transform_0, window_bounds = array<i64: 1, 3, 1152>}, {pipeline_mode = #tpu.pipeline_mode<synchronous>, transform_indices = @transform_1, window_bounds = array<i64: 25, 6, 3>}, {pipeline_mode = #tpu.pipeline_mode<synchronous>, transform_indices = @transform_2, window_bounds = array<i64: 6, 1>}, {pipeline_mode = #tpu.pipeline_mode<synchronous>, transform_indices = @transform_3, window_bounds = array<i64: 4, 896, 256>}, {transform_indices = @transform_4, window_bounds = array<i64: 1, 6, 256>}]} {
    %c0 = arith.constant 0 : index
    %c0_0 = arith.constant 0 : index
    %c0_1 = arith.constant 0 : index
    %0 = vector.load %arg1[%c0, %c0_0, %c0_1] : memref<1x3x1152xf32, #tpu.memory_space<vmem>>, vector<1x3x1152xf32>
    %1 = vector.shape_cast %0 : vector<1x3x1152xf32> to vector<3x1152xf32>
    %cst = arith.constant 0.000000e+00 : f32
    %2 = vector.broadcast %cst : f32 to vector<6x896xf32>
    %3 = vector.extract_strided_slice %1 {offsets = [0, 0], sizes = [3, 896], strides = [1, 1]} : vector<3x1152xf32> to vector<3x896xf32>
    %c0_2 = arith.constant 0 : index
    %c0_3 = arith.constant 0 : index
    %c0_4 = arith.constant 0 : index
    %4 = vector.load %arg2[%c0_2, %c0_3, %c0_4] : memref<25x6x3xf32, #tpu.memory_space<vmem>>, vector<1x6x3xf32>
    %5 = vector.shape_cast %4 : vector<1x6x3xf32> to vector<6x3xf32>
    %cst_5 = arith.constant dense<0.000000e+00> : vector<6x896xf32>
    %6 = tpu.matmul %5, %3, %cst_5 {dimension_numbers = #tpu.dot_dimension_numbers<[1], [0], [0], [1], [0, 0, 1, 1], [], []>} : vector<6x3xf32>, vector<3x896xf32>, vector<6x896xf32> -> vector<6x896xf32>
    %7 = arith.addf %2, %6 : vector<6x896xf32>
    %8 = vector.extract_strided_slice %1 {offsets = [0, 1], sizes = [3, 896], strides = [1, 1]} : vector<3x1152xf32> to vector<3x896xf32>
    %c1 = arith.constant 1 : index
    %c0_6 = arith.constant 0 : index
    %c0_7 = arith.constant 0 : index
    %9 = vector.load %arg2[%c1, %c0_6, %c0_7] : memref<25x6x3xf32, #tpu.memory_space<vmem>>, vector<1x6x3xf32>
    %10 = vector.shape_cast %9 : vector<1x6x3xf32> to vector<6x3xf32>
    %cst_8 = arith.constant dense<0.000000e+00> : vector<6x896xf32>
    %11 = tpu.matmul %10, %8, %cst_8 {dimension_numbers = #tpu.dot_dimension_numbers<[1], [0], [0], [1], [0, 0, 1, 1], [], []>} : vector<6x3xf32>, vector<3x896xf32>, vector<6x896xf32> -> vector<6x896xf32>
    %12 = arith.addf %7, %11 : vector<6x896xf32>
    %13 = vector.extract_strided_slice %1 {offsets = [0, 2], sizes = [3, 896], strides = [1, 1]} : vector<3x1152xf32> to vector<3x896xf32>
    %c2 = arith.constant 2 : index
    %c0_9 = arith.constant 0 : index
    %c0_10 = arith.constant 0 : index
    %14 = vector.load %arg2[%c2, %c0_9, %c0_10] : memref<25x6x3xf32, #tpu.memory_space<vmem>>, vector<1x6x3xf32>
    %15 = vector.shape_cast %14 : vector<1x6x3xf32> to vector<6x3xf32>
    %cst_11 = arith.constant dense<0.000000e+00> : vector<6x896xf32>
    %16 = tpu.matmul %15, %13, %cst_11 {dimension_numbers = #tpu.dot_dimension_numbers<[1], [0], [0], [1], [0, 0, 1, 1], [], []>} : vector<6x3xf32>, vector<3x896xf32>, vector<6x896xf32> -> vector<6x896xf32>
    %17 = arith.addf %12, %16 : vector<6x896xf32>
    %18 = vector.extract_strided_slice %1 {offsets = [0, 3], sizes = [3, 896], strides = [1, 1]} : vector<3x1152xf32> to vector<3x896xf32>
    %c3 = arith.constant 3 : index
    %c0_12 = arith.constant 0 : index
    %c0_13 = arith.constant 0 : index
    %19 = vector.load %arg2[%c3, %c0_12, %c0_13] : memref<25x6x3xf32, #tpu.memory_space<vmem>>, vector<1x6x3xf32>
    %20 = vector.shape_cast %19 : vector<1x6x3xf32> to vector<6x3xf32>
    %cst_14 = arith.constant dense<0.000000e+00> : vector<6x896xf32>
    %21 = tpu.matmul %20, %18, %cst_14 {dimension_numbers = #tpu.dot_dimension_numbers<[1], [0], [0], [1], [0, 0, 1, 1], [], []>} : vector<6x3xf32>, vector<3x896xf32>, vector<6x896xf32> -> vector<6x896xf32>
    %22 = arith.addf %17, %21 : vector<6x896xf32>
    %23 = vector.extract_strided_slice %1 {offsets = [0, 4], sizes = [3, 896], strides = [1, 1]} : vector<3x1152xf32> to vector<3x896xf32>
    %c4 = arith.constant 4 : index
    %c0_15 = arith.constant 0 : index
    %c0_16 = arith.constant 0 : index
    %24 = vector.load %arg2[%c4, %c0_15, %c0_16] : memref<25x6x3xf32, #tpu.memory_space<vmem>>, vector<1x6x3xf32>
    %25 = vector.shape_cast %24 : vector<1x6x3xf32> to vector<6x3xf32>
    %cst_17 = arith.constant dense<0.000000e+00> : vector<6x896xf32>
    %26 = tpu.matmul %25, %23, %cst_17 {dimension_numbers = #tpu.dot_dimension_numbers<[1], [0], [0], [1], [0, 0, 1, 1], [], []>} : vector<6x3xf32>, vector<3x896xf32>, vector<6x896xf32> -> vector<6x896xf32>
    %27 = arith.addf %22, %26 : vector<6x896xf32>
    %28 = vector.extract_strided_slice %1 {offsets = [0, 32], sizes = [3, 896], strides = [1, 1]} : vector<3x1152xf32> to vector<3x896xf32>
    %c5 = arith.constant 5 : index
    %c0_18 = arith.constant 0 : index
    %c0_19 = arith.constant 0 : index
    %29 = vector.load %arg2[%c5, %c0_18, %c0_19] : memref<25x6x3xf32, #tpu.memory_space<vmem>>, vector<1x6x3xf32>
    %30 = vector.shape_cast %29 : vector<1x6x3xf32> to vector<6x3xf32>
    %cst_20 = arith.constant dense<0.000000e+00> : vector<6x896xf32>
    %31 = tpu.matmul %30, %28, %cst_20 {dimension_numbers = #tpu.dot_dimension_numbers<[1], [0], [0], [1], [0, 0, 1, 1], [], []>} : vector<6x3xf32>, vector<3x896xf32>, vector<6x896xf32> -> vector<6x896xf32>
    %32 = arith.addf %27, %31 : vector<6x896xf32>
    %33 = vector.extract_strided_slice %1 {offsets = [0, 33], sizes = [3, 896], strides = [1, 1]} : vector<3x1152xf32> to vector<3x896xf32>
    %c6 = arith.constant 6 : index
    %c0_21 = arith.constant 0 : index
    %c0_22 = arith.constant 0 : index
    %34 = vector.load %arg2[%c6, %c0_21, %c0_22] : memref<25x6x3xf32, #tpu.memory_space<vmem>>, vector<1x6x3xf32>
    %35 = vector.shape_cast %34 : vector<1x6x3xf32> to vector<6x3xf32>
    %cst_23 = arith.constant dense<0.000000e+00> : vector<6x896xf32>
    %36 = tpu.matmul %35, %33, %cst_23 {dimension_numbers = #tpu.dot_dimension_numbers<[1], [0], [0], [1], [0, 0, 1, 1], [], []>} : vector<6x3xf32>, vector<3x896xf32>, vector<6x896xf32> -> vector<6x896xf32>
    %37 = arith.addf %32, %36 : vector<6x896xf32>
    %38 = vector.extract_strided_slice %1 {offsets = [0, 34], sizes = [3, 896], strides = [1, 1]} : vector<3x1152xf32> to vector<3x896xf32>
    %c7 = arith.constant 7 : index
    %c0_24 = arith.constant 0 : index
    %c0_25 = arith.constant 0 : index
    %39 = vector.load %arg2[%c7, %c0_24, %c0_25] : memref<25x6x3xf32, #tpu.memory_space<vmem>>, vector<1x6x3xf32>
    %40 = vector.shape_cast %39 : vector<1x6x3xf32> to vector<6x3xf32>
    %cst_26 = arith.constant dense<0.000000e+00> : vector<6x896xf32>
    %41 = tpu.matmul %40, %38, %cst_26 {dimension_numbers = #tpu.dot_dimension_numbers<[1], [0], [0], [1], [0, 0, 1, 1], [], []>} : vector<6x3xf32>, vector<3x896xf32>, vector<6x896xf32> -> vector<6x896xf32>
    %42 = arith.addf %37, %41 : vector<6x896xf32>
    %43 = vector.extract_strided_slice %1 {offsets = [0, 35], sizes = [3, 896], strides = [1, 1]} : vector<3x1152xf32> to vector<3x896xf32>
    %c8 = arith.constant 8 : index
    %c0_27 = arith.constant 0 : index
    %c0_28 = arith.constant 0 : index
    %44 = vector.load %arg2[%c8, %c0_27, %c0_28] : memref<25x6x3xf32, #tpu.memory_space<vmem>>, vector<1x6x3xf32>
    %45 = vector.shape_cast %44 : vector<1x6x3xf32> to vector<6x3xf32>
    %cst_29 = arith.constant dense<0.000000e+00> : vector<6x896xf32>
    %46 = tpu.matmul %45, %43, %cst_29 {dimension_numbers = #tpu.dot_dimension_numbers<[1], [0], [0], [1], [0, 0, 1, 1], [], []>} : vector<6x3xf32>, vector<3x896xf32>, vector<6x896xf32> -> vector<6x896xf32>
    %47 = arith.addf %42, %46 : vector<6x896xf32>
    %48 = vector.extract_strided_slice %1 {offsets = [0, 36], sizes = [3, 896], strides = [1, 1]} : vector<3x1152xf32> to vector<3x896xf32>
    %c9 = arith.constant 9 : index
    %c0_30 = arith.constant 0 : index
    %c0_31 = arith.constant 0 : index
    %49 = vector.load %arg2[%c9, %c0_30, %c0_31] : memref<25x6x3xf32, #tpu.memory_space<vmem>>, vector<1x6x3xf32>
    %50 = vector.shape_cast %49 : vector<1x6x3xf32> to vector<6x3xf32>
    %cst_32 = arith.constant dense<0.000000e+00> : vector<6x896xf32>
    %51 = tpu.matmul %50, %48, %cst_32 {dimension_numbers = #tpu.dot_dimension_numbers<[1], [0], [0], [1], [0, 0, 1, 1], [], []>} : vector<6x3xf32>, vector<3x896xf32>, vector<6x896xf32> -> vector<6x896xf32>
    %52 = arith.addf %47, %51 : vector<6x896xf32>
    %53 = vector.extract_strided_slice %1 {offsets = [0, 64], sizes = [3, 896], strides = [1, 1]} : vector<3x1152xf32> to vector<3x896xf32>
    %c10 = arith.constant 10 : index
    %c0_33 = arith.constant 0 : index
    %c0_34 = arith.constant 0 : index
    %54 = vector.load %arg2[%c10, %c0_33, %c0_34] : memref<25x6x3xf32, #tpu.memory_space<vmem>>, vector<1x6x3xf32>
    %55 = vector.shape_cast %54 : vector<1x6x3xf32> to vector<6x3xf32>
    %cst_35 = arith.constant dense<0.000000e+00> : vector<6x896xf32>
    %56 = tpu.matmul %55, %53, %cst_35 {dimension_numbers = #tpu.dot_dimension_numbers<[1], [0], [0], [1], [0, 0, 1, 1], [], []>} : vector<6x3xf32>, vector<3x896xf32>, vector<6x896xf32> -> vector<6x896xf32>
    %57 = arith.addf %52, %56 : vector<6x896xf32>
    %58 = vector.extract_strided_slice %1 {offsets = [0, 65], sizes = [3, 896], strides = [1, 1]} : vector<3x1152xf32> to vector<3x896xf32>
    %c11 = arith.constant 11 : index
    %c0_36 = arith.constant 0 : index
    %c0_37 = arith.constant 0 : index
    %59 = vector.load %arg2[%c11, %c0_36, %c0_37] : memref<25x6x3xf32, #tpu.memory_space<vmem>>, vector<1x6x3xf32>
    %60 = vector.shape_cast %59 : vector<1x6x3xf32> to vector<6x3xf32>
    %cst_38 = arith.constant dense<0.000000e+00> : vector<6x896xf32>
    %61 = tpu.matmul %60, %58, %cst_38 {dimension_numbers = #tpu.dot_dimension_numbers<[1], [0], [0], [1], [0, 0, 1, 1], [], []>} : vector<6x3xf32>, vector<3x896xf32>, vector<6x896xf32> -> vector<6x896xf32>
    %62 = arith.addf %57, %61 : vector<6x896xf32>
    %63 = vector.extract_strided_slice %1 {offsets = [0, 66], sizes = [3, 896], strides = [1, 1]} : vector<3x1152xf32> to vector<3x896xf32>
    %c12 = arith.constant 12 : index
    %c0_39 = arith.constant 0 : index
    %c0_40 = arith.constant 0 : index
    %64 = vector.load %arg2[%c12, %c0_39, %c0_40] : memref<25x6x3xf32, #tpu.memory_space<vmem>>, vector<1x6x3xf32>
    %65 = vector.shape_cast %64 : vector<1x6x3xf32> to vector<6x3xf32>
    %cst_41 = arith.constant dense<0.000000e+00> : vector<6x896xf32>
    %66 = tpu.matmul %65, %63, %cst_41 {dimension_numbers = #tpu.dot_dimension_numbers<[1], [0], [0], [1], [0, 0, 1, 1], [], []>} : vector<6x3xf32>, vector<3x896xf32>, vector<6x896xf32> -> vector<6x896xf32>
    %67 = arith.addf %62, %66 : vector<6x896xf32>
    %68 = vector.extract_strided_slice %1 {offsets = [0, 67], sizes = [3, 896], strides = [1, 1]} : vector<3x1152xf32> to vector<3x896xf32>
    %c13 = arith.constant 13 : index
    %c0_42 = arith.constant 0 : index
    %c0_43 = arith.constant 0 : index
    %69 = vector.load %arg2[%c13, %c0_42, %c0_43] : memref<25x6x3xf32, #tpu.memory_space<vmem>>, vector<1x6x3xf32>
    %70 = vector.shape_cast %69 : vector<1x6x3xf32> to vector<6x3xf32>
    %cst_44 = arith.constant dense<0.000000e+00> : vector<6x896xf32>
    %71 = tpu.matmul %70, %68, %cst_44 {dimension_numbers = #tpu.dot_dimension_numbers<[1], [0], [0], [1], [0, 0, 1, 1], [], []>} : vector<6x3xf32>, vector<3x896xf32>, vector<6x896xf32> -> vector<6x896xf32>
    %72 = arith.addf %67, %71 : vector<6x896xf32>
    %73 = vector.extract_strided_slice %1 {offsets = [0, 68], sizes = [3, 896], strides = [1, 1]} : vector<3x1152xf32> to vector<3x896xf32>
    %c14 = arith.constant 14 : index
    %c0_45 = arith.constant 0 : index
    %c0_46 = arith.constant 0 : index
    %74 = vector.load %arg2[%c14, %c0_45, %c0_46] : memref<25x6x3xf32, #tpu.memory_space<vmem>>, vector<1x6x3xf32>
    %75 = vector.shape_cast %74 : vector<1x6x3xf32> to vector<6x3xf32>
    %cst_47 = arith.constant dense<0.000000e+00> : vector<6x896xf32>
    %76 = tpu.matmul %75, %73, %cst_47 {dimension_numbers = #tpu.dot_dimension_numbers<[1], [0], [0], [1], [0, 0, 1, 1], [], []>} : vector<6x3xf32>, vector<3x896xf32>, vector<6x896xf32> -> vector<6x896xf32>
    %77 = arith.addf %72, %76 : vector<6x896xf32>
    %78 = vector.extract_strided_slice %1 {offsets = [0, 96], sizes = [3, 896], strides = [1, 1]} : vector<3x1152xf32> to vector<3x896xf32>
    %c15 = arith.constant 15 : index
    %c0_48 = arith.constant 0 : index
    %c0_49 = arith.constant 0 : index
    %79 = vector.load %arg2[%c15, %c0_48, %c0_49] : memref<25x6x3xf32, #tpu.memory_space<vmem>>, vector<1x6x3xf32>
    %80 = vector.shape_cast %79 : vector<1x6x3xf32> to vector<6x3xf32>
    %cst_50 = arith.constant dense<0.000000e+00> : vector<6x896xf32>
    %81 = tpu.matmul %80, %78, %cst_50 {dimension_numbers = #tpu.dot_dimension_numbers<[1], [0], [0], [1], [0, 0, 1, 1], [], []>} : vector<6x3xf32>, vector<3x896xf32>, vector<6x896xf32> -> vector<6x896xf32>
    %82 = arith.addf %77, %81 : vector<6x896xf32>
    %83 = vector.extract_strided_slice %1 {offsets = [0, 97], sizes = [3, 896], strides = [1, 1]} : vector<3x1152xf32> to vector<3x896xf32>
    %c16 = arith.constant 16 : index
    %c0_51 = arith.constant 0 : index
    %c0_52 = arith.constant 0 : index
    %84 = vector.load %arg2[%c16, %c0_51, %c0_52] : memref<25x6x3xf32, #tpu.memory_space<vmem>>, vector<1x6x3xf32>
    %85 = vector.shape_cast %84 : vector<1x6x3xf32> to vector<6x3xf32>
    %cst_53 = arith.constant dense<0.000000e+00> : vector<6x896xf32>
    %86 = tpu.matmul %85, %83, %cst_53 {dimension_numbers = #tpu.dot_dimension_numbers<[1], [0], [0], [1], [0, 0, 1, 1], [], []>} : vector<6x3xf32>, vector<3x896xf32>, vector<6x896xf32> -> vector<6x896xf32>
    %87 = arith.addf %82, %86 : vector<6x896xf32>
    %88 = vector.extract_strided_slice %1 {offsets = [0, 98], sizes = [3, 896], strides = [1, 1]} : vector<3x1152xf32> to vector<3x896xf32>
    %c17 = arith.constant 17 : index
    %c0_54 = arith.constant 0 : index
    %c0_55 = arith.constant 0 : index
    %89 = vector.load %arg2[%c17, %c0_54, %c0_55] : memref<25x6x3xf32, #tpu.memory_space<vmem>>, vector<1x6x3xf32>
    %90 = vector.shape_cast %89 : vector<1x6x3xf32> to vector<6x3xf32>
    %cst_56 = arith.constant dense<0.000000e+00> : vector<6x896xf32>
    %91 = tpu.matmul %90, %88, %cst_56 {dimension_numbers = #tpu.dot_dimension_numbers<[1], [0], [0], [1], [0, 0, 1, 1], [], []>} : vector<6x3xf32>, vector<3x896xf32>, vector<6x896xf32> -> vector<6x896xf32>
    %92 = arith.addf %87, %91 : vector<6x896xf32>
    %93 = vector.extract_strided_slice %1 {offsets = [0, 99], sizes = [3, 896], strides = [1, 1]} : vector<3x1152xf32> to vector<3x896xf32>
    %c18 = arith.constant 18 : index
    %c0_57 = arith.constant 0 : index
    %c0_58 = arith.constant 0 : index
    %94 = vector.load %arg2[%c18, %c0_57, %c0_58] : memref<25x6x3xf32, #tpu.memory_space<vmem>>, vector<1x6x3xf32>
    %95 = vector.shape_cast %94 : vector<1x6x3xf32> to vector<6x3xf32>
    %cst_59 = arith.constant dense<0.000000e+00> : vector<6x896xf32>
    %96 = tpu.matmul %95, %93, %cst_59 {dimension_numbers = #tpu.dot_dimension_numbers<[1], [0], [0], [1], [0, 0, 1, 1], [], []>} : vector<6x3xf32>, vector<3x896xf32>, vector<6x896xf32> -> vector<6x896xf32>
    %97 = arith.addf %92, %96 : vector<6x896xf32>
    %98 = vector.extract_strided_slice %1 {offsets = [0, 100], sizes = [3, 896], strides = [1, 1]} : vector<3x1152xf32> to vector<3x896xf32>
    %c19 = arith.constant 19 : index
    %c0_60 = arith.constant 0 : index
    %c0_61 = arith.constant 0 : index
    %99 = vector.load %arg2[%c19, %c0_60, %c0_61] : memref<25x6x3xf32, #tpu.memory_space<vmem>>, vector<1x6x3xf32>
    %100 = vector.shape_cast %99 : vector<1x6x3xf32> to vector<6x3xf32>
    %cst_62 = arith.constant dense<0.000000e+00> : vector<6x896xf32>
    %101 = tpu.matmul %100, %98, %cst_62 {dimension_numbers = #tpu.dot_dimension_numbers<[1], [0], [0], [1], [0, 0, 1, 1], [], []>} : vector<6x3xf32>, vector<3x896xf32>, vector<6x896xf32> -> vector<6x896xf32>
    %102 = arith.addf %97, %101 : vector<6x896xf32>
    %103 = vector.extract_strided_slice %1 {offsets = [0, 128], sizes = [3, 896], strides = [1, 1]} : vector<3x1152xf32> to vector<3x896xf32>
    %c20 = arith.constant 20 : index
    %c0_63 = arith.constant 0 : index
    %c0_64 = arith.constant 0 : index
    %104 = vector.load %arg2[%c20, %c0_63, %c0_64] : memref<25x6x3xf32, #tpu.memory_space<vmem>>, vector<1x6x3xf32>
    %105 = vector.shape_cast %104 : vector<1x6x3xf32> to vector<6x3xf32>
    %cst_65 = arith.constant dense<0.000000e+00> : vector<6x896xf32>
    %106 = tpu.matmul %105, %103, %cst_65 {dimension_numbers = #tpu.dot_dimension_numbers<[1], [0], [0], [1], [0, 0, 1, 1], [], []>} : vector<6x3xf32>, vector<3x896xf32>, vector<6x896xf32> -> vector<6x896xf32>
    %107 = arith.addf %102, %106 : vector<6x896xf32>
    %108 = vector.extract_strided_slice %1 {offsets = [0, 129], sizes = [3, 896], strides = [1, 1]} : vector<3x1152xf32> to vector<3x896xf32>
    %c21 = arith.constant 21 : index
    %c0_66 = arith.constant 0 : index
    %c0_67 = arith.constant 0 : index
    %109 = vector.load %arg2[%c21, %c0_66, %c0_67] : memref<25x6x3xf32, #tpu.memory_space<vmem>>, vector<1x6x3xf32>
    %110 = vector.shape_cast %109 : vector<1x6x3xf32> to vector<6x3xf32>
    %cst_68 = arith.constant dense<0.000000e+00> : vector<6x896xf32>
    %111 = tpu.matmul %110, %108, %cst_68 {dimension_numbers = #tpu.dot_dimension_numbers<[1], [0], [0], [1], [0, 0, 1, 1], [], []>} : vector<6x3xf32>, vector<3x896xf32>, vector<6x896xf32> -> vector<6x896xf32>
    %112 = arith.addf %107, %111 : vector<6x896xf32>
    %113 = vector.extract_strided_slice %1 {offsets = [0, 130], sizes = [3, 896], strides = [1, 1]} : vector<3x1152xf32> to vector<3x896xf32>
    %c22 = arith.constant 22 : index
    %c0_69 = arith.constant 0 : index
    %c0_70 = arith.constant 0 : index
    %114 = vector.load %arg2[%c22, %c0_69, %c0_70] : memref<25x6x3xf32, #tpu.memory_space<vmem>>, vector<1x6x3xf32>
    %115 = vector.shape_cast %114 : vector<1x6x3xf32> to vector<6x3xf32>
    %cst_71 = arith.constant dense<0.000000e+00> : vector<6x896xf32>
    %116 = tpu.matmul %115, %113, %cst_71 {dimension_numbers = #tpu.dot_dimension_numbers<[1], [0], [0], [1], [0, 0, 1, 1], [], []>} : vector<6x3xf32>, vector<3x896xf32>, vector<6x896xf32> -> vector<6x896xf32>
    %117 = arith.addf %112, %116 : vector<6x896xf32>
    %118 = vector.extract_strided_slice %1 {offsets = [0, 131], sizes = [3, 896], strides = [1, 1]} : vector<3x1152xf32> to vector<3x896xf32>
    %c23 = arith.constant 23 : index
    %c0_72 = arith.constant 0 : index
    %c0_73 = arith.constant 0 : index
    %119 = vector.load %arg2[%c23, %c0_72, %c0_73] : memref<25x6x3xf32, #tpu.memory_space<vmem>>, vector<1x6x3xf32>
    %120 = vector.shape_cast %119 : vector<1x6x3xf32> to vector<6x3xf32>
    %cst_74 = arith.constant dense<0.000000e+00> : vector<6x896xf32>
    %121 = tpu.matmul %120, %118, %cst_74 {dimension_numbers = #tpu.dot_dimension_numbers<[1], [0], [0], [1], [0, 0, 1, 1], [], []>} : vector<6x3xf32>, vector<3x896xf32>, vector<6x896xf32> -> vector<6x896xf32>
    %122 = arith.addf %117, %121 : vector<6x896xf32>
    %123 = vector.extract_strided_slice %1 {offsets = [0, 132], sizes = [3, 896], strides = [1, 1]} : vector<3x1152xf32> to vector<3x896xf32>
    %c24 = arith.constant 24 : index
    %c0_75 = arith.constant 0 : index
    %c0_76 = arith.constant 0 : index
    %124 = vector.load %arg2[%c24, %c0_75, %c0_76] : memref<25x6x3xf32, #tpu.memory_space<vmem>>, vector<1x6x3xf32>
    %125 = vector.shape_cast %124 : vector<1x6x3xf32> to vector<6x3xf32>
    %cst_77 = arith.constant dense<0.000000e+00> : vector<6x896xf32>
    %126 = tpu.matmul %125, %123, %cst_77 {dimension_numbers = #tpu.dot_dimension_numbers<[1], [0], [0], [1], [0, 0, 1, 1], [], []>} : vector<6x3xf32>, vector<3x896xf32>, vector<6x896xf32> -> vector<6x896xf32>
    %127 = arith.addf %122, %126 : vector<6x896xf32>
    %c0_78 = arith.constant 0 : index
    %c0_79 = arith.constant 0 : index
    %128 = vector.load %arg3[%c0_78, %c0_79] : memref<6x1xf32, #tpu.memory_space<vmem>>, vector<6x1xf32>
    %129 = vector.broadcast %128 : vector<6x1xf32> to vector<6x896xf32>
    %130 = arith.addf %127, %129 : vector<6x896xf32>
    %cst_80 = arith.constant 0.000000e+00 : f32
    %131 = vector.broadcast %cst_80 : f32 to vector<6x896xf32>
    %132 = arith.maximumf %130, %131 : vector<6x896xf32>
    %c0_81 = arith.constant 0 : index
    %c0_82 = arith.constant 0 : index
    %c0_83 = arith.constant 0 : index
    %133 = vector.load %arg4[%c0_81, %c0_82, %c0_83] : memref<4x896x256xf32, #tpu.memory_space<vmem>>, vector<1x896x256xf32>
    %134 = vector.shape_cast %133 : vector<1x896x256xf32> to vector<896x256xf32>
    %cst_84 = arith.constant dense<0.000000e+00> : vector<6x256xf32>
    %135 = tpu.matmul %132, %134, %cst_84 {dimension_numbers = #tpu.dot_dimension_numbers<[1], [0], [0], [1], [0, 0, 1, 1], [], []>} : vector<6x896xf32>, vector<896x256xf32>, vector<6x256xf32> -> vector<6x256xf32>
    %c1_85 = arith.constant 1 : index
    %c0_86 = arith.constant 0 : index
    %c0_87 = arith.constant 0 : index
    %136 = vector.load %arg4[%c1_85, %c0_86, %c0_87] : memref<4x896x256xf32, #tpu.memory_space<vmem>>, vector<1x896x256xf32>
    %137 = vector.shape_cast %136 : vector<1x896x256xf32> to vector<896x256xf32>
    %cst_88 = arith.constant dense<0.000000e+00> : vector<6x256xf32>
    %138 = tpu.matmul %132, %137, %cst_88 {dimension_numbers = #tpu.dot_dimension_numbers<[1], [0], [0], [1], [0, 0, 1, 1], [], []>} : vector<6x896xf32>, vector<896x256xf32>, vector<6x256xf32> -> vector<6x256xf32>
    %139 = arith.maximumf %135, %138 : vector<6x256xf32>
    %c2_89 = arith.constant 2 : index
    %c0_90 = arith.constant 0 : index
    %c0_91 = arith.constant 0 : index
    %140 = vector.load %arg4[%c2_89, %c0_90, %c0_91] : memref<4x896x256xf32, #tpu.memory_space<vmem>>, vector<1x896x256xf32>
    %141 = vector.shape_cast %140 : vector<1x896x256xf32> to vector<896x256xf32>
    %cst_92 = arith.constant dense<0.000000e+00> : vector<6x256xf32>
    %142 = tpu.matmul %132, %141, %cst_92 {dimension_numbers = #tpu.dot_dimension_numbers<[1], [0], [0], [1], [0, 0, 1, 1], [], []>} : vector<6x896xf32>, vector<896x256xf32>, vector<6x256xf32> -> vector<6x256xf32>
    %143 = arith.maximumf %139, %142 : vector<6x256xf32>
    %c3_93 = arith.constant 3 : index
    %c0_94 = arith.constant 0 : index
    %c0_95 = arith.constant 0 : index
    %144 = vector.load %arg4[%c3_93, %c0_94, %c0_95] : memref<4x896x256xf32, #tpu.memory_space<vmem>>, vector<1x896x256xf32>
    %145 = vector.shape_cast %144 : vector<1x896x256xf32> to vector<896x256xf32>
    %cst_96 = arith.constant dense<0.000000e+00> : vector<6x256xf32>
    %146 = tpu.matmul %132, %145, %cst_96 {dimension_numbers = #tpu.dot_dimension_numbers<[1], [0], [0], [1], [0, 0, 1, 1], [], []>} : vector<6x896xf32>, vector<896x256xf32>, vector<6x256xf32> -> vector<6x256xf32>
    %147 = arith.maximumf %143, %146 : vector<6x256xf32>
    %c0_97 = arith.constant 0 : index
    %c0_98 = arith.constant 0 : index
    %c0_99 = arith.constant 0 : index
    %148 = vector.load %arg5[%c0_97, %c0_98, %c0_99] : memref<1x6x256xf32, #tpu.memory_space<vmem>>, vector<1x6x256xf32>
    %149 = vector.shape_cast %148 : vector<1x6x256xf32> to vector<6x256xf32>
    %150 = vector.shape_cast %147 : vector<6x256xf32> to vector<1x6x256xf32>
    tpu.vector_store %arg5[%c0_97, %c0_98, %c0_99], %150 {strides = array<i32>} : memref<1x6x256xf32, #tpu.memory_space<vmem>>, vector<1x6x256xf32>,
    return
  }
  func.func @transform_0(%arg0: i32) -> (i32, i32, i32) {
    %c0_i32 = arith.constant 0 : i32
    %c0_i32_0 = arith.constant 0 : i32
    %c0_i32_1 = arith.constant 0 : i32
    return %arg0, %c0_i32, %c0_i32_0 : i32, i32, i32
  }
  func.func @transform_1(%arg0: i32) -> (i32, i32, i32) {
    %c0_i32 = arith.constant 0 : i32
    %c0_i32_0 = arith.constant 0 : i32
    %c0_i32_1 = arith.constant 0 : i32
    %c0_i32_2 = arith.constant 0 : i32
    return %c0_i32, %c0_i32_0, %c0_i32_1 : i32, i32, i32
  }
  func.func @transform_2(%arg0: i32) -> (i32, i32) {
    %c0_i32 = arith.constant 0 : i32
    %c0_i32_0 = arith.constant 0 : i32
    %c0_i32_1 = arith.constant 0 : i32
    return %c0_i32, %c0_i32_0 : i32, i32
  }
  func.func @transform_3(%arg0: i32) -> (i32, i32, i32) {
    %c0_i32 = arith.constant 0 : i32
    %c0_i32_0 = arith.constant 0 : i32
    %c0_i32_1 = arith.constant 0 : i32
    %c0_i32_2 = arith.constant 0 : i32
    return %c0_i32, %c0_i32_0, %c0_i32_1 : i32, i32, i32
  }
  func.func @transform_4(%arg0: i32) -> (i32, i32, i32) {
    %c0_i32 = arith.constant 0 : i32
    %c0_i32_0 = arith.constant 0 : i32
    %c0_i32_1 = arith.constant 0 : i32
    return %arg0, %c0_i32, %c0_i32_0 : i32, i32, i32
  }
}

module attributes {stable_mosaic.version = 11 : i64} {
  func.func @kernel(%arg0: i32, %arg1: memref<1x6x256xf32, #tpu.memory_space<vmem>>, %arg2: memref<25x16x6xf32, #tpu.memory_space<vmem>>, %arg3: memref<16x1xf32, #tpu.memory_space<vmem>>, %arg4: memref<4x140x32xf32, #tpu.memory_space<vmem>>, %arg5: memref<1x16x32xf32, #tpu.memory_space<vmem>>) attributes {dimension_semantics = [#tpu.dimension_semantics<parallel>], iteration_bounds = array<i64: 2>, scalar_prefetch = 0 : i64, scratch_operands = 0 : i64, tpu.core_type = #tpu.core_type<tc>, window_params = [{transform_indices = @transform_0, window_bounds = array<i64: 1, 6, 256>}, {pipeline_mode = #tpu.pipeline_mode<synchronous>, transform_indices = @transform_1, window_bounds = array<i64: 25, 16, 6>}, {pipeline_mode = #tpu.pipeline_mode<synchronous>, transform_indices = @transform_2, window_bounds = array<i64: 16, 1>}, {pipeline_mode = #tpu.pipeline_mode<synchronous>, transform_indices = @transform_3, window_bounds = array<i64: 4, 140, 32>}, {transform_indices = @transform_4, window_bounds = array<i64: 1, 16, 32>}]} {
    %c0 = arith.constant 0 : index
    %c0_0 = arith.constant 0 : index
    %c0_1 = arith.constant 0 : index
    %0 = vector.load %arg1[%c0, %c0_0, %c0_1] : memref<1x6x256xf32, #tpu.memory_space<vmem>>, vector<1x6x256xf32>
    %1 = vector.shape_cast %0 : vector<1x6x256xf32> to vector<6x256xf32>
    %cst = arith.constant 0.000000e+00 : f32
    %2 = vector.broadcast %cst : f32 to vector<16x140xf32>
    %3 = vector.extract_strided_slice %1 {offsets = [0, 0], sizes = [6, 140], strides = [1, 1]} : vector<6x256xf32> to vector<6x140xf32>
    %c0_2 = arith.constant 0 : index
    %c0_3 = arith.constant 0 : index
    %c0_4 = arith.constant 0 : index
    %4 = vector.load %arg2[%c0_2, %c0_3, %c0_4] : memref<25x16x6xf32, #tpu.memory_space<vmem>>, vector<1x16x6xf32>
    %5 = vector.shape_cast %4 : vector<1x16x6xf32> to vector<16x6xf32>
    %cst_5 = arith.constant dense<0.000000e+00> : vector<16x140xf32>
    %6 = tpu.matmul %5, %3, %cst_5 {dimension_numbers = #tpu.dot_dimension_numbers<[1], [0], [0], [1], [0, 0, 1, 1], [], []>} : vector<16x6xf32>, vector<6x140xf32>, vector<16x140xf32> -> vector<16x140xf32>
    %7 = arith.addf %2, %6 : vector<16x140xf32>
    %8 = vector.extract_strided_slice %1 {offsets = [0, 1], sizes = [6, 140], strides = [1, 1]} : vector<6x256xf32> to vector<6x140xf32>
    %c1 = arith.constant 1 : index
    %c0_6 = arith.constant 0 : index
    %c0_7 = arith.constant 0 : index
    %9 = vector.load %arg2[%c1, %c0_6, %c0_7] : memref<25x16x6xf32, #tpu.memory_space<vmem>>, vector<1x16x6xf32>
    %10 = vector.shape_cast %9 : vector<1x16x6xf32> to vector<16x6xf32>
    %cst_8 = arith.constant dense<0.000000e+00> : vector<16x140xf32>
    %11 = tpu.matmul %10, %8, %cst_8 {dimension_numbers = #tpu.dot_dimension_numbers<[1], [0], [0], [1], [0, 0, 1, 1], [], []>} : vector<16x6xf32>, vector<6x140xf32>, vector<16x140xf32> -> vector<16x140xf32>
    %12 = arith.addf %7, %11 : vector<16x140xf32>
    %13 = vector.extract_strided_slice %1 {offsets = [0, 2], sizes = [6, 140], strides = [1, 1]} : vector<6x256xf32> to vector<6x140xf32>
    %c2 = arith.constant 2 : index
    %c0_9 = arith.constant 0 : index
    %c0_10 = arith.constant 0 : index
    %14 = vector.load %arg2[%c2, %c0_9, %c0_10] : memref<25x16x6xf32, #tpu.memory_space<vmem>>, vector<1x16x6xf32>
    %15 = vector.shape_cast %14 : vector<1x16x6xf32> to vector<16x6xf32>
    %cst_11 = arith.constant dense<0.000000e+00> : vector<16x140xf32>
    %16 = tpu.matmul %15, %13, %cst_11 {dimension_numbers = #tpu.dot_dimension_numbers<[1], [0], [0], [1], [0, 0, 1, 1], [], []>} : vector<16x6xf32>, vector<6x140xf32>, vector<16x140xf32> -> vector<16x140xf32>
    %17 = arith.addf %12, %16 : vector<16x140xf32>
    %18 = vector.extract_strided_slice %1 {offsets = [0, 3], sizes = [6, 140], strides = [1, 1]} : vector<6x256xf32> to vector<6x140xf32>
    %c3 = arith.constant 3 : index
    %c0_12 = arith.constant 0 : index
    %c0_13 = arith.constant 0 : index
    %19 = vector.load %arg2[%c3, %c0_12, %c0_13] : memref<25x16x6xf32, #tpu.memory_space<vmem>>, vector<1x16x6xf32>
    %20 = vector.shape_cast %19 : vector<1x16x6xf32> to vector<16x6xf32>
    %cst_14 = arith.constant dense<0.000000e+00> : vector<16x140xf32>
    %21 = tpu.matmul %20, %18, %cst_14 {dimension_numbers = #tpu.dot_dimension_numbers<[1], [0], [0], [1], [0, 0, 1, 1], [], []>} : vector<16x6xf32>, vector<6x140xf32>, vector<16x140xf32> -> vector<16x140xf32>
    %22 = arith.addf %17, %21 : vector<16x140xf32>
    %23 = vector.extract_strided_slice %1 {offsets = [0, 4], sizes = [6, 140], strides = [1, 1]} : vector<6x256xf32> to vector<6x140xf32>
    %c4 = arith.constant 4 : index
    %c0_15 = arith.constant 0 : index
    %c0_16 = arith.constant 0 : index
    %24 = vector.load %arg2[%c4, %c0_15, %c0_16] : memref<25x16x6xf32, #tpu.memory_space<vmem>>, vector<1x16x6xf32>
    %25 = vector.shape_cast %24 : vector<1x16x6xf32> to vector<16x6xf32>
    %cst_17 = arith.constant dense<0.000000e+00> : vector<16x140xf32>
    %26 = tpu.matmul %25, %23, %cst_17 {dimension_numbers = #tpu.dot_dimension_numbers<[1], [0], [0], [1], [0, 0, 1, 1], [], []>} : vector<16x6xf32>, vector<6x140xf32>, vector<16x140xf32> -> vector<16x140xf32>
    %27 = arith.addf %22, %26 : vector<16x140xf32>
    %28 = vector.extract_strided_slice %1 {offsets = [0, 14], sizes = [6, 140], strides = [1, 1]} : vector<6x256xf32> to vector<6x140xf32>
    %c5 = arith.constant 5 : index
    %c0_18 = arith.constant 0 : index
    %c0_19 = arith.constant 0 : index
    %29 = vector.load %arg2[%c5, %c0_18, %c0_19] : memref<25x16x6xf32, #tpu.memory_space<vmem>>, vector<1x16x6xf32>
    %30 = vector.shape_cast %29 : vector<1x16x6xf32> to vector<16x6xf32>
    %cst_20 = arith.constant dense<0.000000e+00> : vector<16x140xf32>
    %31 = tpu.matmul %30, %28, %cst_20 {dimension_numbers = #tpu.dot_dimension_numbers<[1], [0], [0], [1], [0, 0, 1, 1], [], []>} : vector<16x6xf32>, vector<6x140xf32>, vector<16x140xf32> -> vector<16x140xf32>
    %32 = arith.addf %27, %31 : vector<16x140xf32>
    %33 = vector.extract_strided_slice %1 {offsets = [0, 15], sizes = [6, 140], strides = [1, 1]} : vector<6x256xf32> to vector<6x140xf32>
    %c6 = arith.constant 6 : index
    %c0_21 = arith.constant 0 : index
    %c0_22 = arith.constant 0 : index
    %34 = vector.load %arg2[%c6, %c0_21, %c0_22] : memref<25x16x6xf32, #tpu.memory_space<vmem>>, vector<1x16x6xf32>
    %35 = vector.shape_cast %34 : vector<1x16x6xf32> to vector<16x6xf32>
    %cst_23 = arith.constant dense<0.000000e+00> : vector<16x140xf32>
    %36 = tpu.matmul %35, %33, %cst_23 {dimension_numbers = #tpu.dot_dimension_numbers<[1], [0], [0], [1], [0, 0, 1, 1], [], []>} : vector<16x6xf32>, vector<6x140xf32>, vector<16x140xf32> -> vector<16x140xf32>
    %37 = arith.addf %32, %36 : vector<16x140xf32>
    %38 = vector.extract_strided_slice %1 {offsets = [0, 16], sizes = [6, 140], strides = [1, 1]} : vector<6x256xf32> to vector<6x140xf32>
    %c7 = arith.constant 7 : index
    %c0_24 = arith.constant 0 : index
    %c0_25 = arith.constant 0 : index
    %39 = vector.load %arg2[%c7, %c0_24, %c0_25] : memref<25x16x6xf32, #tpu.memory_space<vmem>>, vector<1x16x6xf32>
    %40 = vector.shape_cast %39 : vector<1x16x6xf32> to vector<16x6xf32>
    %cst_26 = arith.constant dense<0.000000e+00> : vector<16x140xf32>
    %41 = tpu.matmul %40, %38, %cst_26 {dimension_numbers = #tpu.dot_dimension_numbers<[1], [0], [0], [1], [0, 0, 1, 1], [], []>} : vector<16x6xf32>, vector<6x140xf32>, vector<16x140xf32> -> vector<16x140xf32>
    %42 = arith.addf %37, %41 : vector<16x140xf32>
    %43 = vector.extract_strided_slice %1 {offsets = [0, 17], sizes = [6, 140], strides = [1, 1]} : vector<6x256xf32> to vector<6x140xf32>
    %c8 = arith.constant 8 : index
    %c0_27 = arith.constant 0 : index
    %c0_28 = arith.constant 0 : index
    %44 = vector.load %arg2[%c8, %c0_27, %c0_28] : memref<25x16x6xf32, #tpu.memory_space<vmem>>, vector<1x16x6xf32>
    %45 = vector.shape_cast %44 : vector<1x16x6xf32> to vector<16x6xf32>
    %cst_29 = arith.constant dense<0.000000e+00> : vector<16x140xf32>
    %46 = tpu.matmul %45, %43, %cst_29 {dimension_numbers = #tpu.dot_dimension_numbers<[1], [0], [0], [1], [0, 0, 1, 1], [], []>} : vector<16x6xf32>, vector<6x140xf32>, vector<16x140xf32> -> vector<16x140xf32>
    %47 = arith.addf %42, %46 : vector<16x140xf32>
    %48 = vector.extract_strided_slice %1 {offsets = [0, 18], sizes = [6, 140], strides = [1, 1]} : vector<6x256xf32> to vector<6x140xf32>
    %c9 = arith.constant 9 : index
    %c0_30 = arith.constant 0 : index
    %c0_31 = arith.constant 0 : index
    %49 = vector.load %arg2[%c9, %c0_30, %c0_31] : memref<25x16x6xf32, #tpu.memory_space<vmem>>, vector<1x16x6xf32>
    %50 = vector.shape_cast %49 : vector<1x16x6xf32> to vector<16x6xf32>
    %cst_32 = arith.constant dense<0.000000e+00> : vector<16x140xf32>
    %51 = tpu.matmul %50, %48, %cst_32 {dimension_numbers = #tpu.dot_dimension_numbers<[1], [0], [0], [1], [0, 0, 1, 1], [], []>} : vector<16x6xf32>, vector<6x140xf32>, vector<16x140xf32> -> vector<16x140xf32>
    %52 = arith.addf %47, %51 : vector<16x140xf32>
    %53 = vector.extract_strided_slice %1 {offsets = [0, 28], sizes = [6, 140], strides = [1, 1]} : vector<6x256xf32> to vector<6x140xf32>
    %c10 = arith.constant 10 : index
    %c0_33 = arith.constant 0 : index
    %c0_34 = arith.constant 0 : index
    %54 = vector.load %arg2[%c10, %c0_33, %c0_34] : memref<25x16x6xf32, #tpu.memory_space<vmem>>, vector<1x16x6xf32>
    %55 = vector.shape_cast %54 : vector<1x16x6xf32> to vector<16x6xf32>
    %cst_35 = arith.constant dense<0.000000e+00> : vector<16x140xf32>
    %56 = tpu.matmul %55, %53, %cst_35 {dimension_numbers = #tpu.dot_dimension_numbers<[1], [0], [0], [1], [0, 0, 1, 1], [], []>} : vector<16x6xf32>, vector<6x140xf32>, vector<16x140xf32> -> vector<16x140xf32>
    %57 = arith.addf %52, %56 : vector<16x140xf32>
    %58 = vector.extract_strided_slice %1 {offsets = [0, 29], sizes = [6, 140], strides = [1, 1]} : vector<6x256xf32> to vector<6x140xf32>
    %c11 = arith.constant 11 : index
    %c0_36 = arith.constant 0 : index
    %c0_37 = arith.constant 0 : index
    %59 = vector.load %arg2[%c11, %c0_36, %c0_37] : memref<25x16x6xf32, #tpu.memory_space<vmem>>, vector<1x16x6xf32>
    %60 = vector.shape_cast %59 : vector<1x16x6xf32> to vector<16x6xf32>
    %cst_38 = arith.constant dense<0.000000e+00> : vector<16x140xf32>
    %61 = tpu.matmul %60, %58, %cst_38 {dimension_numbers = #tpu.dot_dimension_numbers<[1], [0], [0], [1], [0, 0, 1, 1], [], []>} : vector<16x6xf32>, vector<6x140xf32>, vector<16x140xf32> -> vector<16x140xf32>
    %62 = arith.addf %57, %61 : vector<16x140xf32>
    %63 = vector.extract_strided_slice %1 {offsets = [0, 30], sizes = [6, 140], strides = [1, 1]} : vector<6x256xf32> to vector<6x140xf32>
    %c12 = arith.constant 12 : index
    %c0_39 = arith.constant 0 : index
    %c0_40 = arith.constant 0 : index
    %64 = vector.load %arg2[%c12, %c0_39, %c0_40] : memref<25x16x6xf32, #tpu.memory_space<vmem>>, vector<1x16x6xf32>
    %65 = vector.shape_cast %64 : vector<1x16x6xf32> to vector<16x6xf32>
    %cst_41 = arith.constant dense<0.000000e+00> : vector<16x140xf32>
    %66 = tpu.matmul %65, %63, %cst_41 {dimension_numbers = #tpu.dot_dimension_numbers<[1], [0], [0], [1], [0, 0, 1, 1], [], []>} : vector<16x6xf32>, vector<6x140xf32>, vector<16x140xf32> -> vector<16x140xf32>
    %67 = arith.addf %62, %66 : vector<16x140xf32>
    %68 = vector.extract_strided_slice %1 {offsets = [0, 31], sizes = [6, 140], strides = [1, 1]} : vector<6x256xf32> to vector<6x140xf32>
    %c13 = arith.constant 13 : index
    %c0_42 = arith.constant 0 : index
    %c0_43 = arith.constant 0 : index
    %69 = vector.load %arg2[%c13, %c0_42, %c0_43] : memref<25x16x6xf32, #tpu.memory_space<vmem>>, vector<1x16x6xf32>
    %70 = vector.shape_cast %69 : vector<1x16x6xf32> to vector<16x6xf32>
    %cst_44 = arith.constant dense<0.000000e+00> : vector<16x140xf32>
    %71 = tpu.matmul %70, %68, %cst_44 {dimension_numbers = #tpu.dot_dimension_numbers<[1], [0], [0], [1], [0, 0, 1, 1], [], []>} : vector<16x6xf32>, vector<6x140xf32>, vector<16x140xf32> -> vector<16x140xf32>
    %72 = arith.addf %67, %71 : vector<16x140xf32>
    %73 = vector.extract_strided_slice %1 {offsets = [0, 32], sizes = [6, 140], strides = [1, 1]} : vector<6x256xf32> to vector<6x140xf32>
    %c14 = arith.constant 14 : index
    %c0_45 = arith.constant 0 : index
    %c0_46 = arith.constant 0 : index
    %74 = vector.load %arg2[%c14, %c0_45, %c0_46] : memref<25x16x6xf32, #tpu.memory_space<vmem>>, vector<1x16x6xf32>
    %75 = vector.shape_cast %74 : vector<1x16x6xf32> to vector<16x6xf32>
    %cst_47 = arith.constant dense<0.000000e+00> : vector<16x140xf32>
    %76 = tpu.matmul %75, %73, %cst_47 {dimension_numbers = #tpu.dot_dimension_numbers<[1], [0], [0], [1], [0, 0, 1, 1], [], []>} : vector<16x6xf32>, vector<6x140xf32>, vector<16x140xf32> -> vector<16x140xf32>
    %77 = arith.addf %72, %76 : vector<16x140xf32>
    %78 = vector.extract_strided_slice %1 {offsets = [0, 42], sizes = [6, 140], strides = [1, 1]} : vector<6x256xf32> to vector<6x140xf32>
    %c15 = arith.constant 15 : index
    %c0_48 = arith.constant 0 : index
    %c0_49 = arith.constant 0 : index
    %79 = vector.load %arg2[%c15, %c0_48, %c0_49] : memref<25x16x6xf32, #tpu.memory_space<vmem>>, vector<1x16x6xf32>
    %80 = vector.shape_cast %79 : vector<1x16x6xf32> to vector<16x6xf32>
    %cst_50 = arith.constant dense<0.000000e+00> : vector<16x140xf32>
    %81 = tpu.matmul %80, %78, %cst_50 {dimension_numbers = #tpu.dot_dimension_numbers<[1], [0], [0], [1], [0, 0, 1, 1], [], []>} : vector<16x6xf32>, vector<6x140xf32>, vector<16x140xf32> -> vector<16x140xf32>
    %82 = arith.addf %77, %81 : vector<16x140xf32>
    %83 = vector.extract_strided_slice %1 {offsets = [0, 43], sizes = [6, 140], strides = [1, 1]} : vector<6x256xf32> to vector<6x140xf32>
    %c16 = arith.constant 16 : index
    %c0_51 = arith.constant 0 : index
    %c0_52 = arith.constant 0 : index
    %84 = vector.load %arg2[%c16, %c0_51, %c0_52] : memref<25x16x6xf32, #tpu.memory_space<vmem>>, vector<1x16x6xf32>
    %85 = vector.shape_cast %84 : vector<1x16x6xf32> to vector<16x6xf32>
    %cst_53 = arith.constant dense<0.000000e+00> : vector<16x140xf32>
    %86 = tpu.matmul %85, %83, %cst_53 {dimension_numbers = #tpu.dot_dimension_numbers<[1], [0], [0], [1], [0, 0, 1, 1], [], []>} : vector<16x6xf32>, vector<6x140xf32>, vector<16x140xf32> -> vector<16x140xf32>
    %87 = arith.addf %82, %86 : vector<16x140xf32>
    %88 = vector.extract_strided_slice %1 {offsets = [0, 44], sizes = [6, 140], strides = [1, 1]} : vector<6x256xf32> to vector<6x140xf32>
    %c17 = arith.constant 17 : index
    %c0_54 = arith.constant 0 : index
    %c0_55 = arith.constant 0 : index
    %89 = vector.load %arg2[%c17, %c0_54, %c0_55] : memref<25x16x6xf32, #tpu.memory_space<vmem>>, vector<1x16x6xf32>
    %90 = vector.shape_cast %89 : vector<1x16x6xf32> to vector<16x6xf32>
    %cst_56 = arith.constant dense<0.000000e+00> : vector<16x140xf32>
    %91 = tpu.matmul %90, %88, %cst_56 {dimension_numbers = #tpu.dot_dimension_numbers<[1], [0], [0], [1], [0, 0, 1, 1], [], []>} : vector<16x6xf32>, vector<6x140xf32>, vector<16x140xf32> -> vector<16x140xf32>
    %92 = arith.addf %87, %91 : vector<16x140xf32>
    %93 = vector.extract_strided_slice %1 {offsets = [0, 45], sizes = [6, 140], strides = [1, 1]} : vector<6x256xf32> to vector<6x140xf32>
    %c18 = arith.constant 18 : index
    %c0_57 = arith.constant 0 : index
    %c0_58 = arith.constant 0 : index
    %94 = vector.load %arg2[%c18, %c0_57, %c0_58] : memref<25x16x6xf32, #tpu.memory_space<vmem>>, vector<1x16x6xf32>
    %95 = vector.shape_cast %94 : vector<1x16x6xf32> to vector<16x6xf32>
    %cst_59 = arith.constant dense<0.000000e+00> : vector<16x140xf32>
    %96 = tpu.matmul %95, %93, %cst_59 {dimension_numbers = #tpu.dot_dimension_numbers<[1], [0], [0], [1], [0, 0, 1, 1], [], []>} : vector<16x6xf32>, vector<6x140xf32>, vector<16x140xf32> -> vector<16x140xf32>
    %97 = arith.addf %92, %96 : vector<16x140xf32>
    %98 = vector.extract_strided_slice %1 {offsets = [0, 46], sizes = [6, 140], strides = [1, 1]} : vector<6x256xf32> to vector<6x140xf32>
    %c19 = arith.constant 19 : index
    %c0_60 = arith.constant 0 : index
    %c0_61 = arith.constant 0 : index
    %99 = vector.load %arg2[%c19, %c0_60, %c0_61] : memref<25x16x6xf32, #tpu.memory_space<vmem>>, vector<1x16x6xf32>
    %100 = vector.shape_cast %99 : vector<1x16x6xf32> to vector<16x6xf32>
    %cst_62 = arith.constant dense<0.000000e+00> : vector<16x140xf32>
    %101 = tpu.matmul %100, %98, %cst_62 {dimension_numbers = #tpu.dot_dimension_numbers<[1], [0], [0], [1], [0, 0, 1, 1], [], []>} : vector<16x6xf32>, vector<6x140xf32>, vector<16x140xf32> -> vector<16x140xf32>
    %102 = arith.addf %97, %101 : vector<16x140xf32>
    %103 = vector.extract_strided_slice %1 {offsets = [0, 56], sizes = [6, 140], strides = [1, 1]} : vector<6x256xf32> to vector<6x140xf32>
    %c20 = arith.constant 20 : index
    %c0_63 = arith.constant 0 : index
    %c0_64 = arith.constant 0 : index
    %104 = vector.load %arg2[%c20, %c0_63, %c0_64] : memref<25x16x6xf32, #tpu.memory_space<vmem>>, vector<1x16x6xf32>
    %105 = vector.shape_cast %104 : vector<1x16x6xf32> to vector<16x6xf32>
    %cst_65 = arith.constant dense<0.000000e+00> : vector<16x140xf32>
    %106 = tpu.matmul %105, %103, %cst_65 {dimension_numbers = #tpu.dot_dimension_numbers<[1], [0], [0], [1], [0, 0, 1, 1], [], []>} : vector<16x6xf32>, vector<6x140xf32>, vector<16x140xf32> -> vector<16x140xf32>
    %107 = arith.addf %102, %106 : vector<16x140xf32>
    %108 = vector.extract_strided_slice %1 {offsets = [0, 57], sizes = [6, 140], strides = [1, 1]} : vector<6x256xf32> to vector<6x140xf32>
    %c21 = arith.constant 21 : index
    %c0_66 = arith.constant 0 : index
    %c0_67 = arith.constant 0 : index
    %109 = vector.load %arg2[%c21, %c0_66, %c0_67] : memref<25x16x6xf32, #tpu.memory_space<vmem>>, vector<1x16x6xf32>
    %110 = vector.shape_cast %109 : vector<1x16x6xf32> to vector<16x6xf32>
    %cst_68 = arith.constant dense<0.000000e+00> : vector<16x140xf32>
    %111 = tpu.matmul %110, %108, %cst_68 {dimension_numbers = #tpu.dot_dimension_numbers<[1], [0], [0], [1], [0, 0, 1, 1], [], []>} : vector<16x6xf32>, vector<6x140xf32>, vector<16x140xf32> -> vector<16x140xf32>
    %112 = arith.addf %107, %111 : vector<16x140xf32>
    %113 = vector.extract_strided_slice %1 {offsets = [0, 58], sizes = [6, 140], strides = [1, 1]} : vector<6x256xf32> to vector<6x140xf32>
    %c22 = arith.constant 22 : index
    %c0_69 = arith.constant 0 : index
    %c0_70 = arith.constant 0 : index
    %114 = vector.load %arg2[%c22, %c0_69, %c0_70] : memref<25x16x6xf32, #tpu.memory_space<vmem>>, vector<1x16x6xf32>
    %115 = vector.shape_cast %114 : vector<1x16x6xf32> to vector<16x6xf32>
    %cst_71 = arith.constant dense<0.000000e+00> : vector<16x140xf32>
    %116 = tpu.matmul %115, %113, %cst_71 {dimension_numbers = #tpu.dot_dimension_numbers<[1], [0], [0], [1], [0, 0, 1, 1], [], []>} : vector<16x6xf32>, vector<6x140xf32>, vector<16x140xf32> -> vector<16x140xf32>
    %117 = arith.addf %112, %116 : vector<16x140xf32>
    %118 = vector.extract_strided_slice %1 {offsets = [0, 59], sizes = [6, 140], strides = [1, 1]} : vector<6x256xf32> to vector<6x140xf32>
    %c23 = arith.constant 23 : index
    %c0_72 = arith.constant 0 : index
    %c0_73 = arith.constant 0 : index
    %119 = vector.load %arg2[%c23, %c0_72, %c0_73] : memref<25x16x6xf32, #tpu.memory_space<vmem>>, vector<1x16x6xf32>
    %120 = vector.shape_cast %119 : vector<1x16x6xf32> to vector<16x6xf32>
    %cst_74 = arith.constant dense<0.000000e+00> : vector<16x140xf32>
    %121 = tpu.matmul %120, %118, %cst_74 {dimension_numbers = #tpu.dot_dimension_numbers<[1], [0], [0], [1], [0, 0, 1, 1], [], []>} : vector<16x6xf32>, vector<6x140xf32>, vector<16x140xf32> -> vector<16x140xf32>
    %122 = arith.addf %117, %121 : vector<16x140xf32>
    %123 = vector.extract_strided_slice %1 {offsets = [0, 60], sizes = [6, 140], strides = [1, 1]} : vector<6x256xf32> to vector<6x140xf32>
    %c24 = arith.constant 24 : index
    %c0_75 = arith.constant 0 : index
    %c0_76 = arith.constant 0 : index
    %124 = vector.load %arg2[%c24, %c0_75, %c0_76] : memref<25x16x6xf32, #tpu.memory_space<vmem>>, vector<1x16x6xf32>
    %125 = vector.shape_cast %124 : vector<1x16x6xf32> to vector<16x6xf32>
    %cst_77 = arith.constant dense<0.000000e+00> : vector<16x140xf32>
    %126 = tpu.matmul %125, %123, %cst_77 {dimension_numbers = #tpu.dot_dimension_numbers<[1], [0], [0], [1], [0, 0, 1, 1], [], []>} : vector<16x6xf32>, vector<6x140xf32>, vector<16x140xf32> -> vector<16x140xf32>
    %127 = arith.addf %122, %126 : vector<16x140xf32>
    %c0_78 = arith.constant 0 : index
    %c0_79 = arith.constant 0 : index
    %128 = vector.load %arg3[%c0_78, %c0_79] : memref<16x1xf32, #tpu.memory_space<vmem>>, vector<16x1xf32>
    %129 = vector.broadcast %128 : vector<16x1xf32> to vector<16x140xf32>
    %130 = arith.addf %127, %129 : vector<16x140xf32>
    %cst_80 = arith.constant 0.000000e+00 : f32
    %131 = vector.broadcast %cst_80 : f32 to vector<16x140xf32>
    %132 = arith.maximumf %130, %131 : vector<16x140xf32>
    %c0_81 = arith.constant 0 : index
    %c0_82 = arith.constant 0 : index
    %c0_83 = arith.constant 0 : index
    %133 = vector.load %arg4[%c0_81, %c0_82, %c0_83] : memref<4x140x32xf32, #tpu.memory_space<vmem>>, vector<1x140x32xf32>
    %134 = vector.shape_cast %133 : vector<1x140x32xf32> to vector<140x32xf32>
    %cst_84 = arith.constant dense<0.000000e+00> : vector<16x32xf32>
    %135 = tpu.matmul %132, %134, %cst_84 {dimension_numbers = #tpu.dot_dimension_numbers<[1], [0], [0], [1], [0, 0, 1, 1], [], []>} : vector<16x140xf32>, vector<140x32xf32>, vector<16x32xf32> -> vector<16x32xf32>
    %c1_85 = arith.constant 1 : index
    %c0_86 = arith.constant 0 : index
    %c0_87 = arith.constant 0 : index
    %136 = vector.load %arg4[%c1_85, %c0_86, %c0_87] : memref<4x140x32xf32, #tpu.memory_space<vmem>>, vector<1x140x32xf32>
    %137 = vector.shape_cast %136 : vector<1x140x32xf32> to vector<140x32xf32>
    %cst_88 = arith.constant dense<0.000000e+00> : vector<16x32xf32>
    %138 = tpu.matmul %132, %137, %cst_88 {dimension_numbers = #tpu.dot_dimension_numbers<[1], [0], [0], [1], [0, 0, 1, 1], [], []>} : vector<16x140xf32>, vector<140x32xf32>, vector<16x32xf32> -> vector<16x32xf32>
    %139 = arith.maximumf %135, %138 : vector<16x32xf32>
    %c2_89 = arith.constant 2 : index
    %c0_90 = arith.constant 0 : index
    %c0_91 = arith.constant 0 : index
    %140 = vector.load %arg4[%c2_89, %c0_90, %c0_91] : memref<4x140x32xf32, #tpu.memory_space<vmem>>, vector<1x140x32xf32>
    %141 = vector.shape_cast %140 : vector<1x140x32xf32> to vector<140x32xf32>
    %cst_92 = arith.constant dense<0.000000e+00> : vector<16x32xf32>
    %142 = tpu.matmul %132, %141, %cst_92 {dimension_numbers = #tpu.dot_dimension_numbers<[1], [0], [0], [1], [0, 0, 1, 1], [], []>} : vector<16x140xf32>, vector<140x32xf32>, vector<16x32xf32> -> vector<16x32xf32>
    %143 = arith.maximumf %139, %142 : vector<16x32xf32>
    %c3_93 = arith.constant 3 : index
    %c0_94 = arith.constant 0 : index
    %c0_95 = arith.constant 0 : index
    %144 = vector.load %arg4[%c3_93, %c0_94, %c0_95] : memref<4x140x32xf32, #tpu.memory_space<vmem>>, vector<1x140x32xf32>
    %145 = vector.shape_cast %144 : vector<1x140x32xf32> to vector<140x32xf32>
    %cst_96 = arith.constant dense<0.000000e+00> : vector<16x32xf32>
    %146 = tpu.matmul %132, %145, %cst_96 {dimension_numbers = #tpu.dot_dimension_numbers<[1], [0], [0], [1], [0, 0, 1, 1], [], []>} : vector<16x140xf32>, vector<140x32xf32>, vector<16x32xf32> -> vector<16x32xf32>
    %147 = arith.maximumf %143, %146 : vector<16x32xf32>
    %c0_97 = arith.constant 0 : index
    %c0_98 = arith.constant 0 : index
    %c0_99 = arith.constant 0 : index
    %148 = vector.load %arg5[%c0_97, %c0_98, %c0_99] : memref<1x16x32xf32, #tpu.memory_space<vmem>>, vector<1x16x32xf32>
    %149 = vector.shape_cast %148 : vector<1x16x32xf32> to vector<16x32xf32>
    %150 = vector.shape_cast %147 : vector<16x32xf32> to vector<1x16x32xf32>
    tpu.vector_store %arg5[%c0_97, %c0_98, %c0_99], %150 {strides = array<i32>} : memref<1x16x32xf32, #tpu.memory_space<vmem>>, vector<1x16x32xf32>,
    return
  }
  func.func @transform_0(%arg0: i32) -> (i32, i32, i32) {
    %c0_i32 = arith.constant 0 : i32
    %c0_i32_0 = arith.constant 0 : i32
    %c0_i32_1 = arith.constant 0 : i32
    return %arg0, %c0_i32, %c0_i32_0 : i32, i32, i32
  }
  func.func @transform_1(%arg0: i32) -> (i32, i32, i32) {
    %c0_i32 = arith.constant 0 : i32
    %c0_i32_0 = arith.constant 0 : i32
    %c0_i32_1 = arith.constant 0 : i32
    %c0_i32_2 = arith.constant 0 : i32
    return %c0_i32, %c0_i32_0, %c0_i32_1 : i32, i32, i32
  }
  func.func @transform_2(%arg0: i32) -> (i32, i32) {
    %c0_i32 = arith.constant 0 : i32
    %c0_i32_0 = arith.constant 0 : i32
    %c0_i32_1 = arith.constant 0 : i32
    return %c0_i32, %c0_i32_0 : i32, i32
  }
  func.func @transform_3(%arg0: i32) -> (i32, i32, i32) {
    %c0_i32 = arith.constant 0 : i32
    %c0_i32_0 = arith.constant 0 : i32
    %c0_i32_1 = arith.constant 0 : i32
    %c0_i32_2 = arith.constant 0 : i32
    return %c0_i32, %c0_i32_0, %c0_i32_1 : i32, i32, i32
  }
  func.func @transform_4(%arg0: i32) -> (i32, i32, i32) {
    %c0_i32 = arith.constant 0 : i32
    %c0_i32_0 = arith.constant 0 : i32
    %c0_i32_1 = arith.constant 0 : i32
    return %arg0, %c0_i32, %c0_i32_0 : i32, i32, i32
  }
}

module attributes {stable_mosaic.version = 11 : i64} {
  func.func @_fc_stack_kernel(%arg0: memref<2x512xf32, #tpu.memory_space<vmem>>, %arg1: memref<512x128xf32, #tpu.memory_space<vmem>>, %arg2: memref<1x128xf32, #tpu.memory_space<vmem>>, %arg3: memref<128x128xf32, #tpu.memory_space<vmem>>, %arg4: memref<1x128xf32, #tpu.memory_space<vmem>>, %arg5: memref<128x10xf32, #tpu.memory_space<vmem>>, %arg6: memref<1x10xf32, #tpu.memory_space<vmem>>, %arg7: memref<2x10xf32, #tpu.memory_space<vmem>>) attributes {dimension_semantics = [], scalar_prefetch = 0 : i64, scratch_operands = 0 : i64, tpu.core_type = #tpu.core_type<tc>} {
    %c0 = arith.constant 0 : index
    %c0_0 = arith.constant 0 : index
    %0 = vector.load %arg0[%c0, %c0_0] : memref<2x512xf32, #tpu.memory_space<vmem>>, vector<2x512xf32>
    %c0_1 = arith.constant 0 : index
    %c0_2 = arith.constant 0 : index
    %1 = vector.load %arg1[%c0_1, %c0_2] : memref<512x128xf32, #tpu.memory_space<vmem>>, vector<512x128xf32>
    %cst = arith.constant dense<0.000000e+00> : vector<2x128xf32>
    %2 = tpu.matmul %0, %1, %cst {dimension_numbers = #tpu.dot_dimension_numbers<[1], [0], [0], [1], [0, 0, 1, 1], [], []>} : vector<2x512xf32>, vector<512x128xf32>, vector<2x128xf32> -> vector<2x128xf32>
    %c0_3 = arith.constant 0 : index
    %c0_4 = arith.constant 0 : index
    %3 = vector.load %arg2[%c0_3, %c0_4] : memref<1x128xf32, #tpu.memory_space<vmem>>, vector<1x128xf32>
    %4 = vector.broadcast %3 : vector<1x128xf32> to vector<2x128xf32>
    %5 = arith.addf %2, %4 : vector<2x128xf32>
    %cst_5 = arith.constant 0.000000e+00 : f32
    %6 = vector.broadcast %cst_5 : f32 to vector<2x128xf32>
    %7 = arith.maximumf %5, %6 : vector<2x128xf32>
    %c0_6 = arith.constant 0 : index
    %c0_7 = arith.constant 0 : index
    %8 = vector.load %arg3[%c0_6, %c0_7] : memref<128x128xf32, #tpu.memory_space<vmem>>, vector<128x128xf32>
    %cst_8 = arith.constant dense<0.000000e+00> : vector<2x128xf32>
    %9 = tpu.matmul %7, %8, %cst_8 {dimension_numbers = #tpu.dot_dimension_numbers<[1], [0], [0], [1], [0, 0, 1, 1], [], []>} : vector<2x128xf32>, vector<128x128xf32>, vector<2x128xf32> -> vector<2x128xf32>
    %c0_9 = arith.constant 0 : index
    %c0_10 = arith.constant 0 : index
    %10 = vector.load %arg4[%c0_9, %c0_10] : memref<1x128xf32, #tpu.memory_space<vmem>>, vector<1x128xf32>
    %11 = vector.broadcast %10 : vector<1x128xf32> to vector<2x128xf32>
    %12 = arith.addf %9, %11 : vector<2x128xf32>
    %cst_11 = arith.constant 0.000000e+00 : f32
    %13 = vector.broadcast %cst_11 : f32 to vector<2x128xf32>
    %14 = arith.maximumf %12, %13 : vector<2x128xf32>
    %c0_12 = arith.constant 0 : index
    %c0_13 = arith.constant 0 : index
    %15 = vector.load %arg5[%c0_12, %c0_13] : memref<128x10xf32, #tpu.memory_space<vmem>>, vector<128x10xf32>
    %cst_14 = arith.constant dense<0.000000e+00> : vector<2x10xf32>
    %16 = tpu.matmul %14, %15, %cst_14 {dimension_numbers = #tpu.dot_dimension_numbers<[1], [0], [0], [1], [0, 0, 1, 1], [], []>} : vector<2x128xf32>, vector<128x10xf32>, vector<2x10xf32> -> vector<2x10xf32>
    %c0_15 = arith.constant 0 : index
    %c0_16 = arith.constant 0 : index
    %17 = vector.load %arg6[%c0_15, %c0_16] : memref<1x10xf32, #tpu.memory_space<vmem>>, vector<1x10xf32>
    %18 = vector.broadcast %17 : vector<1x10xf32> to vector<2x10xf32>
    %19 = arith.addf %16, %18 : vector<2x10xf32>
    %cst_17 = arith.constant dense<0xFF800000> : vector<2xf32>
    %20 = vector.multi_reduction <maximumf>, %19, %cst_17 [1] : vector<2x10xf32> to vector<2xf32>
    %21 = vector.shape_cast %20 : vector<2xf32> to vector<2x1xf32>
    %22 = vector.broadcast %21 : vector<2x1xf32> to vector<2x10xf32>
    %23 = arith.subf %19, %22 : vector<2x10xf32>
    %24 = math.exp %23 : vector<2x10xf32>
    %cst_18 = arith.constant dense<0.000000e+00> : vector<2xf32>
    %25 = vector.multi_reduction <add>, %24, %cst_18 [1] : vector<2x10xf32> to vector<2xf32>
    %26 = vector.shape_cast %25 : vector<2xf32> to vector<2x1xf32>
    %27 = math.log %26 : vector<2x1xf32>
    %28 = vector.broadcast %27 : vector<2x1xf32> to vector<2x10xf32>
    %29 = arith.subf %23, %28 : vector<2x10xf32>
    %c0_19 = arith.constant 0 : index
    %c0_20 = arith.constant 0 : index
    %30 = vector.load %arg7[%c0_19, %c0_20] : memref<2x10xf32, #tpu.memory_space<vmem>>, vector<2x10xf32>
    tpu.vector_store %arg7[%c0_19, %c0_20], %29 {strides = array<i32>} : memref<2x10xf32, #tpu.memory_space<vmem>>, vector<2x10xf32>,
    return
  }
}

</mosaic_0001>

<bundles_post_ra>
// kernel: lenet_forward.5
= control target key start
LH: loop header
LB: loop body
LE: loop exit
PB: predicated region body
PF: predicated region fallthrough
CT: control target
= control target key end

     0   :  { %v800_v47 = vmov 1983009808   ;;  %v104_v49 = vlaneseq  ;;  %s1176_s0 = inlined_call_operand.vmem [shape: f32[2,512], index: 0, kind: input, shape index: {}]   ;;  %s1177_s1 = inlined_call_operand.vmem [shape: f32[512,128], index: 1, kind: input, shape index: {}]   ;;  %s1178_s2 = inlined_call_operand.vmem [shape: f32[1,128], index: 2, kind: input, shape index: {}]   ;;  %s1179_s3 = inlined_call_operand.vmem [shape: f32[128,128], index: 3, kind: input, shape index: {}]   ;;  %s1180_s4 = inlined_call_operand.vmem [shape: f32[1,128], index: 4, kind: input, shape index: {}]   ;;  %s1181_s5 = inlined_call_operand.vmem [shape: f32[128,10], index: 5, kind: input, shape index: {}]   ;;  %s1182_s6 = inlined_call_operand.vmem [shape: f32[1,10], index: 6, kind: input, shape index: {}]   ;;  %s1183_s7 = inlined_call_operand.hbm [shape: f32[2,10], index: 7, kind: output, shape index: {}]  }
   0x1   :  { %v44_v0 = vld [vmem:[%s1177_s1 + $0x80] sm:$0xff]  ;;  %v45_v1 = vld [vmem:[%s1177_s1 + $0x88] sm:$0xff]  ;;  %v46_v11 = vld [vmem:[%s1177_s1 + $0x90] sm:$0xff]  ;;  %v102_v48 = vunpack.c.l.s4 %v800_v47 }
   0x2   :  { %v28_v2 = vld [vmem:[%s1177_s1] sm:$0xff]  ;;  %v654_v3 = vpack.c.bf16 %v45_v1, %v44_v0  ;;  %v29_v4 = vld [vmem:[%s1177_s1 + $0x8] sm:$0xff]  ;;  %v47_v13 = vld [vmem:[%s1177_s1 + $0x98] sm:$0xff]  ;;  %v105_v0 = vshrl.u32 %v104_v49, 7 }
   0x3   :  { %v76_v5 = vld [vmem:[%s1177_s1 + $0x180] sm:$0xff]  ;;  %v77_v6 = vld [vmem:[%s1177_s1 + $0x188] sm:$0xff]  ;;  %v656_v7 = vpack.c.bf16 %v29_v4, %v28_v2  ;;  %v30_v14 = vld [vmem:[%s1177_s1 + $0x10] sm:$0xff]  ;;  %v658_v16 = vpack.c.bf16 %v47_v13, %v46_v11  ;;  %v103_v63 = vunpack.c.0.s8 %v102_v48 }
   0x4   :  { %v686_v8 = vpack.c.bf16 %v77_v6, %v76_v5  ;;  %v60_v9 = vld [vmem:[%s1177_s1 + $0x100] sm:$0xff]  ;;  %v61_v10 = vld [vmem:[%s1177_s1 + $0x108] sm:$0xff]  ;;  %655 = vmatprep.subr.bf16.mxu0 %v654_v3  ;;  %v31_v15 = vld [vmem:[%s1177_s1 + $0x18] sm:$0xff] }
   0x5   :  { %v688_v12 = vpack.c.bf16 %v61_v10, %v60_v9  ;;  %657 = vmatpush3.bf16.msra.mxu0 %v656_v7  ;;  %v660_v17 = vpack.c.bf16 %v31_v15, %v30_v14  ;;  %v78_v18 = vld [vmem:[%s1177_s1 + $0x190] sm:$0xff]  ;;  %v79_v19 = vld [vmem:[%s1177_s1 + $0x198] sm:$0xff]  ;;  %v48_v23 = vld [vmem:[%s1177_s1 + $0xa0] sm:$0xff]  ;;  %v106_v13 = vsub.s32 %v103_v63, %v105_v0 }
   0x6   :  { %687 = vmatprep.subr.bf16.mxu1 %v686_v8  ;;  %v62_v20 = vld [vmem:[%s1177_s1 + $0x110] sm:$0xff]  ;;  %v690_v21 = vpack.c.bf16 %v79_v19, %v78_v18  ;;  %v63_v22 = vld [vmem:[%s1177_s1 + $0x118] sm:$0xff]  ;;  %v49_v24 = vld [vmem:[%s1177_s1 + $0xa8] sm:$0xff]  ;;  %659 = vmatprep.subr.bf16.mxu0 %v658_v16 }
   0x7   :  { %689 = vmatpush3.bf16.msra.mxu1 %v688_v12  ;;  %v692_v25 = vpack.c.bf16 %v63_v22, %v62_v20  ;;  %v662_v26 = vpack.c.bf16 %v49_v24, %v48_v23  ;;  %v32_v27 = vld [vmem:[%s1177_s1 + $0x20] sm:$0xff]  ;;  %v33_v28 = vld [vmem:[%s1177_s1 + $0x28] sm:$0xff]  ;;  %v50_v35 = vld [vmem:[%s1177_s1 + $0xb0] sm:$0xff] }
   0x8   :  { %v80_v29 = vld [vmem:[%s1177_s1 + $0x1a0] sm:$0xff]  ;;  %691 = vmatprep.subr.bf16.mxu1 %v690_v21  ;;  %v81_v30 = vld [vmem:[%s1177_s1 + $0x1a8] sm:$0xff]  ;;  %v664_v33 = vpack.c.bf16 %v33_v28, %v32_v27  ;;  %v51_v36 = vld [vmem:[%s1177_s1 + $0xb8] sm:$0xff] }
   0x9   :  { %v64_v31 = vld [vmem:[%s1177_s1 + $0x120] sm:$0xff]  ;;  %v65_v32 = vld [vmem:[%s1177_s1 + $0x128] sm:$0xff]  ;;  %661 = vmatpush3.bf16.msra.mxu0 %v660_v17  ;;  %v694_v34 = vpack.c.bf16 %v81_v30, %v80_v29  ;;  %v34_v37 = vld [vmem:[%s1177_s1 + $0x30] sm:$0xff]  ;;  %v666_v39 = vpack.c.bf16 %v51_v36, %v50_v35 }
   0xa   :  { %663 = vmatprep.subr.bf16.mxu0 %v662_v26  ;;  %v696_v38 = vpack.c.bf16 %v65_v32, %v64_v31  ;;  %v35_v40 = vld [vmem:[%s1177_s1 + $0x38] sm:$0xff]  ;;  %v82_v41 = vld [vmem:[%s1177_s1 + $0x1b0] sm:$0xff]  ;;  %v52_v46 = vld [vmem:[%s1177_s1 + $0xc0] sm:$0xff] }
   0xb   :  { %693 = vmatpush3.bf16.msra.mxu1 %v692_v25  ;;  %v83_v42 = vld [vmem:[%s1177_s1 + $0x1b8] sm:$0xff]  ;;  %v66_v44 = vld [vmem:[%s1177_s1 + $0x130] sm:$0xff]  ;;  %v53_v50 = vld [vmem:[%s1177_s1 + $0xc8] sm:$0xff]  ;;  %v668_v51 = vpack.c.bf16 %v35_v40, %v34_v37 }
   0xc   :  { %695 = vmatprep.subr.bf16.mxu1 %v694_v34  ;;  %v698_v43 = vpack.c.bf16 %v83_v42, %v82_v41  ;;  %v67_v45 = vld [vmem:[%s1177_s1 + $0x138] sm:$0xff]  ;;  %v84_v52 = vld [vmem:[%s1177_s1 + $0x1c0] sm:$0xff]  ;;  %v85_v53 = vld [vmem:[%s1177_s1 + $0x1c8] sm:$0xff]  ;;  %v670_v55 = vpack.c.bf16 %v53_v50, %v52_v46 }
   0xd   :  { %665 = vmatpush3.bf16.msra.mxu0 %v664_v33  ;;  %v700_v54 = vpack.c.bf16 %v67_v45, %v66_v44  ;;  %v36_v56 = vld [vmem:[%s1177_s1 + $0x40] sm:$0xff]  ;;  %v37_v57 = vld [vmem:[%s1177_s1 + $0x48] sm:$0xff]  ;;  %v702_v59 = vpack.c.bf16 %v85_v53, %v84_v52  ;;  %v54_v61 = vld [vmem:[%s1177_s1 + $0xd0] sm:$0xff] }
   0xe   :  { %667 = vmatprep.subr.bf16.mxu0 %v666_v39  ;;  %v68_v58 = vld [vmem:[%s1177_s1 + $0x140] sm:$0xff]  ;;  %v69_v60 = vld [vmem:[%s1177_s1 + $0x148] sm:$0xff]  ;;  %v55_v62 = vld [vmem:[%s1177_s1 + $0xd8] sm:$0xff]  ;;  %v672_v3 = vpack.c.bf16 %v37_v57, %v36_v56 }
   0xf   :  { %697 = vmatpush3.bf16.msra.mxu1 %v696_v38  ;;  %v86_v1 = vld [vmem:[%s1177_s1 + $0x1d0] sm:$0xff]  ;;  %v87_v2 = vld [vmem:[%s1177_s1 + $0x1d8] sm:$0xff]  ;;  %v704_v4 = vpack.c.bf16 %v69_v60, %v68_v58  ;;  %v674_v5 = vpack.c.bf16 %v55_v62, %v54_v61  ;;  %v56_v11 = vld [vmem:[%s1177_s1 + $0xe0] sm:$0xff] }
  0x10   :  { %699 = vmatprep.subr.bf16.mxu1 %v698_v43  ;;  %v38_v6 = vld [vmem:[%s1177_s1 + $0x50] sm:$0xff]  ;;  %v39_v7 = vld [vmem:[%s1177_s1 + $0x58] sm:$0xff]  ;;  %v706_v9 = vpack.c.bf16 %v87_v2, %v86_v1  ;;  %v57_v12 = vld [vmem:[%s1177_s1 + $0xe8] sm:$0xff] }
  0x11   :  { %669 = vmatpush3.bf16.msra.mxu0 %v668_v51  ;;  %v70_v8 = vld [vmem:[%s1177_s1 + $0x150] sm:$0xff]  ;;  %v71_v10 = vld [vmem:[%s1177_s1 + $0x158] sm:$0xff]  ;;  %v88_v14 = vld [vmem:[%s1177_s1 + $0x1e0] sm:$0xff]  ;;  %v676_v16 = vpack.c.bf16 %v39_v7, %v38_v6  ;;  %v678_v19 = vpack.c.bf16 %v57_v12, %v56_v11 }
  0x12   :  { %671 = vmatprep.subr.bf16.mxu0 %v670_v55  ;;  %v89_v15 = vld [vmem:[%s1177_s1 + $0x1e8] sm:$0xff]  ;;  %v40_v17 = vld [vmem:[%s1177_s1 + $0x60] sm:$0xff]  ;;  %v708_v18 = vpack.c.bf16 %v71_v10, %v70_v8  ;;  %v58_v25 = vld [vmem:[%s1177_s1 + $0xf0] sm:$0xff] }
  0x13   :  { %701 = vmatpush3.bf16.msra.mxu1 %v700_v54  ;;  %v41_v20 = vld [vmem:[%s1177_s1 + $0x68] sm:$0xff]  ;;  %v72_v21 = vld [vmem:[%s1177_s1 + $0x160] sm:$0xff]  ;;  %v710_v23 = vpack.c.bf16 %v89_v15, %v88_v14  ;;  %v59_v26 = vld [vmem:[%s1177_s1 + $0xf8] sm:$0xff] }
  0x14   :  { %703 = vmatprep.subr.bf16.mxu1 %v702_v59  ;;  %v27_v22 = vld [vmem:[%s1176_s0] sm:$0xff]  ;;  %v73_v24 = vld [vmem:[%s1177_s1 + $0x168] sm:$0xff]  ;;  %v90_v29 = vld [vmem:[%s1177_s1 + $0x1f0] sm:$0xff]  ;;  %v680_v31 = vpack.c.bf16 %v41_v20, %v40_v17  ;;  %v682_v35 = vpack.c.bf16 %v59_v26, %v58_v25 }
  0x15   :  { %673 = vmatpush3.bf16.msra.mxu0 %v672_v3  ;;  %v107_v27 = vrot.slane %v27_v22, %v106_v13  ;;  %v100_v28 = vcombine.high %v27_v22, %v27_v22  ;;  %v91_v30 = vld [vmem:[%s1177_s1 + $0x1f8] sm:$0xff]  ;;  %v712_v34 = vpack.c.bf16 %v73_v24, %v72_v21  ;;  %v42_v36 = vld [vmem:[%s1177_s1 + $0x70] sm:$0xff] }
  0x16   :  { %675 = vmatprep.subr.bf16.mxu0 %v674_v5  ;;  %v43_v37 = vld [vmem:[%s1177_s1 + $0x78] sm:$0xff] }
  0x17   :  { %705 = vmatpush3.bf16.msra.mxu1 %v704_v4  ;;  %v115_v32 = vcombine.high %v107_v27, %v107_v27  ;;  %v114_v33 = vrot.slane %v100_v28, %v106_v13 }
  0x18   :  { %707 = vmatprep.subr.bf16.mxu1 %v706_v9 }
  0x19   :  { %677 = vmatpush3.bf16.msra.mxu0 %v676_v16 }
  0x1a   :  { %679 = vmatprep.subr.bf16.mxu0 %v678_v19 }
  0x1b   :  { %709 = vmatpush3.bf16.msra.mxu1 %v708_v18 }
  0x1c   :  { %12 = vsyncpa [#allocation3], 0  ;;  %711 = vmatprep.subr.bf16.mxu1 %v710_v23  ;;  %v714_v38 = vpack.c.bf16 %v91_v30, %v90_v29  ;;  %v74_v39 = vld [vmem:[%s1177_s1 + $0x170] sm:$0xff]  ;;  %v75_v40 = vld [vmem:[%s1177_s1 + $0x178] sm:$0xff]  ;;  %185 = vmatprep.mubr.f32.mxu0 %v115_v32  ;;  %v116_v41 = vcombine.high %v114_v33, %v114_v33  ;;  %v684_v42 = vpack.c.bf16 %v43_v37, %v42_v36  ;;  %v801_v47 = vmov 0.0|0.0  }
  0x1d   :  { %681 = vmatpush3.bf16.msra.mxu0 %v680_v31  ;;  %v716_v43 = vpack.c.bf16 %v75_v40, %v74_v39  ;;  %v262_v44 = vld [vmem:[%s1179_s3] sm:$0xff]  ;;  %v263_v45 = vld [vmem:[%s1179_s3 + $0x8] sm:$0xff]  ;;  %v264_v48 = vld [vmem:[%s1179_s3 + $0x10] sm:$0xff]  ;;  %vm802_vm0 = vmmov 0   ;;  %v803_v5 = vmov 0.0   ;;  %vm449_vm1 = vcmask 74752  }
  0x1e   :  { %255 = vmatprep.mubr.f32.mxu1 %v116_v41  ;;  %683 = vmatprep.subr.bf16.mxu0 %v682_v35  ;;  %v719_v46 = vpack.c.bf16 %v263_v45, %v262_v44  ;;  %v265_v49 = vld [vmem:[%s1179_s3 + $0x18] sm:$0xff]  ;;  %v266_v51 = vld [vmem:[%s1179_s3 + $0x20] sm:$0xff]  ;;  %v267_v52 = vld [vmem:[%s1179_s3 + $0x28] sm:$0xff] }
  0x1f   :  { %713 = vmatpush3.bf16.msra.mxu1 %v712_v34  ;;  %v722_v50 = vpack.c.bf16 %v265_v49, %v264_v48  ;;  %v725_v53 = vpack.c.bf16 %v267_v52, %v266_v51  ;;  %v268_v54 = vld [vmem:[%s1179_s3 + $0x30] sm:$0xff]  ;;  %v269_v55 = vld [vmem:[%s1179_s3 + $0x38] sm:$0xff]  ;;  %v270_v57 = vld [vmem:[%s1179_s3 + $0x40] sm:$0xff] }
  0x20   :  { %715 = vmatprep.subr.bf16.mxu1 %v714_v38  ;;  %v728_v56 = vpack.c.bf16 %v269_v55, %v268_v54  ;;  %v271_v58 = vld [vmem:[%s1179_s3 + $0x48] sm:$0xff]  ;;  %v272_v60 = vld [vmem:[%s1179_s3 + $0x50] sm:$0xff]  ;;  %v273_v61 = vld [vmem:[%s1179_s3 + $0x58] sm:$0xff] }
  0x21   :  { %685 = vmatpush3.bf16.msra.mxu0 %v684_v42  ;;  %v731_v59 = vpack.c.bf16 %v271_v58, %v270_v57  ;;  %v734_v62 = vpack.c.bf16 %v273_v61, %v272_v60  ;;  %v274_v63 = vld [vmem:[%s1179_s3 + $0x60] sm:$0xff]  ;;  %v275_v0 = vld [vmem:[%s1179_s3 + $0x68] sm:$0xff]  ;;  %v276_v2 = vld [vmem:[%s1179_s3 + $0x70] sm:$0xff] }
  0x22   :  { %718 = vmatprep.subr.bf16.mxu0 %v801_v47  ;;  %v737_v1 = vpack.c.bf16 %v275_v0, %v274_v63  ;;  %v277_v3 = vld [vmem:[%s1179_s3 + $0x78] sm:$0xff]  ;;  %v356_v6 = vld [vmem:[%s1181_s5] sm:$0xff]  ;;  %v357_v7 = vld [vmem:[%s1181_s5 + $0x8] sm:$0xff] }
  0x23   :  { %717 = vmatpush3.bf16.msra.mxu1 %v716_v43  ;;  %v740_v4 = vpack.c.bf16 %v277_v3, %v276_v2  ;;  %v358_v8 = vld [vmem:[%s1181_s5 + $0x10] sm:$0xff]  ;;  %v743_v9 = vpack.c.bf16 %v357_v7, %v356_v6  ;;  %v359_v10 = vld [vmem:[%s1181_s5 + $0x18] sm:$0xff]  ;;  %v360_v12 = vld [vmem:[%s1181_s5 + $0x20] sm:$0xff] }
  0x24   :  { %742 = vmatprep.subr.bf16.mxu1 %v801_v47  ;;  %186 = vmatmul.mubr.f32.vlgmr.msra.gmra.mrb[0].mxu0 %v107_v27  ;;  %v746_v11 = vpack.c.bf16 %v359_v10, %v358_v8  ;;  %v361_v13 = vld [vmem:[%s1181_s5 + $0x28] sm:$0xff]  ;;  %v362_v15 = vld [vmem:[%s1181_s5 + $0x30] sm:$0xff]  ;;  %v363_v16 = vld [vmem:[%s1181_s5 + $0x38] sm:$0xff] }
  0x25   :  { %720 = vmatpush3.bf16.msra.mxu0 %v719_v46  ;;  %616 = vmatprep.mubr.msk.f32.mxu0 %vm802_vm0, %v803_v5  ;;  %v749_v14 = vpack.c.bf16 %v361_v13, %v360_v12  ;;  %v752_v17 = vpack.c.bf16 %v363_v16, %v362_v15  ;;  %v364_v18 = vld [vmem:[%s1181_s5 + $0x40] sm:$0xff]  ;;  %v365_v19 = vld [vmem:[%s1181_s5 + $0x48] sm:$0xff]  ;;  %v366_v21 = vld [vmem:[%s1181_s5 + $0x50] sm:$0xff] }
  0x26   :  { %256 = vmatmul.mubr.f32.vlgmr.msra.gmra.mrb[0].mxu1 %v114_v33  ;;  %721 = vmatprep.subr.bf16.mxu0 %v801_v47  ;;  %v755_v20 = vpack.c.bf16 %v365_v19, %v364_v18  ;;  %v367_v22 = vld [vmem:[%s1181_s5 + $0x58] sm:$0xff]  ;;  %v368_v24 = vld [vmem:[%s1181_s5 + $0x60] sm:$0xff]  ;;  %v369_v25 = vld [vmem:[%s1181_s5 + $0x68] sm:$0xff] }
  0x27   :  { %651 = vmatprep.mubr.msk.f32.mxu1 %vm802_vm0, %v803_v5  ;;  %744 = vmatpush3.bf16.msra.mxu1 %v743_v9  ;;  %v758_v23 = vpack.c.bf16 %v367_v22, %v366_v21  ;;  %v761_v26 = vpack.c.bf16 %v369_v25, %v368_v24  ;;  %v477_v28 = vld [vmem:[%s1178_s2] ss:$0 sm:$0xff]  ;;  %v370_v37 = vld [vmem:[%s1181_s5 + $0x70] sm:$0xff]  ;;  %v371_v38 = vld [vmem:[%s1181_s5 + $0x78] sm:$0xff] }
  0x28   :  { %745 = vmatprep.subr.bf16.mxu1 %v801_v47  ;;  %v764_v39 = vpack.c.bf16 %v371_v38, %v370_v37  ;;  %v478_v40 = vld [vmem:[%s1180_s4] ss:$0 sm:$0xff]  ;;  %s804_s4 = smov [#allocation2]  }
  0x29   :  { %723 = vmatpush3.bf16.msra.mxu0 %v722_v50  ;;  %v479_v45 = vld [vmem:[%s1182_s6] ss:$0 sm:$0xff]  ;;  %s469_s5 = sshll.u32 %s804_s4, 4  ;;  %s470_s5 = int_to_ptr.vmem [resolvable:$true] %s469_s5 }
  0x2a   :  { %724 = vmatprep.subr.bf16.mxu0 %v801_v47  ;;  %s776_s6 = scalar_lea.vmem %s470_s5, 32  ;;  %p781_p1 = scmp.lt.s32.totalorder %s470_s5, %s470_s5 }
  0x2b   :  { %747 = vmatpush3.bf16.msra.mxu1 %v746_v11  ;;  %p777_p0 = scmp.ne.s32.totalorder %s470_s5, %s776_s6  ;;  %p782_p2 = scmp.lt.s32.totalorder %s776_s6, %s776_s6 }
  0x2c   :  { %748 = vmatprep.subr.bf16.mxu1 %v801_v47 }
  0x2d   :  { %726 = vmatpush3.bf16.msra.mxu0 %v725_v53  ;;  %p783_p3 = por %p782_p2, %p781_p1 }
  0x2e   :  { %727 = vmatprep.subr.bf16.mxu0 %v801_v47 }
  0x2f   :  { %750 = vmatpush3.bf16.msra.mxu1 %v749_v14  ;;  %p784_p4 = pnand %p783_p3, %p777_p0 }
  0x30   :  { %751 = vmatprep.subr.bf16.mxu1 %v801_v47 }
  0x31   :  { %729 = vmatpush3.bf16.msra.mxu0 %v728_v56 }
  0x32   :  { %730 = vmatprep.subr.bf16.mxu0 %v801_v47 }
  0x33   :  { %753 = vmatpush3.bf16.msra.mxu1 %v752_v17 }
  0x34   :  { %754 = vmatprep.subr.bf16.mxu1 %v801_v47 }
  0x35   :  { %732 = vmatpush3.bf16.msra.mxu0 %v731_v59 }
  0x36   :  { %733 = vmatprep.subr.bf16.mxu0 %v801_v47 }
  0x37   :  { %756 = vmatpush3.bf16.msra.mxu1 %v755_v20 }
  0x38   :  { %757 = vmatprep.subr.bf16.mxu1 %v801_v47 }
  0x39   :  { %735 = vmatpush3.bf16.msra.mxu0 %v734_v62 }
  0x3a   :  { %736 = vmatprep.subr.bf16.mxu0 %v801_v47 }
  0x3b   :  { %759 = vmatpush3.bf16.msra.mxu1 %v758_v23 }
  0x3c   :  { %760 = vmatprep.subr.bf16.mxu1 %v801_v47 }
  0x3d   :  { %738 = vmatpush3.bf16.msra.mxu0 %v737_v1 }
  0x3e   :  { %739 = vmatprep.subr.bf16.mxu0 %v801_v47 }
  0x3f   :  { %762 = vmatpush3.bf16.msra.mxu1 %v761_v26 }
  0x40   :  { %763 = vmatprep.subr.bf16.mxu1 %v801_v47 }
  0x41   :  { %741 = vmatpush3.bf16.msra.mxu0 %v740_v4 }
  0x43   :  { %765 = vmatpush3.bf16.msra.mxu1 %v764_v39 }
  0xf7   :  { %v512_v27 = vpop.f32.mrb[0].mxu0 }
  0xf8   :  { %v513_v29 = vpop.f32.mrb[1].mxu0 }
  0xf9   :  { %v547_v30 = vpop.f32.mrb[0].mxu1  ;;  %v514_v31 = vadd.f32 %v513_v29, %v512_v27 }
  0xfa   :  { %v548_v32 = vpop.f32.mrb[1].mxu1 }
  0xfb   :  { %v549_v33 = vadd.f32 %v548_v32, %v547_v30  ;;  %v188_v34 = vadd.f32 %v514_v31, %v477_v28 }
  0xfd   :  { %v258_v35 = vadd.f32 %v549_v33, %v188_v34 }
  0xff   :  { %v261_v36 = vmax.f32 %v258_v35, 0.0 }
 0x101   :  { %617 = vmatmul.mubr.f32.vlgmr.msra.gmra.mrb[2].mxu0 %v261_v36 }
 0x1d4   :  { %v351_v41 = vpop.f32.mrb[2].mxu0 }
 0x1d5   :  { %v352_v42 = vadd.f32 %v478_v40, %v351_v41  ;;  %v618_v43 = vpop.f32.mrb[3].mxu0 }
 0x1d7   :  { %v355_v44 = vmax.f32 %v352_v42, 0.0 }
 0x1d9   :  { %652 = vmatmul.mubr.f32.vlgmr.msra.gmra.mrb[2].mxu1 %v355_v44 }
 0x2ac   :  { %v445_v46 = vpop.f32.mrb[2].mxu1 }
 0x2ad   :  { %v446_v47 = vadd.f32 %v479_v45, %v445_v46  ;;  %v653_v48 = vpop.f32.mrb[3].mxu1 }
 0x2af   :  { %v450_v49 = vsel %vm449_vm1, %v446_v47, -inf }
 0x2b0   :  { %451 = vmax.xlane.f32.xlu0 %v450_v49 }
 0x33d   :  { %v452_v50 = vpop.xlane.xlu0 %451 }
 0x33e   :  { %v453_v51 = vsub.f32 %v446_v47, %v452_v50 }
 0x340   :  { %v454_v52 = vmul.f32 1.442695, %v453_v51 }
 0x342   :  { %772 = vpow2.f32 %v454_v52 }
 0x34c   :  { %v773_v53 = vpop.eup %772 }
 0x34d   :  { %v456_v54 = vsel %vm449_vm1, %v773_v53, 0.0 }
 0x34e   :  { %457 = vadd.xlane.f32.xlu0 %v456_v54 }
 0x3db   :  { %v458_v55 = vpop.xlane.xlu0 %457 }
 0x3dc   :  { %774 = vlog2.f32 %v458_v55 }
 0x3e6   :  { %v775_v56 = vpop.eup %774 }
 0x3e7   :  { %v460_v57 = vmul.f32 0.6931472, %v775_v56 }
 0x3e9   :  { %v461_v58 = vsub.f32 %v453_v51, %v460_v57 }
 0x3eb   :  { %462 = vst.msk [vmem:[#allocation2] sm:$0x3] %vm449_vm1, %v461_v58 }
 0x3ec   :  { %787 = shalt.err (!%p784_p4)
}
 0x3ed   :  { %s788_s9 = scalar_lea.hbm %s1183_s7, 32 }
 0x3ee   :  { %p789_p5 = scmp.ne.s32.totalorder %s1183_s7, %s788_s9  ;;  %p792_p6 = scmp.lt.u32.totalorder %s788_s9, %s1183_s7 }
 0x3f0   :  { %p794_p7 = pnand %p792_p6, %p789_p5 }
 0x3f2   :  { %797 = shalt.err (!%p794_p7)
}
 0x3f3   :  { %472 = dma.vmem_to_hbm [thread:$0]  %s470_s5, 32, %s1183_s7, [#allocation3]  }
 0x3f4   :  { %798 = dma.done.wait [#allocation3], 32  }
 0x3f5   :  { %799 = vsyncadd [#allocation3], 4294967264 }
 0x3f6   :  { %476 = vsyncpa [#allocation3], 1 }

// kernel: lenet_forward.4
= control target key start
LH: loop header
LB: loop body
LE: loop exit
PB: predicated region body
PF: predicated region fallthrough
CT: control target
= control target key end

     0   :  { %s3702_s15 = smov 0   ;;  %s4466_s0 = inlined_call_operand.vmem [shape: f32[2,6,256], index: 0, kind: input, shape index: {}]   ;;  %s4467_s1 = inlined_call_operand.vmem [shape: f32[25,16,6], index: 1, kind: input, shape index: {}]   ;;  %s4468_s2 = inlined_call_operand.vmem [shape: f32[16,1], index: 2, kind: input, shape index: {}]   ;;  %s4469_s3 = inlined_call_operand.vmem [shape: f32[4,140,32], index: 3, kind: input, shape index: {}]   ;;  %s4470_s4 = inlined_call_operand.vmem [shape: f32[2,16,32], index: 4, kind: output, shape index: {}]  }
   0x1 LB: > { %s3168_s16 = sadd.s32 4294967295, %s3647_s15   ;;  %p3172_p0 = scmp.ge.s32.totalorder %s3647_s15, 1  ;;  %s3647_s15 = sphi %s3702_s15, %s14_s15  }
   0x2   : > { %p162_p1 = scmp.lt.s32.totalorder %s3647_s15, 3 }
   0x4   : > { %p163_p2 = pnand %p3172_p0, %p162_p1 }
   0x5   : > { %p188_p3 = scmp.lt.s32.totalorder (!%p163_p2), %s3168_s16, 1  ;;  %v3649_v0 = vmov (!%p163_p2), 0.0   ;;  %s3650_s21 = smov (!%p163_p2), 124   ;;  %vm596_vm0 = vcmask (!%p163_p2), 1014784   ;;  %vm220_vm1 = vcmask (!%p163_p2), 1045504   ;;  %vm496_vm2 = vcmask (!%p163_p2), 1022976  }
   0x6   : > { %166 = sbr.rel (%p163_p2) target bundleno = 853 (0x355), region = 36  ;;  %572 = vmatprep.mubr.f32.mxu0 (!%p163_p2), %v3649_v0  ;;  %289 = vmatprep.mubr.f32.mxu1 (!%p163_p2), %v3649_v0  ;;  %s3651_s22 = smov (!%p163_p2), 125   ;;  %vm213_vm3 = vcmask (!%p163_p2), 48128   ;;  %v3193_v7 = vld [vmem:[%s4467_s1 + $0x30] sm:$0xff] (!%p163_p2)  ;;  %v3194_v10 = vld [vmem:[%s4467_s1 + $0x38] sm:$0xff] (!%p163_p2)  ;;  %vm696_vm4 = vcmask (!%p163_p2), 932864  }
   0x7   : > { %s3652_s23 = smov (!%p163_p2), 114   ;;  %s3653_s24 = smov (!%p163_p2), 113   ;;  %v3199_v13 = vld [vmem:[%s4467_s1 + $0x40] sm:$0xff] (!%p163_p2)  ;;  %v3200_v17 = vld [vmem:[%s4467_s1 + $0x48] sm:$0xff] (!%p163_p2)  ;;  %vm796_vm5 = vcmask (!%p163_p2), 924672   ;;  %v3205_v20 = vld [vmem:[%s4467_s1 + $0x50] sm:$0xff] (!%p163_p2) }
   0x8   : > { %s3654_s25 = smov (!%p163_p2), 112   ;;  %s3655_s26 = smov (!%p163_p2), 111   ;;  %v3206_v24 = vld [vmem:[%s4467_s1 + $0x58] sm:$0xff] (!%p163_p2)  ;;  %vm896_vm6 = vcmask (!%p163_p2), 916480   ;;  %v3211_v27 = vld [vmem:[%s4467_s1 + $0x60] sm:$0xff] (!%p163_p2)  ;;  %v3212_v31 = vld [vmem:[%s4467_s1 + $0x68] sm:$0xff] (!%p163_p2) }
   0x9   : > { %s3656_s27 = smov (!%p163_p2), 110   ;;  %s3657_s28 = smov (!%p163_p2), 100   ;;  %vm996_vm7 = vcmask (!%p163_p2), 908288   ;;  %v3217_v34 = vld [vmem:[%s4467_s1 + $0x70] sm:$0xff] (!%p163_p2)  ;;  %v3218_v38 = vld [vmem:[%s4467_s1 + $0x78] sm:$0xff] (!%p163_p2)  ;;  %vm1096_vm8 = vcmask (!%p163_p2), 900096  }
   0xa   : > { %s3658_s29 = smov (!%p163_p2), 99   ;;  %s3659_s30 = smov (!%p163_p2), 98   ;;  %v3223_v41 = vld [vmem:[%s4467_s1 + $0x80] sm:$0xff] (!%p163_p2)  ;;  %v3224_v45 = vld [vmem:[%s4467_s1 + $0x88] sm:$0xff] (!%p163_p2)  ;;  %vm1196_vm9 = vcmask (!%p163_p2), 818176   ;;  %v3229_v50 = vld [vmem:[%s4467_s1 + $0x90] sm:$0xff] (!%p163_p2) }
   0xb   : > { %s3660_s5 = smov (!%p163_p2), 97   ;;  %s3661_s6 = smov (!%p163_p2), 96   ;;  %v2689_v48 = vld [vmem:[%s4468_s2] sm:$0xff] (!%p163_p2)  ;;  %v2690_v49 = vld [vmem:[%s4468_s2 + $0x8] sm:$0xff] (!%p163_p2)  ;;  %v3674_v53 = vmov (!%p163_p2), 0   ;;  %v3230_v55 = vld [vmem:[%s4467_s1 + $0x98] sm:$0xff] (!%p163_p2) }
   0xc   : > { %s3662_s7 = smov (!%p163_p2), 86   ;;  %s3663_s8 = smov (!%p163_p2), 85   ;;  %3639 = vset.pattern.permute.xlu0 (!%p163_p2), %v3674_v53  ;;  %3640 = vset.pattern.permute.xlu1 (!%p163_p2), %v3674_v53  ;;  %vm1296_vm10 = vcmask (!%p163_p2), 809984   ;;  %v3235_v58 = vld [vmem:[%s4467_s1 + $0xa0] sm:$0xff] (!%p163_p2)  ;;  %v3236_v62 = vld [vmem:[%s4467_s1 + $0xa8] sm:$0xff] (!%p163_p2)  ;;  %vm1396_vm11 = vcmask (!%p163_p2), 801792  }
   0xd   : > { %s4474_s16 = smov (!%p188_p3, %s3168_s16), 1  ;;  %s3664_s9 = smov 84   ;;  %vm2196_vm12 = vcmask 588800   ;;  %vm2296_vm13 = vcmask 580608   ;;  %vm1496_vm14 = vcmask 793600   ;;  %vm211_vm15 = vcmask 1039360  }
   0xe   : > { %s3393_s17 = sshll.u32 %s4474_s16, 4  ;;  %s3665_s10 = smov 83   ;;  %v3277_v53 = vld [vmem:[%s4467_s1 + $0x110] sm:$0xff] }
   0xf   : > { %s192_s20 = scalar_lea.vmem %s4466_s0, %s3393_s17  ;;  %s3666_s11 = smov 82  }
  0x10   : > { %v3720_v1 = vld [vmem:[%s192_s20] sm:$0x3f]  ;;  %v3724_v2 = vld [vmem:[%s192_s20 + $0x8] sm:$0x3f]  ;;  %s3667_s12 = smov 72   ;;  %s3668_s13 = smov 71  }
  0x11   : > { %592 = vrot.lane.b32.xlu1 %v3720_v1, %s3650_s21  ;;  %492 = vrot.lane.b32.xlu0 %v3720_v1, %s3651_s22  ;;  %s3669_s14 = smov 127   ;;  %s3670_s18 = smov 70  }
  0x12   : > { %s3671_s19 = smov 69   ;;  %s3672_s20 = smov 126  }
  0x15   : > { %594 = vrot.lane.b32.xlu1 %v3724_v2, %s3650_s21  ;;  %494 = vrot.lane.b32.xlu0 %v3724_v2, %s3651_s22  ;;  %s3673_s21 = smov 68  }
  0x19   : > { %694 = vrot.lane.b32.xlu1 %v3724_v2, %s3652_s23  ;;  %692 = vrot.lane.b32.xlu0 %v3720_v1, %s3652_s23 }
  0x1d   : > { %794 = vrot.lane.b32.xlu1 %v3724_v2, %s3653_s24  ;;  %792 = vrot.lane.b32.xlu0 %v3720_v1, %s3653_s24 }
  0x21   : > { %894 = vrot.lane.b32.xlu1 %v3724_v2, %s3654_s25  ;;  %892 = vrot.lane.b32.xlu0 %v3720_v1, %s3654_s25 }
  0x25   : > { %994 = vrot.lane.b32.xlu1 %v3724_v2, %s3655_s26  ;;  %992 = vrot.lane.b32.xlu0 %v3720_v1, %s3655_s26 }
  0x29   : > { %1094 = vrot.lane.b32.xlu1 %v3724_v2, %s3656_s27  ;;  %1092 = vrot.lane.b32.xlu0 %v3720_v1, %s3656_s27 }
  0x2d   : > { %1194 = vrot.lane.b32.xlu1 %v3724_v2, %s3657_s28  ;;  %1192 = vrot.lane.b32.xlu0 %v3720_v1, %s3657_s28 }
  0x31   : > { %1294 = vrot.lane.b32.xlu1 %v3724_v2, %s3658_s29  ;;  %1292 = vrot.lane.b32.xlu0 %v3720_v1, %s3658_s29 }
  0x35   : > { %1394 = vrot.lane.b32.xlu1 %v3724_v2, %s3659_s30  ;;  %1392 = vrot.lane.b32.xlu0 %v3720_v1, %s3659_s30 }
  0x39   : > { %1494 = vrot.lane.b32.xlu1 %v3724_v2, %s3660_s5  ;;  %1492 = vrot.lane.b32.xlu0 %v3720_v1, %s3660_s5 }
  0x3d   : > { %1594 = vrot.lane.b32.xlu1 %v3724_v2, %s3661_s6  ;;  %1592 = vrot.lane.b32.xlu0 %v3720_v1, %s3661_s6 }
  0x41   : > { %1694 = vrot.lane.b32.xlu1 %v3724_v2, %s3662_s7  ;;  %1692 = vrot.lane.b32.xlu0 %v3720_v1, %s3662_s7 }
  0x45   : > { %1794 = vrot.lane.b32.xlu1 %v3724_v2, %s3663_s8  ;;  %1792 = vrot.lane.b32.xlu0 %v3720_v1, %s3663_s8 }
  0x49   : > { %1894 = vrot.lane.b32.xlu1 %v3724_v2, %s3664_s9  ;;  %1892 = vrot.lane.b32.xlu0 %v3720_v1, %s3664_s9 }
  0x4d   : > { %1994 = vrot.lane.b32.xlu1 %v3724_v2, %s3665_s10  ;;  %1992 = vrot.lane.b32.xlu0 %v3720_v1, %s3665_s10 }
  0x51   : > { %2094 = vrot.lane.b32.xlu1 %v3724_v2, %s3666_s11  ;;  %2092 = vrot.lane.b32.xlu0 %v3720_v1, %s3666_s11 }
  0x55   : > { %2194 = vrot.lane.b32.xlu1 %v3724_v2, %s3667_s12  ;;  %2192 = vrot.lane.b32.xlu0 %v3720_v1, %s3667_s12 }
  0x59   : > { %2294 = vrot.lane.b32.xlu1 %v3724_v2, %s3668_s13  ;;  %2292 = vrot.lane.b32.xlu0 %v3720_v1, %s3668_s13 }
  0x5d   : > { %209 = vrot.lane.b32.xlu1 %v3724_v2, %s3669_s14  ;;  %207 = vrot.lane.b32.xlu0 %v3720_v1, %s3669_s14 }
  0x61   : > { %2394 = vrot.lane.b32.xlu1 %v3724_v2, %s3670_s18  ;;  %2392 = vrot.lane.b32.xlu0 %v3720_v1, %s3670_s18 }
  0x65   : > { %2494 = vrot.lane.b32.xlu1 %v3724_v2, %s3671_s19  ;;  %2492 = vrot.lane.b32.xlu0 %v3720_v1, %s3671_s19  ;;  %s197_s19 = scalar_lea.vmem %s4470_s4, %s3393_s17 }
  0x69   : > { %394 = vrot.lane.b32.xlu1 %v3724_v2, %s3672_s20  ;;  %392 = vrot.lane.b32.xlu0 %v3720_v1, %s3672_s20 }
  0x6d   : > { %2594 = vrot.lane.b32.xlu1 %v3724_v2, %s3673_s21  ;;  %2592 = vrot.lane.b32.xlu0 %v3720_v1, %s3673_s21 }
  0x71   : > { %2693 = vperm.xlu0 %3639, %v2689_v48   ;;  %2698 = vperm.xlu1 %3640, %v2690_v49   ;;  %v3266_v49 = vld [vmem:[%s4467_s1 + $0xf8] sm:$0xff] }
  0x83   : > { %v593_v3 = vpop.permute.xlu1 %592  ;;  %v493_v4 = vpop.permute.xlu0 %492 }
  0x87   : > { %v595_v5 = vpop.permute.xlu1 %594  ;;  %v495_v6 = vpop.permute.xlu0 %494 }
  0x88   : > { %v597_v8 = vsel %vm596_vm0, %v593_v3, %v595_v5  ;;  %3195 = vmatprep.subr.msk.mxu0 %vm220_vm1, %v495_v6  ;;  %v497_v9 = vsel %vm496_vm2, %v493_v4, %v495_v6  ;;  %v3241_v4 = vld [vmem:[%s4467_s1 + $0xb0] sm:$0xff]  ;;  %vm2396_vm0 = vcmask 572416   ;;  %vm1596_vm2 = vcmask 785408  }
  0x89   : > { %3196 = vmatpush1.msk.msra.mxu0 %vm220_vm1, %v497_v9  ;;  %v3242_v9 = vld [vmem:[%s4467_s1 + $0xb8] sm:$0xff] }
  0x8a   : > { %3197 = vmatmul.mubr.msk.f32.vlgmr.msra.gmra.mrb[0].mxu0 %vm213_vm3, %v3193_v7  ;;  %3201 = vmatprep.subr.msk.mxu0 %vm220_vm1, %v595_v5 }
  0x8b   : > { %3202 = vmatpush1.msk.msra.mxu0 %vm220_vm1, %v597_v8  ;;  %578 = vmatprep.mubr.f32.mxu0 %v3649_v0  ;;  %v695_v11 = vpop.permute.xlu1 %694  ;;  %v693_v12 = vpop.permute.xlu0 %692 }
  0x8c   : > { %3207 = vmatprep.subr.msk.mxu0 %vm220_vm1, %v695_v11  ;;  %v697_v16 = vsel %vm696_vm4, %v693_v12, %v695_v11  ;;  %vm396_vm4 = vcmask 1031168  }
  0x8e   : > { %3198 = vmatmul.mubr.msk.f32.gmra.mrb[2].mxu0 %vm213_vm3, %v3194_v10 }
  0x8f   : > { %672 = vmatprep.mubr.f32.mxu0 %v3649_v0  ;;  %v795_v14 = vpop.permute.xlu1 %794  ;;  %v793_v15 = vpop.permute.xlu0 %792 }
  0x90   : > { %v797_v23 = vsel %vm796_vm5, %v793_v15, %v795_v14  ;;  %vm1696_vm5 = vcmask 703488  }
  0x92   : > { %3203 = vmatmul.mubr.msk.f32.vlgmr.msra.gmra.mrb[0].mxu0 %vm213_vm3, %v3199_v13  ;;  %v3247_v13 = vld [vmem:[%s4467_s1 + $0xc0] sm:$0xff] }
  0x93   : > { %3208 = vmatpush1.msk.msra.mxu0 %vm220_vm1, %v697_v16  ;;  %678 = vmatprep.mubr.f32.mxu0 %v3649_v0  ;;  %v895_v18 = vpop.permute.xlu1 %894  ;;  %v893_v19 = vpop.permute.xlu0 %892  ;;  %v3177_v16 = vld [vmem:[%s4467_s1 + $0x10] sm:$0xff] }
  0x94   : > { %3213 = vmatprep.subr.msk.mxu0 %vm220_vm1, %v795_v14  ;;  %v897_v30 = vsel %vm896_vm6, %v893_v19, %v895_v18  ;;  %v3248_v19 = vld [vmem:[%s4467_s1 + $0xc8] sm:$0xff]  ;;  %vm1796_vm6 = vcmask 695296  }
  0x96   : > { %3204 = vmatmul.mubr.msk.f32.gmra.mrb[2].mxu0 %vm213_vm3, %v3200_v17 }
  0x97   : > { %772 = vmatprep.mubr.f32.mxu0 %v3649_v0  ;;  %v995_v21 = vpop.permute.xlu1 %994  ;;  %v993_v22 = vpop.permute.xlu0 %992 }
  0x98   : > { %v997_v37 = vsel %vm996_vm7, %v993_v22, %v995_v21  ;;  %vm1896_vm7 = vcmask 687104  }
  0x9a   : > { %3209 = vmatmul.mubr.msk.f32.vlgmr.msra.gmra.mrb[0].mxu0 %vm213_vm3, %v3205_v20  ;;  %v3178_v20 = vld [vmem:[%s4467_s1 + $0x18] sm:$0xff] }
  0x9b   : > { %3214 = vmatpush1.msk.msra.mxu0 %vm220_vm1, %v797_v23  ;;  %778 = vmatprep.mubr.f32.mxu0 %v3649_v0  ;;  %v1095_v25 = vpop.permute.xlu1 %1094  ;;  %v1093_v26 = vpop.permute.xlu0 %1092 }
  0x9c   : > { %3219 = vmatprep.subr.msk.mxu0 %vm220_vm1, %v895_v18  ;;  %v1097_v44 = vsel %vm1096_vm8, %v1093_v26, %v1095_v25  ;;  %vm1996_vm8 = vcmask 678912  }
  0x9e   : > { %3210 = vmatmul.mubr.msk.f32.gmra.mrb[2].mxu0 %vm213_vm3, %v3206_v24  ;;  %v3253_v24 = vld [vmem:[%s4467_s1 + $0xd0] sm:$0xff] }
  0x9f   : > { %872 = vmatprep.mubr.f32.mxu0 %v3649_v0  ;;  %v1195_v28 = vpop.permute.xlu1 %1194  ;;  %v1193_v29 = vpop.permute.xlu0 %1192 }
  0xa0   : > { %v1197_v54 = vsel %vm1196_vm9, %v1193_v29, %v1195_v28  ;;  %vm2096_vm9 = vcmask 670720  }
  0xa2   : > { %3215 = vmatmul.mubr.msk.f32.vlgmr.msra.gmra.mrb[0].mxu0 %vm213_vm3, %v3211_v27 }
  0xa3   : > { %3220 = vmatpush1.msk.msra.mxu0 %vm220_vm1, %v897_v30  ;;  %878 = vmatprep.mubr.f32.mxu0 %v3649_v0  ;;  %v1295_v32 = vpop.permute.xlu1 %1294  ;;  %v1293_v33 = vpop.permute.xlu0 %1292 }
  0xa4   : > { %3225 = vmatprep.subr.msk.mxu0 %vm220_vm1, %v995_v21  ;;  %v1297_v61 = vsel %vm1296_vm10, %v1293_v33, %v1295_v32  ;;  %v2710_v33 = vld [vmem:[%s4469_s3 + $0x8] sm:$0xff]  ;;  %vm2496_vm10 = vcmask 564224  }
  0xa6   : > { %3216 = vmatmul.mubr.msk.f32.gmra.mrb[2].mxu0 %vm213_vm3, %v3212_v31 }
  0xa7   : > { %972 = vmatprep.mubr.f32.mxu0 %v3649_v0  ;;  %v3826_v35 = vpop.permute.xlu1 %1394  ;;  %v3828_v36 = vpop.permute.xlu0 %1392 }
  0xa8   : > { %v1397_v7 = vsel %vm1396_vm11, %v3828_v36, %v3826_v35  ;;  %vm2596_vm11 = vcmask 556032  }
  0xaa   : > { %3221 = vmatmul.mubr.msk.f32.vlgmr.msra.gmra.mrb[0].mxu0 %vm213_vm3, %v3217_v34  ;;  %v3259_v34 = vld [vmem:[%s4467_s1 + $0xe0] sm:$0xff] }
  0xab   : > { %3226 = vmatpush1.msk.msra.mxu0 %vm220_vm1, %v997_v37  ;;  %978 = vmatprep.mubr.f32.mxu0 %v3649_v0  ;;  %v3836_v39 = vpop.permute.xlu1 %1494  ;;  %v3838_v40 = vpop.permute.xlu0 %1492  ;;  %v3675_v37 = vmov 0.0|0.0  }
  0xac   : > { %3231 = vmatprep.subr.msk.mxu0 %vm220_vm1, %v1095_v25  ;;  %v1497_v17 = vsel %vm1496_vm14, %v3838_v40, %v3836_v39  ;;  %v200_v25 = vld [vmem:[%s4467_s1] sm:$0xff]  ;;  %v2712_v40 = vld [vmem:[%s4469_s3 + $0x18] sm:$0xff]  ;;  %vm3110_vm14 = vcmask 261120  }
  0xae   : > { %3222 = vmatmul.mubr.msk.f32.gmra.mrb[2].mxu0 %vm213_vm3, %v3218_v38 }
  0xaf   : > { %1072 = vmatprep.mubr.f32.mxu0 %v3649_v0  ;;  %v3846_v42 = vpop.permute.xlu1 %1594  ;;  %v3848_v43 = vpop.permute.xlu0 %1592 }
  0xb0   : > { %v1597_v27 = vsel %vm1596_vm2, %v3848_v43, %v3846_v42 }
  0xb2   : > { %3227 = vmatmul.mubr.msk.f32.vlgmr.msra.gmra.mrb[0].mxu0 %vm213_vm3, %v3223_v41  ;;  %v3260_v41 = vld [vmem:[%s4467_s1 + $0xe8] sm:$0xff] }
  0xb3   : > { %3232 = vmatpush1.msk.msra.mxu0 %vm220_vm1, %v1097_v44  ;;  %1078 = vmatprep.mubr.f32.mxu0 %v3649_v0  ;;  %v3856_v46 = vpop.permute.xlu1 %1694  ;;  %v3858_v47 = vpop.permute.xlu0 %1692  ;;  %v2713_v44 = vld [vmem:[%s4469_s3 + $0x20] sm:$0xff] }
  0xb4   : > { %3237 = vmatprep.subr.msk.mxu0 %vm220_vm1, %v1195_v28  ;;  %v201_v28 = vld [vmem:[%s4467_s1 + $0x8] sm:$0xff]  ;;  %v1697_v36 = vsel %vm1696_vm5, %v3858_v47, %v3856_v46 }
  0xb6   : > { %3228 = vmatmul.mubr.msk.f32.gmra.mrb[2].mxu0 %vm213_vm3, %v3224_v45  ;;  %v2714_v45 = vld [vmem:[%s4469_s3 + $0x28] sm:$0xff] }
  0xb7   : > { %1172 = vmatprep.mubr.f32.mxu0 %v3649_v0  ;;  %v3872_v51 = vpop.permute.xlu1 %1794  ;;  %v3874_v52 = vpop.permute.xlu0 %1792  ;;  %v3402_v48 = vpack.c.bf16 %v2714_v45, %v2713_v44 }
  0xb8   : > { %v1797_v47 = vsel %vm1796_vm6, %v3874_v52, %v3872_v51  ;;  %v3272_v52 = vld [vmem:[%s4467_s1 + $0x108] sm:$0xff] }
  0xba   : > { %3233 = vmatmul.mubr.msk.f32.vlgmr.msra.gmra.mrb[0].mxu0 %vm213_vm3, %v3229_v50  ;;  %v3271_v50 = vld [vmem:[%s4467_s1 + $0x100] sm:$0xff] }
  0xbb   : > { %3238 = vmatpush1.msk.msra.mxu0 %vm220_vm1, %v1197_v54  ;;  %1178 = vmatprep.mubr.f32.mxu0 %v3649_v0  ;;  %v3882_v56 = vpop.permute.xlu1 %1894  ;;  %v3884_v57 = vpop.permute.xlu0 %1892 }
  0xbc   : > { %3243 = vmatprep.subr.msk.mxu0 %vm220_vm1, %v1295_v32  ;;  %v2709_v32 = vld [vmem:[%s4469_s3] sm:$0xff] }
  0xbd   : > { %v3396_v38 = vpack.c.bf16 %v2710_v33, %v2709_v32 }
  0xbe   : > { %3234 = vmatmul.mubr.msk.f32.gmra.mrb[2].mxu0 %vm213_vm3, %v3230_v55  ;;  %v3278_v55 = vld [vmem:[%s4467_s1 + $0x118] sm:$0xff] }
  0xbf   : > { %1272 = vmatprep.mubr.f32.mxu0 %v3649_v0  ;;  %v3892_v59 = vpop.permute.xlu1 %1994  ;;  %v3894_v60 = vpop.permute.xlu0 %1992 }
  0xc0   : > { %v1997_v54 = vsel %vm1996_vm8, %v3894_v60, %v3892_v59  ;;  %v3290_v60 = vld [vmem:[%s4467_s1 + $0x138] sm:$0xff] }
  0xc2   : > { %3239 = vmatmul.mubr.msk.f32.vlgmr.msra.gmra.mrb[0].mxu0 %vm213_vm3, %v3235_v58  ;;  %v3284_v58 = vld [vmem:[%s4467_s1 + $0x128] sm:$0xff] }
  0xc3   : > { %3244 = vmatpush1.msk.msra.mxu0 %vm220_vm1, %v1297_v61  ;;  %1278 = vmatprep.mubr.f32.mxu0 %v3649_v0  ;;  %v3902_v63 = vpop.permute.xlu1 %2094  ;;  %v3904_v3 = vpop.permute.xlu0 %2092  ;;  %v3295_v61 = vld [vmem:[%s4467_s1 + $0x140] sm:$0xff] }
  0xc4   : > { %3249 = vmatprep.subr.msk.mxu0 %vm220_vm1, %v3826_v35  ;;  %v3187_v35 = vld [vmem:[%s4467_s1 + $0x20] sm:$0xff] }
  0xc6   : > { %3240 = vmatmul.mubr.msk.f32.gmra.mrb[2].mxu0 %vm213_vm3, %v3236_v62  ;;  %v3296_v62 = vld [vmem:[%s4467_s1 + $0x148] sm:$0xff] }
  0xc7   : > { %1372 = vmatprep.mubr.f32.mxu0 %v3649_v0  ;;  %v3913_v5 = vpop.permute.xlu1 %2194  ;;  %v2193_v6 = vpop.permute.xlu0 %2192 }
  0xc8   : > { %v3918_v8 = vsel %vm2196_vm12, %v2193_v6, %v3913_v5 }
  0xca   : > { %3245 = vmatmul.mubr.msk.f32.vlgmr.msra.gmra.mrb[0].mxu0 %vm213_vm3, %v3241_v4  ;;  %v3307_v4 = vld [vmem:[%s4467_s1 + $0x160] sm:$0xff] }
  0xcb   : > { %3250 = vmatpush1.msk.msra.mxu0 %vm220_vm1, %v1397_v7  ;;  %1378 = vmatprep.mubr.f32.mxu0 %v3649_v0  ;;  %v3926_v10 = vpop.permute.xlu1 %2294  ;;  %v2293_v11 = vpop.permute.xlu0 %2292  ;;  %v3308_v7 = vld [vmem:[%s4467_s1 + $0x168] sm:$0xff] }
  0xcc   : > { %3255 = vmatprep.subr.msk.mxu0 %vm220_vm1, %v3836_v39  ;;  %v3931_v12 = vsel %vm2296_vm13, %v2293_v11, %v3926_v10  ;;  %v2711_v39 = vld [vmem:[%s4469_s3 + $0x10] sm:$0xff]  ;;  %v3314_v11 = vld [vmem:[%s4467_s1 + $0x178] sm:$0xff]  ;;  %vm2727_vm13 = vcmask 97280  }
  0xcd   : > { %v3399_v43 = vpack.c.bf16 %v2712_v40, %v2711_v39 }
  0xce   : > { %3246 = vmatmul.mubr.msk.f32.gmra.mrb[2].mxu0 %vm213_vm3, %v3242_v9  ;;  %v3313_v9 = vld [vmem:[%s4467_s1 + $0x170] sm:$0xff] }
  0xcf   : > { %1472 = vmatprep.mubr.f32.mxu0 %v3649_v0  ;;  %v210_v14 = vpop.permute.xlu1 %209  ;;  %v208_v15 = vpop.permute.xlu0 %207 }
  0xd0   : > { %3179 = vmatprep.subr.msk.mxu1 %vm220_vm1, %v210_v14  ;;  %v212_v18 = vsel %vm211_vm15, %v208_v15, %v210_v14  ;;  %v2715_v14 = vld [vmem:[%s4469_s3 + $0x30] sm:$0xff]  ;;  %v2716_v15 = vld [vmem:[%s4469_s3 + $0x38] sm:$0xff] }
  0xd1   : > { %3180 = vmatpush1.msk.msra.mxu1 %vm220_vm1, %v212_v18  ;;  %v2719_v18 = vld [vmem:[%s4469_s3 + $0x50] sm:$0xff] }
  0xd2   : > { %3251 = vmatmul.mubr.msk.f32.vlgmr.msra.gmra.mrb[0].mxu0 %vm213_vm3, %v3247_v13  ;;  %3181 = vmatmul.mubr.msk.f32.vlgmr.msra.gmra.mrb[0].mxu1 %vm213_vm3, %v3177_v16  ;;  %v3320_v13 = vld [vmem:[%s4467_s1 + $0x188] sm:$0xff]  ;;  %v3405_v16 = vpack.c.bf16 %v2716_v15, %v2715_v14 }
  0xd3   : > { %3256 = vmatpush1.msk.msra.mxu0 %vm220_vm1, %v1497_v17  ;;  %1478 = vmatprep.mubr.f32.mxu0 %v3649_v0  ;;  %v3955_v21 = vpop.permute.xlu1 %2394  ;;  %v2393_v22 = vpop.permute.xlu0 %2392  ;;  %v2718_v17 = vld [vmem:[%s4469_s3 + $0x48] sm:$0xff] }
  0xd4   : > { %3261 = vmatprep.subr.msk.mxu0 %vm220_vm1, %v3846_v42  ;;  %295 = vmatprep.mubr.f32.mxu1 %v3649_v0  ;;  %v3961_v23 = vsel %vm2396_vm0, %v2393_v22, %v3955_v21  ;;  %v3188_v42 = vld [vmem:[%s4467_s1 + $0x28] sm:$0xff]  ;;  %v2721_v22 = vld [vmem:[%s4469_s3 + $0x60] sm:$0xff] }
  0xd5   : > { %3183 = vmatprep.subr.msk.mxu1 %vm220_vm1, %v3724_v2  ;;  %v3343_v14 = vld [vmem:[%s4469_s3 + $0x108] sm:$0xff] }
  0xd6   : > { %3252 = vmatmul.mubr.msk.f32.gmra.mrb[2].mxu0 %vm213_vm3, %v3248_v19  ;;  %3182 = vmatmul.mubr.msk.f32.gmra.mrb[2].mxu1 %vm213_vm3, %v3178_v20  ;;  %v2720_v20 = vld [vmem:[%s4469_s3 + $0x58] sm:$0xff] }
  0xd7   : > { %1572 = vmatprep.mubr.f32.mxu0 %v3649_v0  ;;  %3184 = vmatpush1.msk.msra.mxu1 %vm220_vm1, %v3720_v1  ;;  %v3976_v26 = vpop.permute.xlu1 %2494  ;;  %v3978_v2 = vpop.permute.xlu0 %2492  ;;  %v3254_v1 = vld [vmem:[%s4467_s1 + $0xd8] sm:$0xff] }
  0xd8   : > { %376 = vmatprep.mubr.f32.mxu1 %v3649_v0 }
  0xda   : > { %3257 = vmatmul.mubr.msk.f32.vlgmr.msra.gmra.mrb[0].mxu0 %vm213_vm3, %v3253_v24  ;;  %3185 = vmatmul.mubr.msk.f32.vlgmr.msra.gmra.mrb[0].mxu1 %vm213_vm3, %v200_v25  ;;  %v2723_v25 = vld [vmem:[%s4469_s3 + $0x70] sm:$0xff] }
  0xdb   : > { %3262 = vmatpush1.msk.msra.mxu0 %vm220_vm1, %v1597_v27  ;;  %1578 = vmatprep.mubr.f32.mxu0 %v3649_v0  ;;  %v395_v29 = vpop.permute.xlu1 %394  ;;  %v393_v30 = vpop.permute.xlu0 %392  ;;  %v2725_v27 = vld [vmem:[%s4469_s3 + $0x80] sm:$0xff] }
  0xdc   : > { %3267 = vmatprep.subr.msk.mxu0 %vm220_vm1, %v3856_v46  ;;  %382 = vmatprep.mubr.f32.mxu1 %v3649_v0  ;;  %v397_v31 = vsel %vm396_vm4, %v393_v30, %v395_v29  ;;  %v3265_v46 = vld [vmem:[%s4467_s1 + $0xf0] sm:$0xff] }
  0xdd   : > { %3189 = vmatprep.subr.msk.mxu1 %vm220_vm1, %v395_v29 }
  0xde   : > { %3258 = vmatmul.mubr.msk.f32.gmra.mrb[2].mxu0 %vm213_vm3, %v3254_v1  ;;  %3186 = vmatmul.mubr.msk.f32.gmra.mrb[2].mxu1 %vm213_vm3, %v201_v28  ;;  %v2726_v1 = vld [vmem:[%s4469_s3 + $0x88] sm:$0xf] }
  0xdf   : > { %1672 = vmatprep.mubr.f32.mxu0 %v3649_v0  ;;  %3190 = vmatpush1.msk.msra.mxu1 %vm220_vm1, %v397_v31  ;;  %v2595_v6 = vpop.permute.xlu1 %2594  ;;  %v3420_v28 = vpack.c.bf16 %v2726_v1, %v2725_v27  ;;  %v3356_v27 = vld [vmem:[%s4469_s3 + $0x158] sm:$0xff] }
  0xe0   : > { %472 = vmatprep.mubr.f32.mxu1 %v3649_v0  ;;  %3395 = vmatprep.subr.bf16.mxu1 %v3675_v37 }
  0xe2   : > { %3263 = vmatmul.mubr.msk.f32.vlgmr.msra.gmra.mrb[0].mxu0 %vm213_vm3, %v3259_v34  ;;  %3191 = vmatmul.mubr.msk.f32.vlgmr.msra.gmra.mrb[0].mxu1 %vm213_vm3, %v3187_v35 }
  0xe3   : > { %3268 = vmatpush1.msk.msra.mxu0 %vm220_vm1, %v1697_v36  ;;  %1678 = vmatprep.mubr.f32.mxu0 %v3649_v0 }
  0xe4   : > { %3273 = vmatprep.subr.msk.mxu0 %vm220_vm1, %v3872_v51  ;;  %478 = vmatprep.mubr.f32.mxu1 %v3649_v0  ;;  %v1897_v51 = vsel %vm1896_vm7, %v3884_v57, %v3882_v56  ;;  %v2097_v57 = vsel %vm2096_vm9, %v3904_v3, %v3902_v63  ;;  %v3302_v3 = vld [vmem:[%s4467_s1 + $0x158] sm:$0xff] }
  0xe5   : > { %3397 = vmatpush1.bf16.msra.mxu1 %v3396_v38 }
  0xe6   : > { %3264 = vmatmul.mubr.msk.f32.gmra.mrb[2].mxu0 %vm213_vm3, %v3260_v41  ;;  %3192 = vmatmul.mubr.msk.f32.gmra.mrb[2].mxu1 %vm213_vm3, %v3188_v42  ;;  %v3328_v41 = vld [vmem:[%s4469_s3 + $0x90] sm:$0xff]  ;;  %v3329_v42 = vld [vmem:[%s4469_s3 + $0x98] sm:$0xff] }
  0xe7   : > { %1772 = vmatprep.mubr.f32.mxu0 %v3649_v0  ;;  %3398 = vmatprep.subr.bf16.mxu1 %v3675_v37 }
  0xe9   : > { %3400 = vmatpush1.bf16.msra.mxu1 %v3399_v43 }
  0xea   : > { %3269 = vmatmul.mubr.msk.f32.vlgmr.msra.gmra.mrb[0].mxu0 %vm213_vm3, %v3265_v46  ;;  %3401 = vmatprep.subr.bf16.mxu1 %v3675_v37 }
  0xeb   : > { %3274 = vmatpush1.msk.msra.mxu0 %vm220_vm1, %v1797_v47  ;;  %1778 = vmatprep.mubr.f32.mxu0 %v3649_v0 }
  0xec   : > { %3279 = vmatprep.subr.msk.mxu0 %vm220_vm1, %v3882_v56  ;;  %v3283_v56 = vld [vmem:[%s4467_s1 + $0x120] sm:$0xff] }
  0xed   : > { %3403 = vmatpush1.bf16.msra.mxu1 %v3402_v48 }
  0xee   : > { %3270 = vmatmul.mubr.msk.f32.gmra.mrb[2].mxu0 %vm213_vm3, %v3266_v49  ;;  %3404 = vmatprep.subr.bf16.mxu1 %v3675_v37 }
  0xef   : > { %1872 = vmatprep.mubr.f32.mxu0 %v3649_v0 }
  0xf0   : > { %v2699_v45 = vpop.permute.xlu1 %2698 }
  0xf1   : > { %3406 = vmatpush1.bf16.msra.mxu1 %v3405_v16  ;;  %v3344_v16 = vld [vmem:[%s4469_s3 + $0x110] sm:$0xff] }
  0xf2   : > { %3275 = vmatmul.mubr.msk.f32.vlgmr.msra.gmra.mrb[0].mxu0 %vm213_vm3, %v3271_v50  ;;  %3407 = vmatprep.subr.bf16.mxu1 %v3675_v37  ;;  %v3424_v50 = vpack.c.bf16 %v3329_v42, %v3328_v41  ;;  %v3365_v42 = vld [vmem:[%s4469_s3 + $0x1a0] sm:$0xff] }
  0xf3   : > { %3280 = vmatpush1.msk.msra.mxu0 %vm220_vm1, %v1897_v51  ;;  %1878 = vmatprep.mubr.f32.mxu0 %v3649_v0 }
  0xf4   : > { %3285 = vmatprep.subr.msk.mxu0 %vm220_vm1, %v3892_v59  ;;  %v3289_v59 = vld [vmem:[%s4467_s1 + $0x130] sm:$0xff] }
  0xf6   : > { %3276 = vmatmul.mubr.msk.f32.gmra.mrb[2].mxu0 %vm213_vm3, %v3272_v52 }
  0xf7   : > { %1972 = vmatprep.mubr.f32.mxu0 %v3649_v0 }
  0xfa   : > { %3281 = vmatmul.mubr.msk.f32.vlgmr.msra.gmra.mrb[0].mxu0 %vm213_vm3, %v3277_v53  ;;  %v3330_v53 = vld [vmem:[%s4469_s3 + $0xa0] sm:$0xff] }
  0xfb   : > { %3286 = vmatpush1.msk.msra.mxu0 %vm220_vm1, %v1997_v54  ;;  %1978 = vmatprep.mubr.f32.mxu0 %v3649_v0  ;;  %v3331_v54 = vld [vmem:[%s4469_s3 + $0xa8] sm:$0xff] }
  0xfc   : > { %3291 = vmatprep.subr.msk.mxu0 %vm220_vm1, %v3902_v63  ;;  %v3301_v63 = vld [vmem:[%s4467_s1 + $0x150] sm:$0xff] }
  0xfe   : > { %3282 = vmatmul.mubr.msk.f32.gmra.mrb[2].mxu0 %vm213_vm3, %v3278_v55 }
  0xff   : > { %2072 = vmatprep.mubr.f32.mxu0 %v3649_v0 }
 0x102   : > { %3287 = vmatmul.mubr.msk.f32.vlgmr.msra.gmra.mrb[0].mxu0 %vm213_vm3, %v3283_v56 }
 0x103   : > { %3292 = vmatpush1.msk.msra.mxu0 %vm220_vm1, %v2097_v57  ;;  %2078 = vmatprep.mubr.f32.mxu0 %v3649_v0  ;;  %v3427_v57 = vpack.c.bf16 %v3331_v54, %v3330_v53  ;;  %v3374_v53 = vld [vmem:[%s4469_s3 + $0x1d0] sm:$0xff]  ;;  %v3375_v54 = vld [vmem:[%s4469_s3 + $0x1d8] sm:$0xff] }
 0x104   : > { %3297 = vmatprep.subr.msk.mxu0 %vm220_vm1, %v3913_v5  ;;  %v2497_v5 = vsel %vm2496_vm10, %v3978_v2, %v3976_v26 }
 0x106   : > { %3288 = vmatmul.mubr.msk.f32.gmra.mrb[2].mxu0 %vm213_vm3, %v3284_v58 }
 0x107   : > { %2172 = vmatprep.mubr.f32.mxu0 %v3649_v0 }
 0x10a   : > { %3293 = vmatmul.mubr.msk.f32.vlgmr.msra.gmra.mrb[0].mxu0 %vm213_vm3, %v3289_v59  ;;  %v3332_v59 = vld [vmem:[%s4469_s3 + $0xb0] sm:$0xff] }
 0x10b   : > { %3298 = vmatpush1.msk.msra.mxu0 %vm220_vm1, %v3918_v8  ;;  %2178 = vmatprep.mubr.f32.mxu0 %v3649_v0  ;;  %v2593_v8 = vpop.permute.xlu0 %2592 }
 0x10c   : > { %3303 = vmatprep.subr.msk.mxu0 %vm220_vm1, %v3926_v10  ;;  %v2597_v10 = vsel %vm2596_vm11, %v2593_v8, %v2595_v6  ;;  %v3339_v8 = vld [vmem:[%s4469_s3 + $0xe8] sm:$0xff] }
 0x10e   : > { %3294 = vmatmul.mubr.msk.f32.gmra.mrb[2].mxu0 %vm213_vm3, %v3290_v60  ;;  %v3333_v60 = vld [vmem:[%s4469_s3 + $0xb8] sm:$0xff] }
 0x10f   : > { %2272 = vmatprep.mubr.f32.mxu0 %v3649_v0  ;;  %v2694_v35 = vpop.permute.xlu0 %2693 }
 0x112   : > { %3299 = vmatmul.mubr.msk.f32.vlgmr.msra.gmra.mrb[0].mxu0 %vm213_vm3, %v3295_v61  ;;  %v3430_v61 = vpack.c.bf16 %v3333_v60, %v3332_v59  ;;  %v3377_v59 = vld [vmem:[%s4469_s3 + $0x1e8] sm:$0xff] }
 0x113   : > { %3304 = vmatpush1.msk.msra.mxu0 %vm220_vm1, %v3931_v12  ;;  %2278 = vmatprep.mubr.f32.mxu0 %v3649_v0  ;;  %v3319_v12 = vld [vmem:[%s4467_s1 + $0x180] sm:$0xff] }
 0x114   : > { %3309 = vmatprep.subr.msk.mxu0 %vm220_vm1, %v3955_v21  ;;  %v3411_v21 = vpack.c.bf16 %v2720_v20, %v2719_v18  ;;  %v3349_v18 = vld [vmem:[%s4469_s3 + $0x120] sm:$0xff] }
 0x116   : > { %3300 = vmatmul.mubr.msk.f32.gmra.mrb[2].mxu0 %vm213_vm3, %v3296_v62  ;;  %v3334_v62 = vld [vmem:[%s4469_s3 + $0xc0] sm:$0xff] }
 0x117   : > { %2372 = vmatprep.mubr.f32.mxu0 %v3649_v0 }
 0x11a   : > { %3305 = vmatmul.mubr.msk.f32.vlgmr.msra.gmra.mrb[0].mxu0 %vm213_vm3, %v3301_v63  ;;  %v3335_v63 = vld [vmem:[%s4469_s3 + $0xc8] sm:$0xff] }
 0x11b   : > { %3310 = vmatpush1.msk.msra.mxu0 %vm220_vm1, %v3961_v23  ;;  %2378 = vmatprep.mubr.f32.mxu0 %v3649_v0  ;;  %v2722_v23 = vld [vmem:[%s4469_s3 + $0x68] sm:$0xff] }
 0x11c   : > { %3315 = vmatprep.subr.msk.mxu0 %vm220_vm1, %v3976_v26  ;;  %v3414_v24 = vpack.c.bf16 %v2722_v23, %v2721_v22  ;;  %v2724_v26 = vld [vmem:[%s4469_s3 + $0x78] sm:$0xff] }
 0x11d   : > { %v3417_v2 = vpack.c.bf16 %v2724_v26, %v2723_v25  ;;  %v3352_v22 = vld [vmem:[%s4469_s3 + $0x138] sm:$0xff]  ;;  %v3354_v25 = vld [vmem:[%s4469_s3 + $0x148] sm:$0xff] }
 0x11e   : > { %3306 = vmatmul.mubr.msk.f32.gmra.mrb[2].mxu0 %vm213_vm3, %v3302_v3  ;;  %v3433_v3 = vpack.c.bf16 %v3335_v63, %v3334_v62  ;;  %v3380_v63 = vld [vmem:[%s4469_s3 + $0x200] sm:$0xff] }
 0x11f   : > { %2472 = vmatprep.mubr.f32.mxu0 %v3649_v0 }
 0x122   : > { %3311 = vmatmul.mubr.msk.f32.vlgmr.msra.gmra.mrb[0].mxu0 %vm213_vm3, %v3307_v4  ;;  %v3336_v4 = vld [vmem:[%s4469_s3 + $0xd0] sm:$0xff] }
 0x123   : > { %3316 = vmatpush1.msk.msra.mxu0 %vm220_vm1, %v2497_v5  ;;  %2478 = vmatprep.mubr.f32.mxu0 %v3649_v0  ;;  %v3337_v5 = vld [vmem:[%s4469_s3 + $0xd8] sm:$0xff] }
 0x124   : > { %3321 = vmatprep.subr.msk.mxu0 %vm220_vm1, %v2595_v6  ;;  %v3436_v6 = vpack.c.bf16 %v3337_v5, %v3336_v4  ;;  %v3382_v5 = vld [vmem:[%s4469_s3 + $0x210] sm:$0xff] }
 0x126   : > { %3312 = vmatmul.mubr.msk.f32.gmra.mrb[2].mxu0 %vm213_vm3, %v3308_v7  ;;  %v3338_v7 = vld [vmem:[%s4469_s3 + $0xe0] sm:$0xff] }
 0x127   : > { %2572 = vmatprep.mubr.f32.mxu0 %v3649_v0 }
 0x12a   : > { %3317 = vmatmul.mubr.msk.f32.vlgmr.msra.gmra.mrb[0].mxu0 %vm213_vm3, %v3313_v9  ;;  %v3439_v9 = vpack.c.bf16 %v3339_v8, %v3338_v7  ;;  %v3384_v8 = vld [vmem:[%s4469_s3 + $0x220] sm:$0xff] }
 0x12b   : > { %3322 = vmatpush1.msk.msra.mxu0 %vm220_vm1, %v2597_v10  ;;  %2578 = vmatprep.mubr.f32.mxu0 %v3649_v0  ;;  %vm2734_vm1 = vcmask 1043456   ;;  %v3340_v10 = vld [vmem:[%s4469_s3 + $0xf0] sm:$0xff] }
 0x12e   : > { %3318 = vmatmul.mubr.msk.f32.gmra.mrb[2].mxu0 %vm213_vm3, %v3314_v11  ;;  %v3341_v11 = vld [vmem:[%s4469_s3 + $0xf8] sm:$0xff] }
 0x12f   : > { %2672 = vmatprep.mubr.f32.mxu0 %v3649_v0 }
 0x132   : > { %3323 = vmatmul.mubr.msk.f32.vlgmr.msra.gmra.mrb[0].mxu0 %vm213_vm3, %v3319_v12  ;;  %v3442_v12 = vpack.c.bf16 %v3341_v11, %v3340_v10  ;;  %v3386_v11 = vld [vmem:[%s4469_s3 + $0x230] sm:$0xff] }
 0x133   : > { %2678 = vmatprep.mubr.f32.mxu0 %v3649_v0  ;;  %v2717_v0 = vld [vmem:[%s4469_s3 + $0x40] sm:$0xff] }
 0x134   : > { %v3408_v19 = vpack.c.bf16 %v2718_v17, %v2717_v0  ;;  %v3345_v0 = vld [vmem:[%s4469_s3 + $0x118] sm:$0xf] }
 0x135   : > { %v3448_v17 = vpack.c.bf16 %v3345_v0, %v3344_v16 }
 0x136   : > { %3324 = vmatmul.mubr.msk.f32.gmra.mrb[2].mxu0 %vm213_vm3, %v3320_v13  ;;  %3409 = vmatpush1.bf16.msra.mxu1 %v3408_v19  ;;  %vm3676_vm3 = vmmov 1   ;;  %v3342_v13 = vld [vmem:[%s4469_s3 + $0x100] sm:$0xff]  ;;  %v3350_v19 = vld [vmem:[%s4469_s3 + $0x128] sm:$0xff] }
 0x137   : > { %3410 = vmatprep.subr.bf16.mxu1 %v3675_v37  ;;  %vm4225_vm12 = vmpackc.low %vm2734_vm1, %vm3676_vm3  ;;  %v3445_v15 = vpack.c.bf16 %v3343_v14, %v3342_v13  ;;  %v3452_v20 = vpack.c.bf16 %v3350_v19, %v3349_v18 }
 0x13a   : > { %3412 = vmatpush1.bf16.msra.mxu1 %v3411_v21  ;;  %v3351_v21 = vld [vmem:[%s4469_s3 + $0x130] sm:$0xff] }
 0x13b   : > { %3413 = vmatprep.subr.bf16.mxu1 %v3675_v37  ;;  %v3455_v23 = vpack.c.bf16 %v3352_v22, %v3351_v21 }
 0x13e   : > { %3415 = vmatpush1.bf16.msra.mxu1 %v3414_v24  ;;  %v3353_v24 = vld [vmem:[%s4469_s3 + $0x140] sm:$0xff] }
 0x13f   : > { %3416 = vmatprep.subr.bf16.mxu1 %v3675_v37  ;;  %v3458_v26 = vpack.c.bf16 %v3354_v25, %v3353_v24 }
 0x142   : > { %3418 = vmatpush1.bf16.msra.mxu1 %v3417_v2  ;;  %v3355_v2 = vld [vmem:[%s4469_s3 + $0x150] sm:$0xff] }
 0x143   : > { %3419 = vmatprep.subr.bf16.mxu1 %v3675_v37  ;;  %v3461_v1 = vpack.c.bf16 %v3356_v27, %v3355_v2 }
 0x146   : > { %3422 = vmatpush1.bf16.msk.msra.mxu1 %vm4225_vm12, %v3420_v28  ;;  %v3357_v28 = vld [vmem:[%s4469_s3 + $0x160] sm:$0xff] }
 0x147   : > { %3423 = vmatprep.subr.bf16.mxu1 %v3675_v37 }
 0x1b5   : > { %v474_v30 = vpop.f32.mrb[0].mxu1 }
 0x1b6   : > { %v476_v31 = vpop.f32.mrb[1].mxu1 }
 0x1b9   : > { %v480_v32 = vpop.f32.mrb[2].mxu1 }
 0x1ba   : > { %v482_v33 = vpop.f32.mrb[3].mxu1 }
 0x205   : > { %v2674_v34 = vpop.f32.mrb[0].mxu0 }
 0x206   : > { %v3507_v36 = vadd.f32 %v2674_v34, %v474_v30  ;;  %v2676_v38 = vpop.f32.mrb[1].mxu0  ;;  %v3358_v30 = vld [vmem:[%s4469_s3 + $0x168] sm:$0xff] }
 0x207   : > { %v3508_v39 = vadd.f32 %v2676_v38, %v476_v31  ;;  %v3464_v31 = vpack.c.bf16 %v3358_v30, %v3357_v28 }
 0x208   : > { %v2701_v40 = vadd.f32 %v3507_v36, %v2694_v35  ;;  %v3362_v36 = vld [vmem:[%s4469_s3 + $0x188] sm:$0xff] }
 0x209   : > { %v2702_v43 = vadd.f32 %v3508_v39, %v2694_v35  ;;  %v2680_v44 = vpop.f32.mrb[2].mxu0  ;;  %v3361_v35 = vld [vmem:[%s4469_s3 + $0x180] sm:$0xff]  ;;  %v3363_v39 = vld [vmem:[%s4469_s3 + $0x190] sm:$0xff] }
 0x20a   : > { %v3509_v46 = vadd.f32 %v2680_v44, %v480_v32  ;;  %v2682_v47 = vpop.f32.mrb[3].mxu0  ;;  %v4240_v51 = vmax.f32 %v2701_v40, 0.0  ;;  %v3359_v32 = vld [vmem:[%s4469_s3 + $0x170] sm:$0xff]  ;;  %v3470_v38 = vpack.c.bf16 %v3362_v36, %v3361_v35  ;;  %v3364_v40 = vld [vmem:[%s4469_s3 + $0x198] sm:$0xff] }
 0x20b   : > { %v4238_v48 = vmax.f32 %v2702_v43, 0.0  ;;  %v3510_v49 = vadd.f32 %v2682_v47, %v482_v33  ;;  %v3360_v33 = vld [vmem:[%s4469_s3 + $0x178] sm:$0xff]  ;;  %v3473_v41 = vpack.c.bf16 %v3364_v40, %v3363_v39  ;;  %v3366_v43 = vld [vmem:[%s4469_s3 + $0x1a8] sm:$0xf] }
 0x20c   : > { %v2703_v52 = vadd.f32 %v3509_v46, %v2699_v45  ;;  %v3467_v34 = vpack.c.bf16 %v3360_v33, %v3359_v32  ;;  %v3476_v44 = vpack.c.bf16 %v3366_v43, %v3365_v42  ;;  %v3371_v46 = vld [vmem:[%s4469_s3 + $0x1b8] sm:$0xff] }
 0x20d   : > { %v2704_v55 = vadd.f32 %v3510_v49, %v2699_v45  ;;  %3326 = vmatprep.mubr.msk.f32.mxu1 %vm2727_vm13, %v4238_v48  ;;  %v3370_v45 = vld [vmem:[%s4469_s3 + $0x1b0] sm:$0xff]  ;;  %v3372_v49 = vld [vmem:[%s4469_s3 + $0x1c0] sm:$0xff] }
 0x20e   : > { %2803 = vmatmul.mubr.f32.vlgmr.msra.gmra.mrb[4].mxu1 %v4240_v51  ;;  %v4253_v58 = vmax.f32 %v2703_v52, 0.0  ;;  %v3480_v47 = vpack.c.bf16 %v3371_v46, %v3370_v45 }
 0x20f   : > { %v4251_v56 = vmax.f32 %v2704_v55, 0.0  ;;  %3425 = vmatpush1.bf16.msra.mxu1 %v3424_v50  ;;  %v3373_v50 = vld [vmem:[%s4469_s3 + $0x1c8] sm:$0xff]  ;;  %v3486_v55 = vpack.c.bf16 %v3375_v54, %v3374_v53 }
 0x210   : > { %3426 = vmatprep.subr.bf16.mxu1 %v3675_v37  ;;  %v3483_v52 = vpack.c.bf16 %v3373_v50, %v3372_v49 }
 0x211   : > { %3327 = vmatprep.mubr.msk.f32.mxu1 %vm2727_vm13, %v4251_v56 }
 0x212   : > { %2808 = vmatmul.mubr.f32.gmra.mrb[6].mxu1 %v4253_v58 }
 0x213   : > { %3428 = vmatpush1.bf16.msra.mxu1 %v3427_v57  ;;  %3347 = vmatprep.mubr.msk.f32.mxu1 %vm2727_vm13, %v4238_v48  ;;  %v3376_v57 = vld [vmem:[%s4469_s3 + $0x1e0] sm:$0xff] }
 0x214   : > { %3429 = vmatprep.subr.bf16.mxu1 %v3675_v37  ;;  %v3489_v60 = vpack.c.bf16 %v3377_v59, %v3376_v57 }
 0x217   : > { %3431 = vmatpush1.bf16.msra.mxu1 %v3430_v61  ;;  %v3378_v61 = vld [vmem:[%s4469_s3 + $0x1f0] sm:$0xff] }
 0x218   : > { %3432 = vmatprep.subr.bf16.mxu1 %v3675_v37 }
 0x21b   : > { %3434 = vmatpush1.bf16.msra.mxu1 %v3433_v3  ;;  %v3381_v3 = vld [vmem:[%s4469_s3 + $0x208] sm:$0xff] }
 0x21c   : > { %3435 = vmatprep.subr.bf16.mxu1 %v3675_v37  ;;  %v3495_v4 = vpack.c.bf16 %v3381_v3, %v3380_v63 }
 0x21f   : > { %3437 = vmatpush1.bf16.msra.mxu1 %v3436_v6  ;;  %v3383_v6 = vld [vmem:[%s4469_s3 + $0x218] sm:$0xff] }
 0x220   : > { %3438 = vmatprep.subr.bf16.mxu1 %v3675_v37  ;;  %v3498_v7 = vpack.c.bf16 %v3383_v6, %v3382_v5 }
 0x223   : > { %3440 = vmatpush1.bf16.msra.mxu1 %v3439_v9  ;;  %v3385_v9 = vld [vmem:[%s4469_s3 + $0x228] sm:$0xff] }
 0x224   : > { %3441 = vmatprep.subr.bf16.mxu1 %v3675_v37  ;;  %v3501_v10 = vpack.c.bf16 %v3385_v9, %v3384_v8 }
 0x227   : > { %3443 = vmatpush1.bf16.msra.mxu1 %v3442_v12  ;;  %v3387_v12 = vld [vmem:[%s4469_s3 + $0x238] sm:$0xf] }
 0x228   : > { %3444 = vmatprep.subr.bf16.mxu1 %v3675_v37  ;;  %v3504_v13 = vpack.c.bf16 %v3387_v12, %v3386_v11 }
 0x22b   : > { %3446 = vmatpush1.bf16.msra.mxu1 %v3445_v15 }
 0x22c   : > { %3447 = vmatprep.subr.bf16.mxu1 %v3675_v37 }
 0x22f   : > { %3450 = vmatpush1.bf16.msk.msra.mxu1 %vm4225_vm12, %v3448_v17 }
 0x230   : > { %3451 = vmatprep.subr.bf16.mxu1 %v3675_v37 }
 0x232   : > { %2900 = vmatmul.mubr.f32.vlgmr.msra.gmra.mrb[8].mxu1 %v4240_v51 }
 0x233   : > { %3348 = vmatprep.mubr.msk.f32.mxu1 %vm2727_vm13, %v4251_v56  ;;  %3453 = vmatpush1.bf16.msra.mxu1 %v3452_v20 }
 0x234   : > { %3454 = vmatprep.subr.bf16.mxu1 %v3675_v37 }
 0x236   : > { %2905 = vmatmul.mubr.f32.gmra.mrb[10].mxu1 %v4253_v58 }
 0x237   : > { %3456 = vmatpush1.bf16.msra.mxu1 %v3455_v23  ;;  %3368 = vmatprep.mubr.msk.f32.mxu1 %vm2727_vm13, %v4238_v48 }
 0x238   : > { %3457 = vmatprep.subr.bf16.mxu1 %v3675_v37 }
 0x23b   : > { %3459 = vmatpush1.bf16.msra.mxu1 %v3458_v26 }
 0x23c   : > { %3460 = vmatprep.subr.bf16.mxu1 %v3675_v37 }
 0x23f   : > { %3462 = vmatpush1.bf16.msra.mxu1 %v3461_v1 }
 0x240   : > { %3463 = vmatprep.subr.bf16.mxu1 %v3675_v37 }
 0x243   : > { %3465 = vmatpush1.bf16.msra.mxu1 %v3464_v31 }
 0x244   : > { %3466 = vmatprep.subr.bf16.mxu1 %v3675_v37 }
 0x247   : > { %3468 = vmatpush1.bf16.msra.mxu1 %v3467_v34 }
 0x248   : > { %3469 = vmatprep.subr.bf16.mxu1 %v3675_v37 }
 0x24b   : > { %3471 = vmatpush1.bf16.msra.mxu1 %v3470_v38 }
 0x24c   : > { %3472 = vmatprep.subr.bf16.mxu1 %v3675_v37 }
 0x24f   : > { %3474 = vmatpush1.bf16.msra.mxu1 %v3473_v41 }
 0x250   : > { %3475 = vmatprep.subr.bf16.mxu1 %v3675_v37 }
 0x253   : > { %3478 = vmatpush1.bf16.msk.msra.mxu1 %vm4225_vm12, %v3476_v44 }
 0x254   : > { %3479 = vmatprep.subr.bf16.mxu1 %v3675_v37 }
 0x256   : > { %2999 = vmatmul.mubr.f32.vlgmr.msra.gmra.mrb[12].mxu1 %v4240_v51 }
 0x257   : > { %3369 = vmatprep.mubr.msk.f32.mxu1 %vm2727_vm13, %v4251_v56  ;;  %3481 = vmatpush1.bf16.msra.mxu1 %v3480_v47 }
 0x258   : > { %3482 = vmatprep.subr.bf16.mxu1 %v3675_v37 }
 0x25a   : > { %3004 = vmatmul.mubr.f32.gmra.mrb[14].mxu1 %v4253_v58 }
 0x25b   : > { %3484 = vmatpush1.bf16.msra.mxu1 %v3483_v52  ;;  %3389 = vmatprep.mubr.msk.f32.mxu1 %vm2727_vm13, %v4238_v48  ;;  %v3379_v48 = vld [vmem:[%s4469_s3 + $0x1f8] sm:$0xff] }
 0x25c   : > { %3485 = vmatprep.subr.bf16.mxu1 %v3675_v37  ;;  %v3492_v62 = vpack.c.bf16 %v3379_v48, %v3378_v61 }
 0x25f   : > { %3487 = vmatpush1.bf16.msra.mxu1 %v3486_v55 }
 0x260   : > { %3488 = vmatprep.subr.bf16.mxu1 %v3675_v37 }
 0x263   : > { %3490 = vmatpush1.bf16.msra.mxu1 %v3489_v60 }
 0x264   : > { %3491 = vmatprep.subr.bf16.mxu1 %v3675_v37 }
 0x267   : > { %3493 = vmatpush1.bf16.msra.mxu1 %v3492_v62 }
 0x268   : > { %3494 = vmatprep.subr.bf16.mxu1 %v3675_v37 }
 0x26b   : > { %3496 = vmatpush1.bf16.msra.mxu1 %v3495_v4 }
 0x26c   : > { %3497 = vmatprep.subr.bf16.mxu1 %v3675_v37 }
 0x26f   : > { %3499 = vmatpush1.bf16.msra.mxu1 %v3498_v7 }
 0x270   : > { %3500 = vmatprep.subr.bf16.mxu1 %v3675_v37 }
 0x273   : > { %3502 = vmatpush1.bf16.msra.mxu1 %v3501_v10 }
 0x274   : > { %3503 = vmatprep.subr.bf16.mxu1 %v3675_v37 }
 0x277   : > { %3506 = vmatpush1.bf16.msk.msra.mxu1 %vm4225_vm12, %v3504_v13 }
 0x27a   : > { %3098 = vmatmul.mubr.f32.vlgmr.msra.gmra.mrb[16].mxu1 %v4240_v51 }
 0x27b   : > { %3390 = vmatprep.mubr.msk.f32.mxu1 %vm2727_vm13, %v4251_v56 }
 0x27e   : > { %3103 = vmatmul.mubr.f32.gmra.mrb[18].mxu1 %v4253_v58 }
 0x2e1   : > { %v2804_v14 = vpop.f32.mrb[4].mxu1 }
 0x2e2   : > { %v2806_v15 = vpop.f32.mrb[5].mxu1 }
 0x2e5   : > { %v2809_v16 = vpop.f32.mrb[6].mxu1 }
 0x2e6   : > { %v2811_v0 = vpop.f32.mrb[7].mxu1 }
 0x305   : > { %v2901_v17 = vpop.f32.mrb[8].mxu1 }
 0x306   : > { %v2910_v18 = vmax.f32 %v2804_v14, %v2901_v17  ;;  %v2903_v19 = vpop.f32.mrb[9].mxu1 }
 0x309   : > { %v2906_v20 = vpop.f32.mrb[10].mxu1 }
 0x30a   : > { %v2911_v37 = vmax.f32 %v2809_v16, %v2906_v20  ;;  %v2908_v21 = vpop.f32.mrb[11].mxu1 }
 0x329   : > { %v3000_v29 = vpop.f32.mrb[12].mxu1 }
 0x32a   : > { %v3009_v22 = vmax.f32 %v2910_v18, %v3000_v29  ;;  %v3002_v23 = vpop.f32.mrb[13].mxu1 }
 0x32d   : > { %v3005_v51 = vpop.f32.mrb[14].mxu1 }
 0x32e   : > { %v3010_v24 = vmax.f32 %v2911_v37, %v3005_v51  ;;  %v3007_v25 = vpop.f32.mrb[15].mxu1 }
 0x34d   : > { %v3099_v56 = vpop.f32.mrb[16].mxu1 }
 0x34e   : > { %v3108_v58 = vmax.f32 %v3009_v22, %v3099_v56  ;;  %v3101_v26 = vpop.f32.mrb[17].mxu1 }
 0x350   : > { %3111 = vst.msk [vmem:[%s197_s19] sm:$0xff] %vm3110_vm14, %v3108_v58 }
 0x351   : > { %v3104_v2 = vpop.f32.mrb[18].mxu1 }
 0x352   : > { %v3109_v27 = vmax.f32 %v3010_v24, %v3104_v2  ;;  %v3106_v1 = vpop.f32.mrb[19].mxu1 }
 0x354   : > { %3112 = vst.msk [vmem:[%s197_s19 + $0x8] sm:$0xff] %vm3110_vm14, %v3109_v27 }
 0x355 PF: > { %s14_s15 = sadd.s32 1, %s3647_s15  }
 0x356   : > { %p11_p4 = scmp.ge.s32.totalorder %s14_s15, 4  }
 0x358   :  { %13 = sbr.rel (!%p11_p4) target bundleno = 1 (0x1), region = 93 }

// kernel: lenet_forward.3
= control target key start
LH: loop header
LB: loop body
LE: loop exit
PB: predicated region body
PF: predicated region fallthrough
CT: control target
= control target key end

     0   :  { %9 = vsyncpa [#allocation3], 0  ;;  %s12170_s15 = smov 0   ;;  %s13792_s0 = inlined_call_operand.vmem [shape: f32[2,3,1152], index: 0, kind: input, shape index: {}]   ;;  %s13793_s1 = inlined_call_operand.vmem [shape: f32[25,6,3], index: 1, kind: input, shape index: {}]   ;;  %s13794_s2 = inlined_call_operand.vmem [shape: f32[6,1], index: 2, kind: input, shape index: {}]   ;;  %s13795_s3 = inlined_call_operand.hbm [shape: f32[4,896,256], index: 3, kind: input, shape index: {}]   ;;  %s13796_s4 = inlined_call_operand.vmem [shape: f32[2,6,256], index: 4, kind: output, shape index: {}]  }
   0x1 LB: > { %s12176_s16 = sadd.s32 4294967295, %s12118_s15   ;;  %p10479_p0 = scmp.ge.s32.totalorder %s12118_s15, 1  ;;  %s12118_s15 = sphi %s12170_s15, %s15_s15  }
   0x2   : > { %p135_p1 = scmp.lt.s32.totalorder %s12118_s15, 3  ;;  %s12120_s17 = smov [#allocation2]  }
   0x3   : > { %s153_s18 = sshll.u32 %s12120_s17, 4  ;;  %p13797_p3 = scmp.eq.s32.totalorder %s12176_s16, 0  ;;  %s154_s18 = int_to_ptr.vmem [resolvable:$true] %s153_s18 }
   0x4   : > { %p12180_p2 = pnand %p10479_p0, %p135_p1  ;;  %s12080_s23 = scalar_lea.hbm %s13795_s3, 114688 }
   0x5   : > { %p12081_p6 = scmp.ne.s32.totalorder %s13795_s3, %s12080_s23  ;;  %p12087_p10 = scmp.lt.u32.totalorder %s12080_s23, %s13795_s3 }
   0x6   : > { %s13811_s19 = scalar_select %p12180_p2, 1, 0 }
   0x7   : > { %p12033_p4 = pneg %p12180_p2 }
   0x9   : > { %p12189_p5 = pnand %p13797_p3, %p12033_p4 }
   0xb   : > { %p12082_p7 = pneg %p12189_p5 }
   0xd   : > { %p12083_p8 = pnand %p12082_p7, %p12081_p6 }
   0xf   : > { %p12084_p9 = pneg %p12083_p8 }
  0x11   : > { %p12089_p11 = pnand %p12087_p10, %p12084_p9 }
  0x13   : > { %12092 = shalt.err (!%p12089_p11)
}
  0x14   : > { %s12093_s28 = scalar_lea.vmem %s154_s18, 114688  ;;  %p12101_p1 = scmp.lt.s32.totalorder %s154_s18, %s154_s18 }
  0x15   : > { %p12094_p12 = scmp.ne.s32.totalorder %s154_s18, %s12093_s28  ;;  %p12102_p4 = scmp.lt.s32.totalorder %s12093_s28, %s12093_s28 }
  0x17   : > { %p12096_p13 = pnand %p12094_p12, %p12082_p7  ;;  %p12103_p3 = por %p12102_p4, %p12101_p1 }
  0x19   : > { %p12097_p0 = pneg %p12096_p13 }
  0x1b   : > { %p12104_p2 = pnand %p12103_p3, %p12097_p0 }
  0x1d   : > { %12107 = shalt.err (!%p12104_p2)
}
  0x1e   : > { %s12121_s29 = smov 256   ;;  %s12122_s30 = smov 16  }
  0x1f   : > { %12036 = dma.hbm_to_vmem [thread:$0]  (!%p12189_p5), %s13795_s3, 114688, %s154_s18, [#allocation3], %s12121_s29, %s12121_s29, %s12122_s30  }
  0x20   : > { %p13813_p6 = scmp.ne.s32.totalorder %s13811_s19, 0 }
  0x22   : > { %177 = sbr.rel (%p13813_p6) target bundleno = 1294 (0x50e), region = 36 }
  0x29   : > { %p13814_p8 = scmp.eq.s32.totalorder %s12176_s16, 0 }
  0x2b   : > { %12113 = dma.done.wait (%p13814_p8), [#allocation3], 114688   ;;  %p13815_p7 = pmov %p13814_p8 }
  0x2c   : > { %p203_p2 = scmp.lt.s32.totalorder %s12176_s16, 1  ;;  %v13805_v0 = vmov 0.0   ;;  %s12124_s11 = smov 127   ;;  %vm245_vm0 = vcmask 1039360   ;;  %vm257_vm1 = vcmask 1042432   ;;  %vm253_vm2 = vcmask 23552  }
  0x2d   : > { %12115 = vsyncadd (%p13815_p7), [#allocation3], 4294852608  ;;  %336 = vmatprep.mubr.f32.mxu0 %v13805_v0  ;;  %407 = vmatprep.mubr.f32.mxu1 %v13805_v0  ;;  %s12125_s12 = smov 126   ;;  %s12126_s13 = smov 125   ;;  %v12397_v17 = vld [vmem:[%s13793_s1 + $0x8] sm:$0x3f] }
  0x2e   : > { %s13838_s16 = smov (!%p203_p2, %s12176_s16), 1  ;;  %s12127_s14 = smov 124   ;;  %v12434_v24 = vld [vmem:[%s13793_s1] sm:$0x3f]  ;;  %vm873_vm3 = vcmask 1031168   ;;  %vm1206_vm4 = vcmask 1022976  }
  0x2f   : > { %s12028_s7 = smul.u32 36, %s13838_s16  ;;  %s12128_s17 = smov 96   ;;  %v12475_v32 = vld [vmem:[%s13793_s1 + $0x10] sm:$0x3f]  ;;  %v12518_v41 = vld [vmem:[%s13793_s1 + $0x18] sm:$0x3f] }
  0x30   : > { %s12129_s18 = smov 95   ;;  %s12130_s19 = smov 94   ;;  %vm1539_vm5 = vcmask 1014784   ;;  %v12555_v49 = vld [vmem:[%s13793_s1 + $0x20] sm:$0x3f]  ;;  %vm1872_vm6 = vcmask 785408  }
  0x31   : > { %s12223_s10 = scalar_lea.vmem %s13792_s0, %s12028_s7  ;;  %s12131_s20 = smov 93   ;;  %v12598_v59 = vld [vmem:[%s13793_s1 + $0x28] sm:$0x3f]  ;;  %vm2205_vm7 = vcmask 777216   ;;  %vm2538_vm8 = vcmask 769024   ;;  %vm2871_vm9 = vcmask 760832  }
  0x32   : > { %v12228_v1 = vld [vmem:[%s12223_s10 + $0x8] sm:$0x77]  ;;  %v12231_v2 = vld [vmem:[%s12223_s10] sm:$0x77]  ;;  %v12238_v3 = vld [vmem:[%s12223_s10 + $0x18] sm:$0x77] }
  0x33   : > { %233 = vrot.lane.b32.xlu0 %v12228_v1, %s12124_s11  ;;  %229 = vrot.lane.b32.xlu1 %v12231_v2, %s12124_s11  ;;  %v12241_v4 = vld [vmem:[%s12223_s10 + $0x10] sm:$0x77]  ;;  %v12253_v6 = vcombine.high %v12231_v2, %v12231_v2  ;;  %v12333_v7 = vcombine.high %v12228_v1, %v12228_v1  ;;  %v12349_v8 = vcombine.high %v12238_v3, %v12238_v3  ;;  %s12132_s21 = smov 92   ;;  %s12133_s22 = smov 64   ;;  %vm12139_vm10 = vmmov 0  }
  0x34   : > { %v12249_v5 = vcombine.high %v12241_v4, %v12241_v4  ;;  %s12134_s25 = smov 63   ;;  %s12135_s30 = smov 62   ;;  %vm3204_vm11 = vcmask 752640   ;;  %vm3537_vm12 = vcmask 523264   ;;  %vm3870_vm13 = vcmask 515072  }
  0x35   : > { %s12136_s9 = smov 61   ;;  %s12137_s26 = smov 60   ;;  %vm4203_vm14 = vcmask 506880   ;;  %vm4536_vm15 = vcmask 498688  }
  0x36   : > { %s12138_s5 = smov 32   ;;  %s12140_s7 = smov 31  }
  0x37   : > { %241 = vrot.lane.b32.xlu0 %v12238_v3, %s12124_s11  ;;  %237 = vrot.lane.b32.xlu1 %v12241_v4, %s12124_s11  ;;  %s12143_s28 = smov 28  }
  0x3b   : > { %239 = vrot.lane.b32.xlu1 %v12249_v5, %s12124_s11  ;;  %231 = vrot.lane.b32.xlu0 %v12253_v6, %s12124_s11 }
  0x3f   : > { %861 = vrot.lane.b32.xlu1 %v12228_v1, %s12125_s12  ;;  %859 = vrot.lane.b32.xlu0 %v12253_v6, %s12125_s12 }
  0x43   : > { %867 = vrot.lane.b32.xlu1 %v12249_v5, %s12125_s12  ;;  %857 = vrot.lane.b32.xlu0 %v12231_v2, %s12125_s12 }
  0x47   : > { %865 = vrot.lane.b32.xlu1 %v12241_v4, %s12125_s12  ;;  %869 = vrot.lane.b32.xlu0 %v12238_v3, %s12125_s12 }
  0x4b   : > { %1194 = vrot.lane.b32.xlu1 %v12228_v1, %s12126_s13  ;;  %1192 = vrot.lane.b32.xlu0 %v12253_v6, %s12126_s13 }
  0x4f   : > { %1200 = vrot.lane.b32.xlu1 %v12249_v5, %s12126_s13  ;;  %1190 = vrot.lane.b32.xlu0 %v12231_v2, %s12126_s13 }
  0x53   : > { %1198 = vrot.lane.b32.xlu1 %v12241_v4, %s12126_s13  ;;  %1202 = vrot.lane.b32.xlu0 %v12238_v3, %s12126_s13 }
  0x57   : > { %1527 = vrot.lane.b32.xlu1 %v12228_v1, %s12127_s14  ;;  %1525 = vrot.lane.b32.xlu0 %v12253_v6, %s12127_s14 }
  0x5b   : > { %1533 = vrot.lane.b32.xlu1 %v12249_v5, %s12127_s14  ;;  %1523 = vrot.lane.b32.xlu0 %v12231_v2, %s12127_s14 }
  0x5f   : > { %1531 = vrot.lane.b32.xlu1 %v12241_v4, %s12127_s14  ;;  %1535 = vrot.lane.b32.xlu0 %v12238_v3, %s12127_s14 }
  0x63   : > { %1860 = vrot.lane.b32.xlu1 %v12228_v1, %s12128_s17  ;;  %1858 = vrot.lane.b32.xlu0 %v12253_v6, %s12128_s17 }
  0x67   : > { %1866 = vrot.lane.b32.xlu1 %v12249_v5, %s12128_s17  ;;  %1856 = vrot.lane.b32.xlu0 %v12231_v2, %s12128_s17 }
  0x6b   : > { %1864 = vrot.lane.b32.xlu1 %v12241_v4, %s12128_s17  ;;  %1868 = vrot.lane.b32.xlu0 %v12238_v3, %s12128_s17 }
  0x6f   : > { %2193 = vrot.lane.b32.xlu1 %v12228_v1, %s12129_s18  ;;  %2191 = vrot.lane.b32.xlu0 %v12253_v6, %s12129_s18 }
  0x73   : > { %2199 = vrot.lane.b32.xlu1 %v12249_v5, %s12129_s18  ;;  %2189 = vrot.lane.b32.xlu0 %v12231_v2, %s12129_s18 }
  0x77   : > { %2197 = vrot.lane.b32.xlu1 %v12241_v4, %s12129_s18  ;;  %2201 = vrot.lane.b32.xlu0 %v12238_v3, %s12129_s18 }
  0x7b   : > { %2526 = vrot.lane.b32.xlu1 %v12228_v1, %s12130_s19  ;;  %2524 = vrot.lane.b32.xlu0 %v12253_v6, %s12130_s19 }
  0x7f   : > { %2532 = vrot.lane.b32.xlu1 %v12249_v5, %s12130_s19  ;;  %2522 = vrot.lane.b32.xlu0 %v12231_v2, %s12130_s19 }
  0x83   : > { %2530 = vrot.lane.b32.xlu1 %v12241_v4, %s12130_s19  ;;  %2534 = vrot.lane.b32.xlu0 %v12238_v3, %s12130_s19 }
  0x87   : > { %2857 = vrot.lane.b32.xlu1 %v12253_v6, %s12131_s20  ;;  %235 = vrot.lane.b32.xlu0 %v12333_v7, %s12124_s11 }
  0x8b   : > { %2855 = vrot.lane.b32.xlu1 %v12231_v2, %s12131_s20  ;;  %2859 = vrot.lane.b32.xlu0 %v12228_v1, %s12131_s20 }
  0x8f   : > { %2867 = vrot.lane.b32.xlu1 %v12238_v3, %s12131_s20  ;;  %2865 = vrot.lane.b32.xlu0 %v12249_v5, %s12131_s20 }
  0x93   : > { %2863 = vrot.lane.b32.xlu1 %v12241_v4, %s12131_s20  ;;  %243 = vrot.lane.b32.xlu0 %v12349_v8, %s12124_s11 }
  0x97   : > { %3192 = vrot.lane.b32.xlu1 %v12228_v1, %s12132_s21  ;;  %3190 = vrot.lane.b32.xlu0 %v12253_v6, %s12132_s21 }
  0x9b   : > { %3198 = vrot.lane.b32.xlu1 %v12249_v5, %s12132_s21  ;;  %3188 = vrot.lane.b32.xlu0 %v12231_v2, %s12132_s21 }
  0x9f   : > { %3196 = vrot.lane.b32.xlu1 %v12241_v4, %s12132_s21  ;;  %3200 = vrot.lane.b32.xlu0 %v12238_v3, %s12132_s21 }
  0xa3   : > { %3523 = vrot.lane.b32.xlu1 %v12253_v6, %s12133_s22  ;;  %863 = vrot.lane.b32.xlu0 %v12333_v7, %s12125_s12 }
  0xa5   : > { %v12371_v9 = vpop.permute.xlu0 %233  ;;  %v230_v10 = vpop.permute.xlu1 %229 }
  0xa7   : > { %3521 = vrot.lane.b32.xlu1 %v12231_v2, %s12133_s22  ;;  %3525 = vrot.lane.b32.xlu0 %v12228_v1, %s12133_s22 }
  0xa9   : > { %v12377_v11 = vpop.permute.xlu0 %241  ;;  %v12379_v12 = vpop.permute.xlu1 %237 }
  0xab   : > { %3533 = vrot.lane.b32.xlu1 %v12238_v3, %s12133_s22  ;;  %3531 = vrot.lane.b32.xlu0 %v12249_v5, %s12133_s22 }
  0xad   : > { %v240_v13 = vpop.permute.xlu1 %239  ;;  %v232_v14 = vpop.permute.xlu0 %231 }
  0xae   : > { %v12387_v15 = vsel %vm245_vm0, %v232_v14, %v12371_v9  ;;  %v246_v16 = vsel %vm245_vm0, %v230_v10, %v232_v14  ;;  %v12406_v19 = vsel %vm245_vm0, %v240_v13, %v12377_v11  ;;  %v12410_v21 = vsel %vm245_vm0, %v12379_v12, %v240_v13 }
  0xaf   : > { %3529 = vrot.lane.b32.xlu1 %v12241_v4, %s12133_s22  ;;  %871 = vrot.lane.b32.xlu0 %v12349_v8, %s12125_s12 }
  0xb0   : > { %10488 = vmatprep.subr.msk.mxu0 %vm257_vm1, %v12387_v15 }
  0xb1   : > { %10489 = vmatpush1.msk.msra.mxu0 %vm257_vm1, %v246_v16  ;;  %v12402_v18 = vpop.permute.xlu1 %861  ;;  %v860_v20 = vpop.permute.xlu0 %859 }
  0xb2   : > { %10490 = vmatmul.mubr.msk.f32.vlgmr.msra.gmra.mrb[0].mxu0 %vm253_vm2, %v12397_v17  ;;  %10494 = vmatprep.subr.msk.mxu0 %vm257_vm1, %v12406_v19  ;;  %v12451_v27 = vsel %vm873_vm3, %v860_v20, %v12402_v18 }
  0xb3   : > { %10495 = vmatpush1.msk.msra.mxu0 %vm257_vm1, %v12410_v21  ;;  %3856 = vrot.lane.b32.xlu1 %v12253_v6, %s12134_s25 }
  0xb4   : > { %1196 = vrot.lane.b32.xlu0 %v12333_v7, %s12126_s13  ;;  %478 = vmatprep.mubr.f32.mxu0 %v13805_v0 }
  0xb5   : > { %v868_v22 = vpop.permute.xlu1 %867  ;;  %v858_v23 = vpop.permute.xlu0 %857  ;;  %10499 = vmatprep.subr.msk.mxu0 %vm257_vm1, %v12253_v6 }
  0xb6   : > { %10496 = vmatmul.mubr.msk.f32.vlgmr.msra.gmra.mrb[2].mxu0 %vm253_vm2, %v12397_v17  ;;  %v874_v30 = vsel %vm873_vm3, %v858_v23, %v860_v20  ;;  %v12638_v23 = vld [vmem:[%s13793_s1 + $0x30] sm:$0x3f] }
  0xb7   : > { %3854 = vrot.lane.b32.xlu1 %v12231_v2, %s12134_s25  ;;  %10500 = vmatpush1.msk.msra.mxu0 %vm257_vm1, %v12231_v2 }
  0xb8   : > { %3858 = vrot.lane.b32.xlu0 %v12228_v1, %s12134_s25  ;;  %636 = vmatprep.mubr.f32.mxu0 %v13805_v0 }
  0xb9   : > { %10505 = vmatprep.subr.msk.mxu0 %vm257_vm1, %v12249_v5  ;;  %v12441_v25 = vpop.permute.xlu1 %865  ;;  %v12443_v26 = vpop.permute.xlu0 %869 }
  0xba   : > { %10501 = vmatmul.mubr.msk.f32.vlgmr.msra.gmra.mrb[0].mxu0 %vm253_vm2, %v12434_v24  ;;  %v12468_v31 = vsel %vm873_vm3, %v868_v22, %v12443_v26  ;;  %v12484_v35 = vsel %vm873_vm3, %v12441_v25, %v868_v22 }
  0xbb   : > { %10506 = vmatpush1.msk.msra.mxu0 %vm257_vm1, %v12241_v4  ;;  %3866 = vrot.lane.b32.xlu1 %v12238_v3, %s12134_s25  ;;  %13816 = vst [vmem:[#allocation5_spill] sm:$0xff] %v12484_v35 }
  0xbc   : > { %10511 = vmatprep.subr.msk.mxu0 %vm257_vm1, %v12451_v27  ;;  %3864 = vrot.lane.b32.xlu0 %v12249_v5, %s12134_s25 }
  0xbd   : > { %778 = vmatprep.mubr.f32.mxu0 %v13805_v0  ;;  %v12460_v28 = vpop.permute.xlu1 %1194  ;;  %v1193_v29 = vpop.permute.xlu0 %1192 }
  0xbe   : > { %10507 = vmatmul.mubr.msk.f32.vlgmr.msra.gmra.mrb[2].mxu0 %vm253_vm2, %v12434_v24  ;;  %v12492_v36 = vsel %vm1206_vm4, %v1193_v29, %v12460_v28 }
  0xbf   : > { %10512 = vmatpush1.msk.msra.mxu0 %vm257_vm1, %v874_v30  ;;  %3862 = vrot.lane.b32.xlu1 %v12241_v4, %s12134_s25 }
  0xc0   : > { %10517 = vmatprep.subr.msk.mxu0 %vm257_vm1, %v12468_v31  ;;  %1204 = vrot.lane.b32.xlu0 %v12349_v8, %s12126_s13 }
  0xc1   : > { %962 = vmatprep.mubr.f32.mxu0 %v13805_v0  ;;  %v1201_v33 = vpop.permute.xlu1 %1200  ;;  %v1191_v34 = vpop.permute.xlu0 %1190 }
  0xc2   : > { %10513 = vmatmul.mubr.msk.f32.vlgmr.msra.gmra.mrb[0].mxu0 %vm253_vm2, %v12475_v32  ;;  %v1207_v39 = vsel %vm1206_vm4, %v1191_v34, %v1193_v29 }
  0xc3   : > { %10518 = vmatpush1.msk.msra.mxu0 %vm257_vm1, %v12484_v35  ;;  %4189 = vrot.lane.b32.xlu1 %v12253_v6, %s12135_s30 }
  0xc4   : > { %10523 = vmatprep.subr.msk.mxu0 %vm257_vm1, %v12492_v36  ;;  %1529 = vrot.lane.b32.xlu0 %v12333_v7, %s12127_s14 }
  0xc5   : > { %1104 = vmatprep.mubr.f32.mxu0 %v13805_v0  ;;  %v12501_v37 = vpop.permute.xlu1 %1198  ;;  %v12503_v38 = vpop.permute.xlu0 %1202 }
  0xc6   : > { %10519 = vmatmul.mubr.msk.f32.vlgmr.msra.gmra.mrb[2].mxu0 %vm253_vm2, %v12475_v32  ;;  %v12510_v40 = vsel %vm1206_vm4, %v1201_v33, %v12503_v38  ;;  %v12529_v44 = vsel %vm1206_vm4, %v12501_v37, %v1201_v33 }
  0xc7   : > { %10524 = vmatpush1.msk.msra.mxu0 %vm257_vm1, %v1207_v39  ;;  %4187 = vrot.lane.b32.xlu1 %v12231_v2, %s12135_s30  ;;  %13817 = vst [vmem:[#allocation6_spill] sm:$0xff] %v12529_v44 }
  0xc8   : > { %4191 = vrot.lane.b32.xlu0 %v12228_v1, %s12135_s30  ;;  %10529 = vmatprep.subr.msk.mxu0 %vm257_vm1, %v12510_v40 }
  0xc9   : > { %1295 = vmatprep.mubr.f32.mxu0 %v13805_v0  ;;  %v12525_v42 = vpop.permute.xlu1 %1527  ;;  %v1526_v43 = vpop.permute.xlu0 %1525 }
  0xca   : > { %10525 = vmatmul.mubr.msk.f32.vlgmr.msra.gmra.mrb[0].mxu0 %vm253_vm2, %v12518_v41  ;;  %v12535_v45 = vsel %vm1539_vm5, %v1526_v43, %v12525_v42 }
  0xcb   : > { %10530 = vmatpush1.msk.msra.mxu0 %vm257_vm1, %v12529_v44  ;;  %4199 = vrot.lane.b32.xlu1 %v12238_v3, %s12135_s30 }
  0xcc   : > { %4197 = vrot.lane.b32.xlu0 %v12249_v5, %s12135_s30  ;;  %10535 = vmatprep.subr.msk.mxu0 %vm257_vm1, %v12535_v45 }
  0xcd   : > { %v1534_v46 = vpop.permute.xlu1 %1533  ;;  %v1524_v47 = vpop.permute.xlu0 %1523  ;;  %1437 = vmatprep.mubr.f32.mxu0 %v13805_v0 }
  0xce   : > { %v1540_v48 = vsel %vm1539_vm5, %v1524_v47, %v1526_v43  ;;  %10531 = vmatmul.mubr.msk.f32.vlgmr.msra.gmra.mrb[2].mxu0 %vm253_vm2, %v12518_v41 }
  0xcf   : > { %4195 = vrot.lane.b32.xlu1 %v12241_v4, %s12135_s30  ;;  %10536 = vmatpush1.msk.msra.mxu0 %vm257_vm1, %v1540_v48 }
  0xd0   : > { %1537 = vrot.lane.b32.xlu0 %v12349_v8, %s12127_s14  ;;  %1628 = vmatprep.mubr.f32.mxu0 %v13805_v0 }
  0xd1   : > { %v12560_v50 = vpop.permute.xlu1 %1531  ;;  %v12562_v51 = vpop.permute.xlu0 %1535 }
  0xd2   : > { %v12566_v52 = vsel %vm1539_vm5, %v12560_v50, %v1534_v46  ;;  %v12570_v53 = vsel %vm1539_vm5, %v1534_v46, %v12562_v51  ;;  %10537 = vmatmul.mubr.msk.f32.vlgmr.msra.gmra.mrb[0].mxu0 %vm253_vm2, %v12555_v49 }
  0xd3   : > { %13818 = vst [vmem:[#allocation7_spill] sm:$0xff] %v12566_v52  ;;  %4522 = vrot.lane.b32.xlu1 %v12253_v6, %s12136_s9  ;;  %10541 = vmatprep.subr.msk.mxu0 %vm257_vm1, %v12570_v53 }
  0xd4   : > { %1862 = vrot.lane.b32.xlu0 %v12333_v7, %s12128_s17  ;;  %10542 = vmatpush1.msk.msra.mxu0 %vm257_vm1, %v12566_v52 }
  0xd5   : > { %v12582_v54 = vpop.permute.xlu1 %1860  ;;  %v1859_v55 = vpop.permute.xlu0 %1858  ;;  %1770 = vmatprep.mubr.f32.mxu0 %v13805_v0 }
  0xd6   : > { %v1874_v56 = vsel %vm1872_vm6, %v1859_v55, %v12582_v54  ;;  %10543 = vmatmul.mubr.msk.f32.vlgmr.msra.gmra.mrb[2].mxu0 %vm253_vm2, %v12555_v49 }
  0xd7   : > { %4520 = vrot.lane.b32.xlu1 %v12231_v2, %s12136_s9  ;;  %10547 = vmatprep.subr.msk.mxu0 %vm257_vm1, %v1874_v56  ;;  %v12678_v56 = vld [vmem:[%s13793_s1 + $0x38] sm:$0x3f] }
  0xd8   : > { %4524 = vrot.lane.b32.xlu0 %v12228_v1, %s12136_s9  ;;  %1961 = vmatprep.mubr.f32.mxu0 %v13805_v0 }
  0xd9   : > { %v1867_v57 = vpop.permute.xlu1 %1866  ;;  %v1857_v58 = vpop.permute.xlu0 %1856 }
  0xda   : > { %v1873_v60 = vsel %vm1872_vm6, %v1857_v58, %v1859_v55 }
  0xdb   : > { %4532 = vrot.lane.b32.xlu1 %v12238_v3, %s12136_s9  ;;  %10548 = vmatpush1.msk.msra.mxu0 %vm257_vm1, %v1873_v60 }
  0xdc   : > { %4530 = vrot.lane.b32.xlu0 %v12249_v5, %s12136_s9  ;;  %10549 = vmatmul.mubr.msk.f32.vlgmr.msra.gmra.mrb[0].mxu0 %vm253_vm2, %v12598_v59 }
  0xdd   : > { %v12608_v61 = vpop.permute.xlu1 %1864  ;;  %v12610_v62 = vpop.permute.xlu0 %1868  ;;  %2103 = vmatprep.mubr.f32.mxu0 %v13805_v0 }
  0xde   : > { %v1877_v63 = vsel %vm1872_vm6, %v12608_v61, %v1867_v57  ;;  %v1878_v10 = vsel %vm1872_vm6, %v1867_v57, %v12610_v62 }
  0xdf   : > { %4528 = vrot.lane.b32.xlu1 %v12241_v4, %s12136_s9  ;;  %10553 = vmatprep.subr.msk.mxu0 %vm257_vm1, %v1878_v10 }
  0xe0   : > { %1870 = vrot.lane.b32.xlu0 %v12349_v8, %s12128_s17  ;;  %10554 = vmatpush1.msk.msra.mxu0 %vm257_vm1, %v1877_v63  ;;  %s12142_s17 = smov 29  }
  0xe1   : > { %v12623_v13 = vpop.permute.xlu1 %2193  ;;  %v2192_v14 = vpop.permute.xlu0 %2191  ;;  %10555 = vmatmul.mubr.msk.f32.vlgmr.msra.gmra.mrb[2].mxu0 %vm253_vm2, %v12598_v59 }
  0xe2   : > { %v2207_v16 = vsel %vm2205_vm7, %v2192_v14, %v12623_v13  ;;  %2294 = vmatprep.mubr.f32.mxu0 %v13805_v0 }
  0xe3   : > { %4855 = vrot.lane.b32.xlu1 %v12253_v6, %s12137_s26  ;;  %10559 = vmatprep.subr.msk.mxu0 %vm257_vm1, %v2207_v16 }
  0xe4   : > { %2195 = vrot.lane.b32.xlu0 %v12333_v7, %s12129_s18 }
  0xe5   : > { %v2200_v20 = vpop.permute.xlu1 %2199  ;;  %v2190_v22 = vpop.permute.xlu0 %2189 }
  0xe6   : > { %v2206_v29 = vsel %vm2205_vm7, %v2190_v22, %v2192_v14 }
  0xe7   : > { %4853 = vrot.lane.b32.xlu1 %v12231_v2, %s12137_s26  ;;  %10560 = vmatpush1.msk.msra.mxu0 %vm257_vm1, %v2206_v29 }
  0xe8   : > { %4857 = vrot.lane.b32.xlu0 %v12228_v1, %s12137_s26  ;;  %10561 = vmatmul.mubr.msk.f32.vlgmr.msra.gmra.mrb[0].mxu0 %vm253_vm2, %v12638_v23 }
  0xe9   : > { %v12648_v30 = vpop.permute.xlu1 %2197  ;;  %v12650_v33 = vpop.permute.xlu0 %2201  ;;  %2436 = vmatprep.mubr.f32.mxu0 %v13805_v0 }
  0xea   : > { %v2210_v34 = vsel %vm2205_vm7, %v12648_v30, %v2200_v20  ;;  %v2211_v39 = vsel %vm2205_vm7, %v2200_v20, %v12650_v33 }
  0xeb   : > { %4865 = vrot.lane.b32.xlu1 %v12238_v3, %s12137_s26  ;;  %10565 = vmatprep.subr.msk.mxu0 %vm257_vm1, %v2211_v39  ;;  %v12733_v39 = vld [vmem:[%s13793_s1 + $0x40] sm:$0x3f] }
  0xec   : > { %4863 = vrot.lane.b32.xlu0 %v12249_v5, %s12137_s26  ;;  %10566 = vmatpush1.msk.msra.mxu0 %vm257_vm1, %v2210_v34 }
  0xed   : > { %v12663_v43 = vpop.permute.xlu1 %2526  ;;  %v2525_v46 = vpop.permute.xlu0 %2524  ;;  %10567 = vmatmul.mubr.msk.f32.vlgmr.msra.gmra.mrb[2].mxu0 %vm253_vm2, %v12638_v23 }
  0xee   : > { %v2540_v47 = vsel %vm2538_vm8, %v2525_v46, %v12663_v43  ;;  %2627 = vmatprep.mubr.f32.mxu0 %v13805_v0 }
  0xef   : > { %4861 = vrot.lane.b32.xlu1 %v12241_v4, %s12137_s26  ;;  %10571 = vmatprep.subr.msk.mxu0 %vm257_vm1, %v2540_v47 }
  0xf0   : > { %2203 = vrot.lane.b32.xlu0 %v12349_v8, %s12129_s18 }
  0xf1   : > { %v2533_v48 = vpop.permute.xlu1 %2532  ;;  %v2523_v55 = vpop.permute.xlu0 %2522 }
  0xf2   : > { %v2539_v57 = vsel %vm2538_vm8, %v2523_v55, %v2525_v46 }
  0xf3   : > { %5188 = vrot.lane.b32.xlu1 %v12253_v6, %s12138_s5  ;;  %10572 = vmatpush1.msk.msra.mxu0 %vm257_vm1, %v2539_v57 }
  0xf4   : > { %2528 = vrot.lane.b32.xlu0 %v12333_v7, %s12130_s19  ;;  %10573 = vmatmul.mubr.msk.f32.vlgmr.msra.gmra.mrb[0].mxu0 %vm253_vm2, %v12678_v56 }
  0xf5   : > { %v12688_v58 = vpop.permute.xlu1 %2530  ;;  %v12690_v60 = vpop.permute.xlu0 %2534  ;;  %2769 = vmatprep.mubr.f32.mxu0 %v13805_v0 }
  0xf6   : > { %v2543_v63 = vsel %vm2538_vm8, %v12688_v58, %v2533_v48  ;;  %v2544_v10 = vsel %vm2538_vm8, %v2533_v48, %v12690_v60 }
  0xf7   : > { %5186 = vrot.lane.b32.xlu1 %v12231_v2, %s12138_s5  ;;  %10577 = vmatprep.subr.msk.mxu0 %vm257_vm1, %v2544_v10 }
  0xf8   : > { %5190 = vrot.lane.b32.xlu0 %v12228_v1, %s12138_s5  ;;  %10578 = vmatpush1.msk.msra.mxu0 %vm257_vm1, %v2543_v63 }
  0xf9   : > { %v2858_v14 = vpop.permute.xlu1 %2857  ;;  %v236_v16 = vpop.permute.xlu0 %235  ;;  %10579 = vmatmul.mubr.msk.f32.vlgmr.msra.gmra.mrb[2].mxu0 %vm253_vm2, %v12678_v56 }
  0xfa   : > { %v12707_v20 = vsel %vm245_vm0, %v236_v16, %v12379_v12  ;;  %v12711_v22 = vsel %vm245_vm0, %v12371_v9, %v236_v16  ;;  %2960 = vmatprep.mubr.f32.mxu0 %v13805_v0 }
  0xfb   : > { %5198 = vrot.lane.b32.xlu1 %v12238_v3, %s12138_s5  ;;  %10491 = vmatprep.subr.msk.mxu1 %vm257_vm1, %v12707_v20 }
  0xfc   : > { %5196 = vrot.lane.b32.xlu0 %v12249_v5, %s12138_s5  ;;  %10492 = vmatpush1.msk.msra.mxu1 %vm257_vm1, %v12711_v22 }
  0xfd   : > { %v2856_v12 = vpop.permute.xlu1 %2855  ;;  %v12722_v29 = vpop.permute.xlu0 %2859  ;;  %10839 = vmatprep.subr.mxu1 %v13805_v0  ;;  %10493 = vmatmul.mubr.msk.f32.vlgmr.msra.gmra.mrb[0].mxu1 %vm253_vm2, %v12397_v17 }
  0xfe   : > { %v2872_v9 = vsel %vm2871_vm9, %v2856_v12, %v2858_v14  ;;  %v2873_v34 = vsel %vm2871_vm9, %v2858_v14, %v12722_v29  ;;  %10841 = vmatprep.mubr.msk.f32.mxu1 %vm12139_vm10, %v13805_v0 }
  0xff   : > { %5194 = vrot.lane.b32.xlu1 %v12241_v4, %s12138_s5  ;;  %10583 = vmatprep.subr.msk.mxu0 %vm257_vm1, %v2873_v34 }
 0x100   : > { %2536 = vrot.lane.b32.xlu0 %v12349_v8, %s12130_s19  ;;  %10584 = vmatpush1.msk.msra.mxu0 %vm257_vm1, %v2872_v9  ;;  %v12797_v9 = vld [vmem:[%s13793_s1 + $0x48] sm:$0x3f] }
 0x101   : > { %v12743_v46 = vpop.permute.xlu1 %2867  ;;  %v2866_v47 = vpop.permute.xlu0 %2865  ;;  %10585 = vmatmul.mubr.msk.f32.vlgmr.msra.gmra.mrb[0].mxu0 %vm253_vm2, %v12733_v39 }
 0x102   : > { %v2877_v48 = vsel %vm2871_vm9, %v2866_v47, %v12743_v46  ;;  %3102 = vmatprep.mubr.f32.mxu0 %v13805_v0 }
 0x103   : > { %5521 = vrot.lane.b32.xlu1 %v12253_v6, %s12140_s7  ;;  %10589 = vmatprep.subr.msk.mxu0 %vm257_vm1, %v2877_v48 }
 0x104   : > { %2861 = vrot.lane.b32.xlu0 %v12333_v7, %s12131_s20 }
 0x105   : > { %v12755_v55 = vpop.permute.xlu1 %2863  ;;  %v12757_v57 = vpop.permute.xlu0 %243 }
 0x106   : > { %13819 = vst [vmem:[#allocation8_spill] sm:$0xff] %v12757_v57  ;;  %v2876_v63 = vsel %vm2871_vm9, %v12755_v55, %v2866_v47  ;;  %v12764_v10 = vsel %vm245_vm0, %v12377_v11, %v12757_v57 }
 0x107   : > { %5519 = vrot.lane.b32.xlu1 %v12231_v2, %s12140_s7  ;;  %10840 = vmatpush3.msk.msra.mxu1 %vm257_vm1, %v12764_v10 }
 0x108   : > { %5523 = vrot.lane.b32.xlu0 %v12228_v1, %s12140_s7  ;;  %10590 = vmatpush1.msk.msra.mxu0 %vm257_vm1, %v2876_v63 }
 0x109   : > { %v12773_v14 = vpop.permute.xlu1 %3192  ;;  %v3191_v16 = vpop.permute.xlu0 %3190  ;;  %10591 = vmatmul.mubr.msk.f32.vlgmr.msra.gmra.mrb[2].mxu0 %vm253_vm2, %v12733_v39  ;;  %10842 = vmatmul.mubr.msk.f32.vlgmr.msra.gmra.mrb[2].mxu1 %vm253_vm2, %v12397_v17 }
 0x10a   : > { %v3206_v11 = vsel %vm3204_vm11, %v3191_v16, %v12773_v14  ;;  %10502 = vmatprep.subr.msk.mxu1 %vm257_vm1, %v12333_v7  ;;  %707 = vmatprep.mubr.f32.mxu1 %v13805_v0 }
 0x10b   : > { %5531 = vrot.lane.b32.xlu1 %v12238_v3, %s12140_s7  ;;  %10595 = vmatprep.subr.msk.mxu0 %vm257_vm1, %v3206_v11 }
 0x10c   : > { %5529 = vrot.lane.b32.xlu0 %v12249_v5, %s12140_s7  ;;  %10503 = vmatpush1.msk.msra.mxu1 %vm257_vm1, %v12228_v1 }
 0x10d   : > { %v3199_v17 = vpop.permute.xlu1 %3198  ;;  %v3189_v12 = vpop.permute.xlu0 %3188  ;;  %3293 = vmatprep.mubr.f32.mxu0 %v13805_v0  ;;  %10504 = vmatmul.mubr.msk.f32.vlgmr.msra.gmra.mrb[0].mxu1 %vm253_vm2, %v12434_v24 }
 0x10e   : > { %v3205_v34 = vsel %vm3204_vm11, %v3189_v12, %v3191_v16  ;;  %10844 = vmatprep.subr.mxu1 %v13805_v0  ;;  %10846 = vmatprep.mubr.msk.f32.mxu1 %vm12139_vm10, %v13805_v0 }
 0x10f   : > { %5527 = vrot.lane.b32.xlu1 %v12241_v4, %s12140_s7  ;;  %10596 = vmatpush1.msk.msra.mxu0 %vm257_vm1, %v3205_v34 }
 0x110   : > { %2869 = vrot.lane.b32.xlu0 %v12349_v8, %s12131_s20  ;;  %10597 = vmatmul.mubr.msk.f32.vlgmr.msra.gmra.mrb[0].mxu0 %vm253_vm2, %v12797_v9  ;;  %s12141_s20 = smov 30  }
 0x111   : > { %v12810_v47 = vpop.permute.xlu1 %3196  ;;  %v12812_v48 = vpop.permute.xlu0 %3200  ;;  %10845 = vmatpush3.msk.msra.mxu1 %vm257_vm1, %v12238_v3  ;;  %3435 = vmatprep.mubr.f32.mxu0 %v13805_v0 }
 0x112   : > { %v3209_v63 = vsel %vm3204_vm11, %v12810_v47, %v3199_v17  ;;  %v3210_v16 = vsel %vm3204_vm11, %v3199_v17, %v12812_v48  ;;  %10847 = vmatmul.mubr.msk.f32.vlgmr.msra.gmra.mrb[4].mxu1 %vm253_vm2, %v12434_v24 }
 0x113   : > { %5854 = vrot.lane.b32.xlu1 %v12253_v6, %s12141_s20  ;;  %10601 = vmatprep.subr.msk.mxu0 %vm257_vm1, %v3210_v16  ;;  %v12860_v16 = vld [vmem:[%s13793_s1 + $0x50] sm:$0x3f] }
 0x114   : > { %3194 = vrot.lane.b32.xlu0 %v12333_v7, %s12132_s21  ;;  %10602 = vmatpush1.msk.msra.mxu0 %vm257_vm1, %v3209_v63 }
 0x115   : > { %v3524_v11 = vpop.permute.xlu1 %3523  ;;  %v864_v12 = vpop.permute.xlu0 %863  ;;  %10603 = vmatmul.mubr.msk.f32.vlgmr.msra.gmra.mrb[2].mxu0 %vm253_vm2, %v12797_v9  ;;  %1033 = vmatprep.mubr.f32.mxu1 %v13805_v0 }
 0x116   : > { %v12834_v24 = vsel %vm873_vm3, %v12402_v18, %v864_v12  ;;  %v12838_v17 = vsel %vm873_vm3, %v864_v12, %v12441_v25  ;;  %3626 = vmatprep.mubr.f32.mxu0 %v13805_v0 }
 0x117   : > { %13820 = vst [vmem:[#allocation9_spill] sm:$0xff] %v12838_v17  ;;  %5852 = vrot.lane.b32.xlu1 %v12231_v2, %s12141_s20  ;;  %10514 = vmatprep.subr.msk.mxu1 %vm257_vm1, %v12838_v17 }
 0x118   : > { %5856 = vrot.lane.b32.xlu0 %v12228_v1, %s12141_s20  ;;  %10515 = vmatpush1.msk.msra.mxu1 %vm257_vm1, %v12834_v24 }
 0x119   : > { %v3522_v18 = vpop.permute.xlu1 %3521  ;;  %v12849_v34 = vpop.permute.xlu0 %3525  ;;  %10849 = vmatprep.subr.mxu1 %v13805_v0  ;;  %10516 = vmatmul.mubr.msk.f32.vlgmr.msra.gmra.mrb[0].mxu1 %vm253_vm2, %v12475_v32 }
 0x11a   : > { %v3538_v25 = vsel %vm3537_vm12, %v3522_v18, %v3524_v11  ;;  %v3539_v63 = vsel %vm3537_vm12, %v3524_v11, %v12849_v34  ;;  %10851 = vmatprep.mubr.msk.f32.mxu1 %vm12139_vm10, %v13805_v0 }
 0x11b   : > { %5864 = vrot.lane.b32.xlu1 %v12238_v3, %s12141_s20  ;;  %10607 = vmatprep.subr.msk.mxu0 %vm257_vm1, %v3539_v63 }
 0x11c   : > { %5862 = vrot.lane.b32.xlu0 %v12249_v5, %s12141_s20  ;;  %10608 = vmatpush1.msk.msra.mxu0 %vm257_vm1, %v3538_v25 }
 0x11d   : > { %v12870_v12 = vpop.permute.xlu1 %3533  ;;  %v3532_v11 = vpop.permute.xlu0 %3531  ;;  %10609 = vmatmul.mubr.msk.f32.vlgmr.msra.gmra.mrb[0].mxu0 %vm253_vm2, %v12860_v16 }
 0x11e   : > { %v3543_v18 = vsel %vm3537_vm12, %v3532_v11, %v12870_v12  ;;  %3768 = vmatprep.mubr.f32.mxu0 %v13805_v0 }
 0x11f   : > { %5860 = vrot.lane.b32.xlu1 %v12241_v4, %s12141_s20  ;;  %10613 = vmatprep.subr.msk.mxu0 %vm257_vm1, %v3543_v18 }
 0x120   : > { %3202 = vrot.lane.b32.xlu0 %v12349_v8, %s12132_s21 }
 0x121   : > { %v12882_v25 = vpop.permute.xlu1 %3529  ;;  %v12884_v63 = vpop.permute.xlu0 %871 }
 0x122   : > { %13821 = vst [vmem:[#allocation10_spill] sm:$0xff] %v12884_v63  ;;  %v3542_v52 = vsel %vm3537_vm12, %v12882_v25, %v3532_v11  ;;  %v12891_v44 = vsel %vm873_vm3, %v12443_v26, %v12884_v63 }
 0x123   : > { %6187 = vrot.lane.b32.xlu1 %v12253_v6, %s12142_s17  ;;  %10850 = vmatpush3.msk.msra.mxu1 %vm257_vm1, %v12891_v44 }
 0x124   : > { %3527 = vrot.lane.b32.xlu0 %v12333_v7, %s12133_s22  ;;  %10614 = vmatpush1.msk.msra.mxu0 %vm257_vm1, %v3542_v52 }
 0x125   : > { %v3857_v18 = vpop.permute.xlu1 %3856  ;;  %10852 = vmatmul.mubr.msk.f32.vlgmr.msra.gmra.mrb[6].mxu1 %vm253_vm2, %v12475_v32  ;;  %10615 = vmatmul.mubr.msk.f32.vlgmr.msra.gmra.mrb[2].mxu0 %vm253_vm2, %v12860_v16 }
 0x126   : > { %v1197_v26 = vpop.permute.xlu0 %1196  ;;  %1366 = vmatprep.mubr.f32.mxu1 %v13805_v0  ;;  %3959 = vmatprep.mubr.f32.mxu0 %v13805_v0 }
 0x127   : > { %v12908_v11 = vsel %vm1206_vm4, %v12460_v28, %v1197_v26  ;;  %v12912_v63 = vsel %vm1206_vm4, %v1197_v26, %v12501_v37  ;;  %6185 = vrot.lane.b32.xlu1 %v12231_v2, %s12142_s17  ;;  %v12935_v26 = vld [vmem:[%s13793_s1 + $0x58] sm:$0x3f] }
 0x128   : > { %13822 = vst [vmem:[#allocation11_spill] sm:$0xff] %v12912_v63  ;;  %6189 = vrot.lane.b32.xlu0 %v12228_v1, %s12142_s17  ;;  %10526 = vmatprep.subr.msk.mxu1 %vm257_vm1, %v12912_v63 }
 0x129   : > { %10527 = vmatpush1.msk.msra.mxu1 %vm257_vm1, %v12908_v11  ;;  %v3855_v32 = vpop.permute.xlu1 %3854 }
 0x12a   : > { %v3871_v28 = vsel %vm3870_vm13, %v3855_v32, %v3857_v18  ;;  %v12923_v52 = vpop.permute.xlu0 %3858  ;;  %10854 = vmatprep.subr.mxu1 %v13805_v0  ;;  %10528 = vmatmul.mubr.msk.f32.vlgmr.msra.gmra.mrb[0].mxu1 %vm253_vm2, %v12518_v41 }
 0x12b   : > { %v3872_v37 = vsel %vm3870_vm13, %v3857_v18, %v12923_v52  ;;  %6197 = vrot.lane.b32.xlu1 %v12238_v3, %s12142_s17  ;;  %10856 = vmatprep.mubr.msk.f32.mxu1 %vm12139_vm10, %v13805_v0 }
 0x12c   : > { %6195 = vrot.lane.b32.xlu0 %v12249_v5, %s12142_s17  ;;  %10619 = vmatprep.subr.msk.mxu0 %vm257_vm1, %v3872_v37 }
 0x12d   : > { %10620 = vmatpush1.msk.msra.mxu0 %vm257_vm1, %v3871_v28  ;;  %v12943_v32 = vpop.permute.xlu1 %3866 }
 0x12e   : > { %v3865_v18 = vpop.permute.xlu0 %3864  ;;  %10621 = vmatmul.mubr.msk.f32.vlgmr.msra.gmra.mrb[0].mxu0 %vm253_vm2, %v12935_v26 }
 0x12f   : > { %v3876_v63 = vsel %vm3870_vm13, %v3865_v18, %v12943_v32  ;;  %6193 = vrot.lane.b32.xlu1 %v12241_v4, %s12142_s17  ;;  %4101 = vmatprep.mubr.f32.mxu0 %v13805_v0 }
 0x130   : > { %3535 = vrot.lane.b32.xlu0 %v12349_v8, %s12133_s22  ;;  %10625 = vmatprep.subr.msk.mxu0 %vm257_vm1, %v3876_v63 }
 0x131   : > { %v12955_v28 = vpop.permute.xlu1 %3862 }
 0x132   : > { %v3875_v37 = vsel %vm3870_vm13, %v12955_v28, %v3865_v18  ;;  %v12959_v17 = vpop.permute.xlu0 %1204 }
 0x133   : > { %13823 = vst [vmem:[#allocation12_spill] sm:$0xff] %v12959_v17  ;;  %v12964_v35 = vsel %vm1206_vm4, %v12503_v38, %v12959_v17  ;;  %6520 = vrot.lane.b32.xlu1 %v12253_v6, %s12143_s28  ;;  %10626 = vmatpush1.msk.msra.mxu0 %vm257_vm1, %v3875_v37 }
 0x134   : > { %3860 = vrot.lane.b32.xlu0 %v12333_v7, %s12134_s25  ;;  %10855 = vmatpush3.msk.msra.mxu1 %vm257_vm1, %v12964_v35 }
 0x135   : > { %v4190_v63 = vpop.permute.xlu1 %4189  ;;  %10857 = vmatmul.mubr.msk.f32.vlgmr.msra.gmra.mrb[8].mxu1 %vm253_vm2, %v12518_v41  ;;  %10627 = vmatmul.mubr.msk.f32.vlgmr.msra.gmra.mrb[2].mxu0 %vm253_vm2, %v12935_v26 }
 0x136   : > { %v1530_v38 = vpop.permute.xlu0 %1529  ;;  %1699 = vmatprep.mubr.f32.mxu1 %v13805_v0  ;;  %4292 = vmatprep.mubr.f32.mxu0 %v13805_v0 }
 0x137   : > { %v12981_v18 = vsel %vm1539_vm5, %v12525_v42, %v1530_v38  ;;  %v12985_v37 = vsel %vm1539_vm5, %v1530_v38, %v12560_v50  ;;  %6518 = vrot.lane.b32.xlu1 %v12231_v2, %s12143_s28  ;;  %v13825_v50 = vmov 0.0  }
 0x138   : > { %13824 = vst [vmem:[#allocation13_spill] sm:$0xff] %v12985_v37  ;;  %6522 = vrot.lane.b32.xlu0 %v12228_v1, %s12143_s28  ;;  %10538 = vmatprep.subr.msk.mxu1 %vm257_vm1, %v12985_v37  ;;  %v13008_v1 = vld [vmem:[%s13793_s1 + $0x60] sm:$0x3f] }
 0x139   : > { %10539 = vmatpush1.msk.msra.mxu1 %vm257_vm1, %v12981_v18  ;;  %v4188_v41 = vpop.permute.xlu1 %4187 }
 0x13a   : > { %v4204_v42 = vsel %vm4203_vm14, %v4188_v41, %v4190_v63  ;;  %v12996_v0 = vpop.permute.xlu0 %4191  ;;  %10859 = vmatprep.subr.mxu1 %v13825_v50  ;;  %10540 = vmatmul.mubr.msk.f32.vlgmr.msra.gmra.mrb[0].mxu1 %vm253_vm2, %v12555_v49 }
 0x13b   : > { %v4205_v2 = vsel %vm4203_vm14, %v4190_v63, %v12996_v0  ;;  %6530 = vrot.lane.b32.xlu1 %v12238_v3, %s12143_s28  ;;  %10861 = vmatprep.mubr.msk.f32.mxu1 %vm12139_vm10, %v13825_v50 }
 0x13c   : > { %6528 = vrot.lane.b32.xlu0 %v12249_v5, %s12143_s28  ;;  %10631 = vmatprep.subr.msk.mxu0 %vm257_vm1, %v4205_v2 }
 0x13d   : > { %10632 = vmatpush1.msk.msra.mxu0 %vm257_vm1, %v4204_v42  ;;  %v13016_v38 = vpop.permute.xlu1 %4199 }
 0x13e   : > { %v4198_v63 = vpop.permute.xlu0 %4197  ;;  %10633 = vmatmul.mubr.msk.f32.vlgmr.msra.gmra.mrb[0].mxu0 %vm253_vm2, %v13008_v1 }
 0x13f   : > { %v4209_v3 = vsel %vm4203_vm14, %v4198_v63, %v13016_v38  ;;  %6526 = vrot.lane.b32.xlu1 %v12241_v4, %s12143_s28  ;;  %4434 = vmatprep.mubr.f32.mxu0 %v13825_v50 }
 0x140   : > { %3868 = vrot.lane.b32.xlu0 %v12349_v8, %s12134_s25  ;;  %10637 = vmatprep.subr.msk.mxu0 %vm257_vm1, %v4209_v3 }
 0x141   : > { %v13028_v41 = vpop.permute.xlu1 %4195 }
 0x142   : > { %v4208_v42 = vsel %vm4203_vm14, %v13028_v41, %v4198_v63  ;;  %v13032_v2 = vpop.permute.xlu0 %1537 }
 0x143   : > { %13826 = vst [vmem:[#allocation14_spill] sm:$0xff] %v13032_v2  ;;  %v13037_v37 = vsel %vm1539_vm5, %v12562_v51, %v13032_v2  ;;  %4201 = vrot.lane.b32.xlu1 %v12349_v8, %s12135_s30  ;;  %10638 = vmatpush1.msk.msra.mxu0 %vm257_vm1, %v4208_v42 }
 0x144   : > { %4193 = vrot.lane.b32.xlu0 %v12333_v7, %s12135_s30  ;;  %10860 = vmatpush3.msk.msra.mxu1 %vm257_vm1, %v13037_v37 }
 0x145   : > { %v4523_v4 = vpop.permute.xlu1 %4522  ;;  %10862 = vmatmul.mubr.msk.f32.vlgmr.msra.gmra.mrb[10].mxu1 %vm253_vm2, %v12555_v49  ;;  %10639 = vmatmul.mubr.msk.f32.vlgmr.msra.gmra.mrb[2].mxu0 %vm253_vm2, %v13008_v1 }
 0x146   : > { %v1863_v51 = vpop.permute.xlu0 %1862  ;;  %2032 = vmatprep.mubr.f32.mxu1 %v13825_v50  ;;  %4625 = vmatprep.mubr.f32.mxu0 %v13825_v50 }
 0x147   : > { %v1875_v63 = vsel %vm1872_vm6, %v12582_v54, %v1863_v51  ;;  %v1876_v3 = vsel %vm1872_vm6, %v1863_v51, %v12608_v61  ;;  %4534 = vrot.lane.b32.xlu1 %v12349_v8, %s12136_s9  ;;  %v13075_v61 = vld [vmem:[%s13793_s1 + $0x68] sm:$0x3f] }
 0x148   : > { %4526 = vrot.lane.b32.xlu0 %v12333_v7, %s12136_s9  ;;  %10550 = vmatprep.subr.msk.mxu1 %vm257_vm1, %v1876_v3 }
 0x149   : > { %10551 = vmatpush1.msk.msra.mxu1 %vm257_vm1, %v1875_v63  ;;  %v4521_v49 = vpop.permute.xlu1 %4520 }
 0x14a   : > { %v4537_v42 = vsel %vm4536_vm15, %v4521_v49, %v4523_v4  ;;  %v13063_v2 = vpop.permute.xlu0 %4524  ;;  %10864 = vmatprep.subr.mxu1 %v13825_v50  ;;  %10552 = vmatmul.mubr.msk.f32.vlgmr.msra.gmra.mrb[0].mxu1 %vm253_vm2, %v12598_v59 }
 0x14b   : > { %v4538_v54 = vsel %vm4536_vm15, %v4523_v4, %v13063_v2  ;;  %4867 = vrot.lane.b32.xlu1 %v12349_v8, %s12137_s26  ;;  %10866 = vmatprep.mubr.msk.f32.mxu1 %vm12139_vm10, %v13825_v50 }
 0x14c   : > { %4859 = vrot.lane.b32.xlu0 %v12333_v7, %s12137_s26  ;;  %10643 = vmatprep.subr.msk.mxu0 %vm257_vm1, %v4538_v54 }
 0x14d   : > { %10644 = vmatpush1.msk.msra.mxu0 %vm257_vm1, %v4537_v42  ;;  %v13083_v51 = vpop.permute.xlu1 %4532 }
 0x14e   : > { %v4531_v4 = vpop.permute.xlu0 %4530  ;;  %10645 = vmatmul.mubr.msk.f32.vlgmr.msra.gmra.mrb[0].mxu0 %vm253_vm2, %v13075_v61 }
 0x14f   : > { %v4542_v63 = vsel %vm4536_vm15, %v4531_v4, %v13083_v51  ;;  %5200 = vrot.lane.b32.xlu1 %v12349_v8, %s12138_s5  ;;  %4767 = vmatprep.mubr.f32.mxu0 %v13825_v50 }
 0x150   : > { %5192 = vrot.lane.b32.xlu0 %v12333_v7, %s12138_s5  ;;  %10649 = vmatprep.subr.msk.mxu0 %vm257_vm1, %v4542_v63 }
 0x151   : > { %v13095_v3 = vpop.permute.xlu1 %4528 }
 0x152   : > { %v4541_v49 = vsel %vm4536_vm15, %v13095_v3, %v4531_v4  ;;  %v1871_v42 = vpop.permute.xlu0 %1870 }
 0x153   : > { %v1879_v54 = vsel %vm1872_vm6, %v12610_v62, %v1871_v42  ;;  %5533 = vrot.lane.b32.xlu1 %v12349_v8, %s12140_s7  ;;  %10650 = vmatpush1.msk.msra.mxu0 %vm257_vm1, %v4541_v49  ;;  %vm4869_vm6 = vcmask 490496  }
 0x154   : > { %5525 = vrot.lane.b32.xlu0 %v12333_v7, %s12140_s7  ;;  %10865 = vmatpush3.msk.msra.mxu1 %vm257_vm1, %v1879_v54 }
 0x155   : > { %v4856_v63 = vpop.permute.xlu1 %4855  ;;  %10867 = vmatmul.mubr.msk.f32.vlgmr.msra.gmra.mrb[12].mxu1 %vm253_vm2, %v12598_v59  ;;  %10651 = vmatmul.mubr.msk.f32.vlgmr.msra.gmra.mrb[2].mxu0 %vm253_vm2, %v13075_v61 }
 0x156   : > { %v2196_v4 = vpop.permute.xlu0 %2195  ;;  %2365 = vmatprep.mubr.f32.mxu1 %v13825_v50  ;;  %4958 = vmatprep.mubr.f32.mxu0 %v13825_v50 }
 0x157   : > { %v2208_v62 = vsel %vm2205_vm7, %v12623_v13, %v2196_v4  ;;  %v2209_v49 = vsel %vm2205_vm7, %v2196_v4, %v12648_v30  ;;  %5866 = vrot.lane.b32.xlu1 %v12349_v8, %s12141_s20  ;;  %v13136_v30 = vld [vmem:[%s13793_s1 + $0x70] sm:$0x3f] }
 0x158   : > { %5858 = vrot.lane.b32.xlu0 %v12333_v7, %s12141_s20  ;;  %10562 = vmatprep.subr.msk.mxu1 %vm257_vm1, %v2209_v49  ;;  %v217_v49 = vld [vmem:[%s12223_s10 + $0x20] sm:$0x7] }
 0x159   : > { %10563 = vmatpush1.msk.msra.mxu1 %vm257_vm1, %v2208_v62  ;;  %v4854_v59 = vpop.permute.xlu1 %4853 }
 0x15a   : > { %v4870_v42 = vsel %vm4869_vm6, %v4854_v59, %v4856_v63  ;;  %v13124_v54 = vpop.permute.xlu0 %4857  ;;  %10869 = vmatprep.subr.mxu1 %v13825_v50  ;;  %10564 = vmatmul.mubr.msk.f32.vlgmr.msra.gmra.mrb[0].mxu1 %vm253_vm2, %v12638_v23 }
 0x15b   : > { %v4871_v13 = vsel %vm4869_vm6, %v4856_v63, %v13124_v54  ;;  %6199 = vrot.lane.b32.xlu1 %v12349_v8, %s12142_s17  ;;  %10871 = vmatprep.mubr.msk.f32.mxu1 %vm12139_vm10, %v13825_v50 }
 0x15c   : > { %6191 = vrot.lane.b32.xlu0 %v12333_v7, %s12142_s17  ;;  %10655 = vmatprep.subr.msk.mxu0 %vm257_vm1, %v4871_v13 }
 0x15d   : > { %10656 = vmatpush1.msk.msra.mxu0 %vm257_vm1, %v4870_v42  ;;  %v13144_v4 = vpop.permute.xlu1 %4865 }
 0x15e   : > { %v4864_v63 = vpop.permute.xlu0 %4863  ;;  %10657 = vmatmul.mubr.msk.f32.vlgmr.msra.gmra.mrb[0].mxu0 %vm253_vm2, %v13136_v30 }
 0x15f   : > { %v4875_v62 = vsel %vm4869_vm6, %v4864_v63, %v13144_v4  ;;  %6532 = vrot.lane.b32.xlu1 %v12349_v8, %s12143_s28  ;;  %5100 = vmatprep.mubr.f32.mxu0 %v13825_v50 }
 0x160   : > { %6524 = vrot.lane.b32.xlu0 %v12333_v7, %s12143_s28  ;;  %10661 = vmatprep.subr.msk.mxu0 %vm257_vm1, %v4875_v62 }
 0x161   : > { %v13157_v59 = vpop.permute.xlu1 %4861 }
 0x162   : > { %v4874_v42 = vsel %vm4869_vm6, %v13157_v59, %v4864_v63  ;;  %v2204_v13 = vpop.permute.xlu0 %2203 }
 0x163   : > { %v2212_v17 = vsel %vm2205_vm7, %v12650_v33, %v2204_v13  ;;  %7449 = vrot.lane.b32.xlu1 %v217_v49, %s12125_s12  ;;  %10662 = vmatpush1.msk.msra.mxu0 %vm257_vm1, %v4874_v42  ;;  %vm5202_vm7 = vcmask 261120  }
 0x164   : > { %7149 = vrot.lane.b32.xlu0 %v217_v49, %s12124_s11  ;;  %10870 = vmatpush3.msk.msra.mxu1 %vm257_vm1, %v2212_v17 }
 0x165   : > { %v5189_v57 = vpop.permute.xlu1 %5188  ;;  %10872 = vmatmul.mubr.msk.f32.vlgmr.msra.gmra.mrb[14].mxu1 %vm253_vm2, %v12638_v23  ;;  %10663 = vmatmul.mubr.msk.f32.vlgmr.msra.gmra.mrb[2].mxu0 %vm253_vm2, %v13136_v30 }
 0x166   : > { %v2529_v63 = vpop.permute.xlu0 %2528  ;;  %2698 = vmatprep.mubr.f32.mxu1 %v13825_v50  ;;  %5291 = vmatprep.mubr.f32.mxu0 %v13825_v50 }
 0x167   : > { %v2541_v33 = vsel %vm2538_vm8, %v12663_v43, %v2529_v63  ;;  %v2542_v62 = vsel %vm2538_vm8, %v2529_v63, %v12688_v58  ;;  %8049 = vrot.lane.b32.xlu1 %v217_v49, %s12127_s14  ;;  %v13194_v58 = vld [vmem:[%s13793_s1 + $0x78] sm:$0x3f] }
 0x168   : > { %7749 = vrot.lane.b32.xlu0 %v217_v49, %s12126_s13  ;;  %10574 = vmatprep.subr.msk.mxu1 %vm257_vm1, %v2542_v62 }
 0x169   : > { %10575 = vmatpush1.msk.msra.mxu1 %vm257_vm1, %v2541_v33  ;;  %v5187_v23 = vpop.permute.xlu1 %5186 }
 0x16a   : > { %v5203_v17 = vsel %vm5202_vm7, %v5187_v23, %v5189_v57  ;;  %v13182_v42 = vpop.permute.xlu0 %5190  ;;  %10576 = vmatmul.mubr.msk.f32.vlgmr.msra.gmra.mrb[0].mxu1 %vm253_vm2, %v12678_v56  ;;  %10874 = vmatprep.subr.mxu1 %v13825_v50 }
 0x16b   : > { %v5204_v43 = vsel %vm5202_vm7, %v5189_v57, %v13182_v42  ;;  %10876 = vmatprep.mubr.msk.f32.mxu1 %vm12139_vm10, %v13825_v50 }
 0x16c   : > { %10667 = vmatprep.subr.msk.mxu0 %vm257_vm1, %v5204_v43 }
 0x16d   : > { %10668 = vmatpush1.msk.msra.mxu0 %vm257_vm1, %v5203_v17  ;;  %v13198_v49 = vpop.permute.xlu1 %5198 }
 0x16e   : > { %v5197_v13 = vpop.permute.xlu0 %5196  ;;  %10669 = vmatmul.mubr.msk.f32.vlgmr.msra.gmra.mrb[0].mxu0 %vm253_vm2, %v13194_v58 }
 0x16f   : > { %v5208_v57 = vsel %vm5202_vm7, %v5197_v13, %v13198_v49  ;;  %5433 = vmatprep.mubr.f32.mxu0 %v13825_v50 }
 0x170   : > { %10673 = vmatprep.subr.msk.mxu0 %vm257_vm1, %v5208_v57 }
 0x171   : > { %v13206_v63 = vpop.permute.xlu1 %5194 }
 0x172   : > { %v5207_v33 = vsel %vm5202_vm7, %v13206_v63, %v5197_v13  ;;  %v2537_v62 = vpop.permute.xlu0 %2536 }
 0x173   : > { %v2545_v23 = vsel %vm2538_vm8, %v12690_v60, %v2537_v62  ;;  %10674 = vmatpush1.msk.msra.mxu0 %vm257_vm1, %v5207_v33  ;;  %vm5535_vm8 = vcmask 252928  }
 0x174   : > { %10875 = vmatpush3.msk.msra.mxu1 %vm257_vm1, %v2545_v23  ;;  %10675 = vmatmul.mubr.msk.f32.vlgmr.msra.gmra.mrb[2].mxu0 %vm253_vm2, %v13194_v58 }
 0x175   : > { %10877 = vmatmul.mubr.msk.f32.vlgmr.msra.gmra.mrb[16].mxu1 %vm253_vm2, %v12678_v56  ;;  %v5522_v17 = vpop.permute.xlu1 %5521  ;;  %5624 = vmatprep.mubr.f32.mxu0 %v13825_v50 }
 0x176   : > { %v2862_v43 = vpop.permute.xlu0 %2861  ;;  %3031 = vmatprep.mubr.f32.mxu1 %v13825_v50 }
 0x177   : > { %v2874_v13 = vsel %vm2871_vm9, %v12722_v29, %v2862_v43  ;;  %v2875_v60 = vsel %vm2871_vm9, %v2862_v43, %v12755_v55  ;;  %v13239_v55 = vld [vmem:[%s13793_s1 + $0x80] sm:$0x3f] }
 0x178   : > { %10586 = vmatprep.subr.msk.mxu1 %vm257_vm1, %v2875_v60 }
 0x179   : > { %10587 = vmatpush1.msk.msra.mxu1 %vm257_vm1, %v2874_v13  ;;  %v5520_v57 = vpop.permute.xlu1 %5519 }
 0x17a   : > { %v5536_v56 = vsel %vm5535_vm8, %v5520_v57, %v5522_v17  ;;  %v13227_v33 = vpop.permute.xlu0 %5523  ;;  %10588 = vmatmul.mubr.msk.f32.vlgmr.msra.gmra.mrb[0].mxu1 %vm253_vm2, %v12733_v39  ;;  %10879 = vmatprep.subr.mxu1 %v13825_v50 }
 0x17b   : > { %v5537_v29 = vsel %vm5535_vm8, %v5522_v17, %v13227_v33  ;;  %10881 = vmatprep.mubr.msk.f32.mxu1 %vm12139_vm10, %v13825_v50 }
 0x17c   : > { %10679 = vmatprep.subr.msk.mxu0 %vm257_vm1, %v5537_v29 }
 0x17d   : > { %10680 = vmatpush1.msk.msra.mxu0 %vm257_vm1, %v5536_v56  ;;  %v13243_v62 = vpop.permute.xlu1 %5531 }
 0x17e   : > { %v5530_v23 = vpop.permute.xlu0 %5529  ;;  %10681 = vmatmul.mubr.msk.f32.vlgmr.msra.gmra.mrb[0].mxu0 %vm253_vm2, %v13239_v55 }
 0x17f   : > { %v5541_v17 = vsel %vm5535_vm8, %v5530_v23, %v13243_v62  ;;  %5766 = vmatprep.mubr.f32.mxu0 %v13825_v50 }
 0x180   : > { %10685 = vmatprep.subr.msk.mxu0 %vm257_vm1, %v5541_v17 }
 0x181   : > { %v13251_v43 = vpop.permute.xlu1 %5527 }
 0x182   : > { %v5540_v13 = vsel %vm5535_vm8, %v13251_v43, %v5530_v23  ;;  %v2870_v60 = vpop.permute.xlu0 %2869 }
 0x183   : > { %v2878_v57 = vsel %vm2871_vm9, %v12743_v46, %v2870_v60  ;;  %10686 = vmatpush1.msk.msra.mxu0 %vm257_vm1, %v5540_v13  ;;  %vm5868_vm9 = vcmask 244736  }
 0x184   : > { %10880 = vmatpush3.msk.msra.mxu1 %vm257_vm1, %v2878_v57  ;;  %10687 = vmatmul.mubr.msk.f32.vlgmr.msra.gmra.mrb[2].mxu0 %vm253_vm2, %v13239_v55 }
 0x185   : > { %10882 = vmatmul.mubr.msk.f32.vlgmr.msra.gmra.mrb[18].mxu1 %vm253_vm2, %v12733_v39  ;;  %v5855_v56 = vpop.permute.xlu1 %5854  ;;  %5957 = vmatprep.mubr.f32.mxu0 %v13825_v50 }
 0x186   : > { %v3195_v29 = vpop.permute.xlu0 %3194  ;;  %3364 = vmatprep.mubr.f32.mxu1 %v13825_v50 }
 0x187   : > { %v3207_v23 = vsel %vm3204_vm11, %v12773_v14, %v3195_v29  ;;  %v3208_v46 = vsel %vm3204_vm11, %v3195_v29, %v12810_v47  ;;  %v13284_v47 = vld [vmem:[%s13793_s1 + $0x88] sm:$0x3f] }
 0x188   : > { %10598 = vmatprep.subr.msk.mxu1 %vm257_vm1, %v3208_v46 }
 0x189   : > { %10599 = vmatpush1.msk.msra.mxu1 %vm257_vm1, %v3207_v23  ;;  %v5853_v17 = vpop.permute.xlu1 %5852 }
 0x18a   : > { %v5869_v39 = vsel %vm5868_vm9, %v5853_v17, %v5855_v56  ;;  %v13272_v13 = vpop.permute.xlu0 %5856  ;;  %10600 = vmatmul.mubr.msk.f32.vlgmr.msra.gmra.mrb[0].mxu1 %vm253_vm2, %v12797_v9  ;;  %10884 = vmatprep.subr.mxu1 %v13825_v50 }
 0x18b   : > { %v5870_v14 = vsel %vm5868_vm9, %v5855_v56, %v13272_v13  ;;  %10886 = vmatprep.mubr.msk.f32.mxu1 %vm12139_vm10, %v13825_v50 }
 0x18c   : > { %10691 = vmatprep.subr.msk.mxu0 %vm257_vm1, %v5870_v14 }
 0x18d   : > { %10692 = vmatpush1.msk.msra.mxu0 %vm257_vm1, %v5869_v39  ;;  %v13288_v60 = vpop.permute.xlu1 %5864 }
 0x18e   : > { %v5863_v57 = vpop.permute.xlu0 %5862  ;;  %10693 = vmatmul.mubr.msk.f32.vlgmr.msra.gmra.mrb[0].mxu0 %vm253_vm2, %v13284_v47 }
 0x18f   : > { %v5874_v56 = vsel %vm5868_vm9, %v5863_v57, %v13288_v60  ;;  %6099 = vmatprep.mubr.f32.mxu0 %v13825_v50 }
 0x190   : > { %10697 = vmatprep.subr.msk.mxu0 %vm257_vm1, %v5874_v56 }
 0x191   : > { %v13296_v29 = vpop.permute.xlu1 %5860 }
 0x192   : > { %v5873_v23 = vsel %vm5868_vm9, %v13296_v29, %v5863_v57  ;;  %v3203_v46 = vpop.permute.xlu0 %3202 }
 0x193   : > { %v3211_v17 = vsel %vm3204_vm11, %v12812_v48, %v3203_v46  ;;  %10698 = vmatpush1.msk.msra.mxu0 %vm257_vm1, %v5873_v23  ;;  %vm6201_vm11 = vcmask 236544  }
 0x194   : > { %10885 = vmatpush3.msk.msra.mxu1 %vm257_vm1, %v3211_v17  ;;  %10699 = vmatmul.mubr.msk.f32.vlgmr.msra.gmra.mrb[2].mxu0 %vm253_vm2, %v13284_v47 }
 0x195   : > { %10887 = vmatmul.mubr.msk.f32.vlgmr.msra.gmra.mrb[20].mxu1 %vm253_vm2, %v12797_v9  ;;  %v6188_v39 = vpop.permute.xlu1 %6187  ;;  %6290 = vmatprep.mubr.f32.mxu0 %v13825_v50 }
 0x196   : > { %v3528_v14 = vpop.permute.xlu0 %3527  ;;  %3697 = vmatprep.mubr.f32.mxu1 %v13825_v50 }
 0x197   : > { %v3540_v57 = vsel %vm3537_vm12, %v12849_v34, %v3528_v14  ;;  %v3541_v48 = vsel %vm3537_vm12, %v3528_v14, %v12882_v25  ;;  %v13329_v25 = vld [vmem:[%s13793_s1 + $0x90] sm:$0x3f] }
 0x198   : > { %10610 = vmatprep.subr.msk.mxu1 %vm257_vm1, %v3541_v48 }
 0x199   : > { %10611 = vmatpush1.msk.msra.mxu1 %vm257_vm1, %v3540_v57  ;;  %v6186_v56 = vpop.permute.xlu1 %6185  ;;  %v12144_v57 = vmov 0  }
 0x19a   : > { %v6202_v9 = vsel %vm6201_vm11, %v6186_v56, %v6188_v39  ;;  %v13317_v23 = vpop.permute.xlu0 %6189  ;;  %10612 = vmatmul.mubr.msk.f32.vlgmr.msra.gmra.mrb[0].mxu1 %vm253_vm2, %v12860_v16  ;;  %10889 = vmatprep.subr.mxu1 %v13825_v50 }
 0x19b   : > { %v6203_v34 = vsel %vm6201_vm11, %v6188_v39, %v13317_v23  ;;  %10891 = vmatprep.mubr.msk.f32.mxu1 %vm12139_vm10, %v13825_v50  ;;  %v8347_v39 = vld [vmem:[%s13794_s2] sm:$0x3f]  ;;  %12072 = vset.pattern.permute.xlu0 %v12144_v57 }
 0x19c   : > { %10703 = vmatprep.subr.msk.mxu0 %vm257_vm1, %v6203_v34  ;;  %8350 = vperm.xlu0 %12072, %v8347_v39  }
 0x19d   : > { %10704 = vmatpush1.msk.msra.mxu0 %vm257_vm1, %v6202_v9  ;;  %v13333_v46 = vpop.permute.xlu1 %6197 }
 0x19e   : > { %v6196_v17 = vpop.permute.xlu0 %6195  ;;  %10705 = vmatmul.mubr.msk.f32.vlgmr.msra.gmra.mrb[0].mxu0 %vm253_vm2, %v13329_v25 }
 0x19f   : > { %v6207_v14 = vsel %vm6201_vm11, %v6196_v17, %v13333_v46  ;;  %6432 = vmatprep.mubr.f32.mxu0 %v13825_v50 }
 0x1a0   : > { %10709 = vmatprep.subr.msk.mxu0 %vm257_vm1, %v6207_v14 }
 0x1a1   : > { %v13344_v48 = vpop.permute.xlu1 %6193 }
 0x1a2   : > { %v6206_v56 = vsel %vm6201_vm11, %v13344_v48, %v6196_v17  ;;  %v3536_v9 = vpop.permute.xlu0 %3535 }
 0x1a3   : > { %v3544_v34 = vsel %vm3537_vm12, %v12870_v12, %v3536_v9  ;;  %10710 = vmatpush1.msk.msra.mxu0 %vm257_vm1, %v6206_v56  ;;  %vm6534_vm12 = vcmask 228352  }
 0x1a4   : > { %10890 = vmatpush3.msk.msra.mxu1 %vm257_vm1, %v3544_v34  ;;  %10711 = vmatmul.mubr.msk.f32.vlgmr.msra.gmra.mrb[2].mxu0 %vm253_vm2, %v13329_v25 }
 0x1a5   : > { %10892 = vmatmul.mubr.msk.f32.vlgmr.msra.gmra.mrb[22].mxu1 %vm253_vm2, %v12860_v16  ;;  %v6521_v39 = vpop.permute.xlu1 %6520  ;;  %6623 = vmatprep.mubr.f32.mxu0 %v13825_v50 }
 0x1a6   : > { %v3861_v14 = vpop.permute.xlu0 %3860  ;;  %4030 = vmatprep.mubr.f32.mxu1 %v13825_v50 }
 0x1a7   : > { %v3873_v17 = vsel %vm3870_vm13, %v12923_v52, %v3861_v14  ;;  %v3874_v12 = vsel %vm3870_vm13, %v3861_v14, %v12955_v28  ;;  %v13375_v28 = vld [vmem:[%s13793_s1 + $0x98] sm:$0x3f] }
 0x1a8   : > { %10622 = vmatprep.subr.msk.mxu1 %vm257_vm1, %v3874_v12 }
 0x1a9   : > { %10623 = vmatpush1.msk.msra.mxu1 %vm257_vm1, %v3873_v17  ;;  %v6519_v57 = vpop.permute.xlu1 %6518 }
 0x1aa   : > { %v6535_v16 = vsel %vm6534_vm12, %v6519_v57, %v6521_v39  ;;  %v13365_v56 = vpop.permute.xlu0 %6522  ;;  %10624 = vmatmul.mubr.msk.f32.vlgmr.msra.gmra.mrb[0].mxu1 %vm253_vm2, %v12935_v26  ;;  %10894 = vmatprep.subr.mxu1 %v13825_v50 }
 0x1ab   : > { %v6536_v52 = vsel %vm6534_vm12, %v6521_v39, %v13365_v56  ;;  %10896 = vmatprep.mubr.msk.f32.mxu1 %vm12139_vm10, %v13825_v50 }
 0x1ac   : > { %10715 = vmatprep.subr.msk.mxu0 %vm257_vm1, %v6536_v52  ;;  %v12077_v52 = vld [vmem:[%s12223_s10 + $0x8] sm:$0x77] }
 0x1ad   : > { %10716 = vmatpush1.msk.msra.mxu0 %vm257_vm1, %v6535_v16  ;;  %v13381_v9 = vpop.permute.xlu1 %6530 }
 0x1ae   : > { %v6529_v34 = vpop.permute.xlu0 %6528  ;;  %10717 = vmatmul.mubr.msk.f32.vlgmr.msra.gmra.mrb[0].mxu0 %vm253_vm2, %v13375_v28 }
 0x1af   : > { %v6540_v39 = vsel %vm6534_vm12, %v6529_v34, %v13381_v9  ;;  %6765 = vmatprep.mubr.f32.mxu0 %v13825_v50 }
 0x1b0   : > { %10721 = vmatprep.subr.msk.mxu0 %vm257_vm1, %v6540_v39 }
 0x1b1   : > { %v13389_v14 = vpop.permute.xlu1 %6526 }
 0x1b2   : > { %v6539_v17 = vsel %vm6534_vm12, %v13389_v14, %v6529_v34  ;;  %v3869_v12 = vpop.permute.xlu0 %3868  ;;  %v13406_v34 = vld [vmem:[%s13793_s1 + $0xa0] sm:$0x3f] }
 0x1b3   : > { %v3877_v57 = vsel %vm3870_vm13, %v12943_v32, %v3869_v12  ;;  %10722 = vmatpush1.msk.msra.mxu0 %vm257_vm1, %v6539_v17  ;;  %v12078_v17 = vld [vmem:[%s12223_s10 + $0x18] sm:$0x77] }
 0x1b4   : > { %10895 = vmatpush3.msk.msra.mxu1 %vm257_vm1, %v3877_v57  ;;  %10723 = vmatmul.mubr.msk.f32.vlgmr.msra.gmra.mrb[2].mxu0 %vm253_vm2, %v13375_v28  ;;  %v13529_v57 = vld [vmem:[%s13793_s1 + $0xb8] sm:$0x3f] }
 0x1b5   : > { %10897 = vmatmul.mubr.msk.f32.vlgmr.msra.gmra.mrb[24].mxu1 %vm253_vm2, %v12935_v26  ;;  %v4202_v16 = vpop.permute.xlu1 %4201  ;;  %10727 = vmatprep.subr.msk.mxu0 %vm257_vm1, %v12077_v52 }
 0x1b6   : > { %v4194_v32 = vpop.permute.xlu0 %4193  ;;  %10728 = vmatpush1.msk.msra.mxu0 %vm257_vm1, %v12253_v6  ;;  %6920 = vmatprep.mubr.f32.mxu0 %v13825_v50 }
 0x1b7   : > { %v4206_v39 = vsel %vm4203_vm14, %v12996_v0, %v4194_v32  ;;  %v4207_v26 = vsel %vm4203_vm14, %v4194_v32, %v13028_v41  ;;  %10733 = vmatprep.subr.msk.mxu0 %vm257_vm1, %v12078_v17  ;;  %4363 = vmatprep.mubr.f32.mxu1 %v13825_v50  ;;  %v4210_v0 = vsel %vm4203_vm14, %v13016_v38, %v4202_v16  ;;  %v8369_v16 = vld [vmem:[#allocation2 + $0x10] sm:$0xff]  ;;  %v8372_v32 = vld [vmem:[#allocation2 + $0x28] sm:$0xff] }
 0x1b8   : > { %10634 = vmatprep.subr.msk.mxu1 %vm257_vm1, %v4207_v26  ;;  %10729 = vmatmul.mubr.msk.f32.vlgmr.msra.gmra.mrb[0].mxu0 %vm253_vm2, %v13406_v34  ;;  %v8373_v17 = vld [vmem:[#allocation2 + $0x30] sm:$0xff] }
 0x1b9   : > { %10635 = vmatpush1.msk.msra.mxu1 %vm257_vm1, %v4206_v39  ;;  %10734 = vmatpush1.msk.msra.mxu0 %vm257_vm1, %v12249_v5  ;;  %v4535_v6 = vpop.permute.xlu1 %4534  ;;  %v8374_v39 = vld [vmem:[#allocation2 + $0x38] sm:$0xff] }
 0x1ba   : > { %10636 = vmatmul.mubr.msk.f32.vlgmr.msra.gmra.mrb[0].mxu1 %vm253_vm2, %v13008_v1  ;;  %10899 = vmatprep.subr.mxu1 %v13825_v50  ;;  %v4527_v41 = vpop.permute.xlu0 %4526  ;;  %v10968_v26 = vpack.c.bf16 %v8374_v39, %v8372_v32  ;;  %v8400_v32 = vld [vmem:[#allocation2 + $0x108] sm:$0xff]  ;;  %v8402_v39 = vld [vmem:[#allocation2 + $0x118] sm:$0xff] }
 0x1bb   : > { %10739 = vmatprep.subr.msk.mxu0 %vm257_vm1, %v12711_v22  ;;  %v4540_v12 = vsel %vm4536_vm15, %v4527_v41, %v13095_v3  ;;  %10900 = vmatpush3.msk.msra.mxu1 %vm257_vm1, %v4210_v0  ;;  %v4539_v38 = vsel %vm4536_vm15, %v13063_v2, %v4527_v41  ;;  %v13449_v3 = vld [vmem:[%s13793_s1 + $0xa8] sm:$0x3f] }
 0x1bc   : > { %10646 = vmatprep.subr.msk.mxu1 %vm257_vm1, %v4540_v12  ;;  %7062 = vmatprep.mubr.f32.mxu0 %v13825_v50 }
 0x1bd   : > { %10901 = vmatprep.mubr.msk.f32.mxu1 %vm12139_vm10, %v13825_v50  ;;  %10735 = vmatmul.mubr.msk.f32.vlgmr.msra.gmra.mrb[2].mxu0 %vm253_vm2, %v13406_v34  ;;  %v4868_v5 = vpop.permute.xlu1 %4867 }
 0x1be   : > { %10740 = vmatpush1.msk.msra.mxu0 %vm257_vm1, %v12387_v15  ;;  %10902 = vmatmul.mubr.msk.f32.vlgmr.msra.gmra.mrb[26].mxu1 %vm253_vm2, %v13008_v1  ;;  %v4860_v22 = vpop.permute.xlu0 %4859  ;;  %v4543_v1 = vsel %vm4536_vm15, %v13083_v51, %v4535_v6 }
 0x1bf   : > { %10647 = vmatpush1.msk.msra.mxu1 %vm257_vm1, %v4539_v38  ;;  %10745 = vmatprep.subr.msk.mxu0 %vm257_vm1, %v12764_v10  ;;  %v4873_v2 = vsel %vm4869_vm6, %v4860_v22, %v13157_v59  ;;  %v4872_v51 = vsel %vm4869_vm6, %v13124_v54, %v4860_v22  ;;  %v13487_v59 = vld [vmem:[%s13793_s1 + $0xb0] sm:$0x3f]  ;;  %v8378_v38 = vld [vmem:[#allocation2 + $0x58] sm:$0xff]  ;;  %v8375_v22 = vld [vmem:[#allocation2 + $0x40] sm:$0xff] }
 0x1c0   : > { %7221 = vmatprep.mubr.f32.mxu0 %v13825_v50  ;;  %4696 = vmatprep.mubr.f32.mxu1 %v13825_v50 }
 0x1c1   : > { %10904 = vmatprep.subr.mxu1 %v13825_v50  ;;  %10741 = vmatmul.mubr.msk.f32.vlgmr.msra.gmra.mrb[0].mxu0 %vm253_vm2, %v13449_v3  ;;  %v5201_v15 = vpop.permute.xlu1 %5200 }
 0x1c2   : > { %10746 = vmatpush1.msk.msra.mxu0 %vm257_vm1, %v12406_v19  ;;  %10648 = vmatmul.mubr.msk.f32.vlgmr.msra.gmra.mrb[0].mxu1 %vm253_vm2, %v13075_v61  ;;  %v5193_v10 = vpop.permute.xlu0 %5192 }
 0x1c3   : > { %10905 = vmatpush3.msk.msra.mxu1 %vm257_vm1, %v4543_v1  ;;  %10751 = vmatprep.subr.msk.mxu0 %vm257_vm1, %v12834_v24  ;;  %v5206_v54 = vsel %vm5202_vm7, %v5193_v10, %v13206_v63  ;;  %v8380_v1 = vld [vmem:[#allocation2 + $0x68] sm:$0xff] }
 0x1c4   : > { %10658 = vmatprep.subr.msk.mxu1 %vm257_vm1, %v4873_v2  ;;  %7363 = vmatprep.mubr.f32.mxu0 %v13825_v50 }
 0x1c5   : > { %10906 = vmatprep.mubr.msk.f32.mxu1 %vm12139_vm10, %v13825_v50  ;;  %10747 = vmatmul.mubr.msk.f32.vlgmr.msra.gmra.mrb[2].mxu0 %vm253_vm2, %v13449_v3  ;;  %v13476_v19 = vpop.permute.xlu1 %5533 }
 0x1c6   : > { %10752 = vmatpush1.msk.msra.mxu0 %vm257_vm1, %v12451_v27  ;;  %10907 = vmatmul.mubr.msk.f32.vlgmr.msra.gmra.mrb[28].mxu1 %vm253_vm2, %v13075_v61  ;;  %v5526_v24 = vpop.permute.xlu0 %5525  ;;  %v4876_v61 = vsel %vm4869_vm6, %v13144_v4, %v4868_v5  ;;  %v5205_v4 = vsel %vm5202_vm7, %v13182_v42, %v5193_v10  ;;  %v8376_v5 = vld [vmem:[#allocation2 + $0x48] sm:$0xff]  ;;  %v8382_v10 = vld [vmem:[#allocation2 + $0x78] sm:$0xff] }
 0x1c7   : > { %10659 = vmatpush1.msk.msra.mxu1 %vm257_vm1, %v4872_v51  ;;  %10757 = vmatprep.subr.msk.mxu0 %vm257_vm1, %v12891_v44  ;;  %v10976_v2 = vpack.c.bf16 %v8382_v10, %v8380_v1  ;;  %v8381_v51 = vld [vmem:[#allocation2 + $0x70] sm:$0xff]  ;;  %v13835_v10 = vld [vmem:[#allocation13_spill] sm:$0xff] }
 0x1c8   : > { %7521 = vmatprep.mubr.f32.mxu0 %v13825_v50  ;;  %5029 = vmatprep.mubr.f32.mxu1 %v13825_v50 }
 0x1c9   : > { %10909 = vmatprep.subr.mxu1 %v13825_v50  ;;  %10753 = vmatmul.mubr.msk.f32.vlgmr.msra.gmra.mrb[0].mxu0 %vm253_vm2, %v13487_v59  ;;  %v13497_v27 = vpop.permute.xlu1 %5866 }
 0x1ca   : > { %10758 = vmatpush1.msk.msra.mxu0 %vm257_vm1, %v12468_v31  ;;  %10660 = vmatmul.mubr.msk.f32.vlgmr.msra.gmra.mrb[0].mxu1 %vm253_vm2, %v13136_v30  ;;  %v5859_v44 = vpop.permute.xlu0 %5858 }
 0x1cb   : > { %10910 = vmatpush3.msk.msra.mxu1 %vm257_vm1, %v4876_v61  ;;  %10763 = vmatprep.subr.msk.mxu0 %vm257_vm1, %v12908_v11 }
 0x1cc   : > { %10670 = vmatprep.subr.msk.mxu1 %vm257_vm1, %v5206_v54  ;;  %7663 = vmatprep.mubr.f32.mxu0 %v13825_v50  ;;  %v8385_v54 = vld [vmem:[#allocation2 + $0x90] sm:$0xff] }
 0x1cd   : > { %10911 = vmatprep.mubr.msk.f32.mxu1 %vm12139_vm10, %v13825_v50  ;;  %10759 = vmatmul.mubr.msk.f32.vlgmr.msra.gmra.mrb[2].mxu0 %vm253_vm2, %v13487_v59  ;;  %v6200_v31 = vpop.permute.xlu1 %6199 }
 0x1ce   : > { %10764 = vmatpush1.msk.msra.mxu0 %vm257_vm1, %v12492_v36  ;;  %v13522_v11 = vsel %vm6201_vm11, %v13333_v46, %v6200_v31  ;;  %10912 = vmatmul.mubr.msk.f32.vlgmr.msra.gmra.mrb[30].mxu1 %vm253_vm2, %v13136_v30  ;;  %v6192_v63 = vpop.permute.xlu0 %6191  ;;  %v5209_v46 = vsel %vm5202_vm7, %v13198_v49, %v5201_v15  ;;  %v8377_v15 = vld [vmem:[#allocation2 + $0x50] sm:$0xff] }
 0x1cf   : > { %10671 = vmatpush1.msk.msra.mxu1 %vm257_vm1, %v5205_v4  ;;  %10769 = vmatprep.subr.msk.mxu0 %vm257_vm1, %v12964_v35  ;;  %v6204_v36 = vsel %vm6201_vm11, %v13317_v23, %v6192_v63  ;;  %v6205_v42 = vsel %vm6201_vm11, %v6192_v63, %v13344_v48  ;;  %v5539_v48 = vsel %vm5535_vm8, %v5526_v24, %v13251_v43  ;;  %v8388_v4 = vld [vmem:[#allocation2 + $0xa8] sm:$0xff] }
 0x1d0   : > { %7821 = vmatprep.mubr.f32.mxu0 %v13825_v50  ;;  %5362 = vmatprep.mubr.f32.mxu1 %v13825_v50 }
 0x1d1   : > { %10914 = vmatprep.subr.mxu1 %v13825_v50  ;;  %10765 = vmatmul.mubr.msk.f32.vlgmr.msra.gmra.mrb[0].mxu0 %vm253_vm2, %v13529_v57  ;;  %v6533_v30 = vpop.permute.xlu1 %6532 }
 0x1d2   : > { %10770 = vmatpush1.msk.msra.mxu0 %vm257_vm1, %v12510_v40  ;;  %v13549_v35 = vsel %vm6534_vm12, %v13381_v9, %v6533_v30  ;;  %10672 = vmatmul.mubr.msk.f32.vlgmr.msra.gmra.mrb[0].mxu1 %vm253_vm2, %v13194_v58  ;;  %v6525_v23 = vpop.permute.xlu0 %6524  ;;  %v5538_v40 = vsel %vm5535_vm8, %v13227_v33, %v5526_v24  ;;  %v5871_v33 = vsel %vm5868_vm9, %v13272_v13, %v5859_v44  ;;  %v8367_v9 = vld [vmem:[#allocation2] sm:$0xff]  ;;  %v8389_v30 = vld [vmem:[#allocation2 + $0xb0] sm:$0xff] }
 0x1d3   : > { %10915 = vmatpush3.msk.msra.mxu1 %vm257_vm1, %v5209_v46  ;;  %10775 = vmatprep.subr.msk.mxu0 %vm257_vm1, %v12981_v18  ;;  %v6537_v49 = vsel %vm6534_vm12, %v13365_v56, %v6525_v23  ;;  %v13575_v18 = vld [vmem:[%s13793_s1 + $0xc0] sm:$0x3f]  ;;  %v6538_v52 = vsel %vm6534_vm12, %v6525_v23, %v13389_v14  ;;  %v12079_v14 = vld [vmem:[%s12223_s10 + $0x10] sm:$0x77]  ;;  %s10788_s10 = sshll.u32 %s13838_s16, 4 }
 0x1d4   : > { %10682 = vmatprep.subr.msk.mxu1 %vm257_vm1, %v5539_v48  ;;  %7963 = vmatprep.mubr.f32.mxu0 %v13825_v50  ;;  %s212_s12 = scalar_lea.vmem %s13796_s4, %s10788_s10 }
 0x1d5   : > { %10916 = vmatprep.mubr.msk.f32.mxu1 %vm12139_vm10, %v13825_v50  ;;  %10771 = vmatmul.mubr.msk.f32.vlgmr.msra.gmra.mrb[2].mxu0 %vm253_vm2, %v13529_v57  ;;  %v7450_v46 = vpop.permute.xlu1 %7449 }
 0x1d6   : > { %10776 = vmatpush1.msk.msra.mxu0 %vm257_vm1, %v12535_v45  ;;  %10917 = vmatmul.mubr.msk.f32.vlgmr.msra.gmra.mrb[32].mxu1 %vm253_vm2, %v13194_v58  ;;  %v5542_v45 = vsel %vm5535_vm8, %v13243_v62, %v13476_v19  ;;  %v5875_v62 = vsel %vm5868_vm9, %v13288_v60, %v13497_v27  ;;  %v8368_v60 = vld [vmem:[#allocation2 + $0x8] sm:$0xff]  ;;  %v8379_v19 = vld [vmem:[#allocation2 + $0x60] sm:$0xff]  ;;  %v7150_v61 = vpop.permute.xlu0 %7149 }
 0x1d7   : > { %10683 = vmatpush1.msk.msra.mxu1 %vm257_vm1, %v5538_v40  ;;  %10781 = vmatprep.subr.msk.mxu0 %vm257_vm1, %v13037_v37  ;;  %v5872_v37 = vsel %vm5868_vm9, %v5859_v44, %v13296_v29  ;;  %v8370_v29 = vld [vmem:[#allocation2 + $0x18] sm:$0xff]  ;;  %v10978_v24 = vpack.c.bf16 %v8381_v51, %v8379_v19  ;;  %v8384_v27 = vld [vmem:[#allocation2 + $0x88] sm:$0xff]  ;;  %v8876_v51 = vld [vmem:[#allocation2 + $0x700] sm:$0xff] }
 0x1d8   : > { %8121 = vmatprep.mubr.f32.mxu0 %v13825_v50  ;;  %5695 = vmatprep.mubr.f32.mxu1 %v13825_v50  ;;  %v10964_v56 = vpack.c.bf16 %v8370_v29, %v8368_v60  ;;  %v8398_v60 = vld [vmem:[#allocation2 + $0xf8] sm:$0xff] }
 0x1d9   : > { %10919 = vmatprep.subr.mxu1 %v13825_v50  ;;  %10777 = vmatmul.mubr.msk.f32.vlgmr.msra.gmra.mrb[0].mxu0 %vm253_vm2, %v13575_v18  ;;  %v8050_v1 = vpop.permute.xlu1 %8049 }
 0x1da   : > { %10782 = vmatpush1.msk.msra.mxu0 %vm257_vm1, %v12570_v53  ;;  %10684 = vmatmul.mubr.msk.f32.vlgmr.msra.gmra.mrb[0].mxu1 %vm253_vm2, %v13239_v55 }
 0x1db   : > { %10920 = vmatpush3.msk.msra.mxu1 %vm257_vm1, %v5542_v45  ;;  %8263 = vmatprep.mubr.f32.mxu0 %v13825_v50  ;;  %v8392_v45 = vld [vmem:[#allocation2 + $0xc8] sm:$0xff] }
 0x1dc   : > { %10694 = vmatprep.subr.msk.mxu1 %vm257_vm1, %v5872_v37  ;;  %10921 = vmatprep.mubr.msk.f32.mxu1 %vm12139_vm10, %v13825_v50  ;;  %v551_v58 = vpop.f32.mrb[2].mxu1  ;;  %v8394_v37 = vld [vmem:[#allocation2 + $0xd8] sm:$0xff] }
 0x1dd   : > { %10783 = vmatmul.mubr.msk.f32.vlgmr.msra.gmra.mrb[2].mxu0 %vm253_vm2, %v13575_v18  ;;  %v10843_v53 = vpop.f32.mrb[3].mxu1  ;;  %10965 = vmatprep.subr.bf16.mxu0 %v10964_v56  ;;  %v8395_v56 = vld [vmem:[#allocation2 + $0xe0] sm:$0xff] }
 0x1de   : > { %10922 = vmatmul.mubr.msk.f32.vlgmr.msra.gmra.mrb[34].mxu1 %vm253_vm2, %v13239_v55  ;;  %v10988_v53 = vpack.c.bf16 %v8394_v37, %v8392_v45  ;;  %v8413_v45 = vld [vmem:[#allocation2 + $0x170] sm:$0xff] }
 0x1df   : > { %10695 = vmatpush1.msk.msra.mxu1 %vm257_vm1, %v5871_v33  ;;  %6028 = vmatprep.mubr.f32.mxu1 %v13825_v50  ;;  %v8391_v33 = vld [vmem:[#allocation2 + $0xc0] sm:$0xff] }
 0x1e0   : > { %10924 = vmatprep.subr.mxu1 %v13825_v50 }
 0x1e2   : > { %10696 = vmatmul.mubr.msk.f32.vlgmr.msra.gmra.mrb[0].mxu1 %vm253_vm2, %v13284_v47 }
 0x1e3   : > { %10925 = vmatpush3.msk.msra.mxu1 %vm257_vm1, %v5875_v62  ;;  %10926 = vmatprep.mubr.msk.f32.mxu1 %vm12139_vm10, %v13825_v50  ;;  %v8393_v62 = vld [vmem:[#allocation2 + $0xd0] sm:$0xff] }
 0x1e4   : > { %10706 = vmatprep.subr.msk.mxu1 %vm257_vm1, %v6205_v42  ;;  %v8387_v42 = vld [vmem:[#allocation2 + $0xa0] sm:$0xff] }
 0x1e5   : > { %v851_v55 = vpop.f32.mrb[4].mxu1  ;;  %v10986_v23 = vpack.c.bf16 %v8389_v30, %v8387_v42  ;;  %v8412_v42 = vld [vmem:[#allocation2 + $0x168] sm:$0xff] }
 0x1e6   : > { %10927 = vmatmul.mubr.msk.f32.vlgmr.msra.gmra.mrb[36].mxu1 %vm253_vm2, %v13284_v47  ;;  %v852_v43 = vadd.f32 %v851_v55, %v551_v58  ;;  %v10848_v13 = vpop.f32.mrb[5].mxu1  ;;  %v10966_v47 = vpack.c.bf16 %v8369_v16, %v8367_v9  ;;  %v13830_v58 = vld [vmem:[#allocation10_spill] sm:$0xff]  ;;  %v10990_v55 = vpack.c.bf16 %v8393_v62, %v8391_v33  ;;  %v8397_v9 = vld [vmem:[#allocation2 + $0xf0] sm:$0xff] }
 0x1e7   : > { %10707 = vmatpush1.msk.msra.mxu1 %vm257_vm1, %v6204_v36  ;;  %6361 = vmatprep.mubr.f32.mxu1 %v13825_v50  ;;  %v13828_v36 = vld [vmem:[#allocation5_spill] sm:$0xff]  ;;  %v13831_v13 = vld [vmem:[#allocation6_spill] sm:$0xff]  ;;  %v10994_v16 = vpack.c.bf16 %v8397_v9, %v8395_v56  ;;  %v8886_v33 = vld [vmem:[#allocation2 + $0x750] sm:$0xff] }
 0x1e8   : > { %10929 = vmatprep.subr.mxu1 %v13825_v50  ;;  %10967 = vmatpush1.bf16.msra.mxu0 %v10966_v47  ;;  %v13832_v47 = vld [vmem:[#allocation11_spill] sm:$0xff]  ;;  %v8889_v62 = vld [vmem:[#allocation2 + $0x768] sm:$0xff] }
 0x1e9   : > { %10969 = vmatprep.subr.bf16.mxu0 %v10968_v26  ;;  %v13833_v26 = vld [vmem:[#allocation12_spill] sm:$0xff]  ;;  %v8417_v56 = vld [vmem:[#allocation2 + $0x190] sm:$0xff] }
 0x1ea   : > { %10708 = vmatmul.mubr.msk.f32.vlgmr.msra.gmra.mrb[0].mxu1 %vm253_vm2, %v13329_v25 }
 0x1eb   : > { %10930 = vmatpush3.msk.msra.mxu1 %vm257_vm1, %v13522_v11  ;;  %10931 = vmatprep.mubr.msk.f32.mxu1 %vm12139_vm10, %v13825_v50  ;;  %v8390_v11 = vld [vmem:[#allocation2 + $0xb8] sm:$0xff] }
 0x1ec   : > { %10718 = vmatprep.subr.msk.mxu1 %vm257_vm1, %v6538_v52  ;;  %v7750_v52 = vpop.permute.xlu0 %7749 }
 0x1ee   : > { %10932 = vmatmul.mubr.msk.f32.vlgmr.msra.gmra.mrb[38].mxu1 %vm253_vm2, %v13329_v25  ;;  %v8371_v25 = vld [vmem:[#allocation2 + $0x20] sm:$0xff] }
 0x1ef   : > { %10719 = vmatpush1.msk.msra.mxu1 %vm257_vm1, %v6537_v49  ;;  %6694 = vmatprep.mubr.f32.mxu1 %v13825_v50  ;;  %v10970_v6 = vpack.c.bf16 %v8373_v17, %v8371_v25  ;;  %v8399_v25 = vld [vmem:[#allocation2 + $0x100] sm:$0xff]  ;;  %v8401_v17 = vld [vmem:[#allocation2 + $0x110] sm:$0xff] }
 0x1f0   : > { %10934 = vmatprep.subr.mxu1 %v13825_v50 }
 0x1f1   : > { %10971 = vmatpush1.bf16.msra.mxu0 %v10970_v6  ;;  %v10998_v6 = vpack.c.bf16 %v8401_v17, %v8399_v25  ;;  %v8419_v25 = vld [vmem:[#allocation2 + $0x1a0] sm:$0xff]  ;;  %v8421_v17 = vld [vmem:[#allocation2 + $0x1b0] sm:$0xff] }
 0x1f2   : > { %10720 = vmatmul.mubr.msk.f32.vlgmr.msra.gmra.mrb[0].mxu1 %vm253_vm2, %v13375_v28 }
 0x1f3   : > { %10935 = vmatpush3.msk.msra.mxu1 %vm257_vm1, %v13549_v35  ;;  %10936 = vmatprep.mubr.msk.f32.mxu1 %vm12139_vm10, %v13825_v50  ;;  %v13829_v35 = vld [vmem:[#allocation9_spill] sm:$0xff] }
 0x1f4   : > { %10730 = vmatprep.subr.msk.mxu1 %vm257_vm1, %v12079_v14  ;;  %v7751_v14 = vsel %vm1206_vm4, %v13833_v26, %v7750_v52  ;;  %v8420_v52 = vld [vmem:[#allocation2 + $0x1a8] sm:$0xff]  ;;  %v8422_v26 = vld [vmem:[#allocation2 + $0x1b8] sm:$0xff] }
 0x1f6   : > { %10937 = vmatmul.mubr.msk.f32.vlgmr.msra.gmra.mrb[40].mxu1 %vm253_vm2, %v13375_v28  ;;  %v10972_v28 = vpack.c.bf16 %v8378_v38, %v8376_v5  ;;  %v8406_v5 = vld [vmem:[#allocation2 + $0x138] sm:$0xff] }
 0x1f7   : > { %10731 = vmatpush1.msk.msra.mxu1 %vm257_vm1, %v12333_v7  ;;  %6991 = vmatprep.mubr.f32.mxu1 %v13825_v50  ;;  %v10974_v7 = vpack.c.bf16 %v8377_v15, %v8375_v22  ;;  %v8879_v38 = vld [vmem:[#allocation2 + $0x718] sm:$0xff]  ;;  %v8403_v22 = vld [vmem:[#allocation2 + $0x120] sm:$0xff]  ;;  %v8405_v15 = vld [vmem:[#allocation2 + $0x130] sm:$0xff] }
 0x1f8   : > { %10939 = vmatprep.subr.mxu1 %v13825_v50  ;;  %v1177_v0 = vpop.f32.mrb[6].mxu1  ;;  %10973 = vmatprep.subr.bf16.mxu0 %v10972_v28 }
 0x1f9   : > { %v1187_v41 = vadd.f32 %v1177_v0, %v852_v43  ;;  %v10853_v12 = vpop.f32.mrb[7].mxu1  ;;  %10975 = vmatpush1.bf16.msra.mxu0 %v10974_v7  ;;  %v8396_v43 = vld [vmem:[#allocation2 + $0xe8] sm:$0xff]  ;;  %v11002_v7 = vpack.c.bf16 %v8405_v15, %v8403_v22 }
 0x1fa   : > { %10732 = vmatmul.mubr.msk.f32.vlgmr.msra.gmra.mrb[0].mxu1 %vm253_vm2, %v13406_v34  ;;  %10977 = vmatprep.subr.bf16.mxu0 %v10976_v2  ;;  %v10992_v29 = vpack.c.bf16 %v8398_v60, %v8396_v43  ;;  %v8404_v0 = vld [vmem:[#allocation2 + $0x128] sm:$0xff] }
 0x1fb   : > { %10940 = vmatpush3.msk.msra.mxu1 %vm257_vm1, %v12349_v8  ;;  %10941 = vmatprep.mubr.msk.f32.mxu1 %vm12139_vm10, %v13825_v50  ;;  %v8386_v8 = vld [vmem:[#allocation2 + $0x98] sm:$0xff]  ;;  %v8877_v12 = vld [vmem:[#allocation2 + $0x708] sm:$0xff]  ;;  %v11000_v28 = vpack.c.bf16 %v8406_v5, %v8404_v0  ;;  %v8892_v5 = vld [vmem:[#allocation2 + $0x780] sm:$0xff] }
 0x1fc   : > { %10742 = vmatprep.subr.msk.mxu1 %vm257_vm1, %v12410_v21  ;;  %v10980_v44 = vpack.c.bf16 %v8386_v8, %v8384_v27  ;;  %v8383_v21 = vld [vmem:[#allocation2 + $0x80] sm:$0xff]  ;;  %v11188_v19 = vpack.c.bf16 %v8879_v38, %v8877_v12  ;;  %v8881_v27 = vld [vmem:[#allocation2 + $0x728] sm:$0xff]  ;;  %v8894_v38 = vld [vmem:[#allocation2 + $0x790] sm:$0xff] }
 0x1fd   : > { %10979 = vmatpush1.bf16.msra.mxu0 %v10978_v24  ;;  %v10982_v31 = vpack.c.bf16 %v8385_v54, %v8383_v21  ;;  %v8878_v24 = vld [vmem:[#allocation2 + $0x710] sm:$0xff]  ;;  %v8410_v21 = vld [vmem:[#allocation2 + $0x158] sm:$0xff]  ;;  %v13836_v54 = vld [vmem:[#allocation14_spill] sm:$0xff] }
 0x1fe   : > { %10942 = vmatmul.mubr.msk.f32.vlgmr.msra.gmra.mrb[42].mxu1 %vm253_vm2, %v13406_v34  ;;  %v13827_v34 = vld [vmem:[#allocation8_spill] sm:$0xff]  ;;  %10981 = vmatprep.subr.bf16.mxu0 %v10980_v44  ;;  %v8416_v43 = vld [vmem:[#allocation2 + $0x188] sm:$0xff] }
 0x1ff   : > { %10743 = vmatpush1.msk.msra.mxu1 %vm257_vm1, %v12707_v20  ;;  %7292 = vmatprep.mubr.f32.mxu1 %v13825_v50  ;;  %v7151_v63 = vsel %vm245_vm0, %v13827_v34, %v7150_v61  ;;  %v10984_v20 = vpack.c.bf16 %v8390_v11, %v8388_v4  ;;  %v8883_v44 = vld [vmem:[#allocation2 + $0x738] sm:$0xff]  ;;  %v8407_v11 = vld [vmem:[#allocation2 + $0x140] sm:$0xff]  ;;  %v8409_v34 = vld [vmem:[#allocation2 + $0x150] sm:$0xff] }
 0x200   : > { %10944 = vmatprep.subr.mxu1 %v13825_v50  ;;  %v11192_v30 = vpack.c.bf16 %v8883_v44, %v8881_v27  ;;  %v8896_v44 = vld [vmem:[#allocation2 + $0x7a0] sm:$0xff] }
 0x201   : > { %10983 = vmatpush1.bf16.msra.mxu0 %v10982_v31  ;;  %v8051_v31 = vsel %vm1539_vm5, %v13836_v54, %v8050_v1  ;;  %v8424_v1 = vld [vmem:[#allocation2 + $0x1c8] sm:$0xff]  ;;  %v8903_v54 = vld [vmem:[#allocation2 + $0x7d8] sm:$0xff] }
 0x202   : > { %10744 = vmatmul.mubr.msk.f32.vlgmr.msra.gmra.mrb[0].mxu1 %vm253_vm2, %v13449_v3  ;;  %10985 = vmatprep.subr.bf16.mxu0 %v10984_v20  ;;  %v8880_v20 = vld [vmem:[#allocation2 + $0x720] sm:$0xff] }
 0x203   : > { %10945 = vmatpush3.msk.msra.mxu1 %vm257_vm1, %v7151_v63  ;;  %10946 = vmatprep.mubr.msk.f32.mxu1 %vm12139_vm10, %v13825_v50  ;;  %v11190_v63 = vpack.c.bf16 %v8878_v24, %v8876_v51  ;;  %v8425_v51 = vld [vmem:[#allocation2 + $0x1d0] sm:$0xff]  ;;  %v11206_v24 = vpack.c.bf16 %v8894_v38, %v8892_v5  ;;  %v8925_v38 = vld [vmem:[#allocation2 + $0x888] sm:$0xff] }
 0x204   : > { %10754 = vmatprep.subr.msk.mxu1 %vm257_vm1, %v13828_v36  ;;  %v11006_v36 = vpack.c.bf16 %v8409_v34, %v8407_v11  ;;  %v8427_v11 = vld [vmem:[#allocation2 + $0x1e0] sm:$0xff]  ;;  %v8429_v34 = vld [vmem:[#allocation2 + $0x1f0] sm:$0xff] }
 0x205   : > { %10987 = vmatpush1.bf16.msra.mxu0 %v10986_v23  ;;  %v8414_v23 = vld [vmem:[#allocation2 + $0x178] sm:$0xff]  ;;  %v8922_v5 = vld [vmem:[#allocation2 + $0x870] sm:$0xff] }
 0x206   : > { %10947 = vmatmul.mubr.msk.f32.vlgmr.msra.gmra.mrb[44].mxu1 %vm253_vm2, %v13449_v3  ;;  %v7451_v3 = vsel %vm873_vm3, %v13830_v58, %v7450_v46  ;;  %10989 = vmatprep.subr.bf16.mxu0 %v10988_v53  ;;  %v8882_v46 = vld [vmem:[#allocation2 + $0x730] sm:$0xff]  ;;  %v8884_v53 = vld [vmem:[#allocation2 + $0x740] sm:$0xff] }
 0x207   : > { %10755 = vmatpush1.msk.msra.mxu1 %vm257_vm1, %v13829_v35  ;;  %7592 = vmatprep.mubr.f32.mxu1 %v13825_v50  ;;  %v8885_v35 = vld [vmem:[#allocation2 + $0x748] sm:$0xff]  ;;  %v11194_v58 = vpack.c.bf16 %v8882_v46, %v8880_v20  ;;  %v11198_v9 = vpack.c.bf16 %v8886_v33, %v8884_v53  ;;  %v11026_v20 = vpack.c.bf16 %v8429_v34, %v8427_v11  ;;  %v8911_v53 = vld [vmem:[#allocation2 + $0x818] sm:$0xff]  ;;  %v8934_v11 = vld [vmem:[#allocation2 + $0x8d0] sm:$0xff] }
 0x208   : > { %10949 = vmatprep.subr.mxu1 %v13825_v50  ;;  %v1510_v48 = vpop.f32.mrb[8].mxu1  ;;  %v8905_v46 = vld [vmem:[#allocation2 + $0x7e8] sm:$0xff] }
 0x209   : > { %v1520_v49 = vadd.f32 %v1510_v48, %v1187_v41  ;;  %v10858_v40 = vpop.f32.mrb[9].mxu1  ;;  %10991 = vmatpush1.bf16.msra.mxu0 %v10990_v55  ;;  %v13834_v41 = vld [vmem:[#allocation7_spill] sm:$0xff]  ;;  %v8887_v48 = vld [vmem:[#allocation2 + $0x758] sm:$0xff]  ;;  %v8937_v34 = vld [vmem:[#allocation2 + $0x8e8] sm:$0xff] }
 0x20a   : > { %10756 = vmatmul.mubr.msk.f32.vlgmr.msra.gmra.mrb[0].mxu1 %vm253_vm2, %v13487_v59  ;;  %10993 = vmatprep.subr.bf16.mxu0 %v10992_v29  ;;  %v8411_v40 = vld [vmem:[#allocation2 + $0x160] sm:$0xff]  ;;  %v8891_v55 = vld [vmem:[#allocation2 + $0x778] sm:$0xff] }
 0x20b   : > { %10950 = vmatpush3.msk.msra.mxu1 %vm257_vm1, %v7451_v3  ;;  %10951 = vmatprep.mubr.msk.f32.mxu1 %vm12139_vm10, %v13825_v50  ;;  %v11010_v37 = vpack.c.bf16 %v8413_v45, %v8411_v40  ;;  %v11196_v3 = vpack.c.bf16 %v8887_v48, %v8885_v35  ;;  %v8415_v29 = vld [vmem:[#allocation2 + $0x180] sm:$0xff]  ;;  %v8907_v35 = vld [vmem:[#allocation2 + $0x7f8] sm:$0xff] }
 0x20c   : > { %10766 = vmatprep.subr.msk.mxu1 %vm257_vm1, %v13831_v13  ;;  %v8418_v13 = vld [vmem:[#allocation2 + $0x198] sm:$0xff]  ;;  %v11216_v45 = vpack.c.bf16 %v8907_v35, %v8905_v46  ;;  %v8941_v46 = vld [vmem:[#allocation2 + $0x908] sm:$0xff] }
 0x20d   : > { %10995 = vmatpush1.bf16.msra.mxu0 %v10994_v16  ;;  %v11012_v60 = vpack.c.bf16 %v8418_v13, %v8416_v43  ;;  %v8888_v16 = vld [vmem:[#allocation2 + $0x760] sm:$0xff]  ;;  %v8434_v48 = vld [vmem:[#allocation2 + $0x218] sm:$0xff]  ;;  %v8910_v13 = vld [vmem:[#allocation2 + $0x810] sm:$0xff] }
 0x20e   : > { %10952 = vmatmul.mubr.msk.f32.vlgmr.msra.gmra.mrb[46].mxu1 %vm253_vm2, %v13487_v59  ;;  %v10996_v59 = vpack.c.bf16 %v8402_v39, %v8400_v32  ;;  %v8890_v32 = vld [vmem:[#allocation2 + $0x770] sm:$0xff]  ;;  %v8893_v39 = vld [vmem:[#allocation2 + $0x788] sm:$0xff]  ;;  %v8908_v43 = vld [vmem:[#allocation2 + $0x800] sm:$0xff] }
 0x20f   : > { %10767 = vmatpush1.msk.msra.mxu1 %vm257_vm1, %v13832_v47  ;;  %7892 = vmatprep.mubr.f32.mxu1 %v13825_v50  ;;  %v11200_v47 = vpack.c.bf16 %v8891_v55, %v8889_v62  ;;  %v11202_v0 = vpack.c.bf16 %v8890_v32, %v8888_v16  ;;  %v11222_v16 = vpack.c.bf16 %v8910_v13, %v8908_v43  ;;  %v8917_v32 = vld [vmem:[#allocation2 + $0x848] sm:$0xff]  ;;  %v8943_v35 = vld [vmem:[#allocation2 + $0x918] sm:$0xff] }
 0x210   : > { %10954 = vmatprep.subr.mxu1 %v13825_v50  ;;  %10997 = vmatprep.subr.bf16.mxu0 %v10996_v59  ;;  %v11016_v59 = vpack.c.bf16 %v8422_v26, %v8420_v52  ;;  %v8912_v52 = vld [vmem:[#allocation2 + $0x820] sm:$0xff] }
 0x211   : > { %10999 = vmatpush1.bf16.msra.mxu0 %v10998_v6  ;;  %v11018_v6 = vpack.c.bf16 %v8421_v17, %v8419_v25  ;;  %v8918_v25 = vld [vmem:[#allocation2 + $0x850] sm:$0xff]  ;;  %v8921_v17 = vld [vmem:[#allocation2 + $0x868] sm:$0xff] }
 0x212   : > { %10768 = vmatmul.mubr.msk.f32.vlgmr.msra.gmra.mrb[0].mxu1 %vm253_vm2, %v13529_v57  ;;  %11001 = vmatprep.subr.bf16.mxu0 %v11000_v28  ;;  %v8897_v28 = vld [vmem:[#allocation2 + $0x7a8] sm:$0xff] }
 0x213   : > { %10955 = vmatpush3.msk.msra.mxu1 %vm257_vm1, %v7751_v14  ;;  %10956 = vmatprep.mubr.msk.f32.mxu1 %vm12139_vm10, %v13825_v50  ;;  %v8895_v14 = vld [vmem:[#allocation2 + $0x798] sm:$0xff] }
 0x214   : > { %10778 = vmatprep.subr.msk.mxu1 %vm257_vm1, %v13834_v41  ;;  %v11204_v12 = vpack.c.bf16 %v8895_v14, %v8893_v39  ;;  %v8919_v39 = vld [vmem:[#allocation2 + $0x858] sm:$0xff] }
 0x215   : > { %11003 = vmatpush1.bf16.msra.mxu0 %v11002_v7  ;;  %v8899_v7 = vld [vmem:[#allocation2 + $0x7b8] sm:$0xff]  ;;  %v11228_v14 = vpack.c.bf16 %v8919_v39, %v8917_v32 }
 0x216   : > { %10957 = vmatmul.mubr.msk.f32.vlgmr.msra.gmra.mrb[48].mxu1 %vm253_vm2, %v13529_v57  ;;  %v8408_v57 = vld [vmem:[#allocation2 + $0x148] sm:$0xff] }
 0x217   : > { %10779 = vmatpush1.msk.msra.mxu1 %vm257_vm1, %v13835_v10  ;;  %8192 = vmatprep.mubr.f32.mxu1 %v13825_v50  ;;  %v11004_v4 = vpack.c.bf16 %v8410_v21, %v8408_v57  ;;  %v8426_v10 = vld [vmem:[#allocation2 + $0x1d8] sm:$0xff]  ;;  %v8898_v57 = vld [vmem:[#allocation2 + $0x7b0] sm:$0xff]  ;;  %v8901_v21 = vld [vmem:[#allocation2 + $0x7c8] sm:$0xff] }
 0x218   : > { %10959 = vmatprep.subr.mxu1 %v13825_v50  ;;  %v1843_v2 = vpop.f32.mrb[10].mxu1 }
 0x219   : > { %v13709_v8 = vadd.f32 %v1843_v2, %v1520_v49  ;;  %v10863_v61 = vpop.f32.mrb[11].mxu1  ;;  %11005 = vmatprep.subr.bf16.mxu0 %v11004_v4  ;;  %v11008_v49 = vpack.c.bf16 %v8414_v23, %v8412_v42  ;;  %v11020_v2 = vpack.c.bf16 %v8426_v10, %v8424_v1  ;;  %v8900_v42 = vld [vmem:[#allocation2 + $0x7c0] sm:$0xff]  ;;  %v8432_v23 = vld [vmem:[#allocation2 + $0x208] sm:$0xff]  ;;  %v8926_v10 = vld [vmem:[#allocation2 + $0x890] sm:$0xff] }
 0x21a   : > { %10780 = vmatmul.mubr.msk.f32.vlgmr.msra.gmra.mrb[0].mxu1 %vm253_vm2, %v13575_v18  ;;  %11007 = vmatpush1.bf16.msra.mxu0 %v11006_v36  ;;  %v11208_v61 = vpack.c.bf16 %v8899_v7, %v8897_v28  ;;  %v11212_v36 = vpack.c.bf16 %v8903_v54, %v8901_v21  ;;  %v8927_v28 = vld [vmem:[#allocation2 + $0x898] sm:$0xff]  ;;  %v8924_v1 = vld [vmem:[#allocation2 + $0x880] sm:$0xff]  ;;  %v8933_v21 = vld [vmem:[#allocation2 + $0x8c8] sm:$0xff] }
 0x21b   : > { %10960 = vmatpush3.msk.msra.mxu1 %vm257_vm1, %v8051_v31  ;;  %10961 = vmatprep.mubr.msk.f32.mxu1 %vm12139_vm10, %v13825_v50  ;;  %v8430_v31 = vld [vmem:[#allocation2 + $0x1f8] sm:$0xff]  ;;  %v11236_v7 = vpack.c.bf16 %v8927_v28, %v8925_v38  ;;  %v8436_v38 = vld [vmem:[#allocation2 + $0x228] sm:$0xff] }
 0x21c   : > { %11189 = vmatprep.subr.bf16.mxu1 %v11188_v19  ;;  %11009 = vmatprep.subr.bf16.mxu0 %v11008_v49  ;;  %v8423_v19 = vld [vmem:[#allocation2 + $0x1c0] sm:$0xff]  ;;  %v11028_v49 = vpack.c.bf16 %v8434_v48, %v8432_v23  ;;  %v8935_v54 = vld [vmem:[#allocation2 + $0x8d8] sm:$0xff] }
 0x21d   : > { %v11022_v27 = vpack.c.bf16 %v8425_v51, %v8423_v19  ;;  %v8929_v51 = vld [vmem:[#allocation2 + $0x8a8] sm:$0xff] }
 0x21e   : > { %10962 = vmatmul.mubr.msk.f32.vlgmr.msra.gmra.mrb[50].mxu1 %vm253_vm2, %v13575_v18  ;;  %11011 = vmatpush1.bf16.msra.mxu0 %v11010_v37  ;;  %v11014_v18 = vpack.c.bf16 %v8417_v56, %v8415_v29  ;;  %v8904_v37 = vld [vmem:[#allocation2 + $0x7e0] sm:$0xff]  ;;  %v8913_v56 = vld [vmem:[#allocation2 + $0x828] sm:$0xff] }
 0x21f   : > { %11191 = vmatpush1.bf16.msra.mxu1 %v11190_v63  ;;  %11013 = vmatprep.subr.bf16.mxu0 %v11012_v60  ;;  %v11210_v63 = vpack.c.bf16 %v8898_v57, %v8896_v44  ;;  %v8928_v44 = vld [vmem:[#allocation2 + $0x8a0] sm:$0xff]  ;;  %v8930_v57 = vld [vmem:[#allocation2 + $0x8b0] sm:$0xff] }
 0x220   : > { %11193 = vmatprep.subr.bf16.mxu1 %v11192_v30  ;;  %v8902_v30 = vld [vmem:[#allocation2 + $0x7d0] sm:$0xff] }
 0x221   : > { %v11214_v40 = vpack.c.bf16 %v8902_v30, %v8900_v42  ;;  %v8936_v42 = vld [vmem:[#allocation2 + $0x8e0] sm:$0xff]  ;;  %v8938_v30 = vld [vmem:[#allocation2 + $0x8f0] sm:$0xff] }
 0x222   : > { %11015 = vmatpush1.bf16.msra.mxu0 %v11014_v18  ;;  %v11250_v23 = vpack.c.bf16 %v8938_v30, %v8936_v42  ;;  %v8439_v30 = vld [vmem:[#allocation2 + $0x240] sm:$0xff] }
 0x223   : > { %11195 = vmatpush1.bf16.msra.mxu1 %v11194_v58  ;;  %11017 = vmatprep.subr.bf16.mxu0 %v11016_v59  ;;  %v8906_v58 = vld [vmem:[#allocation2 + $0x7f0] sm:$0xff]  ;;  %v8916_v59 = vld [vmem:[#allocation2 + $0x840] sm:$0xff] }
 0x224   : > { %11197 = vmatprep.subr.bf16.mxu1 %v11196_v3  ;;  %v8909_v3 = vld [vmem:[#allocation2 + $0x808] sm:$0xff]  ;;  %v11218_v33 = vpack.c.bf16 %v8906_v58, %v8904_v37 }
 0x225   : > { %v11220_v55 = vpack.c.bf16 %v8911_v53, %v8909_v3 }
 0x226   : > { %11019 = vmatpush1.bf16.msra.mxu0 %v11018_v6  ;;  %v8923_v6 = vld [vmem:[#allocation2 + $0x878] sm:$0xff] }
 0x227   : > { %11199 = vmatpush1.bf16.msra.mxu1 %v11198_v9  ;;  %11021 = vmatprep.subr.bf16.mxu0 %v11020_v2  ;;  %v8915_v9 = vld [vmem:[#allocation2 + $0x838] sm:$0xff] }
 0x228   : > { %v2176_v41 = vpop.f32.mrb[12].mxu1  ;;  %11201 = vmatprep.subr.bf16.mxu1 %v11200_v47  ;;  %v11224_v18 = vpack.c.bf16 %v8915_v9, %v8913_v56  ;;  %v8914_v47 = vld [vmem:[#allocation2 + $0x830] sm:$0xff] }
 0x229   : > { %v2186_v22 = vadd.f32 %v2176_v41, %v13709_v8  ;;  %v10868_v15 = vpop.f32.mrb[13].mxu1  ;;  %v8428_v8 = vld [vmem:[#allocation2 + $0x1e8] sm:$0xff]  ;;  %v11226_v26 = vpack.c.bf16 %v8914_v47, %v8912_v52  ;;  %v11232_v41 = vpack.c.bf16 %v8923_v6, %v8921_v17  ;;  %v8431_v17 = vld [vmem:[#allocation2 + $0x200] sm:$0xff]  ;;  %v8433_v6 = vld [vmem:[#allocation2 + $0x210] sm:$0xff] }
 0x22a   : > { %11023 = vmatpush1.bf16.msra.mxu0 %v11022_v27  ;;  %v11024_v4 = vpack.c.bf16 %v8430_v31, %v8428_v8  ;;  %v11238_v27 = vpack.c.bf16 %v8926_v10, %v8924_v1  ;;  %v11242_v8 = vpack.c.bf16 %v8930_v57, %v8928_v44  ;;  %v11244_v31 = vpack.c.bf16 %v8935_v54, %v8933_v21  ;;  %v8944_v54 = vld [vmem:[#allocation2 + $0x920] sm:$0xff] }
 0x22b   : > { %11203 = vmatpush1.bf16.msra.mxu1 %v11202_v0  ;;  %v11230_v0 = vpack.c.bf16 %v8918_v25, %v8916_v59  ;;  %v13721_v59 = vpop.permute.xlu0 %8350 }
 0x22c   : > { %11205 = vmatprep.subr.bf16.mxu1 %v11204_v12  ;;  %11025 = vmatprep.subr.bf16.mxu0 %v11024_v4  ;;  %v8920_v12 = vld [vmem:[#allocation2 + $0x860] sm:$0xff] }
 0x22d   : > { %v8932_v4 = vld [vmem:[#allocation2 + $0x8c0] sm:$0xff] }
 0x22e   : > { %11027 = vmatpush1.bf16.msra.mxu0 %v11026_v20  ;;  %v11246_v20 = vpack.c.bf16 %v8934_v11, %v8932_v4 }
 0x22f   : > { %11207 = vmatpush1.bf16.msra.mxu1 %v11206_v24  ;;  %11029 = vmatprep.subr.bf16.mxu0 %v11028_v49  ;;  %v8931_v24 = vld [vmem:[#allocation2 + $0x8b8] sm:$0xff]  ;;  %v11252_v49 = vpack.c.bf16 %v8943_v35, %v8941_v46  ;;  %v8441_v46 = vld [vmem:[#allocation2 + $0x250] sm:$0xff] }
 0x230   : > { %11209 = vmatprep.subr.bf16.mxu1 %v11208_v61  ;;  %v11240_v61 = vpack.c.bf16 %v8931_v24, %v8929_v51  ;;  %v8435_v51 = vld [vmem:[#allocation2 + $0x220] sm:$0xff]  ;;  %v8437_v24 = vld [vmem:[#allocation2 + $0x230] sm:$0xff] }
 0x233   : > { %11211 = vmatpush1.bf16.msra.mxu1 %v11210_v63  ;;  %v8939_v63 = vld [vmem:[#allocation2 + $0x8f8] sm:$0xff] }
 0x234   : > { %11213 = vmatprep.subr.bf16.mxu1 %v11212_v36  ;;  %v11248_v36 = vpack.c.bf16 %v8939_v63, %v8937_v34  ;;  %v8442_v34 = vld [vmem:[#allocation2 + $0x258] sm:$0xff]  ;;  %v8949_v63 = vld [vmem:[#allocation2 + $0x948] sm:$0xff] }
 0x237   : > { %11215 = vmatpush1.bf16.msra.mxu1 %v11214_v40 }
 0x238   : > { %v2509_v62 = vpop.f32.mrb[14].mxu1  ;;  %11217 = vmatprep.subr.bf16.mxu1 %v11216_v45 }
 0x239   : > { %v2519_v60 = vadd.f32 %v2509_v62, %v2186_v22  ;;  %v10873_v29 = vpop.f32.mrb[15].mxu1  ;;  %v11234_v22 = vpack.c.bf16 %v8922_v5, %v8920_v12  ;;  %v8940_v12 = vld [vmem:[#allocation2 + $0x900] sm:$0xff]  ;;  %v8942_v5 = vld [vmem:[#allocation2 + $0x910] sm:$0xff] }
 0x23b   : > { %11219 = vmatpush1.bf16.msra.mxu1 %v11218_v33 }
 0x23c   : > { %11221 = vmatprep.subr.bf16.mxu1 %v11220_v55 }
 0x23f   : > { %11223 = vmatpush1.bf16.msra.mxu1 %v11222_v16 }
 0x240   : > { %11225 = vmatprep.subr.bf16.mxu1 %v11224_v18 }
 0x243   : > { %11227 = vmatpush1.bf16.msra.mxu1 %v11226_v26 }
 0x244   : > { %11229 = vmatprep.subr.bf16.mxu1 %v11228_v14 }
 0x247   : > { %11231 = vmatpush1.bf16.msra.mxu1 %v11230_v0 }
 0x248   : > { %v2842_v15 = vpop.f32.mrb[16].mxu1  ;;  %11233 = vmatprep.subr.bf16.mxu1 %v11232_v41 }
 0x249   : > { %v2852_v2 = vadd.f32 %v2842_v15, %v2519_v60  ;;  %v10878_v19 = vpop.f32.mrb[17].mxu1  ;;  %v8945_v15 = vld [vmem:[#allocation2 + $0x928] sm:$0xff] }
 0x24a   : > { %v11254_v19 = vpack.c.bf16 %v8942_v5, %v8940_v12  ;;  %v8454_v12 = vld [vmem:[#allocation2 + $0x2b8] sm:$0xff]  ;;  %v8961_v5 = vld [vmem:[#allocation2 + $0x9a8] sm:$0xff] }
 0x24b   : > { %11235 = vmatpush1.bf16.msra.mxu1 %v11234_v22  ;;  %v8438_v22 = vld [vmem:[#allocation2 + $0x238] sm:$0xff] }
 0x24c   : > { %11237 = vmatprep.subr.bf16.mxu1 %v11236_v7  ;;  %v8947_v7 = vld [vmem:[#allocation2 + $0x938] sm:$0xff]  ;;  %v11032_v57 = vpack.c.bf16 %v8438_v22, %v8436_v38 }
 0x24d   : > { %v11256_v21 = vpack.c.bf16 %v8947_v7, %v8945_v15  ;;  %v8963_v38 = vld [vmem:[#allocation2 + $0x9b8] sm:$0xff]  ;;  %v8451_v15 = vld [vmem:[#allocation2 + $0x2a0] sm:$0xff]  ;;  %v8453_v7 = vld [vmem:[#allocation2 + $0x2b0] sm:$0xff] }
 0x24f   : > { %11239 = vmatpush1.bf16.msra.mxu1 %v11238_v27 }
 0x250   : > { %11241 = vmatprep.subr.bf16.mxu1 %v11240_v61 }
 0x253   : > { %11243 = vmatpush1.bf16.msra.mxu1 %v11242_v8  ;;  %v8946_v8 = vld [vmem:[#allocation2 + $0x930] sm:$0xff] }
 0x254   : > { %11245 = vmatprep.subr.bf16.mxu1 %v11244_v31  ;;  %v8440_v31 = vld [vmem:[#allocation2 + $0x248] sm:$0xff]  ;;  %v11258_v42 = vpack.c.bf16 %v8946_v8, %v8944_v54  ;;  %v8458_v8 = vld [vmem:[#allocation2 + $0x2d8] sm:$0xff] }
 0x255   : > { %v11036_v35 = vpack.c.bf16 %v8442_v34, %v8440_v31  ;;  %v8965_v31 = vld [vmem:[#allocation2 + $0x9c8] sm:$0xff] }
 0x257   : > { %11247 = vmatpush1.bf16.msra.mxu1 %v11246_v20  ;;  %v8951_v20 = vld [vmem:[#allocation2 + $0x958] sm:$0xff] }
 0x258   : > { %v3175_v48 = vpop.f32.mrb[18].mxu1  ;;  %11249 = vmatprep.subr.bf16.mxu1 %v11248_v36  ;;  %v11034_v36 = vpack.c.bf16 %v8437_v24, %v8435_v51  ;;  %v11272_v51 = vpack.c.bf16 %v8963_v38, %v8961_v5  ;;  %v8960_v24 = vld [vmem:[#allocation2 + $0x9a0] sm:$0xff]  ;;  %v8469_v38 = vld [vmem:[#allocation2 + $0x330] sm:$0xff] }
 0x259   : > { %v3185_v40 = vadd.f32 %v3175_v48, %v2852_v2  ;;  %v10883_v45 = vpop.f32.mrb[19].mxu1  ;;  %v11030_v2 = vpack.c.bf16 %v8433_v6, %v8431_v17  ;;  %v8948_v48 = vld [vmem:[#allocation2 + $0x940] sm:$0xff] }
 0x25a   : > { %v8446_v45 = vld [vmem:[#allocation2 + $0x278] sm:$0xff]  ;;  %v8956_v6 = vld [vmem:[#allocation2 + $0x980] sm:$0xff] }
 0x25b   : > { %11251 = vmatpush1.bf16.msra.mxu1 %v11250_v23  ;;  %v11260_v23 = vpack.c.bf16 %v8951_v20, %v8949_v63  ;;  %v8455_v63 = vld [vmem:[#allocation2 + $0x2c0] sm:$0xff]  ;;  %v8457_v20 = vld [vmem:[#allocation2 + $0x2d0] sm:$0xff] }
 0x25c   : > { %11253 = vmatprep.subr.bf16.mxu1 %v11252_v49  ;;  %v8950_v49 = vld [vmem:[#allocation2 + $0x950] sm:$0xff]  ;;  %v8467_v5 = vld [vmem:[#allocation2 + $0x320] sm:$0xff] }
 0x268   : > { %v3508_v37 = vpop.f32.mrb[20].mxu1 }
 0x269   : > { %v3518_v58 = vadd.f32 %v3508_v37, %v3185_v40  ;;  %v10888_v3 = vpop.f32.mrb[21].mxu1  ;;  %v8444_v40 = vld [vmem:[#allocation2 + $0x268] sm:$0xff] }
 0x26a   : > { %v8953_v37 = vld [vmem:[#allocation2 + $0x968] sm:$0xff]  ;;  %v11038_v3 = vpack.c.bf16 %v8441_v46, %v8439_v30  ;;  %v8964_v30 = vld [vmem:[#allocation2 + $0x9c0] sm:$0xff]  ;;  %v8966_v46 = vld [vmem:[#allocation2 + $0x9d0] sm:$0xff] }
 0x278   : > { %v3841_v53 = vpop.f32.mrb[22].mxu1 }
 0x279   : > { %v3851_v33 = vadd.f32 %v3841_v53, %v3518_v58  ;;  %v10893_v62 = vpop.f32.mrb[23].mxu1  ;;  %v8955_v58 = vld [vmem:[#allocation2 + $0x978] sm:$0xff]  ;;  %v11262_v53 = vpack.c.bf16 %v8950_v49, %v8948_v48  ;;  %v8969_v48 = vld [vmem:[#allocation2 + $0x9e8] sm:$0xff] }
 0x27a   : > { %v8445_v62 = vld [vmem:[#allocation2 + $0x270] sm:$0xff]  ;;  %v8971_v49 = vld [vmem:[#allocation2 + $0x9f8] sm:$0xff] }
 0x288   : > { %v4174_v55 = vpop.f32.mrb[24].mxu1 }
 0x289   : > { %v4184_v43 = vadd.f32 %v4174_v55, %v3851_v33  ;;  %v10898_v13 = vpop.f32.mrb[25].mxu1  ;;  %v8443_v33 = vld [vmem:[#allocation2 + $0x260] sm:$0xff] }
 0x28a   : > { %v11264_v13 = vpack.c.bf16 %v8955_v58, %v8953_v37  ;;  %v8459_v37 = vld [vmem:[#allocation2 + $0x2e0] sm:$0xff]  ;;  %v8461_v58 = vld [vmem:[#allocation2 + $0x2f0] sm:$0xff] }
 0x291   : > { %v4507_v60 = vpop.f32.mrb[26].mxu1 }
 0x292   : > { %v4517_v29 = vadd.f32 %v4507_v60, %v4184_v43  ;;  %v10903_v56 = vpop.f32.mrb[27].mxu1  ;;  %v11040_v43 = vpack.c.bf16 %v8446_v45, %v8444_v40  ;;  %v8952_v60 = vld [vmem:[#allocation2 + $0x960] sm:$0xff]  ;;  %v11054_v40 = vpack.c.bf16 %v8457_v20, %v8455_v63  ;;  %v11278_v45 = vpack.c.bf16 %v8966_v46, %v8964_v30  ;;  %v8982_v20 = vld [vmem:[#allocation2 + $0xa50] sm:$0xff]  ;;  %v8985_v30 = vld [vmem:[#allocation2 + $0xa68] sm:$0xff] }
 0x293   : > { %v8448_v56 = vld [vmem:[#allocation2 + $0x288] sm:$0xff]  ;;  %v8980_v63 = vld [vmem:[#allocation2 + $0xa40] sm:$0xff]  ;;  %v8987_v46 = vld [vmem:[#allocation2 + $0xa78] sm:$0xff] }
 0x299   : > { %v4840_v9 = vpop.f32.mrb[28].mxu1 }
 0x29a   : > { %v4850_v16 = vadd.f32 %v4840_v9, %v4517_v29  ;;  %v10908_v18 = vpop.f32.mrb[29].mxu1  ;;  %v8954_v29 = vld [vmem:[#allocation2 + $0x970] sm:$0xff] }
 0x29b   : > { %v8450_v18 = vld [vmem:[#allocation2 + $0x298] sm:$0xff] }
 0x2a1   : > { %v5173_v52 = vpop.f32.mrb[30].mxu1 }
 0x2a2   : > { %v5183_v47 = vadd.f32 %v5173_v52, %v4850_v16  ;;  %v10913_v32 = vpop.f32.mrb[31].mxu1  ;;  %v8957_v52 = vld [vmem:[#allocation2 + $0x988] sm:$0xff] }
 0x2a3   : > { %v11042_v32 = vpack.c.bf16 %v8445_v62, %v8443_v33  ;;  %v11280_v33 = vpack.c.bf16 %v8971_v49, %v8969_v48  ;;  %v8968_v62 = vld [vmem:[#allocation2 + $0x9e0] sm:$0xff]  ;;  %v8477_v49 = vld [vmem:[#allocation2 + $0x370] sm:$0xff] }
 0x2a4   : > { %v8475_v48 = vld [vmem:[#allocation2 + $0x360] sm:$0xff] }
 0x2a9   : > { %v5506_v39 = vpop.f32.mrb[32].mxu1 }
 0x2aa   : > { %v5516_v26 = vadd.f32 %v5506_v39, %v5183_v47  ;;  %v10918_v14 = vpop.f32.mrb[33].mxu1  ;;  %v8959_v47 = vld [vmem:[#allocation2 + $0x998] sm:$0xff]  ;;  %v11266_v39 = vpack.c.bf16 %v8954_v29, %v8952_v60 }
 0x2ab   : > { %v8449_v14 = vld [vmem:[#allocation2 + $0x290] sm:$0xff]  ;;  %v11268_v17 = vpack.c.bf16 %v8959_v47, %v8957_v52  ;;  %v8466_v29 = vld [vmem:[#allocation2 + $0x318] sm:$0xff]  ;;  %v8463_v52 = vld [vmem:[#allocation2 + $0x300] sm:$0xff] }
 0x2ac   : > { %v8123_v25 = vpop.f32.mrb[0].mxu0  ;;  %v8465_v47 = vld [vmem:[#allocation2 + $0x310] sm:$0xff] }
 0x2ad   : > { %v8125_v0 = vpop.f32.mrb[1].mxu0  ;;  %v8353_v41 = vadd.f32 %v13721_v59, %v8123_v25  ;;  %v11044_v25 = vpack.c.bf16 %v8450_v18, %v8448_v56  ;;  %v8973_v56 = vld [vmem:[#allocation2 + $0xa08] sm:$0xff] }
 0x2ae   : > { %v8354_v28 = vadd.f32 %v13721_v59, %v8125_v0  ;;  %v8958_v0 = vld [vmem:[#allocation2 + $0x990] sm:$0xff] }
 0x2af   : > { %v13731_v44 = vmax.f32 %v8353_v41, 0.0  ;;  %v8452_v41 = vld [vmem:[#allocation2 + $0x2a8] sm:$0xff]  ;;  %v11270_v22 = vpack.c.bf16 %v8958_v0, %v8956_v6  ;;  %v8979_v0 = vld [vmem:[#allocation2 + $0xa38] sm:$0xff] }
 0x2b0   : > { %v13725_v1 = vmax.f32 %v8354_v28, 0.0  ;;  %v13727_v10 = vpop.f32.mrb[2].mxu0  ;;  %v8977_v6 = vld [vmem:[#allocation2 + $0xa28] sm:$0xff] }
 0x2b1   : > { %v5839_v27 = vpop.f32.mrb[34].mxu1  ;;  %v13729_v61 = vpop.f32.mrb[3].mxu0 }
 0x2b2   : > { %v5849_v4 = vadd.f32 %v5839_v27, %v5516_v26  ;;  %8655 = vmatprep.mubr.f32.mxu0 %v13725_v1  ;;  %9164 = vmatprep.mubr.f32.mxu1 %v13725_v1  ;;  %v10923_v11 = vpop.f32.mrb[35].mxu1  ;;  %v8447_v26 = vld [vmem:[#allocation2 + $0x280] sm:$0xff]  ;;  %v8962_v27 = vld [vmem:[#allocation2 + $0x9b0] sm:$0xff] }
 0x2b3   : > { %8656 = vmatmul.mubr.f32.vlgmr.msra.gmra.mrb[4].mxu0 %v13731_v44  ;;  %9165 = vmatmul.mubr.f32.vlgmr.msra.gmra.mrb[52].mxu1 %v13731_v44  ;;  %v11046_v28 = vpack.c.bf16 %v8449_v14, %v8447_v26  ;;  %v11050_v11 = vpack.c.bf16 %v8453_v7, %v8451_v15  ;;  %v11274_v34 = vpack.c.bf16 %v8962_v27, %v8960_v24  ;;  %v8972_v26 = vld [vmem:[#allocation2 + $0xa00] sm:$0xff]  ;;  %v8974_v14 = vld [vmem:[#allocation2 + $0xa10] sm:$0xff]  ;;  %v8474_v27 = vld [vmem:[#allocation2 + $0x358] sm:$0xff] }
 0x2b4   : > { %11031 = vmatpush1.bf16.msra.mxu0 %v11030_v2  ;;  %11255 = vmatpush1.bf16.msra.mxu1 %v11254_v19  ;;  %v11048_v19 = vpack.c.bf16 %v8454_v12, %v8452_v41  ;;  %v11062_v41 = vpack.c.bf16 %v8465_v47, %v8463_v52  ;;  %v11286_v12 = vpack.c.bf16 %v8974_v14, %v8972_v26  ;;  %v8976_v7 = vld [vmem:[#allocation2 + $0xa20] sm:$0xff]  ;;  %v8990_v47 = vld [vmem:[#allocation2 + $0xa90] sm:$0xff]  ;;  %v8993_v26 = vld [vmem:[#allocation2 + $0xaa8] sm:$0xff] }
 0x2b5   : > { %11033 = vmatprep.subr.bf16.mxu0 %v11032_v57  ;;  %11257 = vmatprep.subr.bf16.mxu1 %v11256_v21  ;;  %v8456_v57 = vld [vmem:[#allocation2 + $0x2c8] sm:$0xff]  ;;  %v11288_v15 = vpack.c.bf16 %v8979_v0, %v8977_v6  ;;  %v8988_v52 = vld [vmem:[#allocation2 + $0xa80] sm:$0xff]  ;;  %v8995_v14 = vld [vmem:[#allocation2 + $0xab8] sm:$0xff] }
 0x2b6   : > { %v8483_v6 = vld [vmem:[#allocation2 + $0x3a0] sm:$0xff]  ;;  %v8485_v0 = vld [vmem:[#allocation2 + $0x3b0] sm:$0xff] }
 0x2b8   : > { %11035 = vmatpush1.bf16.msra.mxu0 %v11034_v36  ;;  %11259 = vmatpush1.bf16.msra.mxu1 %v11258_v42  ;;  %v11052_v36 = vpack.c.bf16 %v8458_v8, %v8456_v57  ;;  %v8981_v57 = vld [vmem:[#allocation2 + $0xa48] sm:$0xff] }
 0x2b9   : > { %v6172_v55 = vpop.f32.mrb[36].mxu1  ;;  %11037 = vmatprep.subr.bf16.mxu0 %v11036_v35  ;;  %11261 = vmatprep.subr.bf16.mxu1 %v11260_v23  ;;  %v8460_v35 = vld [vmem:[#allocation2 + $0x2e8] sm:$0xff]  ;;  %v8462_v23 = vld [vmem:[#allocation2 + $0x2f8] sm:$0xff] }
 0x2ba   : > { %v6182_v9 = vadd.f32 %v6172_v55, %v5849_v4  ;;  %v10928_v16 = vpop.f32.mrb[37].mxu1  ;;  %v8967_v4 = vld [vmem:[#allocation2 + $0x9d8] sm:$0xff]  ;;  %v8970_v55 = vld [vmem:[#allocation2 + $0x9f0] sm:$0xff] }
 0x2bb   : > { %v11276_v42 = vpack.c.bf16 %v8967_v4, %v8965_v31  ;;  %v11058_v16 = vpack.c.bf16 %v8461_v58, %v8459_v37  ;;  %v11282_v18 = vpack.c.bf16 %v8970_v55, %v8968_v62  ;;  %v8471_v31 = vld [vmem:[#allocation2 + $0x340] sm:$0xff]  ;;  %v8473_v4 = vld [vmem:[#allocation2 + $0x350] sm:$0xff]  ;;  %v11296_v37 = vpack.c.bf16 %v8987_v46, %v8985_v30  ;;  %v8482_v55 = vld [vmem:[#allocation2 + $0x398] sm:$0xff] }
 0x2bc   : > { %11039 = vmatpush1.bf16.msra.mxu0 %v11038_v3  ;;  %11263 = vmatpush1.bf16.msra.mxu1 %v11262_v53  ;;  %v11056_v53 = vpack.c.bf16 %v8462_v23, %v8460_v35  ;;  %v11070_v35 = vpack.c.bf16 %v8473_v4, %v8471_v31  ;;  %v11294_v23 = vpack.c.bf16 %v8982_v20, %v8980_v63  ;;  %v8984_v58 = vld [vmem:[#allocation2 + $0xa60] sm:$0xff]  ;;  %v8998_v4 = vld [vmem:[#allocation2 + $0xad0] sm:$0xff]  ;;  %v9001_v63 = vld [vmem:[#allocation2 + $0xae8] sm:$0xff] }
 0x2bd   : > { %11041 = vmatprep.subr.bf16.mxu0 %v11040_v43  ;;  %11265 = vmatprep.subr.bf16.mxu1 %v11264_v13  ;;  %v8464_v43 = vld [vmem:[#allocation2 + $0x308] sm:$0xff]  ;;  %v8996_v31 = vld [vmem:[#allocation2 + $0xac0] sm:$0xff]  ;;  %v9003_v20 = vld [vmem:[#allocation2 + $0xaf8] sm:$0xff] }
 0x2be   : > { %v8491_v30 = vld [vmem:[#allocation2 + $0x3e0] sm:$0xff]  ;;  %v8493_v46 = vld [vmem:[#allocation2 + $0x3f0] sm:$0xff] }
 0x2c0   : > { %11043 = vmatpush1.bf16.msra.mxu0 %v11042_v32  ;;  %11267 = vmatpush1.bf16.msra.mxu1 %v11266_v39  ;;  %v11060_v32 = vpack.c.bf16 %v8466_v29, %v8464_v43  ;;  %v8989_v43 = vld [vmem:[#allocation2 + $0xa88] sm:$0xff] }
 0x2c1   : > { %v6505_v2 = vpop.f32.mrb[38].mxu1  ;;  %11045 = vmatprep.subr.bf16.mxu0 %v11044_v25  ;;  %11269 = vmatprep.subr.bf16.mxu1 %v11268_v17  ;;  %v8468_v25 = vld [vmem:[#allocation2 + $0x328] sm:$0xff]  ;;  %v8470_v17 = vld [vmem:[#allocation2 + $0x338] sm:$0xff] }
 0x2c2   : > { %v6515_v21 = vadd.f32 %v6505_v2, %v6182_v9  ;;  %v10933_v54 = vpop.f32.mrb[39].mxu1  ;;  %v8975_v9 = vld [vmem:[#allocation2 + $0xa18] sm:$0xff]  ;;  %v8978_v2 = vld [vmem:[#allocation2 + $0xa30] sm:$0xff] }
 0x2c3   : > { %v11284_v39 = vpack.c.bf16 %v8975_v9, %v8973_v56  ;;  %v11066_v54 = vpack.c.bf16 %v8469_v38, %v8467_v5  ;;  %v11290_v8 = vpack.c.bf16 %v8978_v2, %v8976_v7  ;;  %v8479_v56 = vld [vmem:[#allocation2 + $0x380] sm:$0xff]  ;;  %v8481_v9 = vld [vmem:[#allocation2 + $0x390] sm:$0xff]  ;;  %v11304_v5 = vpack.c.bf16 %v8995_v14, %v8993_v26  ;;  %v8490_v2 = vld [vmem:[#allocation2 + $0x3d8] sm:$0xff] }
 0x2c4   : > { %11047 = vmatpush1.bf16.msra.mxu0 %v11046_v28  ;;  %11271 = vmatpush1.bf16.msra.mxu1 %v11270_v22  ;;  %v11064_v22 = vpack.c.bf16 %v8470_v17, %v8468_v25  ;;  %v11078_v25 = vpack.c.bf16 %v8481_v9, %v8479_v56  ;;  %v11302_v17 = vpack.c.bf16 %v8990_v47, %v8988_v52  ;;  %v8992_v38 = vld [vmem:[#allocation2 + $0xaa0] sm:$0xff]  ;;  %v9006_v52 = vld [vmem:[#allocation2 + $0xb10] sm:$0xff]  ;;  %v8502_v26 = vld [vmem:[#allocation2 + $0x438] sm:$0xff] }
 0x2c5   : > { %11049 = vmatprep.subr.bf16.mxu0 %v11048_v19  ;;  %11273 = vmatprep.subr.bf16.mxu1 %v11272_v51  ;;  %v8472_v19 = vld [vmem:[#allocation2 + $0x348] sm:$0xff] }
 0x2c6   : > { %v9009_v14 = vld [vmem:[#allocation2 + $0xb28] sm:$0xff] }
 0x2c8   : > { %11051 = vmatpush1.bf16.msra.mxu0 %v11050_v11  ;;  %11275 = vmatpush1.bf16.msra.mxu1 %v11274_v34  ;;  %v11068_v11 = vpack.c.bf16 %v8474_v27, %v8472_v19  ;;  %v8997_v19 = vld [vmem:[#allocation2 + $0xac8] sm:$0xff] }
 0x2c9   : > { %v6838_v3 = vpop.f32.mrb[40].mxu1  ;;  %11053 = vmatprep.subr.bf16.mxu0 %v11052_v36  ;;  %11277 = vmatprep.subr.bf16.mxu1 %v11276_v42  ;;  %v8476_v36 = vld [vmem:[#allocation2 + $0x368] sm:$0xff]  ;;  %v8478_v42 = vld [vmem:[#allocation2 + $0x378] sm:$0xff] }
 0x2ca   : > { %v6848_v13 = vadd.f32 %v6838_v3, %v6515_v21  ;;  %v10938_v60 = vpop.f32.mrb[41].mxu1  ;;  %v8983_v21 = vld [vmem:[#allocation2 + $0xa58] sm:$0xff]  ;;  %v8986_v3 = vld [vmem:[#allocation2 + $0xa70] sm:$0xff] }
 0x2cb   : > { %v11292_v34 = vpack.c.bf16 %v8983_v21, %v8981_v57  ;;  %v11074_v60 = vpack.c.bf16 %v8477_v49, %v8475_v48  ;;  %v11298_v29 = vpack.c.bf16 %v8986_v3, %v8984_v58  ;;  %v8487_v57 = vld [vmem:[#allocation2 + $0x3c0] sm:$0xff]  ;;  %v8489_v21 = vld [vmem:[#allocation2 + $0x3d0] sm:$0xff]  ;;  %v11312_v48 = vpack.c.bf16 %v9003_v20, %v9001_v63  ;;  %v8498_v3 = vld [vmem:[#allocation2 + $0x418] sm:$0xff] }
 0x2cc   : > { %11055 = vmatpush1.bf16.msra.mxu0 %v11054_v40  ;;  %11279 = vmatpush1.bf16.msra.mxu1 %v11278_v45  ;;  %v11072_v45 = vpack.c.bf16 %v8478_v42, %v8476_v36  ;;  %v11086_v36 = vpack.c.bf16 %v8489_v21, %v8487_v57  ;;  %v11310_v42 = vpack.c.bf16 %v8998_v4, %v8996_v31  ;;  %v9000_v49 = vld [vmem:[#allocation2 + $0xae0] sm:$0xff]  ;;  %v8505_v31 = vld [vmem:[#allocation2 + $0x450] sm:$0xff]  ;;  %v8508_v20 = vld [vmem:[#allocation2 + $0x468] sm:$0xff] }
 0x2cd   : > { %11057 = vmatprep.subr.bf16.mxu0 %v11056_v53  ;;  %11281 = vmatprep.subr.bf16.mxu1 %v11280_v33  ;;  %v8480_v53 = vld [vmem:[#allocation2 + $0x388] sm:$0xff]  ;;  %v9014_v63 = vld [vmem:[#allocation2 + $0xb50] sm:$0xff] }
 0x2d0   : > { %11059 = vmatpush1.bf16.msra.mxu0 %v11058_v16  ;;  %11283 = vmatpush1.bf16.msra.mxu1 %v11282_v18  ;;  %v11076_v16 = vpack.c.bf16 %v8482_v55, %v8480_v53  ;;  %v9005_v53 = vld [vmem:[#allocation2 + $0xb08] sm:$0xff] }
 0x2d1   : > { %v7135_v28 = vpop.f32.mrb[42].mxu1  ;;  %11061 = vmatprep.subr.bf16.mxu0 %v11060_v32  ;;  %11285 = vmatprep.subr.bf16.mxu1 %v11284_v39  ;;  %v8484_v32 = vld [vmem:[#allocation2 + $0x3a8] sm:$0xff]  ;;  %v8486_v39 = vld [vmem:[#allocation2 + $0x3b8] sm:$0xff] }
 0x2d2   : > { %v7145_v51 = vadd.f32 %v7135_v28, %v6848_v13  ;;  %v10943_v24 = vpop.f32.mrb[43].mxu1  ;;  %v8991_v13 = vld [vmem:[#allocation2 + $0xa98] sm:$0xff]  ;;  %v8994_v28 = vld [vmem:[#allocation2 + $0xab0] sm:$0xff] }
 0x2d3   : > { %v11300_v18 = vpack.c.bf16 %v8991_v13, %v8989_v43  ;;  %v11082_v24 = vpack.c.bf16 %v8485_v0, %v8483_v6  ;;  %v11306_v27 = vpack.c.bf16 %v8994_v28, %v8992_v38 }
 0x2d4   : > { %11063 = vmatpush1.bf16.msra.mxu0 %v11062_v41  ;;  %11287 = vmatpush1.bf16.msra.mxu1 %v11286_v12  ;;  %v11080_v12 = vpack.c.bf16 %v8486_v39, %v8484_v32  ;;  %v8500_v32 = vld [vmem:[#allocation2 + $0x428] sm:$0xff]  ;;  %v8358_v39 = vadd.f32 %v13721_v59, %v13729_v61  ;;  %v9010_v61 = vld [vmem:[#allocation2 + $0xb30] sm:$0xff] }
 0x2d5   : > { %11065 = vmatprep.subr.bf16.mxu0 %v11064_v22  ;;  %11289 = vmatprep.subr.bf16.mxu1 %v11288_v15  ;;  %v8488_v22 = vld [vmem:[#allocation2 + $0x3c8] sm:$0xff] }
 0x2d6   : > { %v13749_v57 = vmax.f32 %v8358_v39, 0.0 }
 0x2d8   : > { %11067 = vmatpush1.bf16.msra.mxu0 %v11066_v54  ;;  %11291 = vmatpush1.bf16.msra.mxu1 %v11290_v8  ;;  %v11084_v54 = vpack.c.bf16 %v8490_v2, %v8488_v22  ;;  %v9008_v22 = vld [vmem:[#allocation2 + $0xb20] sm:$0xff]  ;;  %v11096_v2 = vpack.c.bf16 %v8502_v26, %v8500_v32 }
 0x2d9   : > { %v7436_v40 = vpop.f32.mrb[44].mxu1  ;;  %11069 = vmatprep.subr.bf16.mxu0 %v11068_v11  ;;  %11293 = vmatprep.subr.bf16.mxu1 %v11292_v34  ;;  %v8492_v11 = vld [vmem:[#allocation2 + $0x3e8] sm:$0xff]  ;;  %v8494_v34 = vld [vmem:[#allocation2 + $0x3f8] sm:$0xff]  ;;  %v8515_v26 = vld [vmem:[#allocation2 + $0x4a0] sm:$0xff] }
 0x2da   : > { %v7446_v33 = vadd.f32 %v7436_v40, %v7145_v51  ;;  %v10948_v62 = vpop.f32.mrb[45].mxu1  ;;  %v8999_v51 = vld [vmem:[#allocation2 + $0xad8] sm:$0xff]  ;;  %v9002_v40 = vld [vmem:[#allocation2 + $0xaf0] sm:$0xff] }
 0x2db   : > { %v11308_v8 = vpack.c.bf16 %v8999_v51, %v8997_v19  ;;  %v11090_v62 = vpack.c.bf16 %v8493_v46, %v8491_v30  ;;  %v11314_v55 = vpack.c.bf16 %v9002_v40, %v9000_v49  ;;  %v8506_v51 = vld [vmem:[#allocation2 + $0x458] sm:$0xff] }
 0x2dc   : > { %11071 = vmatpush1.bf16.msra.mxu0 %v11070_v35  ;;  %11295 = vmatpush1.bf16.msra.mxu1 %v11294_v23  ;;  %v11088_v23 = vpack.c.bf16 %v8494_v34, %v8492_v11  ;;  %v9012_v34 = vld [vmem:[#allocation2 + $0xb40] sm:$0xff]  ;;  %v9019_v30 = vld [vmem:[#allocation2 + $0xb78] sm:$0xff] }
 0x2dd   : > { %11073 = vmatprep.subr.bf16.mxu0 %v11072_v45  ;;  %11297 = vmatprep.subr.bf16.mxu1 %v11296_v37  ;;  %v8496_v45 = vld [vmem:[#allocation2 + $0x408] sm:$0xff] }
 0x2de   : > { %v11092_v13 = vpack.c.bf16 %v8498_v3, %v8496_v45  ;;  %v9016_v45 = vld [vmem:[#allocation2 + $0xb60] sm:$0xff]  ;;  %v8514_v3 = vld [vmem:[#allocation2 + $0x498] sm:$0xff] }
 0x2e0   : > { %11075 = vmatpush1.bf16.msra.mxu0 %v11074_v60  ;;  %11299 = vmatpush1.bf16.msra.mxu1 %v11298_v29  ;;  %v8495_v29 = vld [vmem:[#allocation2 + $0x400] sm:$0xff] }
 0x2e1   : > { %v7736_v41 = vpop.f32.mrb[46].mxu1  ;;  %11077 = vmatprep.subr.bf16.mxu0 %v11076_v16  ;;  %11301 = vmatprep.subr.bf16.mxu1 %v11300_v18  ;;  %v8497_v16 = vld [vmem:[#allocation2 + $0x410] sm:$0xff]  ;;  %v9004_v18 = vld [vmem:[#allocation2 + $0xb00] sm:$0xff] }
 0x2e2   : > { %v7746_v15 = vadd.f32 %v7736_v41, %v7446_v33  ;;  %v10953_v7 = vpop.f32.mrb[47].mxu1  ;;  %v9007_v33 = vld [vmem:[#allocation2 + $0xb18] sm:$0xff]  ;;  %v11094_v0 = vpack.c.bf16 %v8497_v16, %v8495_v29  ;;  %v11318_v41 = vpack.c.bf16 %v9006_v52, %v9004_v18  ;;  %v8516_v16 = vld [vmem:[#allocation2 + $0x4a8] sm:$0xff] }
 0x2e3   : > { %v11316_v60 = vpack.c.bf16 %v9007_v33, %v9005_v53  ;;  %v9021_v53 = vld [vmem:[#allocation2 + $0xb88] sm:$0xff]  ;;  %v9023_v33 = vld [vmem:[#allocation2 + $0xb98] sm:$0xff] }
 0x2e4   : > { %11079 = vmatpush1.bf16.msra.mxu0 %v11078_v25  ;;  %11303 = vmatpush1.bf16.msra.mxu1 %v11302_v17  ;;  %v9011_v25 = vld [vmem:[#allocation2 + $0xb38] sm:$0xff]  ;;  %v11332_v29 = vpack.c.bf16 %v9023_v33, %v9021_v53  ;;  %v9025_v52 = vld [vmem:[#allocation2 + $0xba8] sm:$0xff]  ;;  %v9036_v33 = vld [vmem:[#allocation2 + $0xc00] sm:$0xff] }
 0x2e5   : > { %11081 = vmatprep.subr.bf16.mxu0 %v11080_v12  ;;  %11305 = vmatprep.subr.bf16.mxu1 %v11304_v5  ;;  %v8499_v12 = vld [vmem:[#allocation2 + $0x420] sm:$0xff]  ;;  %v8501_v5 = vld [vmem:[#allocation2 + $0x430] sm:$0xff]  ;;  %v11320_v19 = vpack.c.bf16 %v9011_v25, %v9009_v14  ;;  %v8518_v18 = vld [vmem:[#allocation2 + $0x4b8] sm:$0xff] }
 0x2e6   : > { %v11098_v21 = vpack.c.bf16 %v8501_v5, %v8499_v12  ;;  %v8517_v14 = vld [vmem:[#allocation2 + $0x4b0] sm:$0xff]  ;;  %v11112_v25 = vpack.c.bf16 %v8518_v18, %v8516_v16  ;;  %v8520_v12 = vld [vmem:[#allocation2 + $0x4c8] sm:$0xff]  ;;  %v8522_v5 = vld [vmem:[#allocation2 + $0x4d8] sm:$0xff] }
 0x2e7   : > { %v8533_v16 = vld [vmem:[#allocation2 + $0x530] sm:$0xff] }
 0x2e8   : > { %11083 = vmatpush1.bf16.msra.mxu0 %v11082_v24  ;;  %11307 = vmatpush1.bf16.msra.mxu1 %v11306_v27  ;;  %v9013_v24 = vld [vmem:[#allocation2 + $0xb48] sm:$0xff]  ;;  %v9015_v27 = vld [vmem:[#allocation2 + $0xb58] sm:$0xff] }
 0x2e9   : > { %v8036_v35 = vpop.f32.mrb[48].mxu1  ;;  %11085 = vmatprep.subr.bf16.mxu0 %v11084_v54  ;;  %11309 = vmatprep.subr.bf16.mxu1 %v11308_v8  ;;  %v11322_v54 = vpack.c.bf16 %v9010_v61, %v9008_v22  ;;  %v8503_v8 = vld [vmem:[#allocation2 + $0x440] sm:$0xff]  ;;  %v11324_v11 = vpack.c.bf16 %v9015_v27, %v9013_v24  ;;  %v9029_v22 = vld [vmem:[#allocation2 + $0xbc8] sm:$0xff]  ;;  %v9031_v61 = vld [vmem:[#allocation2 + $0xbd8] sm:$0xff] }
 0x2ea   : > { %v8046_v37 = vadd.f32 %v8036_v35, %v7746_v15  ;;  %v10958_v58 = vpop.f32.mrb[49].mxu1  ;;  %v8504_v15 = vld [vmem:[#allocation2 + $0x448] sm:$0xff]  ;;  %v11102_v46 = vpack.c.bf16 %v8505_v31, %v8503_v8  ;;  %v11326_v35 = vpack.c.bf16 %v9014_v63, %v9012_v34  ;;  %v11340_v24 = vpack.c.bf16 %v9031_v61, %v9029_v22  ;;  %v9028_v27 = vld [vmem:[#allocation2 + $0xbc0] sm:$0xff]  ;;  %v8526_v8 = vld [vmem:[#allocation2 + $0x4f8] sm:$0xff] }
 0x2eb   : > { %v11100_v4 = vpack.c.bf16 %v8506_v51, %v8504_v15  ;;  %v8512_v58 = vld [vmem:[#allocation2 + $0x488] sm:$0xff]  ;;  %v11114_v15 = vpack.c.bf16 %v8517_v14, %v8515_v26  ;;  %v11116_v51 = vpack.c.bf16 %v8522_v5, %v8520_v12  ;;  %v8523_v63 = vld [vmem:[#allocation2 + $0x4e0] sm:$0xff]  ;;  %v8538_v26 = vld [vmem:[#allocation2 + $0x558] sm:$0xff] }
 0x2ec   : > { %11087 = vmatpush1.bf16.msra.mxu0 %v11086_v36  ;;  %11311 = vmatpush1.bf16.msra.mxu1 %v11310_v42  ;;  %v8510_v36 = vld [vmem:[#allocation2 + $0x478] sm:$0xff]  ;;  %v9017_v42 = vld [vmem:[#allocation2 + $0xb68] sm:$0xff]  ;;  %v8537_v12 = vld [vmem:[#allocation2 + $0x550] sm:$0xff] }
 0x2ed   : > { %v8194_v43 = vpop.f32.mrb[0].mxu1  ;;  %11089 = vmatprep.subr.bf16.mxu0 %v11088_v23  ;;  %11313 = vmatprep.subr.bf16.mxu1 %v11312_v48  ;;  %v8507_v23 = vld [vmem:[#allocation2 + $0x460] sm:$0xff]  ;;  %v8509_v48 = vld [vmem:[#allocation2 + $0x470] sm:$0xff]  ;;  %v11104_v49 = vpack.c.bf16 %v8510_v36, %v8508_v20  ;;  %v11328_v40 = vpack.c.bf16 %v9019_v30, %v9017_v42  ;;  %v9033_v31 = vld [vmem:[#allocation2 + $0xbe8] sm:$0xff] }
 0x2ee   : > { %v8355_v56 = vadd.f32 %v13721_v59, %v8194_v43  ;;  %v8196_v9 = vpop.f32.mrb[1].mxu1  ;;  %v8511_v43 = vld [vmem:[#allocation2 + $0x480] sm:$0xff]  ;;  %v8525_v20 = vld [vmem:[#allocation2 + $0x4f0] sm:$0xff]  ;;  %v9045_v14 = vld [vmem:[#allocation2 + $0xc48] sm:$0xff] }
 0x2ef   : > { %v8356_v47 = vadd.f32 %v13721_v59, %v8196_v9  ;;  %v9022_v9 = vld [vmem:[#allocation2 + $0xb90] sm:$0xff]  ;;  %v9032_v30 = vld [vmem:[#allocation2 + $0xbe0] sm:$0xff] }
 0x2f0   : > { %11091 = vmatpush1.bf16.msra.mxu0 %v11090_v62  ;;  %11315 = vmatpush1.bf16.msra.mxu1 %v11314_v55  ;;  %v13743_v38 = vmax.f32 %v8355_v56, 0.0  ;;  %v11106_v62 = vpack.c.bf16 %v8509_v48, %v8507_v23  ;;  %v9020_v56 = vld [vmem:[#allocation2 + $0xb80] sm:$0xff]  ;;  %v8530_v23 = vld [vmem:[#allocation2 + $0x518] sm:$0xff]  ;;  %v9037_v48 = vld [vmem:[#allocation2 + $0xc08] sm:$0xff] }
 0x2f1   : > { %v13741_v17 = vmax.f32 %v8356_v47, 0.0  ;;  %v8336_v6 = vpop.f32.mrb[50].mxu1  ;;  %11093 = vmatprep.subr.bf16.mxu0 %v11092_v13  ;;  %11317 = vmatprep.subr.bf16.mxu1 %v11316_v60  ;;  %v8513_v13 = vld [vmem:[#allocation2 + $0x490] sm:$0xff]  ;;  %v11108_v60 = vpack.c.bf16 %v8514_v3, %v8512_v58  ;;  %v9027_v47 = vld [vmem:[#allocation2 + $0xbb8] sm:$0xff]  ;;  %v11334_v39 = vpack.c.bf16 %v9022_v9, %v9020_v56  ;;  %v8531_v9 = vld [vmem:[#allocation2 + $0x520] sm:$0xff] }
 0x2f2   : > { %v13745_v28 = vadd.f32 %v8336_v6, %v8046_v37  ;;  %v10963_v7 = vpop.f32.mrb[51].mxu1  ;;  %v9018_v37 = vld [vmem:[#allocation2 + $0xb70] sm:$0xff]  ;;  %v11110_v32 = vpack.c.bf16 %v8513_v13, %v8511_v43  ;;  %v11336_v6 = vpack.c.bf16 %v9027_v47, %v9025_v52  ;;  %v8534_v43 = vld [vmem:[#allocation2 + $0x538] sm:$0xff]  ;;  %v9041_v13 = vld [vmem:[#allocation2 + $0xc28] sm:$0xff] }
 0x2f3   : > { %8726 = vmatprep.mubr.f32.mxu0 %v13741_v17  ;;  %9235 = vmatprep.mubr.f32.mxu1 %v13741_v17  ;;  %v11330_v55 = vpack.c.bf16 %v9018_v37, %v9016_v45  ;;  %v8527_v37 = vld [vmem:[#allocation2 + $0x500] sm:$0xff]  ;;  %v8529_v58 = vld [vmem:[#allocation2 + $0x510] sm:$0xff] }
 0x2f4   : > { %8727 = vmatmul.mubr.f32.vlgmr.msra.gmra.mrb[4].mxu0 %v13743_v38  ;;  %9236 = vmatmul.mubr.f32.vlgmr.msra.gmra.mrb[52].mxu1 %v13743_v38  ;;  %v9040_v47 = vld [vmem:[#allocation2 + $0xc20] sm:$0xff] }
 0x2f5   : > { %11095 = vmatpush1.bf16.msra.mxu0 %v11094_v0  ;;  %11319 = vmatpush1.bf16.msra.mxu1 %v11318_v41  ;;  %v9024_v0 = vld [vmem:[#allocation2 + $0xba0] sm:$0xff]  ;;  %v9026_v41 = vld [vmem:[#allocation2 + $0xbb0] sm:$0xff] }
 0x2f6   : > { %8797 = vmatprep.mubr.f32.mxu0 %v13749_v57  ;;  %9306 = vmatprep.mubr.f32.mxu1 %v13749_v57  ;;  %v11338_v7 = vpack.c.bf16 %v9026_v41, %v9024_v0  ;;  %v8535_v41 = vld [vmem:[#allocation2 + $0x540] sm:$0xff] }
 0x2f7   : > { %11097 = vmatprep.subr.bf16.mxu0 %v11096_v2  ;;  %11321 = vmatprep.subr.bf16.mxu1 %v11320_v19  ;;  %v8519_v2 = vld [vmem:[#allocation2 + $0x4c0] sm:$0xff]  ;;  %v8521_v19 = vld [vmem:[#allocation2 + $0x4d0] sm:$0xff] }
 0x2f8   : > { %v9044_v61 = vld [vmem:[#allocation2 + $0xc40] sm:$0xff] }
 0x2f9   : > { %11099 = vmatpush1.bf16.msra.mxu0 %v11098_v21  ;;  %11323 = vmatpush1.bf16.msra.mxu1 %v11322_v54  ;;  %v9030_v21 = vld [vmem:[#allocation2 + $0xbd0] sm:$0xff]  ;;  %v8524_v54 = vld [vmem:[#allocation2 + $0x4e8] sm:$0xff] }
 0x2fa   : > { %11101 = vmatprep.subr.bf16.mxu0 %v11100_v4  ;;  %11325 = vmatprep.subr.bf16.mxu1 %v11324_v11  ;;  %v9035_v4 = vld [vmem:[#allocation2 + $0xbf8] sm:$0xff]  ;;  %v11118_v11 = vpack.c.bf16 %v8521_v19, %v8519_v2  ;;  %v11342_v34 = vpack.c.bf16 %v9030_v21, %v9028_v27  ;;  %v11120_v36 = vpack.c.bf16 %v8526_v8, %v8524_v54  ;;  %v9049_v19 = vld [vmem:[#allocation2 + $0xc68] sm:$0xff]  ;;  %v8539_v21 = vld [vmem:[#allocation2 + $0x560] sm:$0xff] }
 0x2fb   : > { %v11344_v42 = vpack.c.bf16 %v9035_v4, %v9033_v31  ;;  %v8542_v2 = vld [vmem:[#allocation2 + $0x578] sm:$0xff]  ;;  %v8541_v54 = vld [vmem:[#allocation2 + $0x570] sm:$0xff]  ;;  %v9048_v4 = vld [vmem:[#allocation2 + $0xc60] sm:$0xff] }
 0x2fd   : > { %11103 = vmatpush1.bf16.msra.mxu0 %v11102_v46  ;;  %11327 = vmatpush1.bf16.msra.mxu1 %v11326_v35  ;;  %v9034_v46 = vld [vmem:[#allocation2 + $0xbf0] sm:$0xff]  ;;  %v8528_v35 = vld [vmem:[#allocation2 + $0x508] sm:$0xff] }
 0x2fe   : > { %11105 = vmatprep.subr.bf16.mxu0 %v11104_v49  ;;  %11329 = vmatprep.subr.bf16.mxu1 %v11328_v40  ;;  %v9039_v49 = vld [vmem:[#allocation2 + $0xc18] sm:$0xff]  ;;  %v11122_v40 = vpack.c.bf16 %v8525_v20, %v8523_v63  ;;  %v11346_v45 = vpack.c.bf16 %v9034_v46, %v9032_v30  ;;  %v11124_v3 = vpack.c.bf16 %v8530_v23, %v8528_v35  ;;  %v9053_v20 = vld [vmem:[#allocation2 + $0xc88] sm:$0xff]  ;;  %v8543_v46 = vld [vmem:[#allocation2 + $0x580] sm:$0xff] }
 0x2ff   : > { %v11348_v53 = vpack.c.bf16 %v9039_v49, %v9037_v48  ;;  %v8546_v63 = vld [vmem:[#allocation2 + $0x598] sm:$0xff]  ;;  %v8545_v35 = vld [vmem:[#allocation2 + $0x590] sm:$0xff]  ;;  %v9052_v49 = vld [vmem:[#allocation2 + $0xc80] sm:$0xff] }
 0x301   : > { %11107 = vmatpush1.bf16.msra.mxu0 %v11106_v62  ;;  %11331 = vmatpush1.bf16.msra.mxu1 %v11330_v55  ;;  %v9038_v62 = vld [vmem:[#allocation2 + $0xc10] sm:$0xff]  ;;  %v8532_v55 = vld [vmem:[#allocation2 + $0x528] sm:$0xff] }
 0x302   : > { %11109 = vmatprep.subr.bf16.mxu0 %v11108_v60  ;;  %11333 = vmatprep.subr.bf16.mxu1 %v11332_v29  ;;  %v9043_v60 = vld [vmem:[#allocation2 + $0xc38] sm:$0xff]  ;;  %v11126_v29 = vpack.c.bf16 %v8529_v58, %v8527_v37  ;;  %v11350_v56 = vpack.c.bf16 %v9038_v62, %v9036_v33  ;;  %v11128_v18 = vpack.c.bf16 %v8534_v43, %v8532_v55  ;;  %v9057_v58 = vld [vmem:[#allocation2 + $0xca8] sm:$0xff]  ;;  %v8547_v62 = vld [vmem:[#allocation2 + $0x5a0] sm:$0xff] }
 0x303   : > { %v11352_v52 = vpack.c.bf16 %v9043_v60, %v9041_v13  ;;  %v8550_v37 = vld [vmem:[#allocation2 + $0x5b8] sm:$0xff]  ;;  %v8549_v55 = vld [vmem:[#allocation2 + $0x5b0] sm:$0xff]  ;;  %v9056_v60 = vld [vmem:[#allocation2 + $0xca0] sm:$0xff] }
 0x305   : > { %11111 = vmatpush1.bf16.msra.mxu0 %v11110_v32  ;;  %11335 = vmatpush1.bf16.msra.mxu1 %v11334_v39  ;;  %v9042_v32 = vld [vmem:[#allocation2 + $0xc30] sm:$0xff]  ;;  %v8536_v39 = vld [vmem:[#allocation2 + $0x548] sm:$0xff] }
 0x306   : > { %11113 = vmatprep.subr.bf16.mxu0 %v11112_v25  ;;  %11337 = vmatprep.subr.bf16.mxu1 %v11336_v6  ;;  %v9047_v25 = vld [vmem:[#allocation2 + $0xc58] sm:$0xff]  ;;  %v11130_v6 = vpack.c.bf16 %v8533_v16, %v8531_v9  ;;  %v11354_v0 = vpack.c.bf16 %v9042_v32, %v9040_v47  ;;  %v11132_v5 = vpack.c.bf16 %v8538_v26, %v8536_v39  ;;  %v9061_v16 = vld [vmem:[#allocation2 + $0xcc8] sm:$0xff]  ;;  %v8551_v32 = vld [vmem:[#allocation2 + $0x5c0] sm:$0xff] }
 0x307   : > { %v11356_v22 = vpack.c.bf16 %v9047_v25, %v9045_v14  ;;  %v8554_v9 = vld [vmem:[#allocation2 + $0x5d8] sm:$0xff]  ;;  %v8553_v39 = vld [vmem:[#allocation2 + $0x5d0] sm:$0xff]  ;;  %v9060_v25 = vld [vmem:[#allocation2 + $0xcc0] sm:$0xff] }
 0x309   : > { %11115 = vmatpush1.bf16.msra.mxu0 %v11114_v15  ;;  %11339 = vmatpush1.bf16.msra.mxu1 %v11338_v7  ;;  %v9046_v15 = vld [vmem:[#allocation2 + $0xc50] sm:$0xff]  ;;  %v8540_v7 = vld [vmem:[#allocation2 + $0x568] sm:$0xff] }
 0x30a   : > { %11117 = vmatprep.subr.bf16.mxu0 %v11116_v51  ;;  %11341 = vmatprep.subr.bf16.mxu1 %v11340_v24  ;;  %v9051_v51 = vld [vmem:[#allocation2 + $0xc78] sm:$0xff]  ;;  %v11134_v24 = vpack.c.bf16 %v8537_v12, %v8535_v41  ;;  %v11358_v27 = vpack.c.bf16 %v9046_v15, %v9044_v61  ;;  %v11136_v8 = vpack.c.bf16 %v8542_v2, %v8540_v7  ;;  %v9065_v12 = vld [vmem:[#allocation2 + $0xce8] sm:$0xff]  ;;  %v8555_v15 = vld [vmem:[#allocation2 + $0x5e0] sm:$0xff] }
 0x30b   : > { %v11360_v31 = vpack.c.bf16 %v9051_v51, %v9049_v19  ;;  %v8558_v41 = vld [vmem:[#allocation2 + $0x5f8] sm:$0xff]  ;;  %v8557_v7 = vld [vmem:[#allocation2 + $0x5f0] sm:$0xff]  ;;  %v9064_v51 = vld [vmem:[#allocation2 + $0xce0] sm:$0xff] }
 0x30d   : > { %11119 = vmatpush1.bf16.msra.mxu0 %v11118_v11  ;;  %11343 = vmatpush1.bf16.msra.mxu1 %v11342_v34  ;;  %v9050_v11 = vld [vmem:[#allocation2 + $0xc70] sm:$0xff]  ;;  %v8544_v34 = vld [vmem:[#allocation2 + $0x588] sm:$0xff] }
 0x30e   : > { %11121 = vmatprep.subr.bf16.mxu0 %v11120_v36  ;;  %11345 = vmatprep.subr.bf16.mxu1 %v11344_v42  ;;  %v9055_v36 = vld [vmem:[#allocation2 + $0xc98] sm:$0xff]  ;;  %v11138_v42 = vpack.c.bf16 %v8541_v54, %v8539_v21  ;;  %v11362_v30 = vpack.c.bf16 %v9050_v11, %v9048_v4  ;;  %v11140_v23 = vpack.c.bf16 %v8546_v63, %v8544_v34  ;;  %v9069_v54 = vld [vmem:[#allocation2 + $0xd08] sm:$0xff]  ;;  %v8559_v11 = vld [vmem:[#allocation2 + $0x600] sm:$0xff] }
 0x30f   : > { %v11364_v48 = vpack.c.bf16 %v9055_v36, %v9053_v20  ;;  %v8562_v21 = vld [vmem:[#allocation2 + $0x618] sm:$0xff]  ;;  %v8561_v34 = vld [vmem:[#allocation2 + $0x610] sm:$0xff]  ;;  %v8357_v63 = vadd.f32 %v13721_v59, %v13727_v10 }
 0x311   : > { %11123 = vmatpush1.bf16.msra.mxu0 %v11122_v40  ;;  %11347 = vmatpush1.bf16.msra.mxu1 %v11346_v45  ;;  %v9054_v40 = vld [vmem:[#allocation2 + $0xc90] sm:$0xff]  ;;  %v8548_v45 = vld [vmem:[#allocation2 + $0x5a8] sm:$0xff] }
 0x312   : > { %11125 = vmatprep.subr.bf16.mxu0 %v11124_v3  ;;  %11349 = vmatprep.subr.bf16.mxu1 %v11348_v53  ;;  %v9059_v3 = vld [vmem:[#allocation2 + $0xcb8] sm:$0xff]  ;;  %v11142_v53 = vpack.c.bf16 %v8545_v35, %v8543_v46  ;;  %v11366_v33 = vpack.c.bf16 %v9054_v40, %v9052_v49  ;;  %v11144_v43 = vpack.c.bf16 %v8550_v37, %v8548_v45  ;;  %v8564_v46 = vld [vmem:[#allocation2 + $0x628] sm:$0xff]  ;;  %v8563_v45 = vld [vmem:[#allocation2 + $0x620] sm:$0xff] }
 0x313   : > { %v11368_v13 = vpack.c.bf16 %v9059_v3, %v9057_v58  ;;  %v8566_v35 = vld [vmem:[#allocation2 + $0x638] sm:$0xff]  ;;  %v11158_v49 = vpack.c.bf16 %v8561_v34, %v8559_v11  ;;  %v8565_v37 = vld [vmem:[#allocation2 + $0x630] sm:$0xff]  ;;  %v13757_v58 = vmax.f32 %v8357_v63, 0.0  ;;  %v8580_v11 = vld [vmem:[#allocation2 + $0x6a8] sm:$0xff] }
 0x314   : > { %v11160_v10 = vpack.c.bf16 %v8566_v35, %v8564_v46  ;;  %v8582_v34 = vld [vmem:[#allocation2 + $0x6b8] sm:$0xff]  ;;  %v9089_v63 = vld [vmem:[#allocation2 + $0xda8] sm:$0xff]  ;;  %v8581_v46 = vld [vmem:[#allocation2 + $0x6b0] sm:$0xff] }
 0x315   : > { %11127 = vmatpush1.bf16.msra.mxu0 %v11126_v29  ;;  %11351 = vmatpush1.bf16.msra.mxu1 %v11350_v56  ;;  %v9058_v29 = vld [vmem:[#allocation2 + $0xcb0] sm:$0xff]  ;;  %v8552_v56 = vld [vmem:[#allocation2 + $0x5c8] sm:$0xff]  ;;  %v11176_v35 = vpack.c.bf16 %v8582_v34, %v8580_v11  ;;  %v9902_v34 = vld [vmem:[#allocation2 + $0x1520] sm:$0xff] }
 0x316   : > { %11129 = vmatprep.subr.bf16.mxu0 %v11128_v18  ;;  %11353 = vmatprep.subr.bf16.mxu1 %v11352_v52  ;;  %v9063_v18 = vld [vmem:[#allocation2 + $0xcd8] sm:$0xff]  ;;  %v11146_v52 = vpack.c.bf16 %v8549_v55, %v8547_v62  ;;  %v11370_v47 = vpack.c.bf16 %v9058_v29, %v9056_v60  ;;  %v11148_v26 = vpack.c.bf16 %v8554_v9, %v8552_v56  ;;  %v8568_v62 = vld [vmem:[#allocation2 + $0x648] sm:$0xff]  ;;  %v8567_v56 = vld [vmem:[#allocation2 + $0x640] sm:$0xff] }
 0x317   : > { %v11372_v14 = vpack.c.bf16 %v9063_v18, %v9061_v16  ;;  %v8570_v55 = vld [vmem:[#allocation2 + $0x658] sm:$0xff]  ;;  %v11162_v60 = vpack.c.bf16 %v8565_v37, %v8563_v45  ;;  %v8569_v9 = vld [vmem:[#allocation2 + $0x650] sm:$0xff]  ;;  %v9093_v37 = vld [vmem:[#allocation2 + $0xdc8] sm:$0xff] }
 0x318   : > { %v11164_v16 = vpack.c.bf16 %v8570_v55, %v8568_v62  ;;  %v8586_v45 = vld [vmem:[#allocation2 + $0x6d8] sm:$0xff]  ;;  %v8585_v62 = vld [vmem:[#allocation2 + $0x6d0] sm:$0xff] }
 0x319   : > { %11131 = vmatpush1.bf16.msra.mxu0 %v11130_v6  ;;  %11355 = vmatpush1.bf16.msra.mxu1 %v11354_v0  ;;  %v9062_v6 = vld [vmem:[#allocation2 + $0xcd0] sm:$0xff]  ;;  %v8556_v0 = vld [vmem:[#allocation2 + $0x5e8] sm:$0xff] }
 0x31a   : > { %11133 = vmatprep.subr.bf16.mxu0 %v11132_v5  ;;  %11357 = vmatprep.subr.bf16.mxu1 %v11356_v22  ;;  %v9067_v5 = vld [vmem:[#allocation2 + $0xcf8] sm:$0xff]  ;;  %v11150_v22 = vpack.c.bf16 %v8553_v39, %v8551_v32  ;;  %v11374_v61 = vpack.c.bf16 %v9062_v6, %v9060_v25  ;;  %v11152_v2 = vpack.c.bf16 %v8558_v41, %v8556_v0  ;;  %v8572_v32 = vld [vmem:[#allocation2 + $0x668] sm:$0xff]  ;;  %v8571_v0 = vld [vmem:[#allocation2 + $0x660] sm:$0xff] }
 0x31b   : > { %v11376_v19 = vpack.c.bf16 %v9067_v5, %v9065_v12  ;;  %v8574_v39 = vld [vmem:[#allocation2 + $0x678] sm:$0xff]  ;;  %v11166_v25 = vpack.c.bf16 %v8569_v9, %v8567_v56  ;;  %v8573_v41 = vld [vmem:[#allocation2 + $0x670] sm:$0xff]  ;;  %v9097_v9 = vld [vmem:[#allocation2 + $0xde8] sm:$0xff] }
 0x31c   : > { %v11168_v12 = vpack.c.bf16 %v8574_v39, %v8572_v32  ;;  %v8590_v56 = vld [vmem:[#allocation2 + $0x6f8] sm:$0xff]  ;;  %v8589_v32 = vld [vmem:[#allocation2 + $0x6f0] sm:$0xff] }
 0x31d   : > { %11135 = vmatpush1.bf16.msra.mxu0 %v11134_v24  ;;  %11359 = vmatpush1.bf16.msra.mxu1 %v11358_v27  ;;  %v9066_v24 = vld [vmem:[#allocation2 + $0xcf0] sm:$0xff]  ;;  %v8560_v27 = vld [vmem:[#allocation2 + $0x608] sm:$0xff] }
 0x31e   : > { %11137 = vmatprep.subr.bf16.mxu0 %v11136_v8  ;;  %11361 = vmatprep.subr.bf16.mxu1 %v11360_v31  ;;  %v9071_v8 = vld [vmem:[#allocation2 + $0xd18] sm:$0xff]  ;;  %v11154_v31 = vpack.c.bf16 %v8557_v7, %v8555_v15  ;;  %v11378_v4 = vpack.c.bf16 %v9066_v24, %v9064_v51  ;;  %v11156_v20 = vpack.c.bf16 %v8562_v21, %v8560_v27  ;;  %v8576_v15 = vld [vmem:[#allocation2 + $0x688] sm:$0xff]  ;;  %v8575_v27 = vld [vmem:[#allocation2 + $0x680] sm:$0xff] }
 0x31f   : > { %v11380_v36 = vpack.c.bf16 %v9071_v8, %v9069_v54  ;;  %v8578_v7 = vld [vmem:[#allocation2 + $0x698] sm:$0xff]  ;;  %v11170_v51 = vpack.c.bf16 %v8573_v41, %v8571_v0  ;;  %v8577_v21 = vld [vmem:[#allocation2 + $0x690] sm:$0xff]  ;;  %v9899_v41 = vld [vmem:[#allocation2 + $0x1508] sm:$0xff] }
 0x320   : > { %v11172_v54 = vpack.c.bf16 %v8578_v7, %v8576_v15  ;;  %v9390_v0 = vld [vmem:[#allocation2 + $0xe18] sm:$0xff]  ;;  %v9393_v11 = vld [vmem:[#allocation2 + $0xe30] sm:$0xff] }
 0x321   : > { %11139 = vmatpush1.bf16.msra.mxu0 %v11138_v42  ;;  %11363 = vmatpush1.bf16.msra.mxu1 %v11362_v30  ;;  %v9068_v42 = vld [vmem:[#allocation2 + $0xd00] sm:$0xff]  ;;  %v9070_v30 = vld [vmem:[#allocation2 + $0xd10] sm:$0xff] }
 0x322   : > { %11141 = vmatprep.subr.bf16.mxu0 %v11140_v23  ;;  %11365 = vmatprep.subr.bf16.mxu1 %v11364_v48  ;;  %v9073_v23 = vld [vmem:[#allocation2 + $0xd28] sm:$0xff]  ;;  %v9075_v48 = vld [vmem:[#allocation2 + $0xd38] sm:$0xff]  ;;  %v11382_v40 = vpack.c.bf16 %v9070_v30, %v9068_v42  ;;  %v8579_v30 = vld [vmem:[#allocation2 + $0x6a0] sm:$0xff] }
 0x323   : > { %v11384_v3 = vpack.c.bf16 %v9075_v48, %v9073_v23  ;;  %v9088_v48 = vld [vmem:[#allocation2 + $0xda0] sm:$0xff] }
 0x325   : > { %11143 = vmatpush1.bf16.msra.mxu0 %v11142_v53  ;;  %11367 = vmatpush1.bf16.msra.mxu1 %v11366_v33  ;;  %v9072_v53 = vld [vmem:[#allocation2 + $0xd20] sm:$0xff]  ;;  %v9074_v33 = vld [vmem:[#allocation2 + $0xd30] sm:$0xff] }
 0x326   : > { %11145 = vmatprep.subr.bf16.mxu0 %v11144_v43  ;;  %11369 = vmatprep.subr.bf16.mxu1 %v11368_v13  ;;  %v9077_v43 = vld [vmem:[#allocation2 + $0xd48] sm:$0xff]  ;;  %v9079_v13 = vld [vmem:[#allocation2 + $0xd58] sm:$0xff]  ;;  %v11386_v29 = vpack.c.bf16 %v9074_v33, %v9072_v53  ;;  %v8583_v33 = vld [vmem:[#allocation2 + $0x6c0] sm:$0xff] }
 0x327   : > { %v11388_v18 = vpack.c.bf16 %v9079_v13, %v9077_v43  ;;  %v9092_v13 = vld [vmem:[#allocation2 + $0xdc0] sm:$0xff] }
 0x329   : > { %11147 = vmatpush1.bf16.msra.mxu0 %v11146_v52  ;;  %11371 = vmatpush1.bf16.msra.mxu1 %v11370_v47  ;;  %v9076_v52 = vld [vmem:[#allocation2 + $0xd40] sm:$0xff]  ;;  %v9078_v47 = vld [vmem:[#allocation2 + $0xd50] sm:$0xff] }
 0x32a   : > { %11149 = vmatprep.subr.bf16.mxu0 %v11148_v26  ;;  %11373 = vmatprep.subr.bf16.mxu1 %v11372_v14  ;;  %v9081_v26 = vld [vmem:[#allocation2 + $0xd68] sm:$0xff]  ;;  %v9083_v14 = vld [vmem:[#allocation2 + $0xd78] sm:$0xff]  ;;  %v11390_v6 = vpack.c.bf16 %v9078_v47, %v9076_v52  ;;  %v8587_v47 = vld [vmem:[#allocation2 + $0x6e0] sm:$0xff] }
 0x32b   : > { %v11392_v5 = vpack.c.bf16 %v9083_v14, %v9081_v26  ;;  %v9096_v14 = vld [vmem:[#allocation2 + $0xde0] sm:$0xff] }
 0x32d   : > { %11151 = vmatpush1.bf16.msra.mxu0 %v11150_v22  ;;  %11375 = vmatpush1.bf16.msra.mxu1 %v11374_v61  ;;  %v9080_v22 = vld [vmem:[#allocation2 + $0xd60] sm:$0xff]  ;;  %v9082_v61 = vld [vmem:[#allocation2 + $0xd70] sm:$0xff] }
 0x32e   : > { %11153 = vmatprep.subr.bf16.mxu0 %v11152_v2  ;;  %11377 = vmatprep.subr.bf16.mxu1 %v11376_v19  ;;  %v9085_v2 = vld [vmem:[#allocation2 + $0xd88] sm:$0xff]  ;;  %v9087_v19 = vld [vmem:[#allocation2 + $0xd98] sm:$0xff]  ;;  %v11394_v24 = vpack.c.bf16 %v9082_v61, %v9080_v22  ;;  %v8359_v61 = vadd.f32 %v13721_v59, %v13745_v28  ;;  %v9391_v28 = vld [vmem:[#allocation2 + $0xe20] sm:$0xff] }
 0x32f   : > { %v11396_v8 = vpack.c.bf16 %v9087_v19, %v9085_v2  ;;  %v9387_v2 = vld [vmem:[#allocation2 + $0xe00] sm:$0xff]  ;;  %v9389_v19 = vld [vmem:[#allocation2 + $0xe10] sm:$0xff] }
 0x331   : > { %11155 = vmatpush1.bf16.msra.mxu0 %v11154_v31  ;;  %11379 = vmatpush1.bf16.msra.mxu1 %v11378_v4  ;;  %v9084_v31 = vld [vmem:[#allocation2 + $0xd80] sm:$0xff]  ;;  %v9086_v4 = vld [vmem:[#allocation2 + $0xd90] sm:$0xff] }
 0x332   : > { %11157 = vmatprep.subr.bf16.mxu0 %v11156_v20  ;;  %11381 = vmatprep.subr.bf16.mxu1 %v11380_v36  ;;  %v9091_v20 = vld [vmem:[#allocation2 + $0xdb8] sm:$0xff]  ;;  %v11174_v36 = vpack.c.bf16 %v8577_v21, %v8575_v27  ;;  %v11398_v42 = vpack.c.bf16 %v9086_v4, %v9084_v31  ;;  %v9392_v27 = vld [vmem:[#allocation2 + $0xe28] sm:$0xff]  ;;  %v11414_v31 = vpack.c.bf16 %v9389_v19, %v9387_v2  ;;  %v13765_v4 = vmax.f32 %v8359_v61, 0.0 }
 0x333   : > { %v11400_v23 = vpack.c.bf16 %v9091_v20, %v9089_v63  ;;  %v9394_v21 = vld [vmem:[#allocation2 + $0xe38] sm:$0xff]  ;;  %v9919_v61 = vld [vmem:[#allocation2 + $0x15a8] sm:$0xff] }
 0x334   : > { %8798 = vmatmul.mubr.f32.vlgmr.msra.gmra.mrb[4].mxu0 %v13757_v58  ;;  %9307 = vmatmul.mubr.f32.vlgmr.msra.gmra.mrb[52].mxu1 %v13757_v58  ;;  %v11416_v63 = vpack.c.bf16 %v9394_v21, %v9392_v27  ;;  %v9918_v27 = vld [vmem:[#allocation2 + $0x15a0] sm:$0xff] }
 0x335   : > { %11159 = vmatpush1.bf16.msra.mxu0 %v11158_v49  ;;  %11383 = vmatpush1.bf16.msra.mxu1 %v11382_v40  ;;  %v9090_v49 = vld [vmem:[#allocation2 + $0xdb0] sm:$0xff]  ;;  %v8584_v40 = vld [vmem:[#allocation2 + $0x6c8] sm:$0xff] }
 0x336   : > { %11161 = vmatprep.subr.bf16.mxu0 %v11160_v10  ;;  %11385 = vmatprep.subr.bf16.mxu1 %v11384_v3  ;;  %v9095_v10 = vld [vmem:[#allocation2 + $0xdd8] sm:$0xff]  ;;  %v11178_v3 = vpack.c.bf16 %v8581_v46, %v8579_v30  ;;  %v11402_v53 = vpack.c.bf16 %v9090_v49, %v9088_v48  ;;  %v11180_v55 = vpack.c.bf16 %v8586_v45, %v8584_v40  ;;  %v9907_v46 = vld [vmem:[#allocation2 + $0x1548] sm:$0xff]  ;;  %v9395_v40 = vld [vmem:[#allocation2 + $0xe40] sm:$0xff] }
 0x337   : > { %8868 = vmatprep.mubr.f32.mxu0 %v13825_v50  ;;  %9377 = vmatprep.mubr.f32.mxu1 %v13825_v50  ;;  %v11404_v43 = vpack.c.bf16 %v9095_v10, %v9093_v37  ;;  %v9398_v30 = vld [vmem:[#allocation2 + $0xe58] sm:$0xff]  ;;  %v9397_v45 = vld [vmem:[#allocation2 + $0xe50] sm:$0xff]  ;;  %v9906_v37 = vld [vmem:[#allocation2 + $0x1540] sm:$0xff] }
 0x339   : > { %11163 = vmatpush1.bf16.msra.mxu0 %v11162_v60  ;;  %11387 = vmatpush1.bf16.msra.mxu1 %v11386_v29  ;;  %v9094_v60 = vld [vmem:[#allocation2 + $0xdd0] sm:$0xff]  ;;  %v8588_v29 = vld [vmem:[#allocation2 + $0x6e8] sm:$0xff] }
 0x33a   : > { %11165 = vmatprep.subr.bf16.mxu0 %v11164_v16  ;;  %11389 = vmatprep.subr.bf16.mxu1 %v11388_v18  ;;  %v9099_v16 = vld [vmem:[#allocation2 + $0xdf8] sm:$0xff]  ;;  %v11182_v18 = vpack.c.bf16 %v8585_v62, %v8583_v33  ;;  %v11406_v52 = vpack.c.bf16 %v9094_v60, %v9092_v13  ;;  %v11184_v39 = vpack.c.bf16 %v8590_v56, %v8588_v29  ;;  %v9911_v62 = vld [vmem:[#allocation2 + $0x1568] sm:$0xff]  ;;  %v9401_v29 = vld [vmem:[#allocation2 + $0xe70] sm:$0xff] }
 0x33b   : > { %v11408_v26 = vpack.c.bf16 %v9099_v16, %v9097_v9  ;;  %v9402_v33 = vld [vmem:[#allocation2 + $0xe78] sm:$0xff]  ;;  %v9910_v56 = vld [vmem:[#allocation2 + $0x1560] sm:$0xff]  ;;  %v9912_v16 = vld [vmem:[#allocation2 + $0x1570] sm:$0xff] }
 0x33d   : > { %11167 = vmatpush1.bf16.msra.mxu0 %v11166_v25  ;;  %11391 = vmatpush1.bf16.msra.mxu1 %v11390_v6  ;;  %v9098_v25 = vld [vmem:[#allocation2 + $0xdf0] sm:$0xff]  ;;  %v9388_v6 = vld [vmem:[#allocation2 + $0xe08] sm:$0xff] }
 0x33e   : > { %11169 = vmatprep.subr.bf16.mxu0 %v11168_v12  ;;  %11393 = vmatprep.subr.bf16.mxu1 %v11392_v5  ;;  %v9901_v12 = vld [vmem:[#allocation2 + $0x1518] sm:$0xff]  ;;  %v11186_v5 = vpack.c.bf16 %v8589_v32, %v8587_v47  ;;  %v11410_v22 = vpack.c.bf16 %v9098_v25, %v9096_v14  ;;  %v11412_v15 = vpack.c.bf16 %v9390_v0, %v9388_v6  ;;  %v9915_v47 = vld [vmem:[#allocation2 + $0x1588] sm:$0xff]  ;;  %v9403_v25 = vld [vmem:[#allocation2 + $0xe80] sm:$0xff] }
 0x33f   : > { %v11636_v7 = vpack.c.bf16 %v9901_v12, %v9899_v41  ;;  %v9917_v32 = vld [vmem:[#allocation2 + $0x1598] sm:$0xff]  ;;  %v9405_v6 = vld [vmem:[#allocation2 + $0xe90] sm:$0xff]  ;;  %v9914_v0 = vld [vmem:[#allocation2 + $0x1580] sm:$0xff] }
 0x340   : > { %v11652_v41 = vpack.c.bf16 %v9917_v32, %v9915_v47  ;;  %v9916_v12 = vld [vmem:[#allocation2 + $0x1590] sm:$0xff]  ;;  %v9424_v32 = vld [vmem:[#allocation2 + $0xf28] sm:$0xff] }
 0x341   : > { %11171 = vmatpush1.bf16.msra.mxu0 %v11170_v51  ;;  %11395 = vmatpush1.bf16.msra.mxu1 %v11394_v24  ;;  %v9898_v51 = vld [vmem:[#allocation2 + $0x1500] sm:$0xff]  ;;  %v9900_v24 = vld [vmem:[#allocation2 + $0x1510] sm:$0xff]  ;;  %v11654_v2 = vpack.c.bf16 %v9916_v12, %v9914_v0 }
 0x342   : > { %11173 = vmatprep.subr.bf16.mxu0 %v11172_v54  ;;  %11397 = vmatprep.subr.bf16.mxu1 %v11396_v8  ;;  %v9903_v54 = vld [vmem:[#allocation2 + $0x1528] sm:$0xff]  ;;  %v9905_v8 = vld [vmem:[#allocation2 + $0x1538] sm:$0xff]  ;;  %v11638_v59 = vpack.c.bf16 %v9900_v24, %v9898_v51  ;;  %v9407_v51 = vld [vmem:[#allocation2 + $0xea0] sm:$0xff] }
 0x343   : > { %v11640_v20 = vpack.c.bf16 %v9905_v8, %v9903_v54  ;;  %v9409_v24 = vld [vmem:[#allocation2 + $0xeb0] sm:$0xff]  ;;  %v9412_v8 = vld [vmem:[#allocation2 + $0xec8] sm:$0xff] }
 0x344   : > { %v9920_v54 = vld [vmem:[#allocation2 + $0x15b0] sm:$0xff] }
 0x345   : > { %11175 = vmatpush1.bf16.msra.mxu0 %v11174_v36  ;;  %11399 = vmatpush1.bf16.msra.mxu1 %v11398_v42  ;;  %v9904_v36 = vld [vmem:[#allocation2 + $0x1530] sm:$0xff]  ;;  %v9396_v42 = vld [vmem:[#allocation2 + $0xe48] sm:$0xff] }
 0x346   : > { %11177 = vmatprep.subr.bf16.mxu0 %v11176_v35  ;;  %11401 = vmatprep.subr.bf16.mxu1 %v11400_v23  ;;  %v9909_v35 = vld [vmem:[#allocation2 + $0x1558] sm:$0xff]  ;;  %v11418_v23 = vpack.c.bf16 %v9393_v11, %v9391_v28  ;;  %v11642_v48 = vpack.c.bf16 %v9904_v36, %v9902_v34  ;;  %v11420_v49 = vpack.c.bf16 %v9398_v30, %v9396_v42  ;;  %v9413_v36 = vld [vmem:[#allocation2 + $0xed0] sm:$0xff]  ;;  %v9922_v42 = vld [vmem:[#allocation2 + $0x15c0] sm:$0xff] }
 0x347   : > { %v11644_v10 = vpack.c.bf16 %v9909_v35, %v9907_v46  ;;  %v9925_v28 = vld [vmem:[#allocation2 + $0x15d8] sm:$0xff]  ;;  %v11434_v11 = vpack.c.bf16 %v9409_v24, %v9407_v51  ;;  %v11658_v34 = vpack.c.bf16 %v9920_v54, %v9918_v27  ;;  %v9924_v46 = vld [vmem:[#allocation2 + $0x15d0] sm:$0xff]  ;;  %v9416_v35 = vld [vmem:[#allocation2 + $0xee8] sm:$0xff] }
 0x348   : > { %v9932_v47 = vld [vmem:[#allocation2 + $0x1610] sm:$0xff] }
 0x349   : > { %11179 = vmatpush1.bf16.msra.mxu0 %v11178_v3  ;;  %11403 = vmatpush1.bf16.msra.mxu1 %v11402_v53  ;;  %v9908_v3 = vld [vmem:[#allocation2 + $0x1550] sm:$0xff]  ;;  %v9400_v53 = vld [vmem:[#allocation2 + $0xe68] sm:$0xff] }
 0x34a   : > { %11181 = vmatprep.subr.bf16.mxu0 %v11180_v55  ;;  %11405 = vmatprep.subr.bf16.mxu1 %v11404_v43  ;;  %v9913_v55 = vld [vmem:[#allocation2 + $0x1578] sm:$0xff]  ;;  %v11422_v43 = vpack.c.bf16 %v9397_v45, %v9395_v40  ;;  %v11646_v13 = vpack.c.bf16 %v9908_v3, %v9906_v37  ;;  %v11424_v60 = vpack.c.bf16 %v9402_v33, %v9400_v53  ;;  %v9417_v3 = vld [vmem:[#allocation2 + $0xef0] sm:$0xff]  ;;  %v9926_v53 = vld [vmem:[#allocation2 + $0x15e0] sm:$0xff] }
 0x34b   : > { %v11648_v9 = vpack.c.bf16 %v9913_v55, %v9911_v62  ;;  %v11662_v45 = vpack.c.bf16 %v9924_v46, %v9922_v42  ;;  %v9928_v62 = vld [vmem:[#allocation2 + $0x15f0] sm:$0xff]  ;;  %v9420_v55 = vld [vmem:[#allocation2 + $0xf08] sm:$0xff] }
 0x34c   : > { %v9425_v12 = vld [vmem:[#allocation2 + $0xf30] sm:$0xff] }
 0x34d   : > { %11183 = vmatpush1.bf16.msra.mxu0 %v11182_v18  ;;  %11407 = vmatpush1.bf16.msra.mxu1 %v11406_v52  ;;  %v9404_v18 = vld [vmem:[#allocation2 + $0xe88] sm:$0xff]  ;;  %v9406_v52 = vld [vmem:[#allocation2 + $0xe98] sm:$0xff]  ;;  %v9429_v54 = vld [vmem:[#allocation2 + $0xf50] sm:$0xff] }
 0x34e   : > { %11185 = vmatprep.subr.bf16.mxu0 %v11184_v39  ;;  %11409 = vmatprep.subr.bf16.mxu1 %v11408_v26  ;;  %v11650_v26 = vpack.c.bf16 %v9912_v16, %v9910_v56  ;;  %v11428_v14 = vpack.c.bf16 %v9406_v52, %v9404_v18  ;;  %v9421_v16 = vld [vmem:[#allocation2 + $0xf10] sm:$0xff]  ;;  %v9930_v18 = vld [vmem:[#allocation2 + $0x1600] sm:$0xff] }
 0x34f   : > { %v9433_v46 = vld [vmem:[#allocation2 + $0xf70] sm:$0xff] }
 0x351   : > { %11187 = vmatpush1.bf16.msra.mxu0 %v11186_v5  ;;  %11411 = vmatpush1.bf16.msra.mxu1 %v11410_v22  ;;  %v9408_v5 = vld [vmem:[#allocation2 + $0xea8] sm:$0xff]  ;;  %v9410_v22 = vld [vmem:[#allocation2 + $0xeb8] sm:$0xff] }
 0x352   : > { %11413 = vmatprep.subr.bf16.mxu0 %v11412_v15  ;;  %11637 = vmatprep.subr.bf16.mxu1 %v11636_v7  ;;  %v9921_v15 = vld [vmem:[#allocation2 + $0x15b8] sm:$0xff]  ;;  %v11430_v7 = vpack.c.bf16 %v9405_v6, %v9403_v25  ;;  %v11432_v19 = vpack.c.bf16 %v9410_v22, %v9408_v5  ;;  %v11670_v6 = vpack.c.bf16 %v9932_v47, %v9930_v18  ;;  %v9934_v5 = vld [vmem:[#allocation2 + $0x1620] sm:$0xff]  ;;  %v9441_v47 = vld [vmem:[#allocation2 + $0xfb0] sm:$0xff] }
 0x353   : > { %v11656_v21 = vpack.c.bf16 %v9921_v15, %v9919_v61  ;;  %v9936_v61 = vld [vmem:[#allocation2 + $0x1630] sm:$0xff]  ;;  %v9428_v15 = vld [vmem:[#allocation2 + $0xf48] sm:$0xff] }
 0x354   : > { %8869 = vmatmul.mubr.f32.vlgmr.msra.gmra.mrb[4].mxu0 %v13765_v4  ;;  %9378 = vmatmul.mubr.f32.vlgmr.msra.gmra.mrb[52].mxu1 %v13765_v4  ;;  %v11674_v24 = vpack.c.bf16 %v9936_v61, %v9934_v5  ;;  %v9445_v61 = vld [vmem:[#allocation2 + $0xfd0] sm:$0xff] }
 0x355   : > { %11415 = vmatpush1.bf16.msra.mxu0 %v11414_v31  ;;  %9675 = vmatprep.mubr.f32.mxu0 %v13725_v1  ;;  %v9414_v31 = vld [vmem:[#allocation2 + $0xed8] sm:$0xff] }
 0x356   : > { %11639 = vmatpush1.bf16.msra.mxu1 %v11638_v59  ;;  %10186 = vmatprep.mubr.f32.mxu1 %v13725_v1  ;;  %v9399_v1 = vld [vmem:[#allocation2 + $0xe60] sm:$0xff]  ;;  %v9923_v59 = vld [vmem:[#allocation2 + $0x15c8] sm:$0xff] }
 0x357   : > { %11417 = vmatprep.subr.bf16.mxu0 %v11416_v63  ;;  %11641 = vmatprep.subr.bf16.mxu1 %v11640_v20  ;;  %v11426_v39 = vpack.c.bf16 %v9401_v29, %v9399_v1  ;;  %v11436_v63 = vpack.c.bf16 %v9414_v31, %v9412_v8  ;;  %v9411_v20 = vld [vmem:[#allocation2 + $0xec0] sm:$0xff]  ;;  %v11660_v30 = vpack.c.bf16 %v9925_v28, %v9923_v59  ;;  %v9940_v59 = vld [vmem:[#allocation2 + $0x1650] sm:$0xff]  ;;  %v9432_v28 = vld [vmem:[#allocation2 + $0xf68] sm:$0xff] }
 0x358   : > { %v11438_v40 = vpack.c.bf16 %v9413_v36, %v9411_v20  ;;  %v11666_v29 = vpack.c.bf16 %v9928_v62, %v9926_v53  ;;  %v9938_v8 = vld [vmem:[#allocation2 + $0x1640] sm:$0xff]  ;;  %v9437_v62 = vld [vmem:[#allocation2 + $0xf90] sm:$0xff] }
 0x359   : > { %11419 = vmatpush1.bf16.msra.mxu0 %v11418_v23  ;;  %v9418_v23 = vld [vmem:[#allocation2 + $0xef8] sm:$0xff]  ;;  %v11678_v36 = vpack.c.bf16 %v9940_v59, %v9938_v8  ;;  %v9449_v59 = vld [vmem:[#allocation2 + $0xff0] sm:$0xff] }
 0x35a   : > { %11643 = vmatpush1.bf16.msra.mxu1 %v11642_v48  ;;  %11421 = vmatprep.subr.bf16.mxu0 %v11420_v49  ;;  %v9927_v48 = vld [vmem:[#allocation2 + $0x15e8] sm:$0xff]  ;;  %v9929_v49 = vld [vmem:[#allocation2 + $0x15f8] sm:$0xff]  ;;  %v11440_v37 = vpack.c.bf16 %v9418_v23, %v9416_v35  ;;  %v9942_v35 = vld [vmem:[#allocation2 + $0x1660] sm:$0xff] }
 0x35b   : > { %11645 = vmatprep.subr.bf16.mxu1 %v11644_v10  ;;  %v9415_v10 = vld [vmem:[#allocation2 + $0xee0] sm:$0xff]  ;;  %v11664_v33 = vpack.c.bf16 %v9929_v49, %v9927_v48  ;;  %v9944_v48 = vld [vmem:[#allocation2 + $0x1670] sm:$0xff]  ;;  %v9436_v49 = vld [vmem:[#allocation2 + $0xf88] sm:$0xff] }
 0x35c   : > { %v11442_v1 = vpack.c.bf16 %v9417_v3, %v9415_v10  ;;  %v11682_v3 = vpack.c.bf16 %v9944_v48, %v9942_v35  ;;  %v9453_v48 = vld [vmem:[#allocation2 + $0x1010] sm:$0xff] }
 0x35d   : > { %11423 = vmatpush1.bf16.msra.mxu0 %v11422_v43  ;;  %v9422_v43 = vld [vmem:[#allocation2 + $0xf18] sm:$0xff] }
 0x35e   : > { %11647 = vmatpush1.bf16.msra.mxu1 %v11646_v13  ;;  %11425 = vmatprep.subr.bf16.mxu0 %v11424_v60  ;;  %v9931_v13 = vld [vmem:[#allocation2 + $0x1608] sm:$0xff]  ;;  %v9933_v60 = vld [vmem:[#allocation2 + $0x1618] sm:$0xff]  ;;  %v11444_v56 = vpack.c.bf16 %v9422_v43, %v9420_v55  ;;  %v9946_v55 = vld [vmem:[#allocation2 + $0x1680] sm:$0xff] }
 0x35f   : > { %11649 = vmatprep.subr.bf16.mxu1 %v11648_v9  ;;  %v9419_v9 = vld [vmem:[#allocation2 + $0xf00] sm:$0xff]  ;;  %v11668_v52 = vpack.c.bf16 %v9933_v60, %v9931_v13  ;;  %v9948_v13 = vld [vmem:[#allocation2 + $0x1690] sm:$0xff]  ;;  %v9440_v60 = vld [vmem:[#allocation2 + $0xfa8] sm:$0xff] }
 0x360   : > { %v11446_v25 = vpack.c.bf16 %v9421_v16, %v9419_v9  ;;  %v11686_v16 = vpack.c.bf16 %v9948_v13, %v9946_v55  ;;  %v9455_v55 = vld [vmem:[#allocation2 + $0x1020] sm:$0xff] }
 0x361   : > { %11427 = vmatpush1.bf16.msra.mxu0 %v11426_v39  ;;  %v9426_v39 = vld [vmem:[#allocation2 + $0xf38] sm:$0xff]  ;;  %v9966_v13 = vld [vmem:[#allocation2 + $0x1720] sm:$0xff] }
 0x362   : > { %11651 = vmatpush1.bf16.msra.mxu1 %v11650_v26  ;;  %11429 = vmatprep.subr.bf16.mxu0 %v11428_v14  ;;  %v9935_v26 = vld [vmem:[#allocation2 + $0x1628] sm:$0xff]  ;;  %v9937_v14 = vld [vmem:[#allocation2 + $0x1638] sm:$0xff]  ;;  %v11448_v0 = vpack.c.bf16 %v9426_v39, %v9424_v32  ;;  %v9950_v32 = vld [vmem:[#allocation2 + $0x16a0] sm:$0xff] }
 0x363   : > { %11653 = vmatprep.subr.bf16.mxu1 %v11652_v41  ;;  %v9423_v41 = vld [vmem:[#allocation2 + $0xf20] sm:$0xff]  ;;  %v11672_v22 = vpack.c.bf16 %v9937_v14, %v9935_v26  ;;  %v9952_v26 = vld [vmem:[#allocation2 + $0x16b0] sm:$0xff]  ;;  %v9444_v14 = vld [vmem:[#allocation2 + $0xfc8] sm:$0xff] }
 0x364   : > { %v11450_v51 = vpack.c.bf16 %v9425_v12, %v9423_v41  ;;  %v11690_v12 = vpack.c.bf16 %v9952_v26, %v9950_v32  ;;  %v9461_v26 = vld [vmem:[#allocation2 + $0x1050] sm:$0xff] }
 0x365   : > { %11431 = vmatpush1.bf16.msra.mxu0 %v11430_v7  ;;  %v9430_v7 = vld [vmem:[#allocation2 + $0xf58] sm:$0xff] }
 0x366   : > { %11655 = vmatpush1.bf16.msra.mxu1 %v11654_v2  ;;  %11433 = vmatprep.subr.bf16.mxu0 %v11432_v19  ;;  %v9939_v2 = vld [vmem:[#allocation2 + $0x1648] sm:$0xff]  ;;  %v9941_v19 = vld [vmem:[#allocation2 + $0x1658] sm:$0xff]  ;;  %v11452_v27 = vpack.c.bf16 %v9430_v7, %v9428_v15  ;;  %v9954_v15 = vld [vmem:[#allocation2 + $0x16c0] sm:$0xff] }
 0x367   : > { %11657 = vmatprep.subr.bf16.mxu1 %v11656_v21  ;;  %v9427_v21 = vld [vmem:[#allocation2 + $0xf40] sm:$0xff]  ;;  %v11676_v31 = vpack.c.bf16 %v9941_v19, %v9939_v2  ;;  %v9956_v2 = vld [vmem:[#allocation2 + $0x16d0] sm:$0xff]  ;;  %v9448_v19 = vld [vmem:[#allocation2 + $0xfe8] sm:$0xff] }
 0x368   : > { %v11454_v20 = vpack.c.bf16 %v9429_v54, %v9427_v21  ;;  %v11694_v54 = vpack.c.bf16 %v9956_v2, %v9954_v15  ;;  %v9463_v15 = vld [vmem:[#allocation2 + $0x1060] sm:$0xff] }
 0x369   : > { %11435 = vmatpush1.bf16.msra.mxu0 %v11434_v11  ;;  %v9434_v11 = vld [vmem:[#allocation2 + $0xf78] sm:$0xff]  ;;  %v9974_v2 = vld [vmem:[#allocation2 + $0x1760] sm:$0xff] }
 0x36a   : > { %11659 = vmatpush1.bf16.msra.mxu1 %v11658_v34  ;;  %11437 = vmatprep.subr.bf16.mxu0 %v11436_v63  ;;  %v9943_v34 = vld [vmem:[#allocation2 + $0x1668] sm:$0xff]  ;;  %v9945_v63 = vld [vmem:[#allocation2 + $0x1678] sm:$0xff]  ;;  %v11456_v42 = vpack.c.bf16 %v9434_v11, %v9432_v28  ;;  %v9958_v28 = vld [vmem:[#allocation2 + $0x16e0] sm:$0xff] }
 0x36b   : > { %11661 = vmatprep.subr.bf16.mxu1 %v11660_v30  ;;  %v9431_v30 = vld [vmem:[#allocation2 + $0xf60] sm:$0xff]  ;;  %v11680_v23 = vpack.c.bf16 %v9945_v63, %v9943_v34  ;;  %v9960_v34 = vld [vmem:[#allocation2 + $0x16f0] sm:$0xff]  ;;  %v9452_v63 = vld [vmem:[#allocation2 + $0x1008] sm:$0xff] }
 0x36c   : > { %v11458_v10 = vpack.c.bf16 %v9433_v46, %v9431_v30  ;;  %v11698_v46 = vpack.c.bf16 %v9960_v34, %v9958_v28  ;;  %v9469_v28 = vld [vmem:[#allocation2 + $0x1090] sm:$0xff] }
 0x36d   : > { %11439 = vmatpush1.bf16.msra.mxu0 %v11438_v40  ;;  %v9438_v40 = vld [vmem:[#allocation2 + $0xf98] sm:$0xff] }
 0x36e   : > { %11663 = vmatpush1.bf16.msra.mxu1 %v11662_v45  ;;  %11441 = vmatprep.subr.bf16.mxu0 %v11440_v37  ;;  %v9947_v45 = vld [vmem:[#allocation2 + $0x1688] sm:$0xff]  ;;  %v9949_v37 = vld [vmem:[#allocation2 + $0x1698] sm:$0xff]  ;;  %v11460_v53 = vpack.c.bf16 %v9438_v40, %v9436_v49  ;;  %v9962_v40 = vld [vmem:[#allocation2 + $0x1700] sm:$0xff] }
 0x36f   : > { %11665 = vmatprep.subr.bf16.mxu1 %v11664_v33  ;;  %v9435_v33 = vld [vmem:[#allocation2 + $0xf80] sm:$0xff]  ;;  %v11684_v43 = vpack.c.bf16 %v9949_v37, %v9947_v45  ;;  %v9964_v45 = vld [vmem:[#allocation2 + $0x1710] sm:$0xff]  ;;  %v9456_v37 = vld [vmem:[#allocation2 + $0x1028] sm:$0xff] }
 0x370   : > { %v11462_v9 = vpack.c.bf16 %v9437_v62, %v9435_v33  ;;  %v9969_v33 = vld [vmem:[#allocation2 + $0x1738] sm:$0xff]  ;;  %v11702_v62 = vpack.c.bf16 %v9964_v45, %v9962_v40  ;;  %v9982_v40 = vld [vmem:[#allocation2 + $0x17a0] sm:$0xff] }
 0x371   : > { %11443 = vmatpush1.bf16.msra.mxu0 %v11442_v1  ;;  %v9442_v1 = vld [vmem:[#allocation2 + $0xfb8] sm:$0xff] }
 0x372   : > { %11667 = vmatpush1.bf16.msra.mxu1 %v11666_v29  ;;  %11445 = vmatprep.subr.bf16.mxu0 %v11444_v56  ;;  %v9951_v29 = vld [vmem:[#allocation2 + $0x16a8] sm:$0xff]  ;;  %v9953_v56 = vld [vmem:[#allocation2 + $0x16b8] sm:$0xff]  ;;  %v11464_v18 = vpack.c.bf16 %v9442_v1, %v9440_v60  ;;  %v9968_v1 = vld [vmem:[#allocation2 + $0x1730] sm:$0xff] }
 0x373   : > { %11669 = vmatprep.subr.bf16.mxu1 %v11668_v52  ;;  %v9439_v52 = vld [vmem:[#allocation2 + $0xfa0] sm:$0xff]  ;;  %v11688_v39 = vpack.c.bf16 %v9953_v56, %v9951_v29  ;;  %v9460_v29 = vld [vmem:[#allocation2 + $0x1048] sm:$0xff]  ;;  %v9462_v56 = vld [vmem:[#allocation2 + $0x1058] sm:$0xff] }
 0x374   : > { %v11466_v41 = vpack.c.bf16 %v9441_v47, %v9439_v52  ;;  %v11706_v47 = vpack.c.bf16 %v9968_v1, %v9966_v13  ;;  %v11484_v32 = vpack.c.bf16 %v9462_v56, %v9460_v29  ;;  %v9475_v13 = vld [vmem:[#allocation2 + $0x10c0] sm:$0xff]  ;;  %v9988_v56 = vld [vmem:[#allocation2 + $0x17d0] sm:$0xff] }
 0x375   : > { %11447 = vmatpush1.bf16.msra.mxu0 %v11446_v25  ;;  %v9446_v25 = vld [vmem:[#allocation2 + $0xfd8] sm:$0xff]  ;;  %v9986_v1 = vld [vmem:[#allocation2 + $0x17c0] sm:$0xff] }
 0x376   : > { %11671 = vmatpush1.bf16.msra.mxu1 %v11670_v6  ;;  %11449 = vmatprep.subr.bf16.mxu0 %v11448_v0  ;;  %v9955_v6 = vld [vmem:[#allocation2 + $0x16c8] sm:$0xff]  ;;  %v9957_v0 = vld [vmem:[#allocation2 + $0x16d8] sm:$0xff]  ;;  %v11468_v5 = vpack.c.bf16 %v9446_v25, %v9444_v14  ;;  %v9970_v14 = vld [vmem:[#allocation2 + $0x1740] sm:$0xff] }
 0x377   : > { %11673 = vmatprep.subr.bf16.mxu1 %v11672_v22  ;;  %v9443_v22 = vld [vmem:[#allocation2 + $0xfc0] sm:$0xff]  ;;  %v11692_v7 = vpack.c.bf16 %v9957_v0, %v9955_v6  ;;  %v9972_v6 = vld [vmem:[#allocation2 + $0x1750] sm:$0xff]  ;;  %v9464_v0 = vld [vmem:[#allocation2 + $0x1068] sm:$0xff] }
 0x378   : > { %v11470_v21 = vpack.c.bf16 %v9445_v61, %v9443_v22  ;;  %v11710_v22 = vpack.c.bf16 %v9972_v6, %v9970_v14  ;;  %v9481_v14 = vld [vmem:[#allocation2 + $0x10f0] sm:$0xff] }
 0x379   : > { %11451 = vmatpush1.bf16.msra.mxu0 %v11450_v51  ;;  %v9450_v51 = vld [vmem:[#allocation2 + $0xff8] sm:$0xff] }
 0x37a   : > { %11675 = vmatpush1.bf16.msra.mxu1 %v11674_v24  ;;  %11453 = vmatprep.subr.bf16.mxu0 %v11452_v27  ;;  %v9959_v24 = vld [vmem:[#allocation2 + $0x16e8] sm:$0xff]  ;;  %v9961_v27 = vld [vmem:[#allocation2 + $0x16f8] sm:$0xff]  ;;  %v11472_v8 = vpack.c.bf16 %v9450_v51, %v9448_v19 }
 0x37b   : > { %11677 = vmatprep.subr.bf16.mxu1 %v11676_v31  ;;  %v9447_v31 = vld [vmem:[#allocation2 + $0xfe0] sm:$0xff]  ;;  %v11696_v11 = vpack.c.bf16 %v9961_v27, %v9959_v24  ;;  %v9468_v51 = vld [vmem:[#allocation2 + $0x1088] sm:$0xff]  ;;  %v9470_v24 = vld [vmem:[#allocation2 + $0x1098] sm:$0xff] }
 0x37c   : > { %v11474_v30 = vpack.c.bf16 %v9449_v59, %v9447_v31  ;;  %v9979_v27 = vld [vmem:[#allocation2 + $0x1788] sm:$0xff]  ;;  %v11492_v31 = vpack.c.bf16 %v9470_v24, %v9468_v51  ;;  %v9467_v59 = vld [vmem:[#allocation2 + $0x1080] sm:$0xff]  ;;  %v9996_v51 = vld [vmem:[#allocation2 + $0x1810] sm:$0xff] }
 0x37d   : > { %11455 = vmatpush1.bf16.msra.mxu0 %v11454_v20  ;;  %v9454_v20 = vld [vmem:[#allocation2 + $0x1018] sm:$0xff]  ;;  %v9488_v24 = vld [vmem:[#allocation2 + $0x1128] sm:$0xff] }
 0x37e   : > { %11679 = vmatpush1.bf16.msra.mxu1 %v11678_v36  ;;  %11457 = vmatprep.subr.bf16.mxu0 %v11456_v42  ;;  %v9963_v36 = vld [vmem:[#allocation2 + $0x1708] sm:$0xff]  ;;  %v9965_v42 = vld [vmem:[#allocation2 + $0x1718] sm:$0xff]  ;;  %v11476_v35 = vpack.c.bf16 %v9454_v20, %v9452_v63  ;;  %v9980_v63 = vld [vmem:[#allocation2 + $0x1790] sm:$0xff] }
 0x37f   : > { %11681 = vmatprep.subr.bf16.mxu1 %v11680_v23  ;;  %v9451_v23 = vld [vmem:[#allocation2 + $0x1000] sm:$0xff]  ;;  %v11700_v49 = vpack.c.bf16 %v9965_v42, %v9963_v36  ;;  %v9472_v20 = vld [vmem:[#allocation2 + $0x10a8] sm:$0xff]  ;;  %v9474_v36 = vld [vmem:[#allocation2 + $0x10b8] sm:$0xff] }
 0x380   : > { %v9983_v42 = vld [vmem:[#allocation2 + $0x17a8] sm:$0xff] }
 0x381   : > { %11459 = vmatpush1.bf16.msra.mxu0 %v11458_v10  ;;  %v9458_v10 = vld [vmem:[#allocation2 + $0x1038] sm:$0xff] }
 0x382   : > { %11683 = vmatpush1.bf16.msra.mxu1 %v11682_v3  ;;  %11461 = vmatprep.subr.bf16.mxu0 %v11460_v53  ;;  %v11478_v3 = vpack.c.bf16 %v9453_v48, %v9451_v23  ;;  %v9967_v53 = vld [vmem:[#allocation2 + $0x1728] sm:$0xff]  ;;  %v11480_v60 = vpack.c.bf16 %v9458_v10, %v9456_v37  ;;  %v11496_v23 = vpack.c.bf16 %v9474_v36, %v9472_v20  ;;  %v9471_v48 = vld [vmem:[#allocation2 + $0x10a0] sm:$0xff]  ;;  %v9984_v37 = vld [vmem:[#allocation2 + $0x17b0] sm:$0xff] }
 0x383   : > { %11685 = vmatprep.subr.bf16.mxu1 %v11684_v43  ;;  %v9457_v43 = vld [vmem:[#allocation2 + $0x1030] sm:$0xff]  ;;  %v9476_v10 = vld [vmem:[#allocation2 + $0x10c8] sm:$0xff] }
 0x384   : > { %v11482_v52 = vpack.c.bf16 %v9457_v43, %v9455_v55  ;;  %v11722_v55 = vpack.c.bf16 %v9984_v37, %v9982_v40  ;;  %v10000_v20 = vld [vmem:[#allocation2 + $0x1830] sm:$0xff]  ;;  %v9492_v36 = vld [vmem:[#allocation2 + $0x1148] sm:$0xff] }
 0x385   : > { %11463 = vmatpush1.bf16.msra.mxu0 %v11462_v9  ;;  %v11704_v9 = vpack.c.bf16 %v9969_v33, %v9967_v53  ;;  %v9987_v53 = vld [vmem:[#allocation2 + $0x17c8] sm:$0xff]  ;;  %v9989_v33 = vld [vmem:[#allocation2 + $0x17d8] sm:$0xff]  ;;  %v9493_v40 = vld [vmem:[#allocation2 + $0x1150] sm:$0xff] }
 0x386   : > { %11687 = vmatpush1.bf16.msra.mxu1 %v11686_v16  ;;  %11465 = vmatprep.subr.bf16.mxu0 %v11464_v18  ;;  %v9971_v16 = vld [vmem:[#allocation2 + $0x1748] sm:$0xff]  ;;  %v9973_v18 = vld [vmem:[#allocation2 + $0x1758] sm:$0xff]  ;;  %v11724_v29 = vpack.c.bf16 %v9989_v33, %v9987_v53 }
 0x387   : > { %11689 = vmatprep.subr.bf16.mxu1 %v11688_v39  ;;  %v9459_v39 = vld [vmem:[#allocation2 + $0x1040] sm:$0xff]  ;;  %v11708_v25 = vpack.c.bf16 %v9973_v18, %v9971_v16  ;;  %v9482_v16 = vld [vmem:[#allocation2 + $0x10f8] sm:$0xff]  ;;  %v9991_v18 = vld [vmem:[#allocation2 + $0x17e8] sm:$0xff] }
 0x388   : > { %v9498_v53 = vld [vmem:[#allocation2 + $0x1178] sm:$0xff]  ;;  %v10007_v33 = vld [vmem:[#allocation2 + $0x1868] sm:$0xff] }
 0x389   : > { %11467 = vmatpush1.bf16.msra.mxu0 %v11466_v41  ;;  %v9466_v41 = vld [vmem:[#allocation2 + $0x1078] sm:$0xff] }
 0x38a   : > { %11691 = vmatpush1.bf16.msra.mxu1 %v11690_v12  ;;  %11469 = vmatprep.subr.bf16.mxu0 %v11468_v5  ;;  %v9975_v12 = vld [vmem:[#allocation2 + $0x1768] sm:$0xff]  ;;  %v11486_v5 = vpack.c.bf16 %v9461_v26, %v9459_v39  ;;  %v11488_v61 = vpack.c.bf16 %v9466_v41, %v9464_v0  ;;  %v9479_v26 = vld [vmem:[#allocation2 + $0x10e0] sm:$0xff]  ;;  %v9992_v0 = vld [vmem:[#allocation2 + $0x17f0] sm:$0xff] }
 0x38b   : > { %11693 = vmatprep.subr.bf16.mxu1 %v11692_v7  ;;  %v9465_v7 = vld [vmem:[#allocation2 + $0x1070] sm:$0xff]  ;;  %v9484_v41 = vld [vmem:[#allocation2 + $0x1108] sm:$0xff] }
 0x38d   : > { %11471 = vmatpush1.bf16.msra.mxu0 %v11470_v21  ;;  %v9981_v21 = vld [vmem:[#allocation2 + $0x1798] sm:$0xff] }
 0x38e   : > { %11695 = vmatpush1.bf16.msra.mxu1 %v11694_v54  ;;  %11473 = vmatprep.subr.bf16.mxu0 %v11472_v8  ;;  %v11490_v54 = vpack.c.bf16 %v9465_v7, %v9463_v15  ;;  %v11716_v34 = vpack.c.bf16 %v9981_v21, %v9979_v27  ;;  %v9483_v7 = vld [vmem:[#allocation2 + $0x1100] sm:$0xff]  ;;  %v9490_v27 = vld [vmem:[#allocation2 + $0x1138] sm:$0xff]  ;;  %v9999_v21 = vld [vmem:[#allocation2 + $0x1828] sm:$0xff] }
 0x38f   : > { %11697 = vmatprep.subr.bf16.mxu1 %v11696_v11  ;;  %v9978_v11 = vld [vmem:[#allocation2 + $0x1780] sm:$0xff] }
 0x391   : > { %11475 = vmatpush1.bf16.msra.mxu0 %v11474_v30  ;;  %v9985_v30 = vld [vmem:[#allocation2 + $0x17b8] sm:$0xff] }
 0x392   : > { %11699 = vmatpush1.bf16.msra.mxu1 %v11698_v46  ;;  %11477 = vmatprep.subr.bf16.mxu0 %v11476_v35  ;;  %v11494_v46 = vpack.c.bf16 %v9469_v28, %v9467_v59  ;;  %v11718_v35 = vpack.c.bf16 %v9980_v63, %v9978_v11  ;;  %v11720_v45 = vpack.c.bf16 %v9985_v30, %v9983_v42  ;;  %v9487_v28 = vld [vmem:[#allocation2 + $0x1120] sm:$0xff]  ;;  %v9489_v11 = vld [vmem:[#allocation2 + $0x1130] sm:$0xff]  ;;  %v9494_v42 = vld [vmem:[#allocation2 + $0x1158] sm:$0xff] }
 0x393   : > { %11701 = vmatprep.subr.bf16.mxu1 %v11700_v49  ;;  %v9473_v49 = vld [vmem:[#allocation2 + $0x10b0] sm:$0xff]  ;;  %v11512_v59 = vpack.c.bf16 %v9490_v27, %v9488_v24  ;;  %v10003_v30 = vld [vmem:[#allocation2 + $0x1848] sm:$0xff] }
 0x394   : > { %9676 = vmatmul.mubr.f32.vlgmr.msra.gmra.mrb[6].mxu0 %v13731_v44  ;;  %v10016_v24 = vld [vmem:[#allocation2 + $0x18b0] sm:$0xff]  ;;  %v9508_v27 = vld [vmem:[#allocation2 + $0x11c8] sm:$0xff] }
 0x395   : > { %10187 = vmatmul.mubr.f32.vlgmr.msra.gmra.mrb[54].mxu1 %v13731_v44  ;;  %11479 = vmatpush1.bf16.msra.mxu0 %v11478_v3  ;;  %v9977_v44 = vld [vmem:[#allocation2 + $0x1778] sm:$0xff] }
 0x396   : > { %9746 = vmatprep.mubr.f32.mxu0 %v13741_v17  ;;  %11703 = vmatpush1.bf16.msra.mxu1 %v11702_v62  ;;  %v11712_v19 = vpack.c.bf16 %v9977_v44, %v9975_v12  ;;  %v9478_v3 = vld [vmem:[#allocation2 + $0x10d8] sm:$0xff]  ;;  %v11498_v62 = vpack.c.bf16 %v9473_v49, %v9471_v48  ;;  %v9995_v44 = vld [vmem:[#allocation2 + $0x1808] sm:$0xff]  ;;  %v11516_v48 = vpack.c.bf16 %v9494_v42, %v9492_v36  ;;  %v9491_v49 = vld [vmem:[#allocation2 + $0x1140] sm:$0xff] }
 0x397   : > { %10257 = vmatprep.mubr.f32.mxu1 %v13741_v17  ;;  %11481 = vmatprep.subr.bf16.mxu0 %v11480_v60  ;;  %v9976_v17 = vld [vmem:[#allocation2 + $0x1770] sm:$0xff]  ;;  %v11500_v43 = vpack.c.bf16 %v9478_v3, %v9476_v10  ;;  %v9486_v12 = vld [vmem:[#allocation2 + $0x1118] sm:$0xff]  ;;  %v9496_v3 = vld [vmem:[#allocation2 + $0x1168] sm:$0xff] }
 0x398   : > { %11705 = vmatprep.subr.bf16.mxu1 %v11704_v9  ;;  %v11714_v8 = vpack.c.bf16 %v9976_v17, %v9974_v2  ;;  %v9477_v60 = vld [vmem:[#allocation2 + $0x10d0] sm:$0xff]  ;;  %v9480_v9 = vld [vmem:[#allocation2 + $0x10e8] sm:$0xff]  ;;  %v11508_v15 = vpack.c.bf16 %v9486_v12, %v9484_v41 }
 0x399   : > { %11483 = vmatpush1.bf16.msra.mxu0 %v11482_v52  ;;  %v9993_v52 = vld [vmem:[#allocation2 + $0x17f8] sm:$0xff]  ;;  %v11504_v39 = vpack.c.bf16 %v9482_v16, %v9480_v9  ;;  %v9485_v2 = vld [vmem:[#allocation2 + $0x1110] sm:$0xff]  ;;  %v9500_v16 = vld [vmem:[#allocation2 + $0x1188] sm:$0xff] }
 0x39a   : > { %11707 = vmatpush1.bf16.msra.mxu1 %v11706_v47  ;;  %11485 = vmatprep.subr.bf16.mxu0 %v11484_v32  ;;  %v11502_v47 = vpack.c.bf16 %v9477_v60, %v9475_v13  ;;  %v11726_v32 = vpack.c.bf16 %v9988_v56, %v9986_v1  ;;  %v11728_v6 = vpack.c.bf16 %v9993_v52, %v9991_v18  ;;  %v10004_v10 = vld [vmem:[#allocation2 + $0x1850] sm:$0xff]  ;;  %v9495_v60 = vld [vmem:[#allocation2 + $0x1160] sm:$0xff]  ;;  %v9502_v18 = vld [vmem:[#allocation2 + $0x1198] sm:$0xff] }
 0x39b   : > { %11709 = vmatprep.subr.bf16.mxu1 %v11708_v25  ;;  %v9990_v25 = vld [vmem:[#allocation2 + $0x17e0] sm:$0xff]  ;;  %v11520_v13 = vpack.c.bf16 %v9498_v53, %v9496_v3  ;;  %v9497_v1 = vld [vmem:[#allocation2 + $0x1170] sm:$0xff]  ;;  %v10011_v52 = vld [vmem:[#allocation2 + $0x1888] sm:$0xff] }
 0x39c   : > { %v10008_v9 = vld [vmem:[#allocation2 + $0x1870] sm:$0xff]  ;;  %v9504_v12 = vld [vmem:[#allocation2 + $0x11a8] sm:$0xff] }
 0x39d   : > { %11487 = vmatpush1.bf16.msra.mxu0 %v11486_v5  ;;  %v9997_v5 = vld [vmem:[#allocation2 + $0x1818] sm:$0xff]  ;;  %v10012_v41 = vld [vmem:[#allocation2 + $0x1890] sm:$0xff]  ;;  %v9512_v42 = vld [vmem:[#allocation2 + $0x11e8] sm:$0xff] }
 0x39e   : > { %11711 = vmatpush1.bf16.msra.mxu1 %v11710_v22  ;;  %11489 = vmatprep.subr.bf16.mxu0 %v11488_v61  ;;  %v11506_v22 = vpack.c.bf16 %v9481_v14, %v9479_v26  ;;  %v11730_v61 = vpack.c.bf16 %v9992_v0, %v9990_v25  ;;  %v11732_v17 = vpack.c.bf16 %v9997_v5, %v9995_v44  ;;  %v9499_v14 = vld [vmem:[#allocation2 + $0x1180] sm:$0xff]  ;;  %v9501_v25 = vld [vmem:[#allocation2 + $0x1190] sm:$0xff]  ;;  %v9506_v44 = vld [vmem:[#allocation2 + $0x11b8] sm:$0xff] }
 0x39f   : > { %11713 = vmatprep.subr.bf16.mxu1 %v11712_v19  ;;  %v9994_v19 = vld [vmem:[#allocation2 + $0x1800] sm:$0xff]  ;;  %v11524_v26 = vpack.c.bf16 %v9502_v18, %v9500_v16  ;;  %v10015_v5 = vld [vmem:[#allocation2 + $0x18a8] sm:$0xff]  ;;  %v10020_v36 = vld [vmem:[#allocation2 + $0x18d0] sm:$0xff] }
 0x3a0   : > { %v10024_v3 = vld [vmem:[#allocation2 + $0x18f0] sm:$0xff]  ;;  %v9516_v53 = vld [vmem:[#allocation2 + $0x1208] sm:$0xff] }
 0x3a1   : > { %11491 = vmatpush1.bf16.msra.mxu0 %v11490_v54  ;;  %v10001_v54 = vld [vmem:[#allocation2 + $0x1838] sm:$0xff]  ;;  %v10028_v16 = vld [vmem:[#allocation2 + $0x1910] sm:$0xff]  ;;  %v9520_v18 = vld [vmem:[#allocation2 + $0x1228] sm:$0xff] }
 0x3a2   : > { %11715 = vmatpush1.bf16.msra.mxu1 %v11714_v8  ;;  %11493 = vmatprep.subr.bf16.mxu0 %v11492_v31  ;;  %v11510_v8 = vpack.c.bf16 %v9485_v2, %v9483_v7  ;;  %v11734_v31 = vpack.c.bf16 %v9996_v51, %v9994_v19  ;;  %v11736_v63 = vpack.c.bf16 %v10001_v54, %v9999_v21  ;;  %v9503_v2 = vld [vmem:[#allocation2 + $0x11a0] sm:$0xff]  ;;  %v9505_v19 = vld [vmem:[#allocation2 + $0x11b0] sm:$0xff]  ;;  %v9510_v21 = vld [vmem:[#allocation2 + $0x11d8] sm:$0xff] }
 0x3a3   : > { %11717 = vmatprep.subr.bf16.mxu1 %v11716_v34  ;;  %v9998_v34 = vld [vmem:[#allocation2 + $0x1820] sm:$0xff]  ;;  %v11528_v7 = vpack.c.bf16 %v9506_v44, %v9504_v12  ;;  %v10019_v54 = vld [vmem:[#allocation2 + $0x18c8] sm:$0xff]  ;;  %v9526_v44 = vld [vmem:[#allocation2 + $0x1258] sm:$0xff] }
 0x3a4   : > { %v9524_v12 = vld [vmem:[#allocation2 + $0x1248] sm:$0xff] }
 0x3a5   : > { %11495 = vmatpush1.bf16.msra.mxu0 %v11494_v46  ;;  %v10005_v46 = vld [vmem:[#allocation2 + $0x1858] sm:$0xff] }
 0x3a6   : > { %11719 = vmatpush1.bf16.msra.mxu1 %v11718_v35  ;;  %11497 = vmatprep.subr.bf16.mxu0 %v11496_v23  ;;  %v11514_v35 = vpack.c.bf16 %v9489_v11, %v9487_v28  ;;  %v11738_v23 = vpack.c.bf16 %v10000_v20, %v9998_v34  ;;  %v11740_v37 = vpack.c.bf16 %v10005_v46, %v10003_v30  ;;  %v9507_v11 = vld [vmem:[#allocation2 + $0x11c0] sm:$0xff]  ;;  %v9509_v34 = vld [vmem:[#allocation2 + $0x11d0] sm:$0xff]  ;;  %v9514_v30 = vld [vmem:[#allocation2 + $0x11f8] sm:$0xff] }
 0x3a7   : > { %11721 = vmatprep.subr.bf16.mxu1 %v11720_v45  ;;  %v10002_v45 = vld [vmem:[#allocation2 + $0x1840] sm:$0xff]  ;;  %v11532_v28 = vpack.c.bf16 %v9510_v21, %v9508_v27  ;;  %v10023_v46 = vld [vmem:[#allocation2 + $0x18e8] sm:$0xff]  ;;  %v10036_v27 = vld [vmem:[#allocation2 + $0x1950] sm:$0xff] }
 0x3a8   : > { %v9528_v21 = vld [vmem:[#allocation2 + $0x1268] sm:$0xff] }
 0x3a9   : > { %11499 = vmatpush1.bf16.msra.mxu0 %v11498_v62  ;;  %v10009_v62 = vld [vmem:[#allocation2 + $0x1878] sm:$0xff] }
 0x3aa   : > { %11723 = vmatpush1.bf16.msra.mxu1 %v11722_v55  ;;  %11501 = vmatprep.subr.bf16.mxu0 %v11500_v43  ;;  %v11518_v55 = vpack.c.bf16 %v9493_v40, %v9491_v49  ;;  %v11742_v43 = vpack.c.bf16 %v10004_v10, %v10002_v45  ;;  %v11744_v56 = vpack.c.bf16 %v10009_v62, %v10007_v33  ;;  %v9511_v40 = vld [vmem:[#allocation2 + $0x11e0] sm:$0xff]  ;;  %v9513_v45 = vld [vmem:[#allocation2 + $0x11f0] sm:$0xff]  ;;  %v9518_v33 = vld [vmem:[#allocation2 + $0x1218] sm:$0xff] }
 0x3ab   : > { %11725 = vmatprep.subr.bf16.mxu1 %v11724_v29  ;;  %v10006_v29 = vld [vmem:[#allocation2 + $0x1860] sm:$0xff]  ;;  %v11536_v49 = vpack.c.bf16 %v9514_v30, %v9512_v42  ;;  %v10027_v62 = vld [vmem:[#allocation2 + $0x1908] sm:$0xff]  ;;  %v9534_v42 = vld [vmem:[#allocation2 + $0x1298] sm:$0xff] }
 0x3ac   : > { %v10043_v30 = vld [vmem:[#allocation2 + $0x1988] sm:$0xff] }
 0x3ad   : > { %11503 = vmatpush1.bf16.msra.mxu0 %v11502_v47  ;;  %v10013_v47 = vld [vmem:[#allocation2 + $0x1898] sm:$0xff] }
 0x3ae   : > { %11727 = vmatpush1.bf16.msra.mxu1 %v11726_v32  ;;  %11505 = vmatprep.subr.bf16.mxu0 %v11504_v39  ;;  %v11522_v32 = vpack.c.bf16 %v9497_v1, %v9495_v60  ;;  %v11746_v39 = vpack.c.bf16 %v10008_v9, %v10006_v29  ;;  %v11748_v0 = vpack.c.bf16 %v10013_v47, %v10011_v52  ;;  %v9515_v1 = vld [vmem:[#allocation2 + $0x1200] sm:$0xff]  ;;  %v9517_v29 = vld [vmem:[#allocation2 + $0x1210] sm:$0xff]  ;;  %v9522_v52 = vld [vmem:[#allocation2 + $0x1238] sm:$0xff] }
 0x3af   : > { %11729 = vmatprep.subr.bf16.mxu1 %v11728_v6  ;;  %v10010_v6 = vld [vmem:[#allocation2 + $0x1880] sm:$0xff]  ;;  %v11540_v60 = vpack.c.bf16 %v9518_v33, %v9516_v53  ;;  %v11542_v47 = vpack.c.bf16 %v9517_v29, %v9515_v1  ;;  %v9538_v53 = vld [vmem:[#allocation2 + $0x12b8] sm:$0xff]  ;;  %v10047_v33 = vld [vmem:[#allocation2 + $0x19a8] sm:$0xff] }
 0x3b0   : > { %v10026_v9 = vld [vmem:[#allocation2 + $0x1900] sm:$0xff]  ;;  %v9537_v1 = vld [vmem:[#allocation2 + $0x12b0] sm:$0xff] }
 0x3b1   : > { %11507 = vmatpush1.bf16.msra.mxu0 %v11506_v22  ;;  %v10017_v22 = vld [vmem:[#allocation2 + $0x18b8] sm:$0xff]  ;;  %v10046_v29 = vld [vmem:[#allocation2 + $0x19a0] sm:$0xff] }
 0x3b2   : > { %11731 = vmatpush1.bf16.msra.mxu1 %v11730_v61  ;;  %11509 = vmatprep.subr.bf16.mxu0 %v11508_v15  ;;  %v11526_v61 = vpack.c.bf16 %v9501_v25, %v9499_v14  ;;  %v11750_v15 = vpack.c.bf16 %v10012_v41, %v10010_v6  ;;  %v11752_v51 = vpack.c.bf16 %v10017_v22, %v10015_v5  ;;  %v9519_v14 = vld [vmem:[#allocation2 + $0x1220] sm:$0xff]  ;;  %v9521_v25 = vld [vmem:[#allocation2 + $0x1230] sm:$0xff]  ;;  %v10035_v22 = vld [vmem:[#allocation2 + $0x1948] sm:$0xff] }
 0x3b3   : > { %11733 = vmatprep.subr.bf16.mxu1 %v11732_v17  ;;  %v10014_v17 = vld [vmem:[#allocation2 + $0x18a0] sm:$0xff]  ;;  %v10032_v41 = vld [vmem:[#allocation2 + $0x1930] sm:$0xff] }
 0x3b4   : > { %v10030_v6 = vld [vmem:[#allocation2 + $0x1920] sm:$0xff] }
 0x3b5   : > { %11511 = vmatpush1.bf16.msra.mxu0 %v11510_v8  ;;  %v10021_v8 = vld [vmem:[#allocation2 + $0x18d8] sm:$0xff] }
 0x3b6   : > { %11735 = vmatpush1.bf16.msra.mxu1 %v11734_v31  ;;  %11513 = vmatprep.subr.bf16.mxu0 %v11512_v59  ;;  %v11530_v31 = vpack.c.bf16 %v9505_v19, %v9503_v2  ;;  %v11754_v59 = vpack.c.bf16 %v10016_v24, %v10014_v17  ;;  %v11756_v20 = vpack.c.bf16 %v10021_v8, %v10019_v54  ;;  %v9523_v19 = vld [vmem:[#allocation2 + $0x1240] sm:$0xff]  ;;  %v9525_v17 = vld [vmem:[#allocation2 + $0x1250] sm:$0xff]  ;;  %v9530_v54 = vld [vmem:[#allocation2 + $0x1278] sm:$0xff] }
 0x3b7   : > { %11737 = vmatprep.subr.bf16.mxu1 %v11736_v63  ;;  %v10018_v63 = vld [vmem:[#allocation2 + $0x18c0] sm:$0xff]  ;;  %v11548_v2 = vpack.c.bf16 %v9526_v44, %v9524_v12  ;;  %v10039_v8 = vld [vmem:[#allocation2 + $0x1968] sm:$0xff]  ;;  %v9546_v44 = vld [vmem:[#allocation2 + $0x12f8] sm:$0xff] }
 0x3b8   : > { %v9544_v12 = vld [vmem:[#allocation2 + $0x12e8] sm:$0xff] }
 0x3b9   : > { %11515 = vmatpush1.bf16.msra.mxu0 %v11514_v35  ;;  %v10025_v35 = vld [vmem:[#allocation2 + $0x18f8] sm:$0xff] }
 0x3ba   : > { %11739 = vmatpush1.bf16.msra.mxu1 %v11738_v23  ;;  %11517 = vmatprep.subr.bf16.mxu0 %v11516_v48  ;;  %v11534_v23 = vpack.c.bf16 %v9509_v34, %v9507_v11  ;;  %v11758_v48 = vpack.c.bf16 %v10020_v36, %v10018_v63  ;;  %v11760_v10 = vpack.c.bf16 %v10025_v35, %v10023_v46  ;;  %v9527_v11 = vld [vmem:[#allocation2 + $0x1260] sm:$0xff]  ;;  %v9529_v34 = vld [vmem:[#allocation2 + $0x1270] sm:$0xff]  ;;  %v9532_v36 = vld [vmem:[#allocation2 + $0x1288] sm:$0xff] }
 0x3bb   : > { %11741 = vmatprep.subr.bf16.mxu1 %v11740_v37  ;;  %v10022_v37 = vld [vmem:[#allocation2 + $0x18e0] sm:$0xff]  ;;  %v10045_v46 = vld [vmem:[#allocation2 + $0x1998] sm:$0xff]  ;;  %v11554_v35 = vpack.c.bf16 %v9529_v34, %v9527_v11  ;;  %v9549_v11 = vld [vmem:[#allocation2 + $0x1310] sm:$0xff] }
 0x3bc   : > { %v10038_v63 = vld [vmem:[#allocation2 + $0x1960] sm:$0xff] }
 0x3bd   : > { %11519 = vmatpush1.bf16.msra.mxu0 %v11518_v55  ;;  %v10029_v55 = vld [vmem:[#allocation2 + $0x1918] sm:$0xff]  ;;  %v10058_v34 = vld [vmem:[#allocation2 + $0x1a00] sm:$0xff] }
 0x3be   : > { %11743 = vmatpush1.bf16.msra.mxu1 %v11742_v43  ;;  %11521 = vmatprep.subr.bf16.mxu0 %v11520_v13  ;;  %v11538_v43 = vpack.c.bf16 %v9513_v45, %v9511_v40  ;;  %v11762_v13 = vpack.c.bf16 %v10024_v3, %v10022_v37  ;;  %v9533_v40 = vld [vmem:[#allocation2 + $0x1290] sm:$0xff]  ;;  %v10042_v45 = vld [vmem:[#allocation2 + $0x1980] sm:$0xff]  ;;  %v11780_v37 = vpack.c.bf16 %v10045_v46, %v10043_v30  ;;  %v9536_v3 = vld [vmem:[#allocation2 + $0x12a8] sm:$0xff] }
 0x3bf   : > { %11745 = vmatprep.subr.bf16.mxu1 %v11744_v56  ;;  %v11764_v56 = vpack.c.bf16 %v10029_v55, %v10027_v62  ;;  %v10049_v62 = vld [vmem:[#allocation2 + $0x19b8] sm:$0xff] }
 0x3c0   : > { %v10065_v30 = vld [vmem:[#allocation2 + $0x1a38] sm:$0xff] }
 0x3c1   : > { %11523 = vmatpush1.bf16.msra.mxu0 %v11522_v32  ;;  %v10031_v32 = vld [vmem:[#allocation2 + $0x1928] sm:$0xff] }
 0x3c2   : > { %11747 = vmatpush1.bf16.msra.mxu1 %v11746_v39  ;;  %11525 = vmatprep.subr.bf16.mxu0 %v11524_v26  ;;  %v10033_v39 = vld [vmem:[#allocation2 + $0x1938] sm:$0xff]  ;;  %v11766_v26 = vpack.c.bf16 %v10028_v16, %v10026_v9  ;;  %v10048_v9 = vld [vmem:[#allocation2 + $0x19b0] sm:$0xff]  ;;  %v9540_v16 = vld [vmem:[#allocation2 + $0x12c8] sm:$0xff] }
 0x3c3   : > { %11749 = vmatprep.subr.bf16.mxu1 %v11748_v0  ;;  %v11544_v0 = vpack.c.bf16 %v9522_v52, %v9520_v18  ;;  %v11768_v5 = vpack.c.bf16 %v10033_v39, %v10031_v32  ;;  %v9542_v18 = vld [vmem:[#allocation2 + $0x12d8] sm:$0xff]  ;;  %v10051_v52 = vld [vmem:[#allocation2 + $0x19c8] sm:$0xff]  ;;  %v11786_v39 = vpack.c.bf16 %v10048_v9, %v10046_v29 }
 0x3c4   : > { %v9560_v9 = vld [vmem:[#allocation2 + $0x1368] sm:$0xff] }
 0x3c5   : > { %11527 = vmatpush1.bf16.msra.mxu0 %v11526_v61  ;;  %v10037_v61 = vld [vmem:[#allocation2 + $0x1958] sm:$0xff] }
 0x3c6   : > { %11751 = vmatpush1.bf16.msra.mxu1 %v11750_v15  ;;  %11529 = vmatprep.subr.bf16.mxu0 %v11528_v7  ;;  %v11546_v15 = vpack.c.bf16 %v9521_v25, %v9519_v14  ;;  %v11770_v7 = vpack.c.bf16 %v10032_v41, %v10030_v6  ;;  %v11772_v24 = vpack.c.bf16 %v10037_v61, %v10035_v22  ;;  %v9539_v14 = vld [vmem:[#allocation2 + $0x12c0] sm:$0xff]  ;;  %v9541_v25 = vld [vmem:[#allocation2 + $0x12d0] sm:$0xff]  ;;  %v10057_v22 = vld [vmem:[#allocation2 + $0x19f8] sm:$0xff] }
 0x3c7   : > { %11753 = vmatprep.subr.bf16.mxu1 %v11752_v51  ;;  %v10034_v51 = vld [vmem:[#allocation2 + $0x1940] sm:$0xff]  ;;  %v10052_v41 = vld [vmem:[#allocation2 + $0x19d0] sm:$0xff]  ;;  %v11566_v61 = vpack.c.bf16 %v9541_v25, %v9539_v14 }
 0x3c8   : > { %v10050_v6 = vld [vmem:[#allocation2 + $0x19c0] sm:$0xff]  ;;  %v9561_v14 = vld [vmem:[#allocation2 + $0x1370] sm:$0xff] }
 0x3c9   : > { %11531 = vmatpush1.bf16.msra.mxu0 %v11530_v31  ;;  %v11550_v31 = vpack.c.bf16 %v9525_v17, %v9523_v19  ;;  %v9545_v19 = vld [vmem:[#allocation2 + $0x12f0] sm:$0xff]  ;;  %v10054_v17 = vld [vmem:[#allocation2 + $0x19e0] sm:$0xff] }
 0x3ca   : > { %11755 = vmatpush1.bf16.msra.mxu1 %v11754_v59  ;;  %11533 = vmatprep.subr.bf16.mxu0 %v11532_v28  ;;  %v11774_v59 = vpack.c.bf16 %v10036_v27, %v10034_v51  ;;  %v11552_v28 = vpack.c.bf16 %v9530_v54, %v9528_v21  ;;  %v9548_v27 = vld [vmem:[#allocation2 + $0x1308] sm:$0xff]  ;;  %v9550_v21 = vld [vmem:[#allocation2 + $0x1318] sm:$0xff]  ;;  %v10070_v25 = vld [vmem:[#allocation2 + $0x1a60] sm:$0xff] }
 0x3cb   : > { %11757 = vmatprep.subr.bf16.mxu1 %v11756_v20  ;;  %v10059_v54 = vld [vmem:[#allocation2 + $0x1a08] sm:$0xff] }
 0x3cd   : > { %11535 = vmatpush1.bf16.msra.mxu0 %v11534_v23 }
 0x3ce   : > { %11759 = vmatpush1.bf16.msra.mxu1 %v11758_v48  ;;  %11537 = vmatprep.subr.bf16.mxu0 %v11536_v49  ;;  %v11556_v48 = vpack.c.bf16 %v9534_v42, %v9532_v36  ;;  %v9531_v49 = vld [vmem:[#allocation2 + $0x1280] sm:$0xff]  ;;  %v9554_v36 = vld [vmem:[#allocation2 + $0x1338] sm:$0xff]  ;;  %v10063_v42 = vld [vmem:[#allocation2 + $0x1a28] sm:$0xff] }
 0x3cf   : > { %11761 = vmatprep.subr.bf16.mxu1 %v11760_v10  ;;  %v10044_v10 = vld [vmem:[#allocation2 + $0x1990] sm:$0xff]  ;;  %v11558_v55 = vpack.c.bf16 %v9533_v40, %v9531_v49  ;;  %v10062_v40 = vld [vmem:[#allocation2 + $0x1a20] sm:$0xff] }
 0x3d0   : > { %v9553_v49 = vld [vmem:[#allocation2 + $0x1330] sm:$0xff] }
 0x3d1   : > { %11539 = vmatpush1.bf16.msra.mxu0 %v11538_v43  ;;  %v11782_v43 = vpack.c.bf16 %v10044_v10, %v10042_v45  ;;  %v11800_v45 = vpack.c.bf16 %v10065_v30, %v10063_v42  ;;  %v9556_v10 = vld [vmem:[#allocation2 + $0x1348] sm:$0xff]  ;;  %v10085_v42 = vld [vmem:[#allocation2 + $0x1ad8] sm:$0xff] }
 0x3d2   : > { %11763 = vmatpush1.bf16.msra.mxu1 %v11762_v13  ;;  %11541 = vmatprep.subr.bf16.mxu0 %v11540_v60  ;;  %v11560_v13 = vpack.c.bf16 %v9538_v53, %v9536_v3  ;;  %v9535_v60 = vld [vmem:[#allocation2 + $0x12a0] sm:$0xff]  ;;  %v9558_v3 = vld [vmem:[#allocation2 + $0x1358] sm:$0xff]  ;;  %v10067_v53 = vld [vmem:[#allocation2 + $0x1a48] sm:$0xff] }
 0x3d3   : > { %11765 = vmatprep.subr.bf16.mxu1 %v11764_v56  ;;  %v11784_v56 = vpack.c.bf16 %v10049_v62, %v10047_v33  ;;  %v11562_v32 = vpack.c.bf16 %v9537_v1, %v9535_v60  ;;  %v10069_v33 = vld [vmem:[#allocation2 + $0x1a58] sm:$0xff]  ;;  %v9557_v60 = vld [vmem:[#allocation2 + $0x1350] sm:$0xff]  ;;  %v10066_v1 = vld [vmem:[#allocation2 + $0x1a40] sm:$0xff] }
 0x3d4   : > { %9747 = vmatmul.mubr.f32.vlgmr.msra.gmra.mrb[6].mxu0 %v13743_v38  ;;  %v11804_v29 = vpack.c.bf16 %v10069_v33, %v10067_v53  ;;  %v10089_v53 = vld [vmem:[#allocation2 + $0x1af8] sm:$0xff] }
 0x3d5   : > { %10258 = vmatmul.mubr.f32.vlgmr.msra.gmra.mrb[54].mxu1 %v13743_v38  ;;  %11543 = vmatpush1.bf16.msra.mxu0 %v11542_v47  ;;  %v10041_v38 = vld [vmem:[#allocation2 + $0x1978] sm:$0xff] }
 0x3d6   : > { %9817 = vmatprep.mubr.f32.mxu0 %v13749_v57  ;;  %11767 = vmatpush1.bf16.msra.mxu1 %v11766_v26  ;;  %v11776_v20 = vpack.c.bf16 %v10041_v38, %v10039_v8  ;;  %v10053_v47 = vld [vmem:[#allocation2 + $0x19d8] sm:$0xff]  ;;  %v11564_v26 = vpack.c.bf16 %v9542_v18, %v9540_v16  ;;  %v10071_v18 = vld [vmem:[#allocation2 + $0x1a68] sm:$0xff] }
 0x3d7   : > { %10328 = vmatprep.mubr.f32.mxu1 %v13749_v57  ;;  %11545 = vmatprep.subr.bf16.mxu0 %v11544_v0  ;;  %v10040_v57 = vld [vmem:[#allocation2 + $0x1970] sm:$0xff]  ;;  %v11788_v0 = vpack.c.bf16 %v10053_v47, %v10051_v52  ;;  %v10061_v8 = vld [vmem:[#allocation2 + $0x1a18] sm:$0xff] }
 0x3d8   : > { %11769 = vmatprep.subr.bf16.mxu1 %v11768_v5  ;;  %v11778_v23 = vpack.c.bf16 %v10040_v57, %v10038_v63  ;;  %v10055_v5 = vld [vmem:[#allocation2 + $0x19e8] sm:$0xff]  ;;  %v11796_v63 = vpack.c.bf16 %v10061_v8, %v10059_v54  ;;  %v9562_v16 = vld [vmem:[#allocation2 + $0x1378] sm:$0xff] }
 0x3d9   : > { %11547 = vmatpush1.bf16.msra.mxu0 %v11546_v15  ;;  %v11790_v15 = vpack.c.bf16 %v10052_v41, %v10050_v6  ;;  %v11792_v51 = vpack.c.bf16 %v10057_v22, %v10055_v5  ;;  %v9552_v57 = vld [vmem:[#allocation2 + $0x1328] sm:$0xff]  ;;  %v10073_v52 = vld [vmem:[#allocation2 + $0x1a78] sm:$0xff] }
 0x3da   : > { %11771 = vmatpush1.bf16.msra.mxu1 %v11770_v7  ;;  %11549 = vmatprep.subr.bf16.mxu0 %v11548_v2  ;;  %v11568_v7 = vpack.c.bf16 %v9546_v44, %v9544_v12  ;;  %v9543_v2 = vld [vmem:[#allocation2 + $0x12e0] sm:$0xff]  ;;  %v11808_v6 = vpack.c.bf16 %v10073_v52, %v10071_v18  ;;  %v9564_v41 = vld [vmem:[#allocation2 + $0x1388] sm:$0xff]  ;;  %v9566_v12 = vld [vmem:[#allocation2 + $0x1398] sm:$0xff] }
 0x3db   : > { %11773 = vmatprep.subr.bf16.mxu1 %v11772_v24  ;;  %v10056_v24 = vld [vmem:[#allocation2 + $0x19f0] sm:$0xff]  ;;  %v11570_v38 = vpack.c.bf16 %v9545_v19, %v9543_v2  ;;  %v10075_v44 = vld [vmem:[#allocation2 + $0x1a88] sm:$0xff]  ;;  %v10077_v5 = vld [vmem:[#allocation2 + $0x1a98] sm:$0xff] }
 0x3dc   : > { %v9565_v2 = vld [vmem:[#allocation2 + $0x1390] sm:$0xff]  ;;  %v10074_v19 = vld [vmem:[#allocation2 + $0x1a80] sm:$0xff]  ;;  %v10081_v54 = vld [vmem:[#allocation2 + $0x1ab8] sm:$0xff] }
 0x3dd   : > { %11551 = vmatpush1.bf16.msra.mxu0 %v11550_v31  ;;  %v11794_v31 = vpack.c.bf16 %v10056_v24, %v10054_v17  ;;  %v11812_v17 = vpack.c.bf16 %v10077_v5, %v10075_v44  ;;  %v9568_v24 = vld [vmem:[#allocation2 + $0x13a8] sm:$0xff]  ;;  %v10093_v18 = vld [vmem:[#allocation2 + $0x1b18] sm:$0xff] }
 0x3de   : > { %11775 = vmatpush1.bf16.msra.mxu1 %v11774_v59  ;;  %11553 = vmatprep.subr.bf16.mxu0 %v11552_v28  ;;  %v11572_v59 = vpack.c.bf16 %v9550_v21, %v9548_v27  ;;  %v9547_v28 = vld [vmem:[#allocation2 + $0x1300] sm:$0xff]  ;;  %v9570_v27 = vld [vmem:[#allocation2 + $0x13b8] sm:$0xff]  ;;  %v10079_v21 = vld [vmem:[#allocation2 + $0x1aa8] sm:$0xff] }
 0x3df   : > { %11777 = vmatprep.subr.bf16.mxu1 %v11776_v20  ;;  %v10060_v20 = vld [vmem:[#allocation2 + $0x1a10] sm:$0xff]  ;;  %v11574_v46 = vpack.c.bf16 %v9549_v11, %v9547_v28  ;;  %v10078_v11 = vld [vmem:[#allocation2 + $0x1aa0] sm:$0xff]  ;;  %v10097_v44 = vld [vmem:[#allocation2 + $0x1b38] sm:$0xff] }
 0x3e0   : > { %v9569_v28 = vld [vmem:[#allocation2 + $0x13b0] sm:$0xff] }
 0x3e1   : > { %11555 = vmatpush1.bf16.msra.mxu0 %v11554_v35  ;;  %v11798_v35 = vpack.c.bf16 %v10060_v20, %v10058_v34  ;;  %v11816_v34 = vpack.c.bf16 %v10081_v54, %v10079_v21  ;;  %v9572_v20 = vld [vmem:[#allocation2 + $0x13c8] sm:$0xff]  ;;  %v10101_v21 = vld [vmem:[#allocation2 + $0x1b58] sm:$0xff] }
 0x3e2   : > { %11779 = vmatpush1.bf16.msra.mxu1 %v11778_v23  ;;  %11557 = vmatprep.subr.bf16.mxu0 %v11556_v48  ;;  %v11576_v23 = vpack.c.bf16 %v9554_v36, %v9552_v57  ;;  %v9551_v48 = vld [vmem:[#allocation2 + $0x1320] sm:$0xff]  ;;  %v9574_v57 = vld [vmem:[#allocation2 + $0x13d8] sm:$0xff]  ;;  %v10083_v36 = vld [vmem:[#allocation2 + $0x1ac8] sm:$0xff] }
 0x3e3   : > { %11781 = vmatprep.subr.bf16.mxu1 %v11780_v37  ;;  %v10064_v37 = vld [vmem:[#allocation2 + $0x1a30] sm:$0xff]  ;;  %v11578_v62 = vpack.c.bf16 %v9553_v49, %v9551_v48  ;;  %v10082_v49 = vld [vmem:[#allocation2 + $0x1ac0] sm:$0xff] }
 0x3e4   : > { %v9573_v48 = vld [vmem:[#allocation2 + $0x13d0] sm:$0xff] }
 0x3e5   : > { %11559 = vmatpush1.bf16.msra.mxu0 %v11558_v55  ;;  %v11802_v55 = vpack.c.bf16 %v10064_v37, %v10062_v40  ;;  %v11820_v40 = vpack.c.bf16 %v10085_v42, %v10083_v36  ;;  %v9576_v37 = vld [vmem:[#allocation2 + $0x13e8] sm:$0xff]  ;;  %v10105_v36 = vld [vmem:[#allocation2 + $0x1b78] sm:$0xff] }
 0x3e6   : > { %11783 = vmatpush1.bf16.msra.mxu1 %v11782_v43  ;;  %11561 = vmatprep.subr.bf16.mxu0 %v11560_v13  ;;  %v11580_v43 = vpack.c.bf16 %v9558_v3, %v9556_v10  ;;  %v9555_v13 = vld [vmem:[#allocation2 + $0x1340] sm:$0xff]  ;;  %v9578_v10 = vld [vmem:[#allocation2 + $0x13f8] sm:$0xff]  ;;  %v10087_v3 = vld [vmem:[#allocation2 + $0x1ae8] sm:$0xff] }
 0x3e7   : > { %11785 = vmatprep.subr.bf16.mxu1 %v11784_v56  ;;  %v10068_v56 = vld [vmem:[#allocation2 + $0x1a50] sm:$0xff]  ;;  %v11582_v47 = vpack.c.bf16 %v9557_v60, %v9555_v13  ;;  %v10086_v60 = vld [vmem:[#allocation2 + $0x1ae0] sm:$0xff] }
 0x3e8   : > { %v9577_v13 = vld [vmem:[#allocation2 + $0x13f0] sm:$0xff] }
 0x3e9   : > { %11563 = vmatpush1.bf16.msra.mxu0 %v11562_v32  ;;  %v11806_v32 = vpack.c.bf16 %v10068_v56, %v10066_v1  ;;  %v11824_v1 = vpack.c.bf16 %v10089_v53, %v10087_v3  ;;  %v9580_v56 = vld [vmem:[#allocation2 + $0x1408] sm:$0xff] }
 0x3ea   : > { %11787 = vmatpush1.bf16.msra.mxu1 %v11786_v39  ;;  %11565 = vmatprep.subr.bf16.mxu0 %v11564_v26  ;;  %v11584_v39 = vpack.c.bf16 %v9562_v16, %v9560_v9  ;;  %v9559_v26 = vld [vmem:[#allocation2 + $0x1360] sm:$0xff]  ;;  %v9582_v9 = vld [vmem:[#allocation2 + $0x1418] sm:$0xff]  ;;  %v10091_v16 = vld [vmem:[#allocation2 + $0x1b08] sm:$0xff] }
 0x3eb   : > { %11789 = vmatprep.subr.bf16.mxu1 %v11788_v0  ;;  %v10072_v0 = vld [vmem:[#allocation2 + $0x1a70] sm:$0xff]  ;;  %v11586_v22 = vpack.c.bf16 %v9561_v14, %v9559_v26  ;;  %v10090_v14 = vld [vmem:[#allocation2 + $0x1b00] sm:$0xff] }
 0x3ec   : > { %v9581_v26 = vld [vmem:[#allocation2 + $0x1410] sm:$0xff] }
 0x3ed   : > { %11567 = vmatpush1.bf16.msra.mxu0 %v11566_v61  ;;  %v11810_v61 = vpack.c.bf16 %v10072_v0, %v10070_v25  ;;  %v11828_v25 = vpack.c.bf16 %v10093_v18, %v10091_v16  ;;  %v9584_v0 = vld [vmem:[#allocation2 + $0x1428] sm:$0xff] }
 0x3ee   : > { %11791 = vmatpush1.bf16.msra.mxu1 %v11790_v15  ;;  %11569 = vmatprep.subr.bf16.mxu0 %v11568_v7  ;;  %v11588_v15 = vpack.c.bf16 %v9566_v12, %v9564_v41  ;;  %v9563_v7 = vld [vmem:[#allocation2 + $0x1380] sm:$0xff]  ;;  %v9586_v41 = vld [vmem:[#allocation2 + $0x1438] sm:$0xff]  ;;  %v10095_v12 = vld [vmem:[#allocation2 + $0x1b28] sm:$0xff] }
 0x3ef   : > { %11793 = vmatprep.subr.bf16.mxu1 %v11792_v51  ;;  %v10076_v51 = vld [vmem:[#allocation2 + $0x1a90] sm:$0xff]  ;;  %v11590_v8 = vpack.c.bf16 %v9565_v2, %v9563_v7  ;;  %v10094_v2 = vld [vmem:[#allocation2 + $0x1b20] sm:$0xff] }
 0x3f0   : > { %v9585_v7 = vld [vmem:[#allocation2 + $0x1430] sm:$0xff] }
 0x3f1   : > { %11571 = vmatpush1.bf16.msra.mxu0 %v11570_v38  ;;  %v11814_v38 = vpack.c.bf16 %v10076_v51, %v10074_v19  ;;  %v11832_v19 = vpack.c.bf16 %v10097_v44, %v10095_v12  ;;  %v9588_v51 = vld [vmem:[#allocation2 + $0x1448] sm:$0xff] }
 0x3f2   : > { %11795 = vmatpush1.bf16.msra.mxu1 %v11794_v31  ;;  %11573 = vmatprep.subr.bf16.mxu0 %v11572_v59  ;;  %v11592_v31 = vpack.c.bf16 %v9570_v27, %v9568_v24  ;;  %v9567_v59 = vld [vmem:[#allocation2 + $0x13a0] sm:$0xff]  ;;  %v9590_v24 = vld [vmem:[#allocation2 + $0x1458] sm:$0xff]  ;;  %v10099_v27 = vld [vmem:[#allocation2 + $0x1b48] sm:$0xff] }
 0x3f3   : > { %11797 = vmatprep.subr.bf16.mxu1 %v11796_v63  ;;  %v10080_v63 = vld [vmem:[#allocation2 + $0x1ab0] sm:$0xff]  ;;  %v11594_v30 = vpack.c.bf16 %v9569_v28, %v9567_v59  ;;  %v10098_v28 = vld [vmem:[#allocation2 + $0x1b40] sm:$0xff] }
 0x3f4   : > { %v9589_v59 = vld [vmem:[#allocation2 + $0x1450] sm:$0xff] }
 0x3f5   : > { %11575 = vmatpush1.bf16.msra.mxu0 %v11574_v46  ;;  %v11818_v46 = vpack.c.bf16 %v10080_v63, %v10078_v11  ;;  %v11836_v11 = vpack.c.bf16 %v10101_v21, %v10099_v27  ;;  %v9592_v63 = vld [vmem:[#allocation2 + $0x1468] sm:$0xff] }
 0x3f6   : > { %11799 = vmatpush1.bf16.msra.mxu1 %v11798_v35  ;;  %11577 = vmatprep.subr.bf16.mxu0 %v11576_v23  ;;  %v11596_v35 = vpack.c.bf16 %v9574_v57, %v9572_v20  ;;  %v9571_v23 = vld [vmem:[#allocation2 + $0x13c0] sm:$0xff]  ;;  %v9594_v20 = vld [vmem:[#allocation2 + $0x1478] sm:$0xff]  ;;  %v10103_v57 = vld [vmem:[#allocation2 + $0x1b68] sm:$0xff] }
 0x3f7   : > { %11801 = vmatprep.subr.bf16.mxu1 %v11800_v45  ;;  %v10084_v45 = vld [vmem:[#allocation2 + $0x1ad0] sm:$0xff]  ;;  %v11598_v33 = vpack.c.bf16 %v9573_v48, %v9571_v23  ;;  %v10102_v23 = vld [vmem:[#allocation2 + $0x1b60] sm:$0xff]  ;;  %v11840_v48 = vpack.c.bf16 %v10105_v36, %v10103_v57 }
 0x3f8   : > { %v10120_v57 = vld [vmem:[#allocation2 + $0x1bf0] sm:$0xff] }
 0x3f9   : > { %11579 = vmatpush1.bf16.msra.mxu0 %v11578_v62  ;;  %v11822_v62 = vpack.c.bf16 %v10084_v45, %v10082_v49  ;;  %v10104_v49 = vld [vmem:[#allocation2 + $0x1b70] sm:$0xff]  ;;  %v9598_v45 = vld [vmem:[#allocation2 + $0x1498] sm:$0xff] }
 0x3fa   : > { %11803 = vmatpush1.bf16.msra.mxu1 %v11802_v55  ;;  %11581 = vmatprep.subr.bf16.mxu0 %v11580_v43  ;;  %v11600_v55 = vpack.c.bf16 %v9578_v10, %v9576_v37  ;;  %v9575_v43 = vld [vmem:[#allocation2 + $0x13e0] sm:$0xff]  ;;  %v10107_v37 = vld [vmem:[#allocation2 + $0x1b88] sm:$0xff]  ;;  %v10109_v10 = vld [vmem:[#allocation2 + $0x1b98] sm:$0xff] }
 0x3fb   : > { %11805 = vmatprep.subr.bf16.mxu1 %v11804_v29  ;;  %v10088_v29 = vld [vmem:[#allocation2 + $0x1af0] sm:$0xff]  ;;  %v11602_v52 = vpack.c.bf16 %v9577_v13, %v9575_v43  ;;  %v11844_v43 = vpack.c.bf16 %v10109_v10, %v10107_v37 }
 0x3fc   : > { %v10108_v13 = vld [vmem:[#allocation2 + $0x1b90] sm:$0xff] }
 0x3fd   : > { %11583 = vmatpush1.bf16.msra.mxu0 %v11582_v47  ;;  %v11826_v47 = vpack.c.bf16 %v10088_v29, %v10086_v60  ;;  %v9600_v60 = vld [vmem:[#allocation2 + $0x14a8] sm:$0xff] }
 0x3fe   : > { %11807 = vmatpush1.bf16.msra.mxu1 %v11806_v32  ;;  %11585 = vmatprep.subr.bf16.mxu0 %v11584_v39  ;;  %v11604_v32 = vpack.c.bf16 %v9582_v9, %v9580_v56  ;;  %v9579_v39 = vld [vmem:[#allocation2 + $0x1400] sm:$0xff]  ;;  %v10111_v29 = vld [vmem:[#allocation2 + $0x1ba8] sm:$0xff]  ;;  %v10113_v56 = vld [vmem:[#allocation2 + $0x1bb8] sm:$0xff] }
 0x3ff   : > { %11809 = vmatprep.subr.bf16.mxu1 %v11808_v6  ;;  %v10092_v6 = vld [vmem:[#allocation2 + $0x1b10] sm:$0xff]  ;;  %v11606_v5 = vpack.c.bf16 %v9581_v26, %v9579_v39  ;;  %v11848_v39 = vpack.c.bf16 %v10113_v56, %v10111_v29 }
 0x400   : > { %v10112_v26 = vld [vmem:[#allocation2 + $0x1bb0] sm:$0xff] }
 0x401   : > { %11587 = vmatpush1.bf16.msra.mxu0 %v11586_v22  ;;  %v11830_v22 = vpack.c.bf16 %v10092_v6, %v10090_v14  ;;  %v9604_v14 = vld [vmem:[#allocation2 + $0x14c8] sm:$0xff] }
 0x402   : > { %11811 = vmatpush1.bf16.msra.mxu1 %v11810_v61  ;;  %11589 = vmatprep.subr.bf16.mxu0 %v11588_v15  ;;  %v11608_v61 = vpack.c.bf16 %v9586_v41, %v9584_v0  ;;  %v9583_v15 = vld [vmem:[#allocation2 + $0x1420] sm:$0xff]  ;;  %v10115_v6 = vld [vmem:[#allocation2 + $0x1bc8] sm:$0xff]  ;;  %v10117_v0 = vld [vmem:[#allocation2 + $0x1bd8] sm:$0xff] }
 0x403   : > { %11813 = vmatprep.subr.bf16.mxu1 %v11812_v17  ;;  %v10096_v17 = vld [vmem:[#allocation2 + $0x1b30] sm:$0xff]  ;;  %v11610_v54 = vpack.c.bf16 %v9585_v7, %v9583_v15 }
 0x405   : > { %11591 = vmatpush1.bf16.msra.mxu0 %v11590_v8  ;;  %v11834_v8 = vpack.c.bf16 %v10096_v17, %v10094_v2  ;;  %v11852_v2 = vpack.c.bf16 %v10117_v0, %v10115_v6  ;;  %v9608_v17 = vld [vmem:[#allocation2 + $0x14e8] sm:$0xff] }
 0x406   : > { %11815 = vmatpush1.bf16.msra.mxu1 %v11814_v38  ;;  %11593 = vmatprep.subr.bf16.mxu0 %v11592_v31  ;;  %v11612_v38 = vpack.c.bf16 %v9590_v24, %v9588_v51  ;;  %v9587_v31 = vld [vmem:[#allocation2 + $0x1440] sm:$0xff]  ;;  %v9610_v51 = vld [vmem:[#allocation2 + $0x14f8] sm:$0xff] }
 0x407   : > { %11817 = vmatprep.subr.bf16.mxu1 %v11816_v34  ;;  %v10100_v34 = vld [vmem:[#allocation2 + $0x1b50] sm:$0xff] }
 0x408   : > { %v11838_v42 = vpack.c.bf16 %v10100_v34, %v10098_v28  ;;  %v11632_v28 = vpack.c.bf16 %v9610_v51, %v9608_v17  ;;  %v9609_v34 = vld [vmem:[#allocation2 + $0x14f0] sm:$0xff] }
 0x409   : > { %11595 = vmatpush1.bf16.msra.mxu0 %v11594_v30  ;;  %v11616_v30 = vpack.c.bf16 %v9594_v20, %v9592_v63  ;;  %v10118_v20 = vld [vmem:[#allocation2 + $0x1be0] sm:$0xff] }
 0x40a   : > { %11819 = vmatpush1.bf16.msra.mxu1 %v11818_v46  ;;  %11597 = vmatprep.subr.bf16.mxu0 %v11596_v35  ;;  %v9591_v46 = vld [vmem:[#allocation2 + $0x1460] sm:$0xff]  ;;  %v9593_v35 = vld [vmem:[#allocation2 + $0x1470] sm:$0xff] }
 0x40b   : > { %11821 = vmatprep.subr.bf16.mxu1 %v11820_v40  ;;  %v9596_v40 = vld [vmem:[#allocation2 + $0x1488] sm:$0xff]  ;;  %v11618_v3 = vpack.c.bf16 %v9593_v35, %v9591_v46 }
 0x40c   : > { %v11620_v53 = vpack.c.bf16 %v9598_v45, %v9596_v40 }
 0x40d   : > { %11599 = vmatpush1.bf16.msra.mxu0 %v11598_v33  ;;  %v9595_v33 = vld [vmem:[#allocation2 + $0x1480] sm:$0xff] }
 0x40e   : > { %11823 = vmatpush1.bf16.msra.mxu1 %v11822_v62  ;;  %11601 = vmatprep.subr.bf16.mxu0 %v11600_v55  ;;  %v9597_v62 = vld [vmem:[#allocation2 + $0x1490] sm:$0xff]  ;;  %v10106_v55 = vld [vmem:[#allocation2 + $0x1b80] sm:$0xff] }
 0x40f   : > { %11825 = vmatprep.subr.bf16.mxu1 %v11824_v1  ;;  %v9602_v1 = vld [vmem:[#allocation2 + $0x14b8] sm:$0xff]  ;;  %v11622_v9 = vpack.c.bf16 %v9597_v62, %v9595_v33  ;;  %v11846_v16 = vpack.c.bf16 %v10108_v13, %v10106_v55 }
 0x410   : > { %v11624_v18 = vpack.c.bf16 %v9602_v1, %v9600_v60 }
 0x411   : > { %11603 = vmatpush1.bf16.msra.mxu0 %v11602_v52  ;;  %v9599_v52 = vld [vmem:[#allocation2 + $0x14a0] sm:$0xff] }
 0x412   : > { %11827 = vmatpush1.bf16.msra.mxu1 %v11826_v47  ;;  %11605 = vmatprep.subr.bf16.mxu0 %v11604_v32  ;;  %v9601_v47 = vld [vmem:[#allocation2 + $0x14b0] sm:$0xff]  ;;  %v10110_v32 = vld [vmem:[#allocation2 + $0x1ba0] sm:$0xff] }
 0x413   : > { %11829 = vmatprep.subr.bf16.mxu1 %v11828_v25  ;;  %v9606_v25 = vld [vmem:[#allocation2 + $0x14d8] sm:$0xff]  ;;  %v11626_v41 = vpack.c.bf16 %v9601_v47, %v9599_v52  ;;  %v11850_v12 = vpack.c.bf16 %v10112_v26, %v10110_v32 }
 0x414   : > { %9818 = vmatmul.mubr.f32.vlgmr.msra.gmra.mrb[6].mxu0 %v13757_v58  ;;  %v11628_v44 = vpack.c.bf16 %v9606_v25, %v9604_v14 }
 0x415   : > { %10329 = vmatmul.mubr.f32.vlgmr.msra.gmra.mrb[54].mxu1 %v13757_v58  ;;  %11607 = vmatpush1.bf16.msra.mxu0 %v11606_v5  ;;  %v11614_v58 = vpack.c.bf16 %v9589_v59, %v9587_v31  ;;  %v9603_v5 = vld [vmem:[#allocation2 + $0x14c0] sm:$0xff] }
 0x416   : > { %11831 = vmatpush1.bf16.msra.mxu1 %v11830_v22  ;;  %11609 = vmatprep.subr.bf16.mxu0 %v11608_v61  ;;  %v9605_v22 = vld [vmem:[#allocation2 + $0x14d0] sm:$0xff]  ;;  %v10114_v61 = vld [vmem:[#allocation2 + $0x1bc0] sm:$0xff] }
 0x417   : > { %11833 = vmatprep.subr.bf16.mxu1 %v11832_v19  ;;  %9888 = vmatprep.mubr.f32.mxu0 %v13825_v50  ;;  %v10116_v19 = vld [vmem:[#allocation2 + $0x1bd0] sm:$0xff]  ;;  %v11630_v31 = vpack.c.bf16 %v9605_v22, %v9603_v5 }
 0x418   : > { %10399 = vmatprep.mubr.f32.mxu1 %v13825_v50  ;;  %v11842_v50 = vpack.c.bf16 %v10104_v49, %v10102_v23  ;;  %v11854_v59 = vpack.c.bf16 %v10116_v19, %v10114_v61 }
 0x419   : > { %11611 = vmatpush1.bf16.msra.mxu0 %v11610_v54  ;;  %v10119_v54 = vld [vmem:[#allocation2 + $0x1be8] sm:$0xff] }
 0x41a   : > { %11835 = vmatpush1.bf16.msra.mxu1 %v11834_v8  ;;  %11613 = vmatprep.subr.bf16.mxu0 %v11612_v38  ;;  %v10121_v8 = vld [vmem:[#allocation2 + $0x1bf8] sm:$0xff] }
 0x41b   : > { %11837 = vmatprep.subr.bf16.mxu1 %v11836_v11  ;;  %v9607_v11 = vld [vmem:[#allocation2 + $0x14e0] sm:$0xff]  ;;  %v11856_v63 = vpack.c.bf16 %v10121_v8, %v10119_v54 }
 0x41c   : > { %v11634_v36 = vpack.c.bf16 %v9609_v34, %v9607_v11 }
 0x41d   : > { %11615 = vmatpush1.bf16.msra.mxu0 %v11614_v58  ;;  %v11858_v58 = vpack.c.bf16 %v10120_v57, %v10118_v20 }
 0x41e   : > { %11839 = vmatpush1.bf16.msra.mxu1 %v11838_v42  ;;  %11617 = vmatprep.subr.bf16.mxu0 %v11616_v30 }
 0x41f   : > { %11841 = vmatprep.subr.bf16.mxu1 %v11840_v48 }
 0x421   : > { %11619 = vmatpush1.bf16.msra.mxu0 %v11618_v3 }
 0x422   : > { %11843 = vmatpush1.bf16.msra.mxu1 %v11842_v50  ;;  %11621 = vmatprep.subr.bf16.mxu0 %v11620_v53 }
 0x423   : > { %11845 = vmatprep.subr.bf16.mxu1 %v11844_v43 }
 0x425   : > { %11623 = vmatpush1.bf16.msra.mxu0 %v11622_v9 }
 0x426   : > { %11847 = vmatpush1.bf16.msra.mxu1 %v11846_v16  ;;  %11625 = vmatprep.subr.bf16.mxu0 %v11624_v18 }
 0x427   : > { %v8870_v15 = vpop.f32.mrb[4].mxu0  ;;  %v9379_v7 = vpop.f32.mrb[52].mxu1  ;;  %11849 = vmatprep.subr.bf16.mxu1 %v11848_v39 }
 0x428   : > { %v9384_v24 = vmax.f32 %v8870_v15, %v9379_v7  ;;  %v8872_v27 = vpop.f32.mrb[5].mxu0  ;;  %v9381_v21 = vpop.f32.mrb[53].mxu1 }
 0x429   : > { %v9385_v38 = vmax.f32 %v8872_v27, %v9381_v21  ;;  %11627 = vmatpush1.bf16.msra.mxu0 %v11626_v41 }
 0x42a   : > { %11851 = vmatpush1.bf16.msra.mxu1 %v11850_v12  ;;  %11629 = vmatprep.subr.bf16.mxu0 %v11628_v44 }
 0x42b   : > { %11853 = vmatprep.subr.bf16.mxu1 %v11852_v2 }
 0x42d   : > { %11631 = vmatpush1.bf16.msra.mxu0 %v11630_v31 }
 0x42e   : > { %11855 = vmatpush1.bf16.msra.mxu1 %v11854_v59  ;;  %11633 = vmatprep.subr.bf16.mxu0 %v11632_v28 }
 0x42f   : > { %11857 = vmatprep.subr.bf16.mxu1 %v11856_v63 }
 0x431   : > { %11635 = vmatpush1.bf16.msra.mxu0 %v11634_v36 }
 0x432   : > { %11859 = vmatpush1.bf16.msra.mxu1 %v11858_v58 }
 0x434   : > { %9889 = vmatmul.mubr.f32.vlgmr.msra.gmra.mrb[6].mxu0 %v13765_v4 }
 0x435   : > { %10400 = vmatmul.mubr.f32.vlgmr.msra.gmra.mrb[54].mxu1 %v13765_v4 }
 0x507   : > { %v9890_v42 = vpop.f32.mrb[6].mxu0 }
 0x508   : > { %v9895_v30 = vmax.f32 %v9384_v24, %v9890_v42  ;;  %v10401_v46 = vpop.f32.mrb[54].mxu1  ;;  %v9892_v35 = vpop.f32.mrb[7].mxu0 }
 0x509   : > { %v9896_v23 = vmax.f32 %v9385_v38, %v9892_v35  ;;  %v10403_v48 = vpop.f32.mrb[55].mxu1 }
 0x50a   : > { %v10406_v49 = vmax.f32 %v9895_v30, %v10401_v46 }
 0x50b   : > { %v10407_v40 = vmax.f32 %v9896_v23, %v10403_v48 }
 0x50c   : > { %10408 = vst [vmem:[%s212_s12] sm:$0x3f] %v10406_v49 }
 0x50d   : > { %10409 = vst [vmem:[%s212_s12 + $0x8] sm:$0x3f] %v10407_v40 }
 0x50e PF: > { %s15_s15 = sadd.s32 1, %s12118_s15  }
 0x50f   : > { %p12_p3 = scmp.ge.s32.totalorder %s15_s15, 4  }
 0x511   :  { %14 = sbr.rel (!%p12_p3) target bundleno = 1 (0x1), region = 98 }
 0x518   :  { %10431 = vsyncpa [#allocation3], 1 }
 0x519   :  { %10433 = vsyncpa [#allocation3 + $0x1], 1 }

</bundles_post_ra>
